<compile_context>
chip_gen: v7x
topology: tpu7x:2x2x1
jax: 0.10.0
libtpu: 0.0.40
codegen_flags: <defaults>
</compile_context>

<pallas_src>
import jax
import jax.numpy as jnp
from jax.experimental import pallas as pl
from jax.experimental.pallas import tpu as pltpu

# Layer dims of the PyTorch Net: 600 -> 1000 -> 800 -> 600 -> 400 -> 3
DIMS = (600, 1000, 800, 600, 400, 3)
VMEM_LIMIT = 32 * 1024 * 1024


def _dense(h, w, b):
    # bf16 x bf16 MXU matmul with f32 accumulation; bias add stays f32 (VPU).
    return jnp.dot(h.astype(jnp.bfloat16), w,
                   preferred_element_type=jnp.float32) + b


def _log_softmax(logits):
    # log_softmax over dim=1 (numerically stable, all f32).
    m = jnp.max(logits, axis=1, keepdims=True)
    shifted = logits - m
    lse = jnp.log(jnp.sum(jnp.exp(shifted), axis=1, keepdims=True))
    return shifted - lse


def mlp_kernel_resident(x_ref,
                        w1_ref, b1_ref, w2_ref, b2_ref, w3_ref, b3_ref,
                        w4_ref, b4_ref, w5_ref, b5_ref,
                        o_ref):
    """Grid path: weights resident in VMEM (constant index_map), batch tiled."""
    h = x_ref[...]  # bf16 batch tile
    h = jnp.maximum(_dense(h, w1_ref[...], b1_ref[...]), 0.0)
    h = jnp.maximum(_dense(h, w2_ref[...], b2_ref[...]), 0.0)
    h = jnp.maximum(_dense(h, w3_ref[...], b3_ref[...]), 0.0)
    h = jnp.maximum(_dense(h, w4_ref[...], b4_ref[...]), 0.0)
    logits = _dense(h, w5_ref[...], b5_ref[...])
    o_ref[...] = _log_softmax(logits).astype(o_ref.dtype)


def mlp_kernel_streamed(x_ref,
                        w1_hbm, b1_ref, w2_hbm, b2_ref, w3_hbm, b3_ref,
                        w4_hbm, b4_ref, w5_hbm, b5_ref,
                        o_ref,
                        w1_v, w2_v, w3_v, w4_v, w5_v, sem):
    """Single-grid-step path: layer-wise manual weight streaming (P4 pattern).

    All five weight DMAs are started up front; layer l only waits on w_l, so
    the DMAs for later layers are hidden behind earlier layers' matmuls.
    """
    w_hbm = (w1_hbm, w2_hbm, w3_hbm, w4_hbm, w5_hbm)
    w_vmem = (w1_v, w2_v, w3_v, w4_v, w5_v)
    biases = (b1_ref, b2_ref, b3_ref, b4_ref, b5_ref)

    copies = [pltpu.make_async_copy(w_hbm[l], w_vmem[l], sem.at[l])
              for l in range(5)]
    for c in copies:          # kick off all weight DMAs immediately
        c.start()

    h = x_ref[...]            # bf16 batch tile
    for l in range(5):
        copies[l].wait()      # block only on the weight this layer needs
        h = _dense(h, w_vmem[l][...], biases[l][...])
        if l < 4:
            h = jnp.maximum(h, 0.0)

    o_ref[...] = _log_softmax(h).astype(o_ref.dtype)


def make_params(key):
    """Deterministic init mimicking nn.Linear default (U[-1/sqrt(fan_in), +]).
    Weights are stored as bf16 [in, out]; biases as f32 [1, out]."""
    params = []
    for i in range(5):
        fan_in, fan_out = DIMS[i], DIMS[i + 1]
        key, kw, kb = jax.random.split(key, 3)
        bound = 1.0 / (fan_in ** 0.5)
        w = jax.random.uniform(kw, (fan_in, fan_out), jnp.float32, -bound, bound)
        b = jax.random.uniform(kb, (1, fan_out), jnp.float32, -bound, bound)
        params += [w.astype(jnp.bfloat16), b]
    return params


def _tile_m(batch):
    # <= 512 rows: single grid step over the (8-row aligned) batch.
    # >  512 rows: 512-row tiles (256 left ~25% of each step as fixed overhead).
    if batch <= 512:
        return max(8, -(-batch // 8) * 8)
    return 512


@jax.jit
def net_forward(x, *params):
    batch = x.shape[0]
    tile_m = _tile_m(batch)
    padded = -(-batch // tile_m) * tile_m

    # Stream activations in bf16 (halves x HBM traffic; MXU runs bf16 anyway).
    x = x.astype(jnp.bfloat16)
    if padded != batch:
        x = jnp.pad(x, ((0, padded - batch), (0, 0)))
    num_tiles = padded // tile_m

    out_shape = jax.ShapeDtypeStruct((padded, DIMS[-1]), jnp.float32)
    x_spec = pl.BlockSpec((tile_m, DIMS[0]), lambda i: (i, 0))
    out_spec = pl.BlockSpec((tile_m, DIMS[-1]), lambda i: (i, 0))

    if num_tiles == 1:
        # Single-step regime: weights stay in HBM, manual layer-wise streaming.
        in_specs = [x_spec]
        for li in range(5):
            in_specs.append(pl.BlockSpec(memory_space=pl.ANY))                 # weight (HBM)
            in_specs.append(pl.BlockSpec((1, DIMS[li + 1]), lambda i: (0, 0)))  # bias (VMEM)
        scratch_shapes = [pltpu.VMEM((DIMS[li], DIMS[li + 1]), jnp.bfloat16)
                          for li in range(5)]
        scratch_shapes.append(pltpu.SemaphoreType.DMA((5,)))

        out = pl.pallas_call(
            mlp_kernel_streamed,
            out_shape=out_shape,
            grid=(1,),
            in_specs=in_specs,
            out_specs=out_spec,
            scratch_shapes=scratch_shapes,
            compiler_params=pltpu.CompilerParams(
                dimension_semantics=("arbitrary",),
                vmem_limit_bytes=VMEM_LIMIT,
            ),
        )(x, *params)
    else:
        # Grid path: weights & biases use a constant index_map so they are
        # DMA'd once and stay resident in VMEM across batch tiles.
        in_specs = [x_spec]
        for li in range(5):
            din, dout = DIMS[li], DIMS[li + 1]
            in_specs.append(pl.BlockSpec((din, dout), lambda i: (0, 0)))  # weight (bf16)
            in_specs.append(pl.BlockSpec((1, dout), lambda i: (0, 0)))    # bias (f32)

        # Megacore sharding only when the batch is big enough to amortize each
        # TC pulling its own private weight copy on v7x.
        semantics = ("parallel",) if padded >= 1024 else ("arbitrary",)

        out = pl.pallas_call(
            mlp_kernel_resident,
            out_shape=out_shape,
            grid=(num_tiles,),
            in_specs=in_specs,
            out_specs=out_spec,
            compiler_params=pltpu.CompilerParams(
                dimension_semantics=semantics,
                vmem_limit_bytes=VMEM_LIMIT,
            ),
        )(x, *params)

    return out[:batch]


def reference_forward(x, *params):
    """Pure-JAX reference using the same bf16 weights / f32 accumulation."""
    h = x
    for i in range(4):
        w, b = params[2 * i], params[2 * i + 1]
        h = jnp.dot(h.astype(jnp.bfloat16), w,
                    preferred_element_type=jnp.float32) + b
        h = jnp.maximum(h, 0.0)
    logits = jnp.dot(h.astype(jnp.bfloat16), params[8],
                     preferred_element_type=jnp.float32) + params[9]
    return jax.nn.log_softmax(logits, axis=1)


if __name__ == "__main__":
    key = jax.random.PRNGKey(0)
    key, kx = jax.random.split(key)

    batch = 8
    # `x = x.view(-1, 600 * 1)` in the original script -> flat [batch, 600] input.
    x = jax.random.normal(kx, (batch, DIMS[0]), jnp.float32)

    params = make_params(key)

    out = net_forward(x, *params)
    out = jax.block_until_ready(out)

    ref = reference_forward(x, *params)
    assert out.shape == (batch, 3)
    assert jnp.allclose(out, ref, atol=2e-3, rtol=2e-3)

    print("KERNEL_OK")
</pallas_src>

<mosaic_0001>
module attributes {stable_mosaic.version = 11 : i64} {
  func.func @mlp_kernel_streamed(%arg0: i32, %arg1: memref<8x600xbf16, #tpu.memory_space<vmem>>, %arg2: memref<600x1000xbf16, #tpu.memory_space<any>>, %arg3: memref<1x1000xf32, #tpu.memory_space<vmem>>, %arg4: memref<1000x800xbf16, #tpu.memory_space<any>>, %arg5: memref<1x800xf32, #tpu.memory_space<vmem>>, %arg6: memref<800x600xbf16, #tpu.memory_space<any>>, %arg7: memref<1x600xf32, #tpu.memory_space<vmem>>, %arg8: memref<600x400xbf16, #tpu.memory_space<any>>, %arg9: memref<1x400xf32, #tpu.memory_space<vmem>>, %arg10: memref<400x3xbf16, #tpu.memory_space<any>>, %arg11: memref<1x3xf32, #tpu.memory_space<vmem>>, %arg12: memref<8x3xf32, #tpu.memory_space<vmem>>, %arg13: memref<600x1000xbf16, #tpu.memory_space<vmem>>, %arg14: memref<1000x800xbf16, #tpu.memory_space<vmem>>, %arg15: memref<800x600xbf16, #tpu.memory_space<vmem>>, %arg16: memref<600x400xbf16, #tpu.memory_space<vmem>>, %arg17: memref<400x3xbf16, #tpu.memory_space<vmem>>, %arg18: memref<5x!tpu.dma_semaphore, #tpu.memory_space<semaphore_mem>>) attributes {dimension_semantics = [#tpu.dimension_semantics<arbitrary>], iteration_bounds = array<i64: 1>, scalar_prefetch = 0 : i64, scratch_operands = 6 : i64, tpu.core_type = #tpu.core_type<tc>, window_params = [{transform_indices = @transform_0, window_bounds = array<i64: 8, 600>}, {}, {pipeline_mode = #tpu.pipeline_mode<synchronous>, transform_indices = @transform_2, window_bounds = array<i64: 1, 1000>}, {}, {pipeline_mode = #tpu.pipeline_mode<synchronous>, transform_indices = @transform_4, window_bounds = array<i64: 1, 800>}, {}, {pipeline_mode = #tpu.pipeline_mode<synchronous>, transform_indices = @transform_6, window_bounds = array<i64: 1, 600>}, {}, {pipeline_mode = #tpu.pipeline_mode<synchronous>, transform_indices = @transform_8, window_bounds = array<i64: 1, 400>}, {}, {pipeline_mode = #tpu.pipeline_mode<synchronous>, transform_indices = @transform_10, window_bounds = array<i64: 1, 3>}, {transform_indices = @transform_11, window_bounds = array<i64: 8, 3>}]} {
    %c0_i32 = arith.constant 0 : i32
    %0 = tpu.memref_slice %arg18[%c0_i32] : memref<5x!tpu.dma_semaphore, #tpu.memory_space<semaphore_mem>> -> memref<1x!tpu.dma_semaphore, #tpu.memory_space<semaphore_mem>>
    %1 = tpu.memref_squeeze %0 : memref<1x!tpu.dma_semaphore, #tpu.memory_space<semaphore_mem>> -> memref<!tpu.dma_semaphore, #tpu.memory_space<semaphore_mem>>
    tpu.enqueue_dma source(%arg2 : memref<600x1000xbf16, #tpu.memory_space<any>>) target(%arg13 : memref<600x1000xbf16, #tpu.memory_space<vmem>>) target_semaphore(%1 : memref<!tpu.dma_semaphore, #tpu.memory_space<semaphore_mem>>)
    %c1_i32 = arith.constant 1 : i32
    %2 = tpu.memref_slice %arg18[%c1_i32] : memref<5x!tpu.dma_semaphore, #tpu.memory_space<semaphore_mem>> -> memref<1x!tpu.dma_semaphore, #tpu.memory_space<semaphore_mem>>
    %3 = tpu.memref_squeeze %2 : memref<1x!tpu.dma_semaphore, #tpu.memory_space<semaphore_mem>> -> memref<!tpu.dma_semaphore, #tpu.memory_space<semaphore_mem>>
    tpu.enqueue_dma source(%arg4 : memref<1000x800xbf16, #tpu.memory_space<any>>) target(%arg14 : memref<1000x800xbf16, #tpu.memory_space<vmem>>) target_semaphore(%3 : memref<!tpu.dma_semaphore, #tpu.memory_space<semaphore_mem>>)
    %c2_i32 = arith.constant 2 : i32
    %4 = tpu.memref_slice %arg18[%c2_i32] : memref<5x!tpu.dma_semaphore, #tpu.memory_space<semaphore_mem>> -> memref<1x!tpu.dma_semaphore, #tpu.memory_space<semaphore_mem>>
    %5 = tpu.memref_squeeze %4 : memref<1x!tpu.dma_semaphore, #tpu.memory_space<semaphore_mem>> -> memref<!tpu.dma_semaphore, #tpu.memory_space<semaphore_mem>>
    tpu.enqueue_dma source(%arg6 : memref<800x600xbf16, #tpu.memory_space<any>>) target(%arg15 : memref<800x600xbf16, #tpu.memory_space<vmem>>) target_semaphore(%5 : memref<!tpu.dma_semaphore, #tpu.memory_space<semaphore_mem>>)
    %c3_i32 = arith.constant 3 : i32
    %6 = tpu.memref_slice %arg18[%c3_i32] : memref<5x!tpu.dma_semaphore, #tpu.memory_space<semaphore_mem>> -> memref<1x!tpu.dma_semaphore, #tpu.memory_space<semaphore_mem>>
    %7 = tpu.memref_squeeze %6 : memref<1x!tpu.dma_semaphore, #tpu.memory_space<semaphore_mem>> -> memref<!tpu.dma_semaphore, #tpu.memory_space<semaphore_mem>>
    tpu.enqueue_dma source(%arg8 : memref<600x400xbf16, #tpu.memory_space<any>>) target(%arg16 : memref<600x400xbf16, #tpu.memory_space<vmem>>) target_semaphore(%7 : memref<!tpu.dma_semaphore, #tpu.memory_space<semaphore_mem>>)
    %c4_i32 = arith.constant 4 : i32
    %8 = tpu.memref_slice %arg18[%c4_i32] : memref<5x!tpu.dma_semaphore, #tpu.memory_space<semaphore_mem>> -> memref<1x!tpu.dma_semaphore, #tpu.memory_space<semaphore_mem>>
    %9 = tpu.memref_squeeze %8 : memref<1x!tpu.dma_semaphore, #tpu.memory_space<semaphore_mem>> -> memref<!tpu.dma_semaphore, #tpu.memory_space<semaphore_mem>>
    tpu.enqueue_dma source(%arg10 : memref<400x3xbf16, #tpu.memory_space<any>>) target(%arg17 : memref<400x3xbf16, #tpu.memory_space<vmem>>) target_semaphore(%9 : memref<!tpu.dma_semaphore, #tpu.memory_space<semaphore_mem>>)
    %c0 = arith.constant 0 : index
    %c0_0 = arith.constant 0 : index
    %10 = vector.load %arg1[%c0, %c0_0] : memref<8x600xbf16, #tpu.memory_space<vmem>>, vector<8x600xbf16>
    %c0_i32_1 = arith.constant 0 : i32
    %11 = tpu.memref_slice %arg18[%c0_i32_1] : memref<5x!tpu.dma_semaphore, #tpu.memory_space<semaphore_mem>> -> memref<1x!tpu.dma_semaphore, #tpu.memory_space<semaphore_mem>>
    %12 = tpu.memref_squeeze %11 : memref<1x!tpu.dma_semaphore, #tpu.memory_space<semaphore_mem>> -> memref<!tpu.dma_semaphore, #tpu.memory_space<semaphore_mem>>
    tpu.wait_dma2 semaphore(%12 : memref<!tpu.dma_semaphore, #tpu.memory_space<semaphore_mem>>) src(%arg2 : memref<600x1000xbf16, #tpu.memory_space<any>>) dst(%arg13 : memref<600x1000xbf16, #tpu.memory_space<vmem>>)
    %c0_2 = arith.constant 0 : index
    %c0_3 = arith.constant 0 : index
    %13 = vector.load %arg13[%c0_2, %c0_3] : memref<600x1000xbf16, #tpu.memory_space<vmem>>, vector<600x1000xbf16>
    %c0_4 = arith.constant 0 : index
    %c0_5 = arith.constant 0 : index
    %14 = vector.load %arg3[%c0_4, %c0_5] : memref<1x1000xf32, #tpu.memory_space<vmem>>, vector<1x1000xf32>
    %cst = arith.constant dense<0.000000e+00> : vector<8x1000xf32>
    %15 = tpu.matmul %10, %13, %cst {dimension_numbers = #tpu.dot_dimension_numbers<[1], [0], [0], [1], [0, 0, 1, 1], [], []>} : vector<8x600xbf16>, vector<600x1000xbf16>, vector<8x1000xf32> -> vector<8x1000xf32>
    %16 = vector.broadcast %14 : vector<1x1000xf32> to vector<8x1000xf32>
    %17 = arith.addf %15, %16 : vector<8x1000xf32>
    %cst_6 = arith.constant 0.000000e+00 : f32
    %18 = vector.broadcast %cst_6 : f32 to vector<8x1000xf32>
    %19 = arith.maximumf %17, %18 : vector<8x1000xf32>
    %c1_i32_7 = arith.constant 1 : i32
    %20 = tpu.memref_slice %arg18[%c1_i32_7] : memref<5x!tpu.dma_semaphore, #tpu.memory_space<semaphore_mem>> -> memref<1x!tpu.dma_semaphore, #tpu.memory_space<semaphore_mem>>
    %21 = tpu.memref_squeeze %20 : memref<1x!tpu.dma_semaphore, #tpu.memory_space<semaphore_mem>> -> memref<!tpu.dma_semaphore, #tpu.memory_space<semaphore_mem>>
    tpu.wait_dma2 semaphore(%21 : memref<!tpu.dma_semaphore, #tpu.memory_space<semaphore_mem>>) src(%arg4 : memref<1000x800xbf16, #tpu.memory_space<any>>) dst(%arg14 : memref<1000x800xbf16, #tpu.memory_space<vmem>>)
    %c0_8 = arith.constant 0 : index
    %c0_9 = arith.constant 0 : index
    %22 = vector.load %arg14[%c0_8, %c0_9] : memref<1000x800xbf16, #tpu.memory_space<vmem>>, vector<1000x800xbf16>
    %c0_10 = arith.constant 0 : index
    %c0_11 = arith.constant 0 : index
    %23 = vector.load %arg5[%c0_10, %c0_11] : memref<1x800xf32, #tpu.memory_space<vmem>>, vector<1x800xf32>
    %24 = arith.truncf %19 : vector<8x1000xf32> to vector<8x1000xbf16>
    %cst_12 = arith.constant dense<0.000000e+00> : vector<8x800xf32>
    %25 = tpu.matmul %24, %22, %cst_12 {dimension_numbers = #tpu.dot_dimension_numbers<[1], [0], [0], [1], [0, 0, 1, 1], [], []>} : vector<8x1000xbf16>, vector<1000x800xbf16>, vector<8x800xf32> -> vector<8x800xf32>
    %26 = vector.broadcast %23 : vector<1x800xf32> to vector<8x800xf32>
    %27 = arith.addf %25, %26 : vector<8x800xf32>
    %cst_13 = arith.constant 0.000000e+00 : f32
    %28 = vector.broadcast %cst_13 : f32 to vector<8x800xf32>
    %29 = arith.maximumf %27, %28 : vector<8x800xf32>
    %c2_i32_14 = arith.constant 2 : i32
    %30 = tpu.memref_slice %arg18[%c2_i32_14] : memref<5x!tpu.dma_semaphore, #tpu.memory_space<semaphore_mem>> -> memref<1x!tpu.dma_semaphore, #tpu.memory_space<semaphore_mem>>
    %31 = tpu.memref_squeeze %30 : memref<1x!tpu.dma_semaphore, #tpu.memory_space<semaphore_mem>> -> memref<!tpu.dma_semaphore, #tpu.memory_space<semaphore_mem>>
    tpu.wait_dma2 semaphore(%31 : memref<!tpu.dma_semaphore, #tpu.memory_space<semaphore_mem>>) src(%arg6 : memref<800x600xbf16, #tpu.memory_space<any>>) dst(%arg15 : memref<800x600xbf16, #tpu.memory_space<vmem>>)
    %c0_15 = arith.constant 0 : index
    %c0_16 = arith.constant 0 : index
    %32 = vector.load %arg15[%c0_15, %c0_16] : memref<800x600xbf16, #tpu.memory_space<vmem>>, vector<800x600xbf16>
    %c0_17 = arith.constant 0 : index
    %c0_18 = arith.constant 0 : index
    %33 = vector.load %arg7[%c0_17, %c0_18] : memref<1x600xf32, #tpu.memory_space<vmem>>, vector<1x600xf32>
    %34 = arith.truncf %29 : vector<8x800xf32> to vector<8x800xbf16>
    %cst_19 = arith.constant dense<0.000000e+00> : vector<8x600xf32>
    %35 = tpu.matmul %34, %32, %cst_19 {dimension_numbers = #tpu.dot_dimension_numbers<[1], [0], [0], [1], [0, 0, 1, 1], [], []>} : vector<8x800xbf16>, vector<800x600xbf16>, vector<8x600xf32> -> vector<8x600xf32>
    %36 = vector.broadcast %33 : vector<1x600xf32> to vector<8x600xf32>
    %37 = arith.addf %35, %36 : vector<8x600xf32>
    %cst_20 = arith.constant 0.000000e+00 : f32
    %38 = vector.broadcast %cst_20 : f32 to vector<8x600xf32>
    %39 = arith.maximumf %37, %38 : vector<8x600xf32>
    %c3_i32_21 = arith.constant 3 : i32
    %40 = tpu.memref_slice %arg18[%c3_i32_21] : memref<5x!tpu.dma_semaphore, #tpu.memory_space<semaphore_mem>> -> memref<1x!tpu.dma_semaphore, #tpu.memory_space<semaphore_mem>>
    %41 = tpu.memref_squeeze %40 : memref<1x!tpu.dma_semaphore, #tpu.memory_space<semaphore_mem>> -> memref<!tpu.dma_semaphore, #tpu.memory_space<semaphore_mem>>
    tpu.wait_dma2 semaphore(%41 : memref<!tpu.dma_semaphore, #tpu.memory_space<semaphore_mem>>) src(%arg8 : memref<600x400xbf16, #tpu.memory_space<any>>) dst(%arg16 : memref<600x400xbf16, #tpu.memory_space<vmem>>)
    %c0_22 = arith.constant 0 : index
    %c0_23 = arith.constant 0 : index
    %42 = vector.load %arg16[%c0_22, %c0_23] : memref<600x400xbf16, #tpu.memory_space<vmem>>, vector<600x400xbf16>
    %c0_24 = arith.constant 0 : index
    %c0_25 = arith.constant 0 : index
    %43 = vector.load %arg9[%c0_24, %c0_25] : memref<1x400xf32, #tpu.memory_space<vmem>>, vector<1x400xf32>
    %44 = arith.truncf %39 : vector<8x600xf32> to vector<8x600xbf16>
    %cst_26 = arith.constant dense<0.000000e+00> : vector<8x400xf32>
    %45 = tpu.matmul %44, %42, %cst_26 {dimension_numbers = #tpu.dot_dimension_numbers<[1], [0], [0], [1], [0, 0, 1, 1], [], []>} : vector<8x600xbf16>, vector<600x400xbf16>, vector<8x400xf32> -> vector<8x400xf32>
    %46 = vector.broadcast %43 : vector<1x400xf32> to vector<8x400xf32>
    %47 = arith.addf %45, %46 : vector<8x400xf32>
    %cst_27 = arith.constant 0.000000e+00 : f32
    %48 = vector.broadcast %cst_27 : f32 to vector<8x400xf32>
    %49 = arith.maximumf %47, %48 : vector<8x400xf32>
    %c4_i32_28 = arith.constant 4 : i32
    %50 = tpu.memref_slice %arg18[%c4_i32_28] : memref<5x!tpu.dma_semaphore, #tpu.memory_space<semaphore_mem>> -> memref<1x!tpu.dma_semaphore, #tpu.memory_space<semaphore_mem>>
    %51 = tpu.memref_squeeze %50 : memref<1x!tpu.dma_semaphore, #tpu.memory_space<semaphore_mem>> -> memref<!tpu.dma_semaphore, #tpu.memory_space<semaphore_mem>>
    tpu.wait_dma2 semaphore(%51 : memref<!tpu.dma_semaphore, #tpu.memory_space<semaphore_mem>>) src(%arg10 : memref<400x3xbf16, #tpu.memory_space<any>>) dst(%arg17 : memref<400x3xbf16, #tpu.memory_space<vmem>>)
    %c0_29 = arith.constant 0 : index
    %c0_30 = arith.constant 0 : index
    %52 = vector.load %arg17[%c0_29, %c0_30] : memref<400x3xbf16, #tpu.memory_space<vmem>>, vector<400x3xbf16>
    %c0_31 = arith.constant 0 : index
    %c0_32 = arith.constant 0 : index
    %53 = vector.load %arg11[%c0_31, %c0_32] : memref<1x3xf32, #tpu.memory_space<vmem>>, vector<1x3xf32>
    %54 = arith.truncf %49 : vector<8x400xf32> to vector<8x400xbf16>
    %cst_33 = arith.constant dense<0.000000e+00> : vector<8x3xf32>
    %55 = tpu.matmul %54, %52, %cst_33 {dimension_numbers = #tpu.dot_dimension_numbers<[1], [0], [0], [1], [0, 0, 1, 1], [], []>} : vector<8x400xbf16>, vector<400x3xbf16>, vector<8x3xf32> -> vector<8x3xf32>
    %56 = vector.broadcast %53 : vector<1x3xf32> to vector<8x3xf32>
    %57 = arith.addf %55, %56 : vector<8x3xf32>
    %cst_34 = arith.constant dense<0xFF800000> : vector<8xf32>
    %58 = vector.multi_reduction <maximumf>, %57, %cst_34 [1] : vector<8x3xf32> to vector<8xf32>
    %59 = vector.shape_cast %58 : vector<8xf32> to vector<8x1xf32>
    %60 = vector.broadcast %59 : vector<8x1xf32> to vector<8x3xf32>
    %61 = arith.subf %57, %60 : vector<8x3xf32>
    %62 = math.exp %61 : vector<8x3xf32>
    %cst_35 = arith.constant dense<0.000000e+00> : vector<8xf32>
    %63 = vector.multi_reduction <add>, %62, %cst_35 [1] : vector<8x3xf32> to vector<8xf32>
    %64 = vector.shape_cast %63 : vector<8xf32> to vector<8x1xf32>
    %65 = math.log %64 : vector<8x1xf32>
    %66 = vector.broadcast %65 : vector<8x1xf32> to vector<8x3xf32>
    %67 = arith.subf %61, %66 : vector<8x3xf32>
    %c0_36 = arith.constant 0 : index
    %c0_37 = arith.constant 0 : index
    %68 = vector.load %arg12[%c0_36, %c0_37] : memref<8x3xf32, #tpu.memory_space<vmem>>, vector<8x3xf32>
    tpu.vector_store %arg12[%c0_36, %c0_37], %67 {strides = array<i32>} : memref<8x3xf32, #tpu.memory_space<vmem>>, vector<8x3xf32>,
    return
  }
  func.func @transform_0(%arg0: i32) -> (i32, i32) {
    %c0_i32 = arith.constant 0 : i32
    %c0_i32_0 = arith.constant 0 : i32
    return %arg0, %c0_i32 : i32, i32
  }
  func.func @transform_2(%arg0: i32) -> (i32, i32) {
    %c0_i32 = arith.constant 0 : i32
    %c0_i32_0 = arith.constant 0 : i32
    %c0_i32_1 = arith.constant 0 : i32
    return %c0_i32, %c0_i32_0 : i32, i32
  }
  func.func @transform_4(%arg0: i32) -> (i32, i32) {
    %c0_i32 = arith.constant 0 : i32
    %c0_i32_0 = arith.constant 0 : i32
    %c0_i32_1 = arith.constant 0 : i32
    return %c0_i32, %c0_i32_0 : i32, i32
  }
  func.func @transform_6(%arg0: i32) -> (i32, i32) {
    %c0_i32 = arith.constant 0 : i32
    %c0_i32_0 = arith.constant 0 : i32
    %c0_i32_1 = arith.constant 0 : i32
    return %c0_i32, %c0_i32_0 : i32, i32
  }
  func.func @transform_8(%arg0: i32) -> (i32, i32) {
    %c0_i32 = arith.constant 0 : i32
    %c0_i32_0 = arith.constant 0 : i32
    %c0_i32_1 = arith.constant 0 : i32
    return %c0_i32, %c0_i32_0 : i32, i32
  }
  func.func @transform_10(%arg0: i32) -> (i32, i32) {
    %c0_i32 = arith.constant 0 : i32
    %c0_i32_0 = arith.constant 0 : i32
    %c0_i32_1 = arith.constant 0 : i32
    return %c0_i32, %c0_i32_0 : i32, i32
  }
  func.func @transform_11(%arg0: i32) -> (i32, i32) {
    %c0_i32 = arith.constant 0 : i32
    %c0_i32_0 = arith.constant 0 : i32
    return %arg0, %c0_i32 : i32, i32
  }
}

</mosaic_0001>

<bundles_post_ra>
// kernel: net_forward.1
= control target key start
LH: loop header
LB: loop body
LE: loop exit
PB: predicated region body
PF: predicated region fallthrough
CT: control target
= control target key end

     0   :  { %s20459_s0 = inlined_call_operand.vmem [shape: bf16[8,600], index: 0, kind: input, shape index: {}]   ;;  %s20460_s1 = inlined_call_operand.vmem [shape: bf16[600,1000], index: 1, kind: input, shape index: {}]   ;;  %s20461_s2 = inlined_call_operand.vmem [shape: f32[1,1000], index: 2, kind: input, shape index: {}]   ;;  %s20462_s3 = inlined_call_operand.vmem [shape: bf16[1000,800], index: 3, kind: input, shape index: {}]   ;;  %s20463_s4 = inlined_call_operand.vmem [shape: f32[1,800], index: 4, kind: input, shape index: {}]   ;;  %s20464_s5 = inlined_call_operand.vmem [shape: bf16[800,600], index: 5, kind: input, shape index: {}]   ;;  %s20465_s6 = inlined_call_operand.vmem [shape: f32[1,600], index: 6, kind: input, shape index: {}]   ;;  %s20466_s7 = inlined_call_operand.vmem [shape: bf16[600,400], index: 7, kind: input, shape index: {}]   ;;  %s20467_s8 = inlined_call_operand.vmem [shape: f32[1,400], index: 8, kind: input, shape index: {}]   ;;  %s20468_s9 = inlined_call_operand.vmem [shape: bf16[400,3], index: 9, kind: input, shape index: {}]   ;;  %s20469_s10 = inlined_call_operand.vmem [shape: f32[1,3], index: 10, kind: input, shape index: {}]   ;;  %s20470_s11 = inlined_call_operand.vmem [shape: f32[8,3], index: 11, kind: output, shape index: {}]  }
   0x1   :  { %v14098_v0 = vld [vmem:[%s20460_s1] sm:$0xff]  ;;  %v14103_v1 = vld [vmem:[%s20460_s1 + $0x8] sm:$0xff]  ;;  %v14108_v2 = vld [vmem:[%s20460_s1 + $0x10] sm:$0xff] }
   0x2   :  { %20866 = vst [vmem:[#allocation18_spill] sm:$0xff] %v14108_v2  ;;  %v14113_v3 = vld [vmem:[%s20460_s1 + $0x18] sm:$0xff]  ;;  %v14118_v4 = vld [vmem:[%s20460_s1 + $0x20] sm:$0xff]  ;;  %v14123_v5 = vld [vmem:[%s20460_s1 + $0x28] sm:$0xff] }
   0x3   :  { %20867 = vst [vmem:[#allocation19_spill] sm:$0xff] %v14113_v3  ;;  %v14128_v6 = vld [vmem:[%s20460_s1 + $0x30] sm:$0xff]  ;;  %v14133_v7 = vld [vmem:[%s20460_s1 + $0x38] sm:$0xff]  ;;  %v14138_v8 = vld [vmem:[%s20460_s1 + $0x40] sm:$0xff] }
   0x4   :  { %20868 = vst [vmem:[#allocation20_spill] sm:$0xff] %v14128_v6  ;;  %20869 = vst [vmem:[#allocation21_spill] sm:$0xff] %v14133_v7  ;;  %v14143_v9 = vld [vmem:[%s20460_s1 + $0x48] sm:$0xff]  ;;  %v14148_v10 = vld [vmem:[%s20460_s1 + $0x50] sm:$0xff] }
   0x5   :  { %20870 = vst [vmem:[#allocation22_spill] sm:$0xff] %v14148_v10  ;;  %v14153_v11 = vld [vmem:[%s20460_s1 + $0x58] sm:$0xff]  ;;  %v14158_v12 = vld [vmem:[%s20460_s1 + $0x60] sm:$0xff]  ;;  %v14163_v13 = vld [vmem:[%s20460_s1 + $0x68] sm:$0xff] }
   0x6   :  { %20871 = vst [vmem:[#allocation23_spill] sm:$0xff] %v14153_v11  ;;  %v14168_v14 = vld [vmem:[%s20460_s1 + $0x70] sm:$0xff]  ;;  %v14173_v15 = vld [vmem:[%s20460_s1 + $0x78] sm:$0xff]  ;;  %v14178_v16 = vld [vmem:[%s20460_s1 + $0x80] sm:$0xff] }
   0x7   :  { %20872 = vst [vmem:[#allocation24_spill] sm:$0xff] %v14168_v14  ;;  %20873 = vst [vmem:[#allocation25_spill] sm:$0xff] %v14173_v15  ;;  %v14183_v17 = vld [vmem:[%s20460_s1 + $0x88] sm:$0xff]  ;;  %v14188_v18 = vld [vmem:[%s20460_s1 + $0x90] sm:$0xff] }
   0x8   :  { %20874 = vst [vmem:[#allocation26_spill] sm:$0xff] %v14188_v18  ;;  %v14193_v19 = vld [vmem:[%s20460_s1 + $0x98] sm:$0xff]  ;;  %v14198_v20 = vld [vmem:[%s20460_s1 + $0xa0] sm:$0xff]  ;;  %v14203_v21 = vld [vmem:[%s20460_s1 + $0xa8] sm:$0xff] }
   0x9   :  { %20875 = vst [vmem:[#allocation27_spill] sm:$0xff] %v14193_v19  ;;  %v14208_v22 = vld [vmem:[%s20460_s1 + $0xb0] sm:$0xff]  ;;  %v14213_v23 = vld [vmem:[%s20460_s1 + $0xb8] sm:$0xff]  ;;  %v14218_v24 = vld [vmem:[%s20460_s1 + $0xc0] sm:$0xff] }
   0xa   :  { %20876 = vst [vmem:[#allocation28_spill] sm:$0xff] %v14208_v22  ;;  %20877 = vst [vmem:[#allocation29_spill] sm:$0xff] %v14213_v23  ;;  %v14223_v25 = vld [vmem:[%s20460_s1 + $0xc8] sm:$0xff]  ;;  %v14228_v26 = vld [vmem:[%s20460_s1 + $0xd0] sm:$0xff] }
   0xb   :  { %20878 = vst [vmem:[#allocation30_spill] sm:$0xff] %v14228_v26  ;;  %v14233_v27 = vld [vmem:[%s20460_s1 + $0xd8] sm:$0xff]  ;;  %v14238_v28 = vld [vmem:[%s20460_s1 + $0xe0] sm:$0xff]  ;;  %v14243_v29 = vld [vmem:[%s20460_s1 + $0xe8] sm:$0xff] }
   0xc   :  { %20879 = vst [vmem:[#allocation31_spill] sm:$0xff] %v14233_v27  ;;  %v14248_v30 = vld [vmem:[%s20460_s1 + $0xf0] sm:$0xff]  ;;  %v14253_v31 = vld [vmem:[%s20460_s1 + $0xf8] sm:$0xff]  ;;  %v14258_v32 = vld [vmem:[%s20460_s1 + $0x100] sm:$0xff] }
   0xd   :  { %20880 = vst [vmem:[#allocation32_spill] sm:$0xff] %v14248_v30  ;;  %20881 = vst [vmem:[#allocation33_spill] sm:$0xff] %v14253_v31  ;;  %v14263_v33 = vld [vmem:[%s20460_s1 + $0x108] sm:$0xff]  ;;  %v14268_v34 = vld [vmem:[%s20460_s1 + $0x110] sm:$0xff] }
   0xe   :  { %20882 = vst [vmem:[#allocation34_spill] sm:$0xff] %v14268_v34  ;;  %v14273_v35 = vld [vmem:[%s20460_s1 + $0x118] sm:$0xff]  ;;  %v14278_v36 = vld [vmem:[%s20460_s1 + $0x120] sm:$0xff]  ;;  %v14283_v37 = vld [vmem:[%s20460_s1 + $0x128] sm:$0xff] }
   0xf   :  { %20883 = vst [vmem:[#allocation35_spill] sm:$0xff] %v14273_v35  ;;  %v14288_v38 = vld [vmem:[%s20460_s1 + $0x130] sm:$0xff]  ;;  %v14293_v39 = vld [vmem:[%s20460_s1 + $0x138] sm:$0xff]  ;;  %v14298_v40 = vld [vmem:[%s20460_s1 + $0x140] sm:$0xff] }
  0x10   :  { %20884 = vst [vmem:[#allocation36_spill] sm:$0xff] %v14288_v38  ;;  %20885 = vst [vmem:[#allocation37_spill] sm:$0xff] %v14293_v39  ;;  %v14303_v41 = vld [vmem:[%s20460_s1 + $0x148] sm:$0xff]  ;;  %v14308_v42 = vld [vmem:[%s20460_s1 + $0x150] sm:$0xff] }
  0x11   :  { %20886 = vst [vmem:[#allocation38_spill] sm:$0xff] %v14308_v42  ;;  %v14313_v43 = vld [vmem:[%s20460_s1 + $0x158] sm:$0xff]  ;;  %v14318_v44 = vld [vmem:[%s20460_s1 + $0x160] sm:$0xff]  ;;  %v14323_v45 = vld [vmem:[%s20460_s1 + $0x168] sm:$0xff] }
  0x12   :  { %20887 = vst [vmem:[#allocation39_spill] sm:$0xff] %v14313_v43  ;;  %v14328_v46 = vld [vmem:[%s20460_s1 + $0x170] sm:$0xff]  ;;  %v14333_v47 = vld [vmem:[%s20460_s1 + $0x178] sm:$0xff]  ;;  %v14338_v48 = vld [vmem:[%s20460_s1 + $0x180] sm:$0xff] }
  0x13   :  { %20888 = vst [vmem:[#allocation40_spill] sm:$0xff] %v14328_v46  ;;  %20889 = vst [vmem:[#allocation41_spill] sm:$0xff] %v14333_v47  ;;  %v14343_v49 = vld [vmem:[%s20460_s1 + $0x188] sm:$0xff]  ;;  %v14348_v50 = vld [vmem:[%s20460_s1 + $0x190] sm:$0xff] }
  0x14   :  { %20890 = vst [vmem:[#allocation42_spill] sm:$0xff] %v14348_v50  ;;  %v14353_v51 = vld [vmem:[%s20460_s1 + $0x198] sm:$0xff]  ;;  %v14358_v52 = vld [vmem:[%s20460_s1 + $0x1a0] sm:$0xff]  ;;  %v14363_v53 = vld [vmem:[%s20460_s1 + $0x1a8] sm:$0xff] }
  0x15   :  { %20891 = vst [vmem:[#allocation43_spill] sm:$0xff] %v14353_v51  ;;  %v14368_v54 = vld [vmem:[%s20460_s1 + $0x1b0] sm:$0xff]  ;;  %v14373_v55 = vld [vmem:[%s20460_s1 + $0x1b8] sm:$0xff]  ;;  %v14378_v56 = vld [vmem:[%s20460_s1 + $0x1c0] sm:$0xff] }
  0x16   :  { %20892 = vst [vmem:[#allocation44_spill] sm:$0xff] %v14368_v54  ;;  %20893 = vst [vmem:[#allocation45_spill] sm:$0xff] %v14373_v55  ;;  %v14383_v57 = vld [vmem:[%s20460_s1 + $0x1c8] sm:$0xff]  ;;  %v14388_v58 = vld [vmem:[%s20460_s1 + $0x1d0] sm:$0xff] }
  0x17   :  { %20894 = vst [vmem:[#allocation46_spill] sm:$0xff] %v14388_v58  ;;  %v14393_v59 = vld [vmem:[%s20460_s1 + $0x1d8] sm:$0xff]  ;;  %v14398_v60 = vld [vmem:[%s20460_s1 + $0x1e0] sm:$0xff]  ;;  %v14403_v61 = vld [vmem:[%s20460_s1 + $0x1e8] sm:$0xff] }
  0x18   :  { %20895 = vst [vmem:[#allocation47_spill] sm:$0xff] %v14393_v59  ;;  %v14408_v62 = vld [vmem:[%s20460_s1 + $0x1f0] sm:$0xff]  ;;  %v14413_v63 = vld [vmem:[%s20460_s1 + $0x1f8] sm:$0xff]  ;;  %v14418_v59 = vld [vmem:[%s20460_s1 + $0x200] sm:$0xff] }
  0x19   :  { %20896 = vst [vmem:[#allocation48_spill] sm:$0xff] %v14408_v62  ;;  %20897 = vst [vmem:[#allocation49_spill] sm:$0xff] %v14413_v63  ;;  %v14423_v58 = vld [vmem:[%s20460_s1 + $0x208] sm:$0xff]  ;;  %v14428_v51 = vld [vmem:[%s20460_s1 + $0x210] sm:$0xff] }
  0x1a   :  { %20898 = vst [vmem:[#allocation50_spill] sm:$0xff] %v14428_v51  ;;  %v14433_v62 = vld [vmem:[%s20460_s1 + $0x218] sm:$0xff]  ;;  %v14438_v63 = vld [vmem:[%s20460_s1 + $0x220] sm:$0xff]  ;;  %v14443_v55 = vld [vmem:[%s20460_s1 + $0x228] sm:$0xff] }
  0x1b   :  { %20899 = vst [vmem:[#allocation51_spill] sm:$0xff] %v14433_v62  ;;  %v14448_v50 = vld [vmem:[%s20460_s1 + $0x230] sm:$0xff]  ;;  %v14453_v51 = vld [vmem:[%s20460_s1 + $0x238] sm:$0xff]  ;;  %v14458_v62 = vld [vmem:[%s20460_s1 + $0x240] sm:$0xff] }
  0x1c   :  { %20900 = vst [vmem:[#allocation52_spill] sm:$0xff] %v14448_v50  ;;  %20901 = vst [vmem:[#allocation53_spill] sm:$0xff] %v14453_v51  ;;  %v14463_v54 = vld [vmem:[%s20460_s1 + $0x248] sm:$0xff]  ;;  %v14468_v43 = vld [vmem:[%s20460_s1 + $0x250] sm:$0xff] }
  0x1d   :  { %20902 = vst [vmem:[#allocation54_spill] sm:$0xff] %v14468_v43  ;;  %v14473_v50 = vld [vmem:[%s20460_s1 + $0x258] sm:$0xff]  ;;  %v14478_v51 = vld [vmem:[%s20460_s1 + $0x260] sm:$0xff]  ;;  %v14483_v47 = vld [vmem:[%s20460_s1 + $0x268] sm:$0xff] }
  0x1e   :  { %20903 = vst [vmem:[#allocation55_spill] sm:$0xff] %v14473_v50  ;;  %v14488_v42 = vld [vmem:[%s20460_s1 + $0x270] sm:$0xff]  ;;  %v14493_v43 = vld [vmem:[%s20460_s1 + $0x278] sm:$0xff]  ;;  %v14498_v50 = vld [vmem:[%s20460_s1 + $0x280] sm:$0xff] }
  0x1f   :  { %20904 = vst [vmem:[#allocation56_spill] sm:$0xff] %v14488_v42  ;;  %20905 = vst [vmem:[#allocation57_spill] sm:$0xff] %v14493_v43  ;;  %v14503_v46 = vld [vmem:[%s20460_s1 + $0x288] sm:$0xff]  ;;  %v14508_v35 = vld [vmem:[%s20460_s1 + $0x290] sm:$0xff] }
  0x20   :  { %20906 = vst [vmem:[#allocation58_spill] sm:$0xff] %v14508_v35  ;;  %v14513_v42 = vld [vmem:[%s20460_s1 + $0x298] sm:$0xff]  ;;  %v14518_v43 = vld [vmem:[%s20460_s1 + $0x2a0] sm:$0xff]  ;;  %v14523_v39 = vld [vmem:[%s20460_s1 + $0x2a8] sm:$0xff] }
  0x21   :  { %20907 = vst [vmem:[#allocation59_spill] sm:$0xff] %v14513_v42  ;;  %v14528_v34 = vld [vmem:[%s20460_s1 + $0x2b0] sm:$0xff]  ;;  %v14533_v35 = vld [vmem:[%s20460_s1 + $0x2b8] sm:$0xff]  ;;  %v14538_v42 = vld [vmem:[%s20460_s1 + $0x2c0] sm:$0xff] }
  0x22   :  { %20908 = vst [vmem:[#allocation60_spill] sm:$0xff] %v14528_v34  ;;  %20909 = vst [vmem:[#allocation61_spill] sm:$0xff] %v14533_v35  ;;  %v14543_v38 = vld [vmem:[%s20460_s1 + $0x2c8] sm:$0xff]  ;;  %v14548_v27 = vld [vmem:[%s20460_s1 + $0x2d0] sm:$0xff] }
  0x23   :  { %20910 = vst [vmem:[#allocation62_spill] sm:$0xff] %v14548_v27  ;;  %v14553_v34 = vld [vmem:[%s20460_s1 + $0x2d8] sm:$0xff]  ;;  %v14558_v35 = vld [vmem:[%s20460_s1 + $0x2e0] sm:$0xff]  ;;  %v14563_v31 = vld [vmem:[%s20460_s1 + $0x2e8] sm:$0xff] }
  0x24   :  { %20911 = vst [vmem:[#allocation63_spill] sm:$0xff] %v14553_v34  ;;  %v14568_v26 = vld [vmem:[%s20460_s1 + $0x2f0] sm:$0xff]  ;;  %v14573_v27 = vld [vmem:[%s20460_s1 + $0x2f8] sm:$0xff]  ;;  %v14578_v34 = vld [vmem:[%s20460_s1 + $0x300] sm:$0xff] }
  0x25   :  { %20912 = vst [vmem:[#allocation64_spill] sm:$0xff] %v14568_v26  ;;  %20913 = vst [vmem:[#allocation65_spill] sm:$0xff] %v14573_v27  ;;  %v14583_v30 = vld [vmem:[%s20460_s1 + $0x308] sm:$0xff]  ;;  %v14588_v19 = vld [vmem:[%s20460_s1 + $0x310] sm:$0xff] }
  0x26   :  { %20914 = vst [vmem:[#allocation66_spill] sm:$0xff] %v14588_v19  ;;  %v14593_v26 = vld [vmem:[%s20460_s1 + $0x318] sm:$0xff]  ;;  %v14598_v27 = vld [vmem:[%s20460_s1 + $0x320] sm:$0xff]  ;;  %v14603_v23 = vld [vmem:[%s20460_s1 + $0x328] sm:$0xff] }
  0x27   :  { %20915 = vst [vmem:[#allocation67_spill] sm:$0xff] %v14593_v26  ;;  %v14608_v18 = vld [vmem:[%s20460_s1 + $0x330] sm:$0xff]  ;;  %v14613_v19 = vld [vmem:[%s20460_s1 + $0x338] sm:$0xff]  ;;  %v14618_v26 = vld [vmem:[%s20460_s1 + $0x340] sm:$0xff] }
  0x28   :  { %20916 = vst [vmem:[#allocation68_spill] sm:$0xff] %v14608_v18  ;;  %20917 = vst [vmem:[#allocation69_spill] sm:$0xff] %v14613_v19  ;;  %v14623_v22 = vld [vmem:[%s20460_s1 + $0x348] sm:$0xff]  ;;  %v14628_v11 = vld [vmem:[%s20460_s1 + $0x350] sm:$0xff] }
  0x29   :  { %20918 = vst [vmem:[#allocation70_spill] sm:$0xff] %v14628_v11  ;;  %v14633_v18 = vld [vmem:[%s20460_s1 + $0x358] sm:$0xff]  ;;  %v14638_v19 = vld [vmem:[%s20460_s1 + $0x360] sm:$0xff]  ;;  %v14643_v15 = vld [vmem:[%s20460_s1 + $0x368] sm:$0xff] }
  0x2a   :  { %20919 = vst [vmem:[#allocation71_spill] sm:$0xff] %v14633_v18  ;;  %v14648_v10 = vld [vmem:[%s20460_s1 + $0x370] sm:$0xff]  ;;  %v14653_v11 = vld [vmem:[%s20460_s1 + $0x378] sm:$0xff]  ;;  %v14658_v18 = vld [vmem:[%s20460_s1 + $0x380] sm:$0xff] }
  0x2b   :  { %20920 = vst [vmem:[#allocation72_spill] sm:$0xff] %v14648_v10  ;;  %20921 = vst [vmem:[#allocation73_spill] sm:$0xff] %v14653_v11  ;;  %v14663_v14 = vld [vmem:[%s20460_s1 + $0x388] sm:$0xff]  ;;  %v14668_v3 = vld [vmem:[%s20460_s1 + $0x390] sm:$0xff] }
  0x2c   :  { %20922 = vst [vmem:[#allocation74_spill] sm:$0xff] %v14658_v18  ;;  %20923 = vst [vmem:[#allocation75_spill] sm:$0xff] %v14663_v14  ;;  %v14673_v10 = vld [vmem:[%s20460_s1 + $0x398] sm:$0xff]  ;;  %v14678_v11 = vld [vmem:[%s20460_s1 + $0x3a0] sm:$0xff] }
  0x2d   :  { %20924 = vst [vmem:[#allocation76_spill] sm:$0xff] %v14668_v3  ;;  %20925 = vst [vmem:[#allocation77_spill] sm:$0xff] %v14673_v10  ;;  %v14683_v7 = vld [vmem:[%s20460_s1 + $0x3a8] sm:$0xff]  ;;  %v14688_v2 = vld [vmem:[%s20460_s1 + $0x3b0] sm:$0xff] }
  0x2e   :  { %20926 = vst [vmem:[#allocation78_spill] sm:$0xff] %v14678_v11  ;;  %20927 = vst [vmem:[#allocation79_spill] sm:$0xff] %v14683_v7  ;;  %v14693_v3 = vld [vmem:[%s20460_s1 + $0x3b8] sm:$0xff]  ;;  %v14698_v10 = vld [vmem:[%s20460_s1 + $0x3c0] sm:$0xff] }
  0x2f   :  { %20928 = vst [vmem:[#allocation80_spill] sm:$0xff] %v14688_v2  ;;  %20929 = vst [vmem:[#allocation81_spill] sm:$0xff] %v14693_v3  ;;  %v14703_v6 = vld [vmem:[%s20460_s1 + $0x3c8] sm:$0xff]  ;;  %v14708_v14 = vld [vmem:[%s20460_s1 + $0x3d0] sm:$0xff] }
  0x30   :  { %20930 = vst [vmem:[#allocation82_spill] sm:$0xff] %v14698_v10  ;;  %20931 = vst [vmem:[#allocation83_spill] sm:$0xff] %v14703_v6  ;;  %v14713_v2 = vld [vmem:[%s20460_s1 + $0x3d8] sm:$0xff]  ;;  %v14718_v3 = vld [vmem:[%s20460_s1 + $0x3e0] sm:$0xff] }
  0x31   :  { %20932 = vst [vmem:[#allocation84_spill] sm:$0xff] %v14708_v14  ;;  %20933 = vst [vmem:[#allocation85_spill] sm:$0xff] %v14713_v2  ;;  %v14723_v10 = vld [vmem:[%s20460_s1 + $0x3e8] sm:$0xff]  ;;  %v14728_v6 = vld [vmem:[%s20460_s1 + $0x3f0] sm:$0xff] }
  0x32   :  { %20934 = vst [vmem:[#allocation86_spill] sm:$0xff] %v14718_v3  ;;  %20935 = vst [vmem:[#allocation87_spill] sm:$0xff] %v14723_v10  ;;  %v14733_v14 = vld [vmem:[%s20460_s1 + $0x3f8] sm:$0xff]  ;;  %v14738_v2 = vld [vmem:[%s20460_s1 + $0x400] sm:$0xff] }
  0x33   :  { %20936 = vst [vmem:[#allocation88_spill] sm:$0xff] %v14728_v6  ;;  %20937 = vst [vmem:[#allocation89_spill] sm:$0xff] %v14733_v14  ;;  %v14743_v3 = vld [vmem:[%s20460_s1 + $0x408] sm:$0xff]  ;;  %v14748_v10 = vld [vmem:[%s20460_s1 + $0x410] sm:$0xff] }
  0x34   :  { %20938 = vst [vmem:[#allocation90_spill] sm:$0xff] %v14738_v2  ;;  %20939 = vst [vmem:[#allocation91_spill] sm:$0xff] %v14743_v3  ;;  %v14753_v6 = vld [vmem:[%s20460_s1 + $0x418] sm:$0xff]  ;;  %v14758_v14 = vld [vmem:[%s20460_s1 + $0x420] sm:$0xff] }
  0x35   :  { %20940 = vst [vmem:[#allocation92_spill] sm:$0xff] %v14748_v10  ;;  %20941 = vst [vmem:[#allocation93_spill] sm:$0xff] %v14753_v6  ;;  %v14763_v2 = vld [vmem:[%s20460_s1 + $0x428] sm:$0xff]  ;;  %v14768_v3 = vld [vmem:[%s20460_s1 + $0x430] sm:$0xff] }
  0x36   :  { %20942 = vst [vmem:[#allocation94_spill] sm:$0xff] %v14758_v14  ;;  %20943 = vst [vmem:[#allocation95_spill] sm:$0xff] %v14763_v2  ;;  %v14773_v10 = vld [vmem:[%s20460_s1 + $0x438] sm:$0xff]  ;;  %v14778_v6 = vld [vmem:[%s20460_s1 + $0x440] sm:$0xff] }
  0x37   :  { %20944 = vst [vmem:[#allocation96_spill] sm:$0xff] %v14768_v3  ;;  %20945 = vst [vmem:[#allocation97_spill] sm:$0xff] %v14773_v10  ;;  %v14783_v14 = vld [vmem:[%s20460_s1 + $0x448] sm:$0xff]  ;;  %v14788_v2 = vld [vmem:[%s20460_s1 + $0x450] sm:$0xff] }
  0x38   :  { %20946 = vst [vmem:[#allocation98_spill] sm:$0xff] %v14778_v6  ;;  %20947 = vst [vmem:[#allocation99_spill] sm:$0xff] %v14783_v14  ;;  %v14793_v3 = vld [vmem:[%s20460_s1 + $0x458] sm:$0xff]  ;;  %v14798_v10 = vld [vmem:[%s20460_s1 + $0x460] sm:$0xff] }
  0x39   :  { %20948 = vst [vmem:[#allocation100_spill] sm:$0xff] %v14788_v2  ;;  %20949 = vst [vmem:[#allocation101_spill] sm:$0xff] %v14793_v3  ;;  %v14803_v6 = vld [vmem:[%s20460_s1 + $0x468] sm:$0xff]  ;;  %v14808_v14 = vld [vmem:[%s20460_s1 + $0x470] sm:$0xff] }
  0x3a   :  { %20950 = vst [vmem:[#allocation102_spill] sm:$0xff] %v14798_v10  ;;  %20951 = vst [vmem:[#allocation103_spill] sm:$0xff] %v14803_v6  ;;  %v14813_v2 = vld [vmem:[%s20460_s1 + $0x478] sm:$0xff]  ;;  %v14818_v3 = vld [vmem:[%s20460_s1 + $0x480] sm:$0xff] }
  0x3b   :  { %20952 = vst [vmem:[#allocation104_spill] sm:$0xff] %v14808_v14  ;;  %20953 = vst [vmem:[#allocation105_spill] sm:$0xff] %v14813_v2  ;;  %v14823_v10 = vld [vmem:[%s20460_s1 + $0x488] sm:$0xff]  ;;  %v14828_v6 = vld [vmem:[%s20460_s1 + $0x490] sm:$0xff] }
  0x3c   :  { %20954 = vst [vmem:[#allocation106_spill] sm:$0xff] %v14818_v3  ;;  %20955 = vst [vmem:[#allocation107_spill] sm:$0xff] %v14823_v10  ;;  %v14833_v14 = vld [vmem:[%s20460_s1 + $0x498] sm:$0xff]  ;;  %v14838_v2 = vld [vmem:[%s20460_s1 + $0x4a0] sm:$0xff] }
  0x3d   :  { %20956 = vst [vmem:[#allocation108_spill] sm:$0xff] %v14828_v6  ;;  %20957 = vst [vmem:[#allocation109_spill] sm:$0xff] %v14833_v14  ;;  %v14843_v3 = vld [vmem:[%s20460_s1 + $0x4a8] sm:$0xff]  ;;  %v14848_v10 = vld [vmem:[%s20460_s1 + $0x4b0] sm:$0xff] }
  0x3e   :  { %20958 = vst [vmem:[#allocation110_spill] sm:$0xff] %v14838_v2  ;;  %20959 = vst [vmem:[#allocation111_spill] sm:$0xff] %v14843_v3  ;;  %v14853_v6 = vld [vmem:[%s20460_s1 + $0x4b8] sm:$0xff]  ;;  %v14858_v14 = vld [vmem:[%s20460_s1 + $0x4c0] sm:$0xff] }
  0x3f   :  { %20960 = vst [vmem:[#allocation112_spill] sm:$0xff] %v14848_v10  ;;  %20961 = vst [vmem:[#allocation113_spill] sm:$0xff] %v14853_v6  ;;  %v14863_v2 = vld [vmem:[%s20460_s1 + $0x4c8] sm:$0xff]  ;;  %v14868_v3 = vld [vmem:[%s20460_s1 + $0x4d0] sm:$0xff] }
  0x40   :  { %20962 = vst [vmem:[#allocation114_spill] sm:$0xff] %v14858_v14  ;;  %20963 = vst [vmem:[#allocation115_spill] sm:$0xff] %v14863_v2  ;;  %v14873_v10 = vld [vmem:[%s20460_s1 + $0x4d8] sm:$0xff]  ;;  %v14878_v6 = vld [vmem:[%s20460_s1 + $0x4e0] sm:$0xff] }
  0x41   :  { %20964 = vst [vmem:[#allocation116_spill] sm:$0xff] %v14868_v3  ;;  %20965 = vst [vmem:[#allocation117_spill] sm:$0xff] %v14873_v10  ;;  %v14883_v14 = vld [vmem:[%s20460_s1 + $0x4e8] sm:$0xff]  ;;  %v14888_v2 = vld [vmem:[%s20460_s1 + $0x4f0] sm:$0xff] }
  0x42   :  { %20966 = vst [vmem:[#allocation118_spill] sm:$0xff] %v14878_v6  ;;  %20967 = vst [vmem:[#allocation119_spill] sm:$0xff] %v14883_v14  ;;  %v14893_v3 = vld [vmem:[%s20460_s1 + $0x4f8] sm:$0xff]  ;;  %v14898_v10 = vld [vmem:[%s20460_s1 + $0x500] sm:$0xff] }
  0x43   :  { %20968 = vst [vmem:[#allocation120_spill] sm:$0xff] %v14888_v2  ;;  %20969 = vst [vmem:[#allocation121_spill] sm:$0xff] %v14893_v3  ;;  %v14903_v6 = vld [vmem:[%s20460_s1 + $0x508] sm:$0xff]  ;;  %v14908_v14 = vld [vmem:[%s20460_s1 + $0x510] sm:$0xff] }
  0x44   :  { %20970 = vst [vmem:[#allocation122_spill] sm:$0xff] %v14898_v10  ;;  %20971 = vst [vmem:[#allocation123_spill] sm:$0xff] %v14903_v6  ;;  %v14913_v2 = vld [vmem:[%s20460_s1 + $0x518] sm:$0xff]  ;;  %v14918_v3 = vld [vmem:[%s20460_s1 + $0x520] sm:$0xff] }
  0x45   :  { %20972 = vst [vmem:[#allocation124_spill] sm:$0xff] %v14908_v14  ;;  %20973 = vst [vmem:[#allocation125_spill] sm:$0xff] %v14913_v2  ;;  %v14923_v10 = vld [vmem:[%s20460_s1 + $0x528] sm:$0xff]  ;;  %v14928_v6 = vld [vmem:[%s20460_s1 + $0x530] sm:$0xff] }
  0x46   :  { %20974 = vst [vmem:[#allocation126_spill] sm:$0xff] %v14918_v3  ;;  %20975 = vst [vmem:[#allocation127_spill] sm:$0xff] %v14923_v10  ;;  %v14933_v14 = vld [vmem:[%s20460_s1 + $0x538] sm:$0xff]  ;;  %v14938_v2 = vld [vmem:[%s20460_s1 + $0x540] sm:$0xff] }
  0x47   :  { %20976 = vst [vmem:[#allocation128_spill] sm:$0xff] %v14928_v6  ;;  %20977 = vst [vmem:[#allocation129_spill] sm:$0xff] %v14933_v14  ;;  %v14943_v3 = vld [vmem:[%s20460_s1 + $0x548] sm:$0xff]  ;;  %v14948_v10 = vld [vmem:[%s20460_s1 + $0x550] sm:$0xff] }
  0x48   :  { %20978 = vst [vmem:[#allocation130_spill] sm:$0xff] %v14938_v2  ;;  %20979 = vst [vmem:[#allocation131_spill] sm:$0xff] %v14943_v3  ;;  %v14953_v6 = vld [vmem:[%s20460_s1 + $0x558] sm:$0xff]  ;;  %v14958_v14 = vld [vmem:[%s20460_s1 + $0x560] sm:$0xff] }
  0x49   :  { %20980 = vst [vmem:[#allocation132_spill] sm:$0xff] %v14948_v10  ;;  %20981 = vst [vmem:[#allocation133_spill] sm:$0xff] %v14953_v6  ;;  %v14963_v2 = vld [vmem:[%s20460_s1 + $0x568] sm:$0xff]  ;;  %v14968_v3 = vld [vmem:[%s20460_s1 + $0x570] sm:$0xff] }
  0x4a   :  { %20982 = vst [vmem:[#allocation134_spill] sm:$0xff] %v14958_v14  ;;  %20983 = vst [vmem:[#allocation135_spill] sm:$0xff] %v14963_v2  ;;  %v14973_v10 = vld [vmem:[%s20460_s1 + $0x578] sm:$0xff]  ;;  %v14978_v6 = vld [vmem:[%s20460_s1 + $0x580] sm:$0xff] }
  0x4b   :  { %20984 = vst [vmem:[#allocation136_spill] sm:$0xff] %v14968_v3  ;;  %20985 = vst [vmem:[#allocation137_spill] sm:$0xff] %v14973_v10  ;;  %v14983_v14 = vld [vmem:[%s20460_s1 + $0x588] sm:$0xff]  ;;  %v14988_v2 = vld [vmem:[%s20460_s1 + $0x590] sm:$0xff] }
  0x4c   :  { %20986 = vst [vmem:[#allocation138_spill] sm:$0xff] %v14978_v6  ;;  %20987 = vst [vmem:[#allocation139_spill] sm:$0xff] %v14983_v14  ;;  %v14993_v3 = vld [vmem:[%s20460_s1 + $0x598] sm:$0xff]  ;;  %v14998_v10 = vld [vmem:[%s20460_s1 + $0x5a0] sm:$0xff] }
  0x4d   :  { %20988 = vst [vmem:[#allocation140_spill] sm:$0xff] %v14988_v2  ;;  %20989 = vst [vmem:[#allocation141_spill] sm:$0xff] %v14993_v3  ;;  %v15003_v6 = vld [vmem:[%s20460_s1 + $0x5a8] sm:$0xff]  ;;  %v15008_v14 = vld [vmem:[%s20460_s1 + $0x5b0] sm:$0xff] }
  0x4e   :  { %20990 = vst [vmem:[#allocation142_spill] sm:$0xff] %v14998_v10  ;;  %20991 = vst [vmem:[#allocation143_spill] sm:$0xff] %v15003_v6  ;;  %v15013_v2 = vld [vmem:[%s20460_s1 + $0x5b8] sm:$0xff]  ;;  %v15018_v3 = vld [vmem:[%s20460_s1 + $0x5c0] sm:$0xff] }
  0x4f   :  { %20992 = vst [vmem:[#allocation144_spill] sm:$0xff] %v15008_v14  ;;  %20993 = vst [vmem:[#allocation145_spill] sm:$0xff] %v15013_v2  ;;  %v15023_v10 = vld [vmem:[%s20460_s1 + $0x5c8] sm:$0xff]  ;;  %v15028_v6 = vld [vmem:[%s20460_s1 + $0x5d0] sm:$0xff] }
  0x50   :  { %20994 = vst [vmem:[#allocation146_spill] sm:$0xff] %v15018_v3  ;;  %20995 = vst [vmem:[#allocation147_spill] sm:$0xff] %v15023_v10  ;;  %v15033_v14 = vld [vmem:[%s20460_s1 + $0x5d8] sm:$0xff]  ;;  %v15038_v2 = vld [vmem:[%s20460_s1 + $0x5e0] sm:$0xff] }
  0x51   :  { %20996 = vst [vmem:[#allocation148_spill] sm:$0xff] %v15028_v6  ;;  %20997 = vst [vmem:[#allocation149_spill] sm:$0xff] %v15033_v14  ;;  %v15043_v3 = vld [vmem:[%s20460_s1 + $0x5e8] sm:$0xff]  ;;  %v15048_v10 = vld [vmem:[%s20460_s1 + $0x5f0] sm:$0xff] }
  0x52   :  { %20998 = vst [vmem:[#allocation150_spill] sm:$0xff] %v15038_v2  ;;  %20999 = vst [vmem:[#allocation151_spill] sm:$0xff] %v15043_v3  ;;  %v15053_v6 = vld [vmem:[%s20460_s1 + $0x5f8] sm:$0xff]  ;;  %v15058_v14 = vld [vmem:[%s20460_s1 + $0x600] sm:$0xff] }
  0x53   :  { %21000 = vst [vmem:[#allocation152_spill] sm:$0xff] %v15048_v10  ;;  %21001 = vst [vmem:[#allocation153_spill] sm:$0xff] %v15053_v6  ;;  %v15063_v2 = vld [vmem:[%s20460_s1 + $0x608] sm:$0xff]  ;;  %v15068_v3 = vld [vmem:[%s20460_s1 + $0x610] sm:$0xff] }
  0x54   :  { %21002 = vst [vmem:[#allocation154_spill] sm:$0xff] %v15058_v14  ;;  %21003 = vst [vmem:[#allocation155_spill] sm:$0xff] %v15063_v2  ;;  %v15073_v10 = vld [vmem:[%s20460_s1 + $0x618] sm:$0xff]  ;;  %v15078_v6 = vld [vmem:[%s20460_s1 + $0x620] sm:$0xff] }
  0x55   :  { %21004 = vst [vmem:[#allocation156_spill] sm:$0xff] %v15068_v3  ;;  %21005 = vst [vmem:[#allocation157_spill] sm:$0xff] %v15073_v10  ;;  %v15083_v14 = vld [vmem:[%s20460_s1 + $0x628] sm:$0xff]  ;;  %v15088_v2 = vld [vmem:[%s20460_s1 + $0x630] sm:$0xff] }
  0x56   :  { %21006 = vst [vmem:[#allocation158_spill] sm:$0xff] %v15078_v6  ;;  %21007 = vst [vmem:[#allocation159_spill] sm:$0xff] %v15083_v14  ;;  %v15093_v3 = vld [vmem:[%s20460_s1 + $0x638] sm:$0xff]  ;;  %v15098_v10 = vld [vmem:[%s20460_s1 + $0x640] sm:$0xff] }
  0x57   :  { %21008 = vst [vmem:[#allocation160_spill] sm:$0xff] %v15088_v2  ;;  %21009 = vst [vmem:[#allocation161_spill] sm:$0xff] %v15093_v3  ;;  %v15103_v6 = vld [vmem:[%s20460_s1 + $0x648] sm:$0xff]  ;;  %v15108_v14 = vld [vmem:[%s20460_s1 + $0x650] sm:$0xff] }
  0x58   :  { %21010 = vst [vmem:[#allocation162_spill] sm:$0xff] %v15098_v10  ;;  %21011 = vst [vmem:[#allocation163_spill] sm:$0xff] %v15103_v6  ;;  %v15113_v2 = vld [vmem:[%s20460_s1 + $0x658] sm:$0xff]  ;;  %v15118_v3 = vld [vmem:[%s20460_s1 + $0x660] sm:$0xff] }
  0x59   :  { %21012 = vst [vmem:[#allocation164_spill] sm:$0xff] %v15108_v14  ;;  %21013 = vst [vmem:[#allocation165_spill] sm:$0xff] %v15113_v2  ;;  %v15123_v10 = vld [vmem:[%s20460_s1 + $0x668] sm:$0xff]  ;;  %v15128_v6 = vld [vmem:[%s20460_s1 + $0x670] sm:$0xff] }
  0x5a   :  { %21014 = vst [vmem:[#allocation166_spill] sm:$0xff] %v15118_v3  ;;  %21015 = vst [vmem:[#allocation167_spill] sm:$0xff] %v15123_v10  ;;  %v15133_v14 = vld [vmem:[%s20460_s1 + $0x678] sm:$0xff]  ;;  %v15138_v2 = vld [vmem:[%s20460_s1 + $0x680] sm:$0xff] }
  0x5b   :  { %21016 = vst [vmem:[#allocation168_spill] sm:$0xff] %v15128_v6  ;;  %21017 = vst [vmem:[#allocation169_spill] sm:$0xff] %v15133_v14  ;;  %v15143_v3 = vld [vmem:[%s20460_s1 + $0x688] sm:$0xff]  ;;  %v15148_v10 = vld [vmem:[%s20460_s1 + $0x690] sm:$0xff] }
  0x5c   :  { %21018 = vst [vmem:[#allocation170_spill] sm:$0xff] %v15138_v2  ;;  %21019 = vst [vmem:[#allocation171_spill] sm:$0xff] %v15143_v3  ;;  %v15153_v6 = vld [vmem:[%s20460_s1 + $0x698] sm:$0xff]  ;;  %v15158_v14 = vld [vmem:[%s20460_s1 + $0x6a0] sm:$0xff] }
  0x5d   :  { %21020 = vst [vmem:[#allocation172_spill] sm:$0xff] %v15148_v10  ;;  %21021 = vst [vmem:[#allocation173_spill] sm:$0xff] %v15153_v6  ;;  %v15163_v2 = vld [vmem:[%s20460_s1 + $0x6a8] sm:$0xff]  ;;  %v15168_v3 = vld [vmem:[%s20460_s1 + $0x6b0] sm:$0xff] }
  0x5e   :  { %21022 = vst [vmem:[#allocation174_spill] sm:$0xff] %v15158_v14  ;;  %21023 = vst [vmem:[#allocation175_spill] sm:$0xff] %v15163_v2  ;;  %v15173_v10 = vld [vmem:[%s20460_s1 + $0x6b8] sm:$0xff]  ;;  %v15178_v6 = vld [vmem:[%s20460_s1 + $0x6c0] sm:$0xff] }
  0x5f   :  { %21024 = vst [vmem:[#allocation176_spill] sm:$0xff] %v15168_v3  ;;  %21025 = vst [vmem:[#allocation177_spill] sm:$0xff] %v15173_v10  ;;  %v15183_v14 = vld [vmem:[%s20460_s1 + $0x6c8] sm:$0xff]  ;;  %v15188_v2 = vld [vmem:[%s20460_s1 + $0x6d0] sm:$0xff] }
  0x60   :  { %21026 = vst [vmem:[#allocation178_spill] sm:$0xff] %v15178_v6  ;;  %21027 = vst [vmem:[#allocation179_spill] sm:$0xff] %v15183_v14  ;;  %v15193_v3 = vld [vmem:[%s20460_s1 + $0x6d8] sm:$0xff]  ;;  %v15198_v10 = vld [vmem:[%s20460_s1 + $0x6e0] sm:$0xff] }
  0x61   :  { %21028 = vst [vmem:[#allocation180_spill] sm:$0xff] %v15188_v2  ;;  %21029 = vst [vmem:[#allocation181_spill] sm:$0xff] %v15193_v3  ;;  %v15203_v6 = vld [vmem:[%s20460_s1 + $0x6e8] sm:$0xff]  ;;  %v15208_v14 = vld [vmem:[%s20460_s1 + $0x6f0] sm:$0xff] }
  0x62   :  { %21030 = vst [vmem:[#allocation182_spill] sm:$0xff] %v15198_v10  ;;  %21031 = vst [vmem:[#allocation183_spill] sm:$0xff] %v15203_v6  ;;  %v15213_v2 = vld [vmem:[%s20460_s1 + $0x6f8] sm:$0xff]  ;;  %v15218_v3 = vld [vmem:[%s20460_s1 + $0x700] sm:$0xff] }
  0x63   :  { %21032 = vst [vmem:[#allocation184_spill] sm:$0xff] %v15208_v14  ;;  %21033 = vst [vmem:[#allocation185_spill] sm:$0xff] %v15213_v2  ;;  %v15223_v10 = vld [vmem:[%s20460_s1 + $0x708] sm:$0xff]  ;;  %v15228_v6 = vld [vmem:[%s20460_s1 + $0x710] sm:$0xff] }
  0x64   :  { %21034 = vst [vmem:[#allocation186_spill] sm:$0xff] %v15218_v3  ;;  %21035 = vst [vmem:[#allocation187_spill] sm:$0xff] %v15223_v10  ;;  %v15233_v14 = vld [vmem:[%s20460_s1 + $0x718] sm:$0xff]  ;;  %v15238_v2 = vld [vmem:[%s20460_s1 + $0x720] sm:$0xff] }
  0x65   :  { %21036 = vst [vmem:[#allocation188_spill] sm:$0xff] %v15228_v6  ;;  %21037 = vst [vmem:[#allocation189_spill] sm:$0xff] %v15233_v14  ;;  %v15243_v3 = vld [vmem:[%s20460_s1 + $0x728] sm:$0xff]  ;;  %v15248_v10 = vld [vmem:[%s20460_s1 + $0x730] sm:$0xff] }
  0x66   :  { %21038 = vst [vmem:[#allocation190_spill] sm:$0xff] %v15238_v2  ;;  %21039 = vst [vmem:[#allocation191_spill] sm:$0xff] %v15243_v3  ;;  %v15253_v6 = vld [vmem:[%s20460_s1 + $0x738] sm:$0xff]  ;;  %v15258_v14 = vld [vmem:[%s20460_s1 + $0x740] sm:$0xff] }
  0x67   :  { %21040 = vst [vmem:[#allocation192_spill] sm:$0xff] %v15248_v10  ;;  %21041 = vst [vmem:[#allocation193_spill] sm:$0xff] %v15253_v6  ;;  %v15263_v2 = vld [vmem:[%s20460_s1 + $0x748] sm:$0xff]  ;;  %v15268_v3 = vld [vmem:[%s20460_s1 + $0x750] sm:$0xff] }
  0x68   :  { %21042 = vst [vmem:[#allocation194_spill] sm:$0xff] %v15258_v14  ;;  %21043 = vst [vmem:[#allocation195_spill] sm:$0xff] %v15263_v2  ;;  %v15273_v10 = vld [vmem:[%s20460_s1 + $0x758] sm:$0xff]  ;;  %v15278_v6 = vld [vmem:[%s20460_s1 + $0x760] sm:$0xff] }
  0x69   :  { %21044 = vst [vmem:[#allocation196_spill] sm:$0xff] %v15268_v3  ;;  %21045 = vst [vmem:[#allocation197_spill] sm:$0xff] %v15273_v10  ;;  %v15283_v14 = vld [vmem:[%s20460_s1 + $0x768] sm:$0xff]  ;;  %v15288_v2 = vld [vmem:[%s20460_s1 + $0x770] sm:$0xff] }
  0x6a   :  { %21046 = vst [vmem:[#allocation198_spill] sm:$0xff] %v15278_v6  ;;  %21047 = vst [vmem:[#allocation199_spill] sm:$0xff] %v15283_v14  ;;  %v15293_v3 = vld [vmem:[%s20460_s1 + $0x778] sm:$0xff]  ;;  %v15298_v10 = vld [vmem:[%s20460_s1 + $0x780] sm:$0xff] }
  0x6b   :  { %21048 = vst [vmem:[#allocation200_spill] sm:$0xff] %v15288_v2  ;;  %21049 = vst [vmem:[#allocation201_spill] sm:$0xff] %v15293_v3  ;;  %v15303_v6 = vld [vmem:[%s20460_s1 + $0x788] sm:$0xff]  ;;  %v15308_v14 = vld [vmem:[%s20460_s1 + $0x790] sm:$0xff] }
  0x6c   :  { %21050 = vst [vmem:[#allocation202_spill] sm:$0xff] %v15298_v10  ;;  %21051 = vst [vmem:[#allocation203_spill] sm:$0xff] %v15303_v6  ;;  %v15313_v2 = vld [vmem:[%s20460_s1 + $0x798] sm:$0xff]  ;;  %v15318_v3 = vld [vmem:[%s20460_s1 + $0x7a0] sm:$0xff] }
  0x6d   :  { %21052 = vst [vmem:[#allocation204_spill] sm:$0xff] %v15308_v14  ;;  %21053 = vst [vmem:[#allocation205_spill] sm:$0xff] %v15313_v2  ;;  %v15323_v10 = vld [vmem:[%s20460_s1 + $0x7a8] sm:$0xff]  ;;  %v15328_v6 = vld [vmem:[%s20460_s1 + $0x7b0] sm:$0xff] }
  0x6e   :  { %21054 = vst [vmem:[#allocation206_spill] sm:$0xff] %v15318_v3  ;;  %21055 = vst [vmem:[#allocation207_spill] sm:$0xff] %v15323_v10  ;;  %v15333_v14 = vld [vmem:[%s20460_s1 + $0x7b8] sm:$0xff]  ;;  %v15338_v2 = vld [vmem:[%s20460_s1 + $0x7c0] sm:$0xff] }
  0x6f   :  { %21056 = vst [vmem:[#allocation208_spill] sm:$0xff] %v15328_v6  ;;  %21057 = vst [vmem:[#allocation209_spill] sm:$0xff] %v15333_v14  ;;  %v15343_v3 = vld [vmem:[%s20460_s1 + $0x7c8] sm:$0xff]  ;;  %v15348_v10 = vld [vmem:[%s20460_s1 + $0x7d0] sm:$0xff] }
  0x70   :  { %21058 = vst [vmem:[#allocation210_spill] sm:$0xff] %v15338_v2  ;;  %21059 = vst [vmem:[#allocation211_spill] sm:$0xff] %v15343_v3  ;;  %v15353_v6 = vld [vmem:[%s20460_s1 + $0x7d8] sm:$0xff]  ;;  %v15358_v14 = vld [vmem:[%s20460_s1 + $0x7e0] sm:$0xff] }
  0x71   :  { %21060 = vst [vmem:[#allocation212_spill] sm:$0xff] %v15348_v10  ;;  %21061 = vst [vmem:[#allocation213_spill] sm:$0xff] %v15353_v6  ;;  %v15363_v2 = vld [vmem:[%s20460_s1 + $0x7e8] sm:$0xff]  ;;  %v15368_v3 = vld [vmem:[%s20460_s1 + $0x7f0] sm:$0xff] }
  0x72   :  { %21062 = vst [vmem:[#allocation214_spill] sm:$0xff] %v15358_v14  ;;  %21063 = vst [vmem:[#allocation215_spill] sm:$0xff] %v15363_v2  ;;  %v15373_v10 = vld [vmem:[%s20460_s1 + $0x7f8] sm:$0xff]  ;;  %v15378_v6 = vld [vmem:[%s20460_s1 + $0x800] sm:$0xff] }
  0x73   :  { %21064 = vst [vmem:[#allocation216_spill] sm:$0xff] %v15368_v3  ;;  %21065 = vst [vmem:[#allocation217_spill] sm:$0xff] %v15373_v10  ;;  %v15383_v14 = vld [vmem:[%s20460_s1 + $0x808] sm:$0xff]  ;;  %v15388_v2 = vld [vmem:[%s20460_s1 + $0x810] sm:$0xff] }
  0x74   :  { %21066 = vst [vmem:[#allocation218_spill] sm:$0xff] %v15378_v6  ;;  %21067 = vst [vmem:[#allocation219_spill] sm:$0xff] %v15383_v14  ;;  %v15393_v3 = vld [vmem:[%s20460_s1 + $0x818] sm:$0xff]  ;;  %v15398_v10 = vld [vmem:[%s20460_s1 + $0x820] sm:$0xff] }
  0x75   :  { %21068 = vst [vmem:[#allocation220_spill] sm:$0xff] %v15388_v2  ;;  %21069 = vst [vmem:[#allocation221_spill] sm:$0xff] %v15393_v3  ;;  %v15403_v6 = vld [vmem:[%s20460_s1 + $0x828] sm:$0xff]  ;;  %v15408_v14 = vld [vmem:[%s20460_s1 + $0x830] sm:$0xff] }
  0x76   :  { %21070 = vst [vmem:[#allocation222_spill] sm:$0xff] %v15398_v10  ;;  %21071 = vst [vmem:[#allocation223_spill] sm:$0xff] %v15403_v6  ;;  %v15413_v2 = vld [vmem:[%s20460_s1 + $0x838] sm:$0xff]  ;;  %v15418_v3 = vld [vmem:[%s20460_s1 + $0x840] sm:$0xff] }
  0x77   :  { %21072 = vst [vmem:[#allocation224_spill] sm:$0xff] %v15408_v14  ;;  %21073 = vst [vmem:[#allocation225_spill] sm:$0xff] %v15413_v2  ;;  %v15423_v10 = vld [vmem:[%s20460_s1 + $0x848] sm:$0xff]  ;;  %v15428_v6 = vld [vmem:[%s20460_s1 + $0x850] sm:$0xff] }
  0x78   :  { %21074 = vst [vmem:[#allocation226_spill] sm:$0xff] %v15418_v3  ;;  %21075 = vst [vmem:[#allocation227_spill] sm:$0xff] %v15423_v10  ;;  %v15433_v14 = vld [vmem:[%s20460_s1 + $0x858] sm:$0xff]  ;;  %v15438_v2 = vld [vmem:[%s20460_s1 + $0x860] sm:$0xff] }
  0x79   :  { %21076 = vst [vmem:[#allocation228_spill] sm:$0xff] %v15428_v6  ;;  %21077 = vst [vmem:[#allocation229_spill] sm:$0xff] %v15433_v14  ;;  %v15443_v3 = vld [vmem:[%s20460_s1 + $0x868] sm:$0xff]  ;;  %v15448_v10 = vld [vmem:[%s20460_s1 + $0x870] sm:$0xff] }
  0x7a   :  { %21078 = vst [vmem:[#allocation230_spill] sm:$0xff] %v15438_v2  ;;  %21079 = vst [vmem:[#allocation231_spill] sm:$0xff] %v15443_v3  ;;  %v15453_v6 = vld [vmem:[%s20460_s1 + $0x878] sm:$0xff]  ;;  %v15458_v14 = vld [vmem:[%s20460_s1 + $0x880] sm:$0xff] }
  0x7b   :  { %21080 = vst [vmem:[#allocation232_spill] sm:$0xff] %v15448_v10  ;;  %21081 = vst [vmem:[#allocation233_spill] sm:$0xff] %v15453_v6  ;;  %v15463_v2 = vld [vmem:[%s20460_s1 + $0x888] sm:$0xff]  ;;  %v15468_v3 = vld [vmem:[%s20460_s1 + $0x890] sm:$0xff] }
  0x7c   :  { %21082 = vst [vmem:[#allocation234_spill] sm:$0xff] %v15458_v14  ;;  %21083 = vst [vmem:[#allocation235_spill] sm:$0xff] %v15463_v2  ;;  %v15473_v10 = vld [vmem:[%s20460_s1 + $0x898] sm:$0xff]  ;;  %v15478_v6 = vld [vmem:[%s20460_s1 + $0x8a0] sm:$0xff] }
  0x7d   :  { %21084 = vst [vmem:[#allocation236_spill] sm:$0xff] %v15468_v3  ;;  %21085 = vst [vmem:[#allocation237_spill] sm:$0xff] %v15473_v10  ;;  %v15483_v14 = vld [vmem:[%s20460_s1 + $0x8a8] sm:$0xff]  ;;  %v15488_v2 = vld [vmem:[%s20460_s1 + $0x8b0] sm:$0xff] }
  0x7e   :  { %21086 = vst [vmem:[#allocation238_spill] sm:$0xff] %v15478_v6  ;;  %21087 = vst [vmem:[#allocation239_spill] sm:$0xff] %v15483_v14  ;;  %v15493_v3 = vld [vmem:[%s20460_s1 + $0x8b8] sm:$0xff]  ;;  %v15498_v10 = vld [vmem:[%s20460_s1 + $0x8c0] sm:$0xff] }
  0x7f   :  { %21088 = vst [vmem:[#allocation240_spill] sm:$0xff] %v15488_v2  ;;  %21089 = vst [vmem:[#allocation241_spill] sm:$0xff] %v15493_v3  ;;  %v15503_v6 = vld [vmem:[%s20460_s1 + $0x8c8] sm:$0xff]  ;;  %v15508_v14 = vld [vmem:[%s20460_s1 + $0x8d0] sm:$0xff] }
  0x80   :  { %21090 = vst [vmem:[#allocation242_spill] sm:$0xff] %v15498_v10  ;;  %21091 = vst [vmem:[#allocation243_spill] sm:$0xff] %v15503_v6  ;;  %v15513_v2 = vld [vmem:[%s20460_s1 + $0x8d8] sm:$0xff]  ;;  %v15518_v3 = vld [vmem:[%s20460_s1 + $0x8e0] sm:$0xff] }
  0x81   :  { %21092 = vst [vmem:[#allocation244_spill] sm:$0xff] %v15508_v14  ;;  %21093 = vst [vmem:[#allocation245_spill] sm:$0xff] %v15513_v2  ;;  %v15523_v10 = vld [vmem:[%s20460_s1 + $0x8e8] sm:$0xff]  ;;  %v15528_v6 = vld [vmem:[%s20460_s1 + $0x8f0] sm:$0xff] }
  0x82   :  { %21094 = vst [vmem:[#allocation246_spill] sm:$0xff] %v15518_v3  ;;  %21095 = vst [vmem:[#allocation247_spill] sm:$0xff] %v15523_v10  ;;  %v15533_v14 = vld [vmem:[%s20460_s1 + $0x8f8] sm:$0xff]  ;;  %v15538_v2 = vld [vmem:[%s20460_s1 + $0x900] sm:$0xff] }
  0x83   :  { %21096 = vst [vmem:[#allocation248_spill] sm:$0xff] %v15528_v6  ;;  %21097 = vst [vmem:[#allocation249_spill] sm:$0xff] %v15533_v14  ;;  %v15543_v3 = vld [vmem:[%s20460_s1 + $0x908] sm:$0xff]  ;;  %v15548_v10 = vld [vmem:[%s20460_s1 + $0x910] sm:$0xff] }
  0x84   :  { %21098 = vst [vmem:[#allocation250_spill] sm:$0xff] %v15538_v2  ;;  %21099 = vst [vmem:[#allocation251_spill] sm:$0xff] %v15543_v3  ;;  %v15553_v6 = vld [vmem:[%s20460_s1 + $0x918] sm:$0xff]  ;;  %v15558_v14 = vld [vmem:[%s20460_s1 + $0x920] sm:$0xff] }
  0x85   :  { %21100 = vst [vmem:[#allocation252_spill] sm:$0xff] %v15548_v10  ;;  %21101 = vst [vmem:[#allocation253_spill] sm:$0xff] %v15553_v6  ;;  %v15563_v2 = vld [vmem:[%s20460_s1 + $0x928] sm:$0xff]  ;;  %v15568_v3 = vld [vmem:[%s20460_s1 + $0x930] sm:$0xff] }
  0x86   :  { %21102 = vst [vmem:[#allocation254_spill] sm:$0xff] %v15558_v14  ;;  %21103 = vst [vmem:[#allocation255_spill] sm:$0xff] %v15563_v2  ;;  %v15573_v10 = vld [vmem:[%s20460_s1 + $0x938] sm:$0xff]  ;;  %v15578_v6 = vld [vmem:[%s20460_s1 + $0x940] sm:$0xff] }
  0x87   :  { %21104 = vst [vmem:[#allocation256_spill] sm:$0xff] %v15568_v3  ;;  %21105 = vst [vmem:[#allocation257_spill] sm:$0xff] %v15573_v10  ;;  %v15583_v14 = vld [vmem:[%s20460_s1 + $0x948] sm:$0xff]  ;;  %v15588_v2 = vld [vmem:[%s20460_s1 + $0x950] sm:$0xff] }
  0x88   :  { %21106 = vst [vmem:[#allocation258_spill] sm:$0xff] %v15578_v6  ;;  %21107 = vst [vmem:[#allocation259_spill] sm:$0xff] %v15583_v14  ;;  %v15593_v3 = vld [vmem:[%s20460_s1 + $0x958] sm:$0xff] }
  0x89   :  { %21108 = vst [vmem:[#allocation260_spill] sm:$0xff] %v15588_v2  ;;  %21109 = vst [vmem:[#allocation261_spill] sm:$0xff] %v15593_v3 }
  0x8a   :  { %668 = vsyncadd [#allocation7], 38400  ;;  %v707_v10 = vld [vmem:[%s20462_s3] sm:$0xff]  ;;  %v709_v6 = vld [vmem:[%s20462_s3 + $0x8] sm:$0xff] }
  0x8b   :  { %708 = vst [vmem:[#allocation3] sm:$0xff] %v707_v10  ;;  %710 = vst [vmem:[#allocation3 + $0x8] sm:$0xff] %v709_v6  ;;  %v711_v2 = vld [vmem:[%s20462_s3 + $0x10] sm:$0xff]  ;;  %v713_v14 = vld [vmem:[%s20462_s3 + $0x18] sm:$0xff] }
  0x8c   :  { %v715_v3 = vld [vmem:[%s20462_s3 + $0x20] sm:$0xff]  ;;  %712 = vst [vmem:[#allocation3 + $0x10] sm:$0xff] %v711_v2  ;;  %714 = vst [vmem:[#allocation3 + $0x18] sm:$0xff] %v713_v14  ;;  %v717_v10 = vld [vmem:[%s20462_s3 + $0x28] sm:$0xff] }
  0x8d   :  { %716 = vst [vmem:[#allocation3 + $0x20] sm:$0xff] %v715_v3  ;;  %v719_v6 = vld [vmem:[%s20462_s3 + $0x30] sm:$0xff]  ;;  %v721_v7 = vld [vmem:[%s20462_s3 + $0x38] sm:$0xff]  ;;  %718 = vst [vmem:[#allocation3 + $0x28] sm:$0xff] %v717_v10 }
  0x8e   :  { %720 = vst [vmem:[#allocation3 + $0x30] sm:$0xff] %v719_v6  ;;  %722 = vst [vmem:[#allocation3 + $0x38] sm:$0xff] %v721_v7  ;;  %v723_v2 = vld [vmem:[%s20462_s3 + $0x40] sm:$0xff]  ;;  %v725_v3 = vld [vmem:[%s20462_s3 + $0x48] sm:$0xff] }
  0x8f   :  { %v727_v14 = vld [vmem:[%s20462_s3 + $0x50] sm:$0xff]  ;;  %724 = vst [vmem:[#allocation3 + $0x40] sm:$0xff] %v723_v2  ;;  %726 = vst [vmem:[#allocation3 + $0x48] sm:$0xff] %v725_v3  ;;  %v729_v10 = vld [vmem:[%s20462_s3 + $0x58] sm:$0xff] }
  0x90   :  { %728 = vst [vmem:[#allocation3 + $0x50] sm:$0xff] %v727_v14  ;;  %v731_v7 = vld [vmem:[%s20462_s3 + $0x60] sm:$0xff]  ;;  %v733_v6 = vld [vmem:[%s20462_s3 + $0x68] sm:$0xff]  ;;  %730 = vst [vmem:[#allocation3 + $0x58] sm:$0xff] %v729_v10 }
  0x91   :  { %732 = vst [vmem:[#allocation3 + $0x60] sm:$0xff] %v731_v7  ;;  %734 = vst [vmem:[#allocation3 + $0x68] sm:$0xff] %v733_v6  ;;  %v735_v2 = vld [vmem:[%s20462_s3 + $0x70] sm:$0xff]  ;;  %v737_v3 = vld [vmem:[%s20462_s3 + $0x78] sm:$0xff] }
  0x92   :  { %v739_v14 = vld [vmem:[%s20462_s3 + $0x80] sm:$0xff]  ;;  %736 = vst [vmem:[#allocation3 + $0x70] sm:$0xff] %v735_v2  ;;  %738 = vst [vmem:[#allocation3 + $0x78] sm:$0xff] %v737_v3  ;;  %v741_v10 = vld [vmem:[%s20462_s3 + $0x88] sm:$0xff] }
  0x93   :  { %740 = vst [vmem:[#allocation3 + $0x80] sm:$0xff] %v739_v14  ;;  %v743_v7 = vld [vmem:[%s20462_s3 + $0x90] sm:$0xff]  ;;  %v745_v6 = vld [vmem:[%s20462_s3 + $0x98] sm:$0xff]  ;;  %742 = vst [vmem:[#allocation3 + $0x88] sm:$0xff] %v741_v10 }
  0x94   :  { %744 = vst [vmem:[#allocation3 + $0x90] sm:$0xff] %v743_v7  ;;  %746 = vst [vmem:[#allocation3 + $0x98] sm:$0xff] %v745_v6  ;;  %v747_v2 = vld [vmem:[%s20462_s3 + $0xa0] sm:$0xff]  ;;  %v749_v3 = vld [vmem:[%s20462_s3 + $0xa8] sm:$0xff] }
  0x95   :  { %v751_v14 = vld [vmem:[%s20462_s3 + $0xb0] sm:$0xff]  ;;  %748 = vst [vmem:[#allocation3 + $0xa0] sm:$0xff] %v747_v2  ;;  %750 = vst [vmem:[#allocation3 + $0xa8] sm:$0xff] %v749_v3  ;;  %v753_v10 = vld [vmem:[%s20462_s3 + $0xb8] sm:$0xff] }
  0x96   :  { %752 = vst [vmem:[#allocation3 + $0xb0] sm:$0xff] %v751_v14  ;;  %v755_v7 = vld [vmem:[%s20462_s3 + $0xc0] sm:$0xff]  ;;  %v757_v6 = vld [vmem:[%s20462_s3 + $0xc8] sm:$0xff]  ;;  %754 = vst [vmem:[#allocation3 + $0xb8] sm:$0xff] %v753_v10 }
  0x97   :  { %756 = vst [vmem:[#allocation3 + $0xc0] sm:$0xff] %v755_v7  ;;  %758 = vst [vmem:[#allocation3 + $0xc8] sm:$0xff] %v757_v6  ;;  %v759_v2 = vld [vmem:[%s20462_s3 + $0xd0] sm:$0xff]  ;;  %v761_v3 = vld [vmem:[%s20462_s3 + $0xd8] sm:$0xff] }
  0x98   :  { %v763_v14 = vld [vmem:[%s20462_s3 + $0xe0] sm:$0xff]  ;;  %760 = vst [vmem:[#allocation3 + $0xd0] sm:$0xff] %v759_v2  ;;  %762 = vst [vmem:[#allocation3 + $0xd8] sm:$0xff] %v761_v3  ;;  %v765_v10 = vld [vmem:[%s20462_s3 + $0xe8] sm:$0xff] }
  0x99   :  { %764 = vst [vmem:[#allocation3 + $0xe0] sm:$0xff] %v763_v14  ;;  %v767_v7 = vld [vmem:[%s20462_s3 + $0xf0] sm:$0xff]  ;;  %v769_v6 = vld [vmem:[%s20462_s3 + $0xf8] sm:$0xff]  ;;  %766 = vst [vmem:[#allocation3 + $0xe8] sm:$0xff] %v765_v10 }
  0x9a   :  { %768 = vst [vmem:[#allocation3 + $0xf0] sm:$0xff] %v767_v7  ;;  %770 = vst [vmem:[#allocation3 + $0xf8] sm:$0xff] %v769_v6  ;;  %v771_v2 = vld [vmem:[%s20462_s3 + $0x100] sm:$0xff]  ;;  %v773_v3 = vld [vmem:[%s20462_s3 + $0x108] sm:$0xff] }
  0x9b   :  { %v775_v14 = vld [vmem:[%s20462_s3 + $0x110] sm:$0xff]  ;;  %772 = vst [vmem:[#allocation3 + $0x100] sm:$0xff] %v771_v2  ;;  %774 = vst [vmem:[#allocation3 + $0x108] sm:$0xff] %v773_v3  ;;  %v777_v10 = vld [vmem:[%s20462_s3 + $0x118] sm:$0xff] }
  0x9c   :  { %776 = vst [vmem:[#allocation3 + $0x110] sm:$0xff] %v775_v14  ;;  %v779_v7 = vld [vmem:[%s20462_s3 + $0x120] sm:$0xff]  ;;  %v781_v6 = vld [vmem:[%s20462_s3 + $0x128] sm:$0xff]  ;;  %778 = vst [vmem:[#allocation3 + $0x118] sm:$0xff] %v777_v10 }
  0x9d   :  { %780 = vst [vmem:[#allocation3 + $0x120] sm:$0xff] %v779_v7  ;;  %782 = vst [vmem:[#allocation3 + $0x128] sm:$0xff] %v781_v6  ;;  %v783_v2 = vld [vmem:[%s20462_s3 + $0x130] sm:$0xff]  ;;  %v785_v3 = vld [vmem:[%s20462_s3 + $0x138] sm:$0xff] }
  0x9e   :  { %v787_v14 = vld [vmem:[%s20462_s3 + $0x140] sm:$0xff]  ;;  %784 = vst [vmem:[#allocation3 + $0x130] sm:$0xff] %v783_v2  ;;  %786 = vst [vmem:[#allocation3 + $0x138] sm:$0xff] %v785_v3  ;;  %v789_v10 = vld [vmem:[%s20462_s3 + $0x148] sm:$0xff] }
  0x9f   :  { %788 = vst [vmem:[#allocation3 + $0x140] sm:$0xff] %v787_v14  ;;  %v791_v7 = vld [vmem:[%s20462_s3 + $0x150] sm:$0xff]  ;;  %v793_v6 = vld [vmem:[%s20462_s3 + $0x158] sm:$0xff]  ;;  %790 = vst [vmem:[#allocation3 + $0x148] sm:$0xff] %v789_v10 }
  0xa0   :  { %792 = vst [vmem:[#allocation3 + $0x150] sm:$0xff] %v791_v7  ;;  %794 = vst [vmem:[#allocation3 + $0x158] sm:$0xff] %v793_v6  ;;  %v795_v2 = vld [vmem:[%s20462_s3 + $0x160] sm:$0xff]  ;;  %v797_v3 = vld [vmem:[%s20462_s3 + $0x168] sm:$0xff] }
  0xa1   :  { %v799_v14 = vld [vmem:[%s20462_s3 + $0x170] sm:$0xff]  ;;  %796 = vst [vmem:[#allocation3 + $0x160] sm:$0xff] %v795_v2  ;;  %798 = vst [vmem:[#allocation3 + $0x168] sm:$0xff] %v797_v3  ;;  %v801_v10 = vld [vmem:[%s20462_s3 + $0x178] sm:$0xff] }
  0xa2   :  { %800 = vst [vmem:[#allocation3 + $0x170] sm:$0xff] %v799_v14  ;;  %v803_v7 = vld [vmem:[%s20462_s3 + $0x180] sm:$0xff]  ;;  %v805_v6 = vld [vmem:[%s20462_s3 + $0x188] sm:$0xff]  ;;  %802 = vst [vmem:[#allocation3 + $0x178] sm:$0xff] %v801_v10 }
  0xa3   :  { %804 = vst [vmem:[#allocation3 + $0x180] sm:$0xff] %v803_v7  ;;  %806 = vst [vmem:[#allocation3 + $0x188] sm:$0xff] %v805_v6  ;;  %v807_v2 = vld [vmem:[%s20462_s3 + $0x190] sm:$0xff]  ;;  %v809_v3 = vld [vmem:[%s20462_s3 + $0x198] sm:$0xff] }
  0xa4   :  { %v811_v14 = vld [vmem:[%s20462_s3 + $0x1a0] sm:$0xff]  ;;  %808 = vst [vmem:[#allocation3 + $0x190] sm:$0xff] %v807_v2  ;;  %810 = vst [vmem:[#allocation3 + $0x198] sm:$0xff] %v809_v3  ;;  %v813_v10 = vld [vmem:[%s20462_s3 + $0x1a8] sm:$0xff] }
  0xa5   :  { %812 = vst [vmem:[#allocation3 + $0x1a0] sm:$0xff] %v811_v14  ;;  %v815_v7 = vld [vmem:[%s20462_s3 + $0x1b0] sm:$0xff]  ;;  %v817_v6 = vld [vmem:[%s20462_s3 + $0x1b8] sm:$0xff]  ;;  %814 = vst [vmem:[#allocation3 + $0x1a8] sm:$0xff] %v813_v10 }
  0xa6   :  { %816 = vst [vmem:[#allocation3 + $0x1b0] sm:$0xff] %v815_v7  ;;  %818 = vst [vmem:[#allocation3 + $0x1b8] sm:$0xff] %v817_v6  ;;  %v819_v2 = vld [vmem:[%s20462_s3 + $0x1c0] sm:$0xff]  ;;  %v821_v3 = vld [vmem:[%s20462_s3 + $0x1c8] sm:$0xff] }
  0xa7   :  { %v823_v14 = vld [vmem:[%s20462_s3 + $0x1d0] sm:$0xff]  ;;  %820 = vst [vmem:[#allocation3 + $0x1c0] sm:$0xff] %v819_v2  ;;  %822 = vst [vmem:[#allocation3 + $0x1c8] sm:$0xff] %v821_v3  ;;  %v825_v10 = vld [vmem:[%s20462_s3 + $0x1d8] sm:$0xff] }
  0xa8   :  { %824 = vst [vmem:[#allocation3 + $0x1d0] sm:$0xff] %v823_v14  ;;  %v827_v7 = vld [vmem:[%s20462_s3 + $0x1e0] sm:$0xff]  ;;  %v829_v6 = vld [vmem:[%s20462_s3 + $0x1e8] sm:$0xff]  ;;  %826 = vst [vmem:[#allocation3 + $0x1d8] sm:$0xff] %v825_v10 }
  0xa9   :  { %828 = vst [vmem:[#allocation3 + $0x1e0] sm:$0xff] %v827_v7  ;;  %830 = vst [vmem:[#allocation3 + $0x1e8] sm:$0xff] %v829_v6  ;;  %v831_v2 = vld [vmem:[%s20462_s3 + $0x1f0] sm:$0xff]  ;;  %v833_v3 = vld [vmem:[%s20462_s3 + $0x1f8] sm:$0xff] }
  0xaa   :  { %v835_v14 = vld [vmem:[%s20462_s3 + $0x200] sm:$0xff]  ;;  %832 = vst [vmem:[#allocation3 + $0x1f0] sm:$0xff] %v831_v2  ;;  %834 = vst [vmem:[#allocation3 + $0x1f8] sm:$0xff] %v833_v3  ;;  %v837_v10 = vld [vmem:[%s20462_s3 + $0x208] sm:$0xff] }
  0xab   :  { %836 = vst [vmem:[#allocation3 + $0x200] sm:$0xff] %v835_v14  ;;  %v839_v7 = vld [vmem:[%s20462_s3 + $0x210] sm:$0xff]  ;;  %v841_v6 = vld [vmem:[%s20462_s3 + $0x218] sm:$0xff]  ;;  %838 = vst [vmem:[#allocation3 + $0x208] sm:$0xff] %v837_v10 }
  0xac   :  { %840 = vst [vmem:[#allocation3 + $0x210] sm:$0xff] %v839_v7  ;;  %842 = vst [vmem:[#allocation3 + $0x218] sm:$0xff] %v841_v6  ;;  %v843_v2 = vld [vmem:[%s20462_s3 + $0x220] sm:$0xff]  ;;  %v845_v3 = vld [vmem:[%s20462_s3 + $0x228] sm:$0xff] }
  0xad   :  { %v847_v14 = vld [vmem:[%s20462_s3 + $0x230] sm:$0xff]  ;;  %844 = vst [vmem:[#allocation3 + $0x220] sm:$0xff] %v843_v2  ;;  %846 = vst [vmem:[#allocation3 + $0x228] sm:$0xff] %v845_v3  ;;  %v849_v10 = vld [vmem:[%s20462_s3 + $0x238] sm:$0xff] }
  0xae   :  { %848 = vst [vmem:[#allocation3 + $0x230] sm:$0xff] %v847_v14  ;;  %v851_v7 = vld [vmem:[%s20462_s3 + $0x240] sm:$0xff]  ;;  %v853_v6 = vld [vmem:[%s20462_s3 + $0x248] sm:$0xff]  ;;  %850 = vst [vmem:[#allocation3 + $0x238] sm:$0xff] %v849_v10 }
  0xaf   :  { %852 = vst [vmem:[#allocation3 + $0x240] sm:$0xff] %v851_v7  ;;  %854 = vst [vmem:[#allocation3 + $0x248] sm:$0xff] %v853_v6  ;;  %v855_v2 = vld [vmem:[%s20462_s3 + $0x250] sm:$0xff]  ;;  %v857_v3 = vld [vmem:[%s20462_s3 + $0x258] sm:$0xff] }
  0xb0   :  { %v859_v14 = vld [vmem:[%s20462_s3 + $0x260] sm:$0xff]  ;;  %856 = vst [vmem:[#allocation3 + $0x250] sm:$0xff] %v855_v2  ;;  %858 = vst [vmem:[#allocation3 + $0x258] sm:$0xff] %v857_v3  ;;  %v861_v10 = vld [vmem:[%s20462_s3 + $0x268] sm:$0xff] }
  0xb1   :  { %860 = vst [vmem:[#allocation3 + $0x260] sm:$0xff] %v859_v14  ;;  %v863_v7 = vld [vmem:[%s20462_s3 + $0x270] sm:$0xff]  ;;  %v865_v6 = vld [vmem:[%s20462_s3 + $0x278] sm:$0xff]  ;;  %862 = vst [vmem:[#allocation3 + $0x268] sm:$0xff] %v861_v10 }
  0xb2   :  { %864 = vst [vmem:[#allocation3 + $0x270] sm:$0xff] %v863_v7  ;;  %866 = vst [vmem:[#allocation3 + $0x278] sm:$0xff] %v865_v6  ;;  %v867_v2 = vld [vmem:[%s20462_s3 + $0x280] sm:$0xff]  ;;  %v869_v3 = vld [vmem:[%s20462_s3 + $0x288] sm:$0xff] }
  0xb3   :  { %v871_v14 = vld [vmem:[%s20462_s3 + $0x290] sm:$0xff]  ;;  %868 = vst [vmem:[#allocation3 + $0x280] sm:$0xff] %v867_v2  ;;  %870 = vst [vmem:[#allocation3 + $0x288] sm:$0xff] %v869_v3  ;;  %v873_v10 = vld [vmem:[%s20462_s3 + $0x298] sm:$0xff] }
  0xb4   :  { %872 = vst [vmem:[#allocation3 + $0x290] sm:$0xff] %v871_v14  ;;  %v875_v7 = vld [vmem:[%s20462_s3 + $0x2a0] sm:$0xff]  ;;  %v877_v6 = vld [vmem:[%s20462_s3 + $0x2a8] sm:$0xff]  ;;  %874 = vst [vmem:[#allocation3 + $0x298] sm:$0xff] %v873_v10 }
  0xb5   :  { %876 = vst [vmem:[#allocation3 + $0x2a0] sm:$0xff] %v875_v7  ;;  %878 = vst [vmem:[#allocation3 + $0x2a8] sm:$0xff] %v877_v6  ;;  %v879_v2 = vld [vmem:[%s20462_s3 + $0x2b0] sm:$0xff]  ;;  %v881_v3 = vld [vmem:[%s20462_s3 + $0x2b8] sm:$0xff] }
  0xb6   :  { %v883_v14 = vld [vmem:[%s20462_s3 + $0x2c0] sm:$0xff]  ;;  %880 = vst [vmem:[#allocation3 + $0x2b0] sm:$0xff] %v879_v2  ;;  %882 = vst [vmem:[#allocation3 + $0x2b8] sm:$0xff] %v881_v3  ;;  %v885_v10 = vld [vmem:[%s20462_s3 + $0x2c8] sm:$0xff] }
  0xb7   :  { %884 = vst [vmem:[#allocation3 + $0x2c0] sm:$0xff] %v883_v14  ;;  %v887_v7 = vld [vmem:[%s20462_s3 + $0x2d0] sm:$0xff]  ;;  %v889_v6 = vld [vmem:[%s20462_s3 + $0x2d8] sm:$0xff]  ;;  %886 = vst [vmem:[#allocation3 + $0x2c8] sm:$0xff] %v885_v10 }
  0xb8   :  { %888 = vst [vmem:[#allocation3 + $0x2d0] sm:$0xff] %v887_v7  ;;  %890 = vst [vmem:[#allocation3 + $0x2d8] sm:$0xff] %v889_v6  ;;  %v891_v2 = vld [vmem:[%s20462_s3 + $0x2e0] sm:$0xff]  ;;  %v893_v3 = vld [vmem:[%s20462_s3 + $0x2e8] sm:$0xff] }
  0xb9   :  { %v895_v14 = vld [vmem:[%s20462_s3 + $0x2f0] sm:$0xff]  ;;  %892 = vst [vmem:[#allocation3 + $0x2e0] sm:$0xff] %v891_v2  ;;  %894 = vst [vmem:[#allocation3 + $0x2e8] sm:$0xff] %v893_v3  ;;  %v897_v10 = vld [vmem:[%s20462_s3 + $0x2f8] sm:$0xff] }
  0xba   :  { %896 = vst [vmem:[#allocation3 + $0x2f0] sm:$0xff] %v895_v14  ;;  %v899_v7 = vld [vmem:[%s20462_s3 + $0x300] sm:$0xff]  ;;  %v901_v6 = vld [vmem:[%s20462_s3 + $0x308] sm:$0xff]  ;;  %898 = vst [vmem:[#allocation3 + $0x2f8] sm:$0xff] %v897_v10 }
  0xbb   :  { %900 = vst [vmem:[#allocation3 + $0x300] sm:$0xff] %v899_v7  ;;  %902 = vst [vmem:[#allocation3 + $0x308] sm:$0xff] %v901_v6  ;;  %v903_v2 = vld [vmem:[%s20462_s3 + $0x310] sm:$0xff]  ;;  %v905_v3 = vld [vmem:[%s20462_s3 + $0x318] sm:$0xff] }
  0xbc   :  { %v907_v14 = vld [vmem:[%s20462_s3 + $0x320] sm:$0xff]  ;;  %904 = vst [vmem:[#allocation3 + $0x310] sm:$0xff] %v903_v2  ;;  %906 = vst [vmem:[#allocation3 + $0x318] sm:$0xff] %v905_v3  ;;  %v909_v10 = vld [vmem:[%s20462_s3 + $0x328] sm:$0xff] }
  0xbd   :  { %908 = vst [vmem:[#allocation3 + $0x320] sm:$0xff] %v907_v14  ;;  %v911_v7 = vld [vmem:[%s20462_s3 + $0x330] sm:$0xff]  ;;  %v913_v6 = vld [vmem:[%s20462_s3 + $0x338] sm:$0xff]  ;;  %910 = vst [vmem:[#allocation3 + $0x328] sm:$0xff] %v909_v10 }
  0xbe   :  { %912 = vst [vmem:[#allocation3 + $0x330] sm:$0xff] %v911_v7  ;;  %914 = vst [vmem:[#allocation3 + $0x338] sm:$0xff] %v913_v6  ;;  %v915_v2 = vld [vmem:[%s20462_s3 + $0x340] sm:$0xff]  ;;  %v917_v3 = vld [vmem:[%s20462_s3 + $0x348] sm:$0xff] }
  0xbf   :  { %v919_v14 = vld [vmem:[%s20462_s3 + $0x350] sm:$0xff]  ;;  %916 = vst [vmem:[#allocation3 + $0x340] sm:$0xff] %v915_v2  ;;  %918 = vst [vmem:[#allocation3 + $0x348] sm:$0xff] %v917_v3  ;;  %v921_v10 = vld [vmem:[%s20462_s3 + $0x358] sm:$0xff] }
  0xc0   :  { %920 = vst [vmem:[#allocation3 + $0x350] sm:$0xff] %v919_v14  ;;  %v923_v7 = vld [vmem:[%s20462_s3 + $0x360] sm:$0xff]  ;;  %v925_v6 = vld [vmem:[%s20462_s3 + $0x368] sm:$0xff]  ;;  %922 = vst [vmem:[#allocation3 + $0x358] sm:$0xff] %v921_v10 }
  0xc1   :  { %924 = vst [vmem:[#allocation3 + $0x360] sm:$0xff] %v923_v7  ;;  %926 = vst [vmem:[#allocation3 + $0x368] sm:$0xff] %v925_v6  ;;  %v927_v2 = vld [vmem:[%s20462_s3 + $0x370] sm:$0xff]  ;;  %v929_v3 = vld [vmem:[%s20462_s3 + $0x378] sm:$0xff] }
  0xc2   :  { %v931_v14 = vld [vmem:[%s20462_s3 + $0x380] sm:$0xff]  ;;  %928 = vst [vmem:[#allocation3 + $0x370] sm:$0xff] %v927_v2  ;;  %930 = vst [vmem:[#allocation3 + $0x378] sm:$0xff] %v929_v3  ;;  %v933_v10 = vld [vmem:[%s20462_s3 + $0x388] sm:$0xff] }
  0xc3   :  { %932 = vst [vmem:[#allocation3 + $0x380] sm:$0xff] %v931_v14  ;;  %v935_v7 = vld [vmem:[%s20462_s3 + $0x390] sm:$0xff]  ;;  %v937_v6 = vld [vmem:[%s20462_s3 + $0x398] sm:$0xff]  ;;  %934 = vst [vmem:[#allocation3 + $0x388] sm:$0xff] %v933_v10 }
  0xc4   :  { %936 = vst [vmem:[#allocation3 + $0x390] sm:$0xff] %v935_v7  ;;  %938 = vst [vmem:[#allocation3 + $0x398] sm:$0xff] %v937_v6  ;;  %v939_v2 = vld [vmem:[%s20462_s3 + $0x3a0] sm:$0xff]  ;;  %v941_v3 = vld [vmem:[%s20462_s3 + $0x3a8] sm:$0xff] }
  0xc5   :  { %v943_v14 = vld [vmem:[%s20462_s3 + $0x3b0] sm:$0xff]  ;;  %940 = vst [vmem:[#allocation3 + $0x3a0] sm:$0xff] %v939_v2  ;;  %942 = vst [vmem:[#allocation3 + $0x3a8] sm:$0xff] %v941_v3  ;;  %v945_v10 = vld [vmem:[%s20462_s3 + $0x3b8] sm:$0xff] }
  0xc6   :  { %944 = vst [vmem:[#allocation3 + $0x3b0] sm:$0xff] %v943_v14  ;;  %v947_v7 = vld [vmem:[%s20462_s3 + $0x3c0] sm:$0xff]  ;;  %v949_v6 = vld [vmem:[%s20462_s3 + $0x3c8] sm:$0xff]  ;;  %946 = vst [vmem:[#allocation3 + $0x3b8] sm:$0xff] %v945_v10 }
  0xc7   :  { %948 = vst [vmem:[#allocation3 + $0x3c0] sm:$0xff] %v947_v7  ;;  %950 = vst [vmem:[#allocation3 + $0x3c8] sm:$0xff] %v949_v6  ;;  %v951_v2 = vld [vmem:[%s20462_s3 + $0x3d0] sm:$0xff]  ;;  %v953_v3 = vld [vmem:[%s20462_s3 + $0x3d8] sm:$0xff] }
  0xc8   :  { %v955_v14 = vld [vmem:[%s20462_s3 + $0x3e0] sm:$0xff]  ;;  %952 = vst [vmem:[#allocation3 + $0x3d0] sm:$0xff] %v951_v2  ;;  %954 = vst [vmem:[#allocation3 + $0x3d8] sm:$0xff] %v953_v3  ;;  %v957_v10 = vld [vmem:[%s20462_s3 + $0x3e8] sm:$0xff] }
  0xc9   :  { %956 = vst [vmem:[#allocation3 + $0x3e0] sm:$0xff] %v955_v14  ;;  %v959_v7 = vld [vmem:[%s20462_s3 + $0x3f0] sm:$0xff]  ;;  %v961_v6 = vld [vmem:[%s20462_s3 + $0x3f8] sm:$0xff]  ;;  %958 = vst [vmem:[#allocation3 + $0x3e8] sm:$0xff] %v957_v10 }
  0xca   :  { %960 = vst [vmem:[#allocation3 + $0x3f0] sm:$0xff] %v959_v7  ;;  %962 = vst [vmem:[#allocation3 + $0x3f8] sm:$0xff] %v961_v6  ;;  %v963_v2 = vld [vmem:[%s20462_s3 + $0x400] sm:$0xff]  ;;  %v965_v3 = vld [vmem:[%s20462_s3 + $0x408] sm:$0xff] }
  0xcb   :  { %v967_v14 = vld [vmem:[%s20462_s3 + $0x410] sm:$0xff]  ;;  %964 = vst [vmem:[#allocation3 + $0x400] sm:$0xff] %v963_v2  ;;  %966 = vst [vmem:[#allocation3 + $0x408] sm:$0xff] %v965_v3  ;;  %v969_v10 = vld [vmem:[%s20462_s3 + $0x418] sm:$0xff] }
  0xcc   :  { %968 = vst [vmem:[#allocation3 + $0x410] sm:$0xff] %v967_v14  ;;  %v971_v7 = vld [vmem:[%s20462_s3 + $0x420] sm:$0xff]  ;;  %v973_v6 = vld [vmem:[%s20462_s3 + $0x428] sm:$0xff]  ;;  %970 = vst [vmem:[#allocation3 + $0x418] sm:$0xff] %v969_v10 }
  0xcd   :  { %972 = vst [vmem:[#allocation3 + $0x420] sm:$0xff] %v971_v7  ;;  %974 = vst [vmem:[#allocation3 + $0x428] sm:$0xff] %v973_v6  ;;  %v975_v2 = vld [vmem:[%s20462_s3 + $0x430] sm:$0xff]  ;;  %v977_v3 = vld [vmem:[%s20462_s3 + $0x438] sm:$0xff] }
  0xce   :  { %v979_v14 = vld [vmem:[%s20462_s3 + $0x440] sm:$0xff]  ;;  %976 = vst [vmem:[#allocation3 + $0x430] sm:$0xff] %v975_v2  ;;  %978 = vst [vmem:[#allocation3 + $0x438] sm:$0xff] %v977_v3  ;;  %v981_v10 = vld [vmem:[%s20462_s3 + $0x448] sm:$0xff] }
  0xcf   :  { %980 = vst [vmem:[#allocation3 + $0x440] sm:$0xff] %v979_v14  ;;  %v983_v7 = vld [vmem:[%s20462_s3 + $0x450] sm:$0xff]  ;;  %v985_v6 = vld [vmem:[%s20462_s3 + $0x458] sm:$0xff]  ;;  %982 = vst [vmem:[#allocation3 + $0x448] sm:$0xff] %v981_v10 }
  0xd0   :  { %984 = vst [vmem:[#allocation3 + $0x450] sm:$0xff] %v983_v7  ;;  %986 = vst [vmem:[#allocation3 + $0x458] sm:$0xff] %v985_v6  ;;  %v987_v2 = vld [vmem:[%s20462_s3 + $0x460] sm:$0xff]  ;;  %v989_v3 = vld [vmem:[%s20462_s3 + $0x468] sm:$0xff] }
  0xd1   :  { %v991_v14 = vld [vmem:[%s20462_s3 + $0x470] sm:$0xff]  ;;  %988 = vst [vmem:[#allocation3 + $0x460] sm:$0xff] %v987_v2  ;;  %990 = vst [vmem:[#allocation3 + $0x468] sm:$0xff] %v989_v3  ;;  %v993_v10 = vld [vmem:[%s20462_s3 + $0x478] sm:$0xff] }
  0xd2   :  { %992 = vst [vmem:[#allocation3 + $0x470] sm:$0xff] %v991_v14  ;;  %v995_v7 = vld [vmem:[%s20462_s3 + $0x480] sm:$0xff]  ;;  %v997_v6 = vld [vmem:[%s20462_s3 + $0x488] sm:$0xff]  ;;  %994 = vst [vmem:[#allocation3 + $0x478] sm:$0xff] %v993_v10 }
  0xd3   :  { %996 = vst [vmem:[#allocation3 + $0x480] sm:$0xff] %v995_v7  ;;  %998 = vst [vmem:[#allocation3 + $0x488] sm:$0xff] %v997_v6  ;;  %v999_v2 = vld [vmem:[%s20462_s3 + $0x490] sm:$0xff]  ;;  %v1001_v3 = vld [vmem:[%s20462_s3 + $0x498] sm:$0xff] }
  0xd4   :  { %v1003_v14 = vld [vmem:[%s20462_s3 + $0x4a0] sm:$0xff]  ;;  %1000 = vst [vmem:[#allocation3 + $0x490] sm:$0xff] %v999_v2  ;;  %1002 = vst [vmem:[#allocation3 + $0x498] sm:$0xff] %v1001_v3  ;;  %v1005_v10 = vld [vmem:[%s20462_s3 + $0x4a8] sm:$0xff] }
  0xd5   :  { %1004 = vst [vmem:[#allocation3 + $0x4a0] sm:$0xff] %v1003_v14  ;;  %v1007_v7 = vld [vmem:[%s20462_s3 + $0x4b0] sm:$0xff]  ;;  %v1009_v6 = vld [vmem:[%s20462_s3 + $0x4b8] sm:$0xff]  ;;  %1006 = vst [vmem:[#allocation3 + $0x4a8] sm:$0xff] %v1005_v10 }
  0xd6   :  { %1008 = vst [vmem:[#allocation3 + $0x4b0] sm:$0xff] %v1007_v7  ;;  %1010 = vst [vmem:[#allocation3 + $0x4b8] sm:$0xff] %v1009_v6  ;;  %v1011_v2 = vld [vmem:[%s20462_s3 + $0x4c0] sm:$0xff]  ;;  %v1013_v3 = vld [vmem:[%s20462_s3 + $0x4c8] sm:$0xff] }
  0xd7   :  { %v1015_v14 = vld [vmem:[%s20462_s3 + $0x4d0] sm:$0xff]  ;;  %1012 = vst [vmem:[#allocation3 + $0x4c0] sm:$0xff] %v1011_v2  ;;  %1014 = vst [vmem:[#allocation3 + $0x4c8] sm:$0xff] %v1013_v3  ;;  %v1017_v10 = vld [vmem:[%s20462_s3 + $0x4d8] sm:$0xff] }
  0xd8   :  { %1016 = vst [vmem:[#allocation3 + $0x4d0] sm:$0xff] %v1015_v14  ;;  %v1019_v7 = vld [vmem:[%s20462_s3 + $0x4e0] sm:$0xff]  ;;  %v1021_v6 = vld [vmem:[%s20462_s3 + $0x4e8] sm:$0xff]  ;;  %1018 = vst [vmem:[#allocation3 + $0x4d8] sm:$0xff] %v1017_v10 }
  0xd9   :  { %1020 = vst [vmem:[#allocation3 + $0x4e0] sm:$0xff] %v1019_v7  ;;  %1022 = vst [vmem:[#allocation3 + $0x4e8] sm:$0xff] %v1021_v6  ;;  %v1023_v2 = vld [vmem:[%s20462_s3 + $0x4f0] sm:$0xff]  ;;  %v1025_v3 = vld [vmem:[%s20462_s3 + $0x4f8] sm:$0xff] }
  0xda   :  { %v1027_v14 = vld [vmem:[%s20462_s3 + $0x500] sm:$0xff]  ;;  %1024 = vst [vmem:[#allocation3 + $0x4f0] sm:$0xff] %v1023_v2  ;;  %1026 = vst [vmem:[#allocation3 + $0x4f8] sm:$0xff] %v1025_v3  ;;  %v1029_v10 = vld [vmem:[%s20462_s3 + $0x508] sm:$0xff] }
  0xdb   :  { %1028 = vst [vmem:[#allocation3 + $0x500] sm:$0xff] %v1027_v14  ;;  %v1031_v7 = vld [vmem:[%s20462_s3 + $0x510] sm:$0xff]  ;;  %v1033_v6 = vld [vmem:[%s20462_s3 + $0x518] sm:$0xff]  ;;  %1030 = vst [vmem:[#allocation3 + $0x508] sm:$0xff] %v1029_v10 }
  0xdc   :  { %1032 = vst [vmem:[#allocation3 + $0x510] sm:$0xff] %v1031_v7  ;;  %1034 = vst [vmem:[#allocation3 + $0x518] sm:$0xff] %v1033_v6  ;;  %v1035_v2 = vld [vmem:[%s20462_s3 + $0x520] sm:$0xff]  ;;  %v1037_v3 = vld [vmem:[%s20462_s3 + $0x528] sm:$0xff] }
  0xdd   :  { %v1039_v14 = vld [vmem:[%s20462_s3 + $0x530] sm:$0xff]  ;;  %1036 = vst [vmem:[#allocation3 + $0x520] sm:$0xff] %v1035_v2  ;;  %1038 = vst [vmem:[#allocation3 + $0x528] sm:$0xff] %v1037_v3  ;;  %v1041_v10 = vld [vmem:[%s20462_s3 + $0x538] sm:$0xff] }
  0xde   :  { %1040 = vst [vmem:[#allocation3 + $0x530] sm:$0xff] %v1039_v14  ;;  %v1043_v7 = vld [vmem:[%s20462_s3 + $0x540] sm:$0xff]  ;;  %v1045_v6 = vld [vmem:[%s20462_s3 + $0x548] sm:$0xff]  ;;  %1042 = vst [vmem:[#allocation3 + $0x538] sm:$0xff] %v1041_v10 }
  0xdf   :  { %1044 = vst [vmem:[#allocation3 + $0x540] sm:$0xff] %v1043_v7  ;;  %1046 = vst [vmem:[#allocation3 + $0x548] sm:$0xff] %v1045_v6  ;;  %v1047_v2 = vld [vmem:[%s20462_s3 + $0x550] sm:$0xff]  ;;  %v1049_v3 = vld [vmem:[%s20462_s3 + $0x558] sm:$0xff] }
  0xe0   :  { %v1051_v14 = vld [vmem:[%s20462_s3 + $0x560] sm:$0xff]  ;;  %1048 = vst [vmem:[#allocation3 + $0x550] sm:$0xff] %v1047_v2  ;;  %1050 = vst [vmem:[#allocation3 + $0x558] sm:$0xff] %v1049_v3  ;;  %v1053_v10 = vld [vmem:[%s20462_s3 + $0x568] sm:$0xff] }
  0xe1   :  { %1052 = vst [vmem:[#allocation3 + $0x560] sm:$0xff] %v1051_v14  ;;  %v1055_v7 = vld [vmem:[%s20462_s3 + $0x570] sm:$0xff]  ;;  %v1057_v6 = vld [vmem:[%s20462_s3 + $0x578] sm:$0xff]  ;;  %1054 = vst [vmem:[#allocation3 + $0x568] sm:$0xff] %v1053_v10 }
  0xe2   :  { %1056 = vst [vmem:[#allocation3 + $0x570] sm:$0xff] %v1055_v7  ;;  %1058 = vst [vmem:[#allocation3 + $0x578] sm:$0xff] %v1057_v6  ;;  %v1059_v2 = vld [vmem:[%s20462_s3 + $0x580] sm:$0xff]  ;;  %v1061_v3 = vld [vmem:[%s20462_s3 + $0x588] sm:$0xff] }
  0xe3   :  { %v1063_v14 = vld [vmem:[%s20462_s3 + $0x590] sm:$0xff]  ;;  %1060 = vst [vmem:[#allocation3 + $0x580] sm:$0xff] %v1059_v2  ;;  %1062 = vst [vmem:[#allocation3 + $0x588] sm:$0xff] %v1061_v3  ;;  %v1065_v10 = vld [vmem:[%s20462_s3 + $0x598] sm:$0xff] }
  0xe4   :  { %1064 = vst [vmem:[#allocation3 + $0x590] sm:$0xff] %v1063_v14  ;;  %v1067_v7 = vld [vmem:[%s20462_s3 + $0x5a0] sm:$0xff]  ;;  %v1069_v6 = vld [vmem:[%s20462_s3 + $0x5a8] sm:$0xff]  ;;  %1066 = vst [vmem:[#allocation3 + $0x598] sm:$0xff] %v1065_v10 }
  0xe5   :  { %1068 = vst [vmem:[#allocation3 + $0x5a0] sm:$0xff] %v1067_v7  ;;  %1070 = vst [vmem:[#allocation3 + $0x5a8] sm:$0xff] %v1069_v6  ;;  %v1071_v2 = vld [vmem:[%s20462_s3 + $0x5b0] sm:$0xff]  ;;  %v1073_v3 = vld [vmem:[%s20462_s3 + $0x5b8] sm:$0xff] }
  0xe6   :  { %v1075_v14 = vld [vmem:[%s20462_s3 + $0x5c0] sm:$0xff]  ;;  %1072 = vst [vmem:[#allocation3 + $0x5b0] sm:$0xff] %v1071_v2  ;;  %1074 = vst [vmem:[#allocation3 + $0x5b8] sm:$0xff] %v1073_v3  ;;  %v1077_v10 = vld [vmem:[%s20462_s3 + $0x5c8] sm:$0xff] }
  0xe7   :  { %1076 = vst [vmem:[#allocation3 + $0x5c0] sm:$0xff] %v1075_v14  ;;  %v1079_v7 = vld [vmem:[%s20462_s3 + $0x5d0] sm:$0xff]  ;;  %v1081_v6 = vld [vmem:[%s20462_s3 + $0x5d8] sm:$0xff]  ;;  %1078 = vst [vmem:[#allocation3 + $0x5c8] sm:$0xff] %v1077_v10 }
  0xe8   :  { %1080 = vst [vmem:[#allocation3 + $0x5d0] sm:$0xff] %v1079_v7  ;;  %1082 = vst [vmem:[#allocation3 + $0x5d8] sm:$0xff] %v1081_v6  ;;  %v1083_v2 = vld [vmem:[%s20462_s3 + $0x5e0] sm:$0xff]  ;;  %v1085_v3 = vld [vmem:[%s20462_s3 + $0x5e8] sm:$0xff] }
  0xe9   :  { %v1087_v14 = vld [vmem:[%s20462_s3 + $0x5f0] sm:$0xff]  ;;  %1084 = vst [vmem:[#allocation3 + $0x5e0] sm:$0xff] %v1083_v2  ;;  %1086 = vst [vmem:[#allocation3 + $0x5e8] sm:$0xff] %v1085_v3  ;;  %v1089_v10 = vld [vmem:[%s20462_s3 + $0x5f8] sm:$0xff] }
  0xea   :  { %1088 = vst [vmem:[#allocation3 + $0x5f0] sm:$0xff] %v1087_v14  ;;  %v1091_v7 = vld [vmem:[%s20462_s3 + $0x600] sm:$0xff]  ;;  %v1093_v6 = vld [vmem:[%s20462_s3 + $0x608] sm:$0xff]  ;;  %1090 = vst [vmem:[#allocation3 + $0x5f8] sm:$0xff] %v1089_v10 }
  0xeb   :  { %1092 = vst [vmem:[#allocation3 + $0x600] sm:$0xff] %v1091_v7  ;;  %1094 = vst [vmem:[#allocation3 + $0x608] sm:$0xff] %v1093_v6  ;;  %v1095_v2 = vld [vmem:[%s20462_s3 + $0x610] sm:$0xff]  ;;  %v1097_v3 = vld [vmem:[%s20462_s3 + $0x618] sm:$0xff] }
  0xec   :  { %v1099_v14 = vld [vmem:[%s20462_s3 + $0x620] sm:$0xff]  ;;  %1096 = vst [vmem:[#allocation3 + $0x610] sm:$0xff] %v1095_v2  ;;  %1098 = vst [vmem:[#allocation3 + $0x618] sm:$0xff] %v1097_v3  ;;  %v1101_v10 = vld [vmem:[%s20462_s3 + $0x628] sm:$0xff] }
  0xed   :  { %1100 = vst [vmem:[#allocation3 + $0x620] sm:$0xff] %v1099_v14  ;;  %v1103_v7 = vld [vmem:[%s20462_s3 + $0x630] sm:$0xff]  ;;  %v1105_v6 = vld [vmem:[%s20462_s3 + $0x638] sm:$0xff]  ;;  %1102 = vst [vmem:[#allocation3 + $0x628] sm:$0xff] %v1101_v10 }
  0xee   :  { %1104 = vst [vmem:[#allocation3 + $0x630] sm:$0xff] %v1103_v7  ;;  %1106 = vst [vmem:[#allocation3 + $0x638] sm:$0xff] %v1105_v6  ;;  %v1107_v2 = vld [vmem:[%s20462_s3 + $0x640] sm:$0xff]  ;;  %v1109_v3 = vld [vmem:[%s20462_s3 + $0x648] sm:$0xff] }
  0xef   :  { %v1111_v14 = vld [vmem:[%s20462_s3 + $0x650] sm:$0xff]  ;;  %1108 = vst [vmem:[#allocation3 + $0x640] sm:$0xff] %v1107_v2  ;;  %1110 = vst [vmem:[#allocation3 + $0x648] sm:$0xff] %v1109_v3  ;;  %v1113_v10 = vld [vmem:[%s20462_s3 + $0x658] sm:$0xff] }
  0xf0   :  { %1112 = vst [vmem:[#allocation3 + $0x650] sm:$0xff] %v1111_v14  ;;  %v1115_v7 = vld [vmem:[%s20462_s3 + $0x660] sm:$0xff]  ;;  %v1117_v6 = vld [vmem:[%s20462_s3 + $0x668] sm:$0xff]  ;;  %1114 = vst [vmem:[#allocation3 + $0x658] sm:$0xff] %v1113_v10 }
  0xf1   :  { %1116 = vst [vmem:[#allocation3 + $0x660] sm:$0xff] %v1115_v7  ;;  %1118 = vst [vmem:[#allocation3 + $0x668] sm:$0xff] %v1117_v6  ;;  %v1119_v2 = vld [vmem:[%s20462_s3 + $0x670] sm:$0xff]  ;;  %v1121_v3 = vld [vmem:[%s20462_s3 + $0x678] sm:$0xff] }
  0xf2   :  { %v1123_v14 = vld [vmem:[%s20462_s3 + $0x680] sm:$0xff]  ;;  %1120 = vst [vmem:[#allocation3 + $0x670] sm:$0xff] %v1119_v2  ;;  %1122 = vst [vmem:[#allocation3 + $0x678] sm:$0xff] %v1121_v3  ;;  %v1125_v10 = vld [vmem:[%s20462_s3 + $0x688] sm:$0xff] }
  0xf3   :  { %1124 = vst [vmem:[#allocation3 + $0x680] sm:$0xff] %v1123_v14  ;;  %v1127_v7 = vld [vmem:[%s20462_s3 + $0x690] sm:$0xff]  ;;  %v1129_v6 = vld [vmem:[%s20462_s3 + $0x698] sm:$0xff]  ;;  %1126 = vst [vmem:[#allocation3 + $0x688] sm:$0xff] %v1125_v10 }
  0xf4   :  { %1128 = vst [vmem:[#allocation3 + $0x690] sm:$0xff] %v1127_v7  ;;  %1130 = vst [vmem:[#allocation3 + $0x698] sm:$0xff] %v1129_v6  ;;  %v1131_v2 = vld [vmem:[%s20462_s3 + $0x6a0] sm:$0xff]  ;;  %v1133_v3 = vld [vmem:[%s20462_s3 + $0x6a8] sm:$0xff] }
  0xf5   :  { %v1135_v14 = vld [vmem:[%s20462_s3 + $0x6b0] sm:$0xff]  ;;  %1132 = vst [vmem:[#allocation3 + $0x6a0] sm:$0xff] %v1131_v2  ;;  %1134 = vst [vmem:[#allocation3 + $0x6a8] sm:$0xff] %v1133_v3  ;;  %v1137_v10 = vld [vmem:[%s20462_s3 + $0x6b8] sm:$0xff] }
  0xf6   :  { %1136 = vst [vmem:[#allocation3 + $0x6b0] sm:$0xff] %v1135_v14  ;;  %v1139_v7 = vld [vmem:[%s20462_s3 + $0x6c0] sm:$0xff]  ;;  %v1141_v6 = vld [vmem:[%s20462_s3 + $0x6c8] sm:$0xff]  ;;  %1138 = vst [vmem:[#allocation3 + $0x6b8] sm:$0xff] %v1137_v10 }
  0xf7   :  { %1140 = vst [vmem:[#allocation3 + $0x6c0] sm:$0xff] %v1139_v7  ;;  %1142 = vst [vmem:[#allocation3 + $0x6c8] sm:$0xff] %v1141_v6  ;;  %v1143_v2 = vld [vmem:[%s20462_s3 + $0x6d0] sm:$0xff]  ;;  %v1145_v3 = vld [vmem:[%s20462_s3 + $0x6d8] sm:$0xff] }
  0xf8   :  { %v1147_v14 = vld [vmem:[%s20462_s3 + $0x6e0] sm:$0xff]  ;;  %1144 = vst [vmem:[#allocation3 + $0x6d0] sm:$0xff] %v1143_v2  ;;  %1146 = vst [vmem:[#allocation3 + $0x6d8] sm:$0xff] %v1145_v3  ;;  %v1149_v10 = vld [vmem:[%s20462_s3 + $0x6e8] sm:$0xff] }
  0xf9   :  { %1148 = vst [vmem:[#allocation3 + $0x6e0] sm:$0xff] %v1147_v14  ;;  %v1151_v7 = vld [vmem:[%s20462_s3 + $0x6f0] sm:$0xff]  ;;  %v1153_v6 = vld [vmem:[%s20462_s3 + $0x6f8] sm:$0xff]  ;;  %1150 = vst [vmem:[#allocation3 + $0x6e8] sm:$0xff] %v1149_v10 }
  0xfa   :  { %1152 = vst [vmem:[#allocation3 + $0x6f0] sm:$0xff] %v1151_v7  ;;  %1154 = vst [vmem:[#allocation3 + $0x6f8] sm:$0xff] %v1153_v6  ;;  %v1155_v2 = vld [vmem:[%s20462_s3 + $0x700] sm:$0xff]  ;;  %v1157_v3 = vld [vmem:[%s20462_s3 + $0x708] sm:$0xff] }
  0xfb   :  { %v1159_v14 = vld [vmem:[%s20462_s3 + $0x710] sm:$0xff]  ;;  %1156 = vst [vmem:[#allocation3 + $0x700] sm:$0xff] %v1155_v2  ;;  %1158 = vst [vmem:[#allocation3 + $0x708] sm:$0xff] %v1157_v3  ;;  %v1161_v10 = vld [vmem:[%s20462_s3 + $0x718] sm:$0xff] }
  0xfc   :  { %1160 = vst [vmem:[#allocation3 + $0x710] sm:$0xff] %v1159_v14  ;;  %v1163_v7 = vld [vmem:[%s20462_s3 + $0x720] sm:$0xff]  ;;  %v1165_v6 = vld [vmem:[%s20462_s3 + $0x728] sm:$0xff]  ;;  %1162 = vst [vmem:[#allocation3 + $0x718] sm:$0xff] %v1161_v10 }
  0xfd   :  { %1164 = vst [vmem:[#allocation3 + $0x720] sm:$0xff] %v1163_v7  ;;  %1166 = vst [vmem:[#allocation3 + $0x728] sm:$0xff] %v1165_v6  ;;  %v1167_v2 = vld [vmem:[%s20462_s3 + $0x730] sm:$0xff]  ;;  %v1169_v3 = vld [vmem:[%s20462_s3 + $0x738] sm:$0xff] }
  0xfe   :  { %v1171_v14 = vld [vmem:[%s20462_s3 + $0x740] sm:$0xff]  ;;  %1168 = vst [vmem:[#allocation3 + $0x730] sm:$0xff] %v1167_v2  ;;  %1170 = vst [vmem:[#allocation3 + $0x738] sm:$0xff] %v1169_v3  ;;  %v1173_v10 = vld [vmem:[%s20462_s3 + $0x748] sm:$0xff] }
  0xff   :  { %1172 = vst [vmem:[#allocation3 + $0x740] sm:$0xff] %v1171_v14  ;;  %v1175_v7 = vld [vmem:[%s20462_s3 + $0x750] sm:$0xff]  ;;  %v1177_v6 = vld [vmem:[%s20462_s3 + $0x758] sm:$0xff]  ;;  %1174 = vst [vmem:[#allocation3 + $0x748] sm:$0xff] %v1173_v10 }
 0x100   :  { %1176 = vst [vmem:[#allocation3 + $0x750] sm:$0xff] %v1175_v7  ;;  %1178 = vst [vmem:[#allocation3 + $0x758] sm:$0xff] %v1177_v6  ;;  %v1179_v2 = vld [vmem:[%s20462_s3 + $0x760] sm:$0xff]  ;;  %v1181_v3 = vld [vmem:[%s20462_s3 + $0x768] sm:$0xff] }
 0x101   :  { %v1183_v14 = vld [vmem:[%s20462_s3 + $0x770] sm:$0xff]  ;;  %1180 = vst [vmem:[#allocation3 + $0x760] sm:$0xff] %v1179_v2  ;;  %1182 = vst [vmem:[#allocation3 + $0x768] sm:$0xff] %v1181_v3  ;;  %v1185_v10 = vld [vmem:[%s20462_s3 + $0x778] sm:$0xff] }
 0x102   :  { %1184 = vst [vmem:[#allocation3 + $0x770] sm:$0xff] %v1183_v14  ;;  %v1187_v7 = vld [vmem:[%s20462_s3 + $0x780] sm:$0xff]  ;;  %v1189_v6 = vld [vmem:[%s20462_s3 + $0x788] sm:$0xff]  ;;  %1186 = vst [vmem:[#allocation3 + $0x778] sm:$0xff] %v1185_v10 }
 0x103   :  { %1188 = vst [vmem:[#allocation3 + $0x780] sm:$0xff] %v1187_v7  ;;  %1190 = vst [vmem:[#allocation3 + $0x788] sm:$0xff] %v1189_v6  ;;  %v1191_v2 = vld [vmem:[%s20462_s3 + $0x790] sm:$0xff]  ;;  %v1193_v3 = vld [vmem:[%s20462_s3 + $0x798] sm:$0xff] }
 0x104   :  { %v1195_v14 = vld [vmem:[%s20462_s3 + $0x7a0] sm:$0xff]  ;;  %1192 = vst [vmem:[#allocation3 + $0x790] sm:$0xff] %v1191_v2  ;;  %1194 = vst [vmem:[#allocation3 + $0x798] sm:$0xff] %v1193_v3  ;;  %v1197_v10 = vld [vmem:[%s20462_s3 + $0x7a8] sm:$0xff] }
 0x105   :  { %1196 = vst [vmem:[#allocation3 + $0x7a0] sm:$0xff] %v1195_v14  ;;  %v1199_v7 = vld [vmem:[%s20462_s3 + $0x7b0] sm:$0xff]  ;;  %v1201_v6 = vld [vmem:[%s20462_s3 + $0x7b8] sm:$0xff]  ;;  %1198 = vst [vmem:[#allocation3 + $0x7a8] sm:$0xff] %v1197_v10 }
 0x106   :  { %1200 = vst [vmem:[#allocation3 + $0x7b0] sm:$0xff] %v1199_v7  ;;  %1202 = vst [vmem:[#allocation3 + $0x7b8] sm:$0xff] %v1201_v6  ;;  %v1203_v2 = vld [vmem:[%s20462_s3 + $0x7c0] sm:$0xff]  ;;  %v1205_v3 = vld [vmem:[%s20462_s3 + $0x7c8] sm:$0xff] }
 0x107   :  { %v1207_v14 = vld [vmem:[%s20462_s3 + $0x7d0] sm:$0xff]  ;;  %1204 = vst [vmem:[#allocation3 + $0x7c0] sm:$0xff] %v1203_v2  ;;  %1206 = vst [vmem:[#allocation3 + $0x7c8] sm:$0xff] %v1205_v3  ;;  %v1209_v10 = vld [vmem:[%s20462_s3 + $0x7d8] sm:$0xff] }
 0x108   :  { %1208 = vst [vmem:[#allocation3 + $0x7d0] sm:$0xff] %v1207_v14  ;;  %v1211_v7 = vld [vmem:[%s20462_s3 + $0x7e0] sm:$0xff]  ;;  %v1213_v6 = vld [vmem:[%s20462_s3 + $0x7e8] sm:$0xff]  ;;  %1210 = vst [vmem:[#allocation3 + $0x7d8] sm:$0xff] %v1209_v10 }
 0x109   :  { %1212 = vst [vmem:[#allocation3 + $0x7e0] sm:$0xff] %v1211_v7  ;;  %1214 = vst [vmem:[#allocation3 + $0x7e8] sm:$0xff] %v1213_v6  ;;  %v1215_v2 = vld [vmem:[%s20462_s3 + $0x7f0] sm:$0xff]  ;;  %v1217_v3 = vld [vmem:[%s20462_s3 + $0x7f8] sm:$0xff] }
 0x10a   :  { %v1219_v14 = vld [vmem:[%s20462_s3 + $0x800] sm:$0xff]  ;;  %1216 = vst [vmem:[#allocation3 + $0x7f0] sm:$0xff] %v1215_v2  ;;  %1218 = vst [vmem:[#allocation3 + $0x7f8] sm:$0xff] %v1217_v3  ;;  %v1221_v10 = vld [vmem:[%s20462_s3 + $0x808] sm:$0xff] }
 0x10b   :  { %1220 = vst [vmem:[#allocation3 + $0x800] sm:$0xff] %v1219_v14  ;;  %v1223_v7 = vld [vmem:[%s20462_s3 + $0x810] sm:$0xff]  ;;  %v1225_v6 = vld [vmem:[%s20462_s3 + $0x818] sm:$0xff]  ;;  %1222 = vst [vmem:[#allocation3 + $0x808] sm:$0xff] %v1221_v10 }
 0x10c   :  { %1224 = vst [vmem:[#allocation3 + $0x810] sm:$0xff] %v1223_v7  ;;  %1226 = vst [vmem:[#allocation3 + $0x818] sm:$0xff] %v1225_v6  ;;  %v1227_v2 = vld [vmem:[%s20462_s3 + $0x820] sm:$0xff]  ;;  %v1229_v3 = vld [vmem:[%s20462_s3 + $0x828] sm:$0xff] }
 0x10d   :  { %v1231_v14 = vld [vmem:[%s20462_s3 + $0x830] sm:$0xff]  ;;  %1228 = vst [vmem:[#allocation3 + $0x820] sm:$0xff] %v1227_v2  ;;  %1230 = vst [vmem:[#allocation3 + $0x828] sm:$0xff] %v1229_v3  ;;  %v1233_v10 = vld [vmem:[%s20462_s3 + $0x838] sm:$0xff] }
 0x10e   :  { %1232 = vst [vmem:[#allocation3 + $0x830] sm:$0xff] %v1231_v14  ;;  %v1235_v7 = vld [vmem:[%s20462_s3 + $0x840] sm:$0xff]  ;;  %v1237_v6 = vld [vmem:[%s20462_s3 + $0x848] sm:$0xff]  ;;  %1234 = vst [vmem:[#allocation3 + $0x838] sm:$0xff] %v1233_v10 }
 0x10f   :  { %1236 = vst [vmem:[#allocation3 + $0x840] sm:$0xff] %v1235_v7  ;;  %1238 = vst [vmem:[#allocation3 + $0x848] sm:$0xff] %v1237_v6  ;;  %v1239_v2 = vld [vmem:[%s20462_s3 + $0x850] sm:$0xff]  ;;  %v1241_v3 = vld [vmem:[%s20462_s3 + $0x858] sm:$0xff] }
 0x110   :  { %v1243_v14 = vld [vmem:[%s20462_s3 + $0x860] sm:$0xff]  ;;  %1240 = vst [vmem:[#allocation3 + $0x850] sm:$0xff] %v1239_v2  ;;  %1242 = vst [vmem:[#allocation3 + $0x858] sm:$0xff] %v1241_v3  ;;  %v1245_v10 = vld [vmem:[%s20462_s3 + $0x868] sm:$0xff] }
 0x111   :  { %1244 = vst [vmem:[#allocation3 + $0x860] sm:$0xff] %v1243_v14  ;;  %v1247_v7 = vld [vmem:[%s20462_s3 + $0x870] sm:$0xff]  ;;  %v1249_v6 = vld [vmem:[%s20462_s3 + $0x878] sm:$0xff]  ;;  %1246 = vst [vmem:[#allocation3 + $0x868] sm:$0xff] %v1245_v10 }
 0x112   :  { %1248 = vst [vmem:[#allocation3 + $0x870] sm:$0xff] %v1247_v7  ;;  %1250 = vst [vmem:[#allocation3 + $0x878] sm:$0xff] %v1249_v6  ;;  %v1251_v2 = vld [vmem:[%s20462_s3 + $0x880] sm:$0xff]  ;;  %v1253_v3 = vld [vmem:[%s20462_s3 + $0x888] sm:$0xff] }
 0x113   :  { %v1255_v14 = vld [vmem:[%s20462_s3 + $0x890] sm:$0xff]  ;;  %1252 = vst [vmem:[#allocation3 + $0x880] sm:$0xff] %v1251_v2  ;;  %1254 = vst [vmem:[#allocation3 + $0x888] sm:$0xff] %v1253_v3  ;;  %v1257_v10 = vld [vmem:[%s20462_s3 + $0x898] sm:$0xff] }
 0x114   :  { %1256 = vst [vmem:[#allocation3 + $0x890] sm:$0xff] %v1255_v14  ;;  %v1259_v7 = vld [vmem:[%s20462_s3 + $0x8a0] sm:$0xff]  ;;  %v1261_v6 = vld [vmem:[%s20462_s3 + $0x8a8] sm:$0xff]  ;;  %1258 = vst [vmem:[#allocation3 + $0x898] sm:$0xff] %v1257_v10 }
 0x115   :  { %1260 = vst [vmem:[#allocation3 + $0x8a0] sm:$0xff] %v1259_v7  ;;  %1262 = vst [vmem:[#allocation3 + $0x8a8] sm:$0xff] %v1261_v6  ;;  %v1263_v2 = vld [vmem:[%s20462_s3 + $0x8b0] sm:$0xff]  ;;  %v1265_v3 = vld [vmem:[%s20462_s3 + $0x8b8] sm:$0xff] }
 0x116   :  { %v1267_v14 = vld [vmem:[%s20462_s3 + $0x8c0] sm:$0xff]  ;;  %1264 = vst [vmem:[#allocation3 + $0x8b0] sm:$0xff] %v1263_v2  ;;  %1266 = vst [vmem:[#allocation3 + $0x8b8] sm:$0xff] %v1265_v3  ;;  %v1269_v10 = vld [vmem:[%s20462_s3 + $0x8c8] sm:$0xff] }
 0x117   :  { %1268 = vst [vmem:[#allocation3 + $0x8c0] sm:$0xff] %v1267_v14  ;;  %v1271_v7 = vld [vmem:[%s20462_s3 + $0x8d0] sm:$0xff]  ;;  %v1273_v6 = vld [vmem:[%s20462_s3 + $0x8d8] sm:$0xff]  ;;  %1270 = vst [vmem:[#allocation3 + $0x8c8] sm:$0xff] %v1269_v10 }
 0x118   :  { %1272 = vst [vmem:[#allocation3 + $0x8d0] sm:$0xff] %v1271_v7  ;;  %1274 = vst [vmem:[#allocation3 + $0x8d8] sm:$0xff] %v1273_v6  ;;  %v1275_v2 = vld [vmem:[%s20462_s3 + $0x8e0] sm:$0xff]  ;;  %v1277_v3 = vld [vmem:[%s20462_s3 + $0x8e8] sm:$0xff] }
 0x119   :  { %v1279_v14 = vld [vmem:[%s20462_s3 + $0x8f0] sm:$0xff]  ;;  %1276 = vst [vmem:[#allocation3 + $0x8e0] sm:$0xff] %v1275_v2  ;;  %1278 = vst [vmem:[#allocation3 + $0x8e8] sm:$0xff] %v1277_v3  ;;  %v1281_v10 = vld [vmem:[%s20462_s3 + $0x8f8] sm:$0xff] }
 0x11a   :  { %1280 = vst [vmem:[#allocation3 + $0x8f0] sm:$0xff] %v1279_v14  ;;  %v1283_v7 = vld [vmem:[%s20462_s3 + $0x900] sm:$0xff]  ;;  %v1285_v6 = vld [vmem:[%s20462_s3 + $0x908] sm:$0xff]  ;;  %1282 = vst [vmem:[#allocation3 + $0x8f8] sm:$0xff] %v1281_v10 }
 0x11b   :  { %1284 = vst [vmem:[#allocation3 + $0x900] sm:$0xff] %v1283_v7  ;;  %1286 = vst [vmem:[#allocation3 + $0x908] sm:$0xff] %v1285_v6  ;;  %v1287_v2 = vld [vmem:[%s20462_s3 + $0x910] sm:$0xff]  ;;  %v1289_v3 = vld [vmem:[%s20462_s3 + $0x918] sm:$0xff] }
 0x11c   :  { %v1291_v14 = vld [vmem:[%s20462_s3 + $0x920] sm:$0xff]  ;;  %1288 = vst [vmem:[#allocation3 + $0x910] sm:$0xff] %v1287_v2  ;;  %1290 = vst [vmem:[#allocation3 + $0x918] sm:$0xff] %v1289_v3  ;;  %v1293_v10 = vld [vmem:[%s20462_s3 + $0x928] sm:$0xff] }
 0x11d   :  { %1292 = vst [vmem:[#allocation3 + $0x920] sm:$0xff] %v1291_v14  ;;  %v1295_v7 = vld [vmem:[%s20462_s3 + $0x930] sm:$0xff]  ;;  %v1297_v6 = vld [vmem:[%s20462_s3 + $0x938] sm:$0xff]  ;;  %1294 = vst [vmem:[#allocation3 + $0x928] sm:$0xff] %v1293_v10 }
 0x11e   :  { %1296 = vst [vmem:[#allocation3 + $0x930] sm:$0xff] %v1295_v7  ;;  %1298 = vst [vmem:[#allocation3 + $0x938] sm:$0xff] %v1297_v6  ;;  %v1299_v2 = vld [vmem:[%s20462_s3 + $0x940] sm:$0xff]  ;;  %v1301_v3 = vld [vmem:[%s20462_s3 + $0x948] sm:$0xff] }
 0x11f   :  { %v1303_v14 = vld [vmem:[%s20462_s3 + $0x950] sm:$0xff]  ;;  %1300 = vst [vmem:[#allocation3 + $0x940] sm:$0xff] %v1299_v2  ;;  %1302 = vst [vmem:[#allocation3 + $0x948] sm:$0xff] %v1301_v3  ;;  %v1305_v10 = vld [vmem:[%s20462_s3 + $0x958] sm:$0xff] }
 0x120   :  { %1304 = vst [vmem:[#allocation3 + $0x950] sm:$0xff] %v1303_v14  ;;  %v1307_v7 = vld [vmem:[%s20462_s3 + $0x960] sm:$0xff]  ;;  %v1309_v6 = vld [vmem:[%s20462_s3 + $0x968] sm:$0xff]  ;;  %1306 = vst [vmem:[#allocation3 + $0x958] sm:$0xff] %v1305_v10 }
 0x121   :  { %1308 = vst [vmem:[#allocation3 + $0x960] sm:$0xff] %v1307_v7  ;;  %1310 = vst [vmem:[#allocation3 + $0x968] sm:$0xff] %v1309_v6  ;;  %v1311_v2 = vld [vmem:[%s20462_s3 + $0x970] sm:$0xff]  ;;  %v1313_v3 = vld [vmem:[%s20462_s3 + $0x978] sm:$0xff] }
 0x122   :  { %v1315_v14 = vld [vmem:[%s20462_s3 + $0x980] sm:$0xff]  ;;  %1312 = vst [vmem:[#allocation3 + $0x970] sm:$0xff] %v1311_v2  ;;  %1314 = vst [vmem:[#allocation3 + $0x978] sm:$0xff] %v1313_v3  ;;  %v1317_v10 = vld [vmem:[%s20462_s3 + $0x988] sm:$0xff] }
 0x123   :  { %1316 = vst [vmem:[#allocation3 + $0x980] sm:$0xff] %v1315_v14  ;;  %v1319_v7 = vld [vmem:[%s20462_s3 + $0x990] sm:$0xff]  ;;  %v1321_v6 = vld [vmem:[%s20462_s3 + $0x998] sm:$0xff]  ;;  %1318 = vst [vmem:[#allocation3 + $0x988] sm:$0xff] %v1317_v10 }
 0x124   :  { %1320 = vst [vmem:[#allocation3 + $0x990] sm:$0xff] %v1319_v7  ;;  %1322 = vst [vmem:[#allocation3 + $0x998] sm:$0xff] %v1321_v6  ;;  %v1323_v2 = vld [vmem:[%s20462_s3 + $0x9a0] sm:$0xff]  ;;  %v1325_v3 = vld [vmem:[%s20462_s3 + $0x9a8] sm:$0xff] }
 0x125   :  { %v1327_v14 = vld [vmem:[%s20462_s3 + $0x9b0] sm:$0xff]  ;;  %1324 = vst [vmem:[#allocation3 + $0x9a0] sm:$0xff] %v1323_v2  ;;  %1326 = vst [vmem:[#allocation3 + $0x9a8] sm:$0xff] %v1325_v3  ;;  %v1329_v10 = vld [vmem:[%s20462_s3 + $0x9b8] sm:$0xff] }
 0x126   :  { %1328 = vst [vmem:[#allocation3 + $0x9b0] sm:$0xff] %v1327_v14  ;;  %v1331_v7 = vld [vmem:[%s20462_s3 + $0x9c0] sm:$0xff]  ;;  %v1333_v6 = vld [vmem:[%s20462_s3 + $0x9c8] sm:$0xff]  ;;  %1330 = vst [vmem:[#allocation3 + $0x9b8] sm:$0xff] %v1329_v10 }
 0x127   :  { %1332 = vst [vmem:[#allocation3 + $0x9c0] sm:$0xff] %v1331_v7  ;;  %1334 = vst [vmem:[#allocation3 + $0x9c8] sm:$0xff] %v1333_v6  ;;  %v1335_v2 = vld [vmem:[%s20462_s3 + $0x9d0] sm:$0xff]  ;;  %v1337_v3 = vld [vmem:[%s20462_s3 + $0x9d8] sm:$0xff] }
 0x128   :  { %v1339_v14 = vld [vmem:[%s20462_s3 + $0x9e0] sm:$0xff]  ;;  %1336 = vst [vmem:[#allocation3 + $0x9d0] sm:$0xff] %v1335_v2  ;;  %1338 = vst [vmem:[#allocation3 + $0x9d8] sm:$0xff] %v1337_v3  ;;  %v1341_v10 = vld [vmem:[%s20462_s3 + $0x9e8] sm:$0xff] }
 0x129   :  { %1340 = vst [vmem:[#allocation3 + $0x9e0] sm:$0xff] %v1339_v14  ;;  %v1343_v7 = vld [vmem:[%s20462_s3 + $0x9f0] sm:$0xff]  ;;  %v1345_v6 = vld [vmem:[%s20462_s3 + $0x9f8] sm:$0xff]  ;;  %1342 = vst [vmem:[#allocation3 + $0x9e8] sm:$0xff] %v1341_v10 }
 0x12a   :  { %1344 = vst [vmem:[#allocation3 + $0x9f0] sm:$0xff] %v1343_v7  ;;  %1346 = vst [vmem:[#allocation3 + $0x9f8] sm:$0xff] %v1345_v6  ;;  %v1347_v2 = vld [vmem:[%s20462_s3 + $0xa00] sm:$0xff]  ;;  %v1349_v3 = vld [vmem:[%s20462_s3 + $0xa08] sm:$0xff] }
 0x12b   :  { %v1351_v14 = vld [vmem:[%s20462_s3 + $0xa10] sm:$0xff]  ;;  %1348 = vst [vmem:[#allocation3 + $0xa00] sm:$0xff] %v1347_v2  ;;  %1350 = vst [vmem:[#allocation3 + $0xa08] sm:$0xff] %v1349_v3  ;;  %v1353_v10 = vld [vmem:[%s20462_s3 + $0xa18] sm:$0xff] }
 0x12c   :  { %1352 = vst [vmem:[#allocation3 + $0xa10] sm:$0xff] %v1351_v14  ;;  %v1355_v7 = vld [vmem:[%s20462_s3 + $0xa20] sm:$0xff]  ;;  %v1357_v6 = vld [vmem:[%s20462_s3 + $0xa28] sm:$0xff]  ;;  %1354 = vst [vmem:[#allocation3 + $0xa18] sm:$0xff] %v1353_v10 }
 0x12d   :  { %1356 = vst [vmem:[#allocation3 + $0xa20] sm:$0xff] %v1355_v7  ;;  %1358 = vst [vmem:[#allocation3 + $0xa28] sm:$0xff] %v1357_v6  ;;  %v1359_v2 = vld [vmem:[%s20462_s3 + $0xa30] sm:$0xff]  ;;  %v1361_v3 = vld [vmem:[%s20462_s3 + $0xa38] sm:$0xff] }
 0x12e   :  { %v1363_v14 = vld [vmem:[%s20462_s3 + $0xa40] sm:$0xff]  ;;  %1360 = vst [vmem:[#allocation3 + $0xa30] sm:$0xff] %v1359_v2  ;;  %1362 = vst [vmem:[#allocation3 + $0xa38] sm:$0xff] %v1361_v3  ;;  %v1365_v10 = vld [vmem:[%s20462_s3 + $0xa48] sm:$0xff] }
 0x12f   :  { %1364 = vst [vmem:[#allocation3 + $0xa40] sm:$0xff] %v1363_v14  ;;  %v1367_v7 = vld [vmem:[%s20462_s3 + $0xa50] sm:$0xff]  ;;  %v1369_v6 = vld [vmem:[%s20462_s3 + $0xa58] sm:$0xff]  ;;  %1366 = vst [vmem:[#allocation3 + $0xa48] sm:$0xff] %v1365_v10 }
 0x130   :  { %1368 = vst [vmem:[#allocation3 + $0xa50] sm:$0xff] %v1367_v7  ;;  %1370 = vst [vmem:[#allocation3 + $0xa58] sm:$0xff] %v1369_v6  ;;  %v1371_v2 = vld [vmem:[%s20462_s3 + $0xa60] sm:$0xff]  ;;  %v1373_v3 = vld [vmem:[%s20462_s3 + $0xa68] sm:$0xff] }
 0x131   :  { %v1375_v14 = vld [vmem:[%s20462_s3 + $0xa70] sm:$0xff]  ;;  %1372 = vst [vmem:[#allocation3 + $0xa60] sm:$0xff] %v1371_v2  ;;  %1374 = vst [vmem:[#allocation3 + $0xa68] sm:$0xff] %v1373_v3  ;;  %v1377_v10 = vld [vmem:[%s20462_s3 + $0xa78] sm:$0xff] }
 0x132   :  { %1376 = vst [vmem:[#allocation3 + $0xa70] sm:$0xff] %v1375_v14  ;;  %v1379_v7 = vld [vmem:[%s20462_s3 + $0xa80] sm:$0xff]  ;;  %v1381_v6 = vld [vmem:[%s20462_s3 + $0xa88] sm:$0xff]  ;;  %1378 = vst [vmem:[#allocation3 + $0xa78] sm:$0xff] %v1377_v10 }
 0x133   :  { %1380 = vst [vmem:[#allocation3 + $0xa80] sm:$0xff] %v1379_v7  ;;  %1382 = vst [vmem:[#allocation3 + $0xa88] sm:$0xff] %v1381_v6  ;;  %v1383_v2 = vld [vmem:[%s20462_s3 + $0xa90] sm:$0xff]  ;;  %v1385_v3 = vld [vmem:[%s20462_s3 + $0xa98] sm:$0xff] }
 0x134   :  { %v1387_v14 = vld [vmem:[%s20462_s3 + $0xaa0] sm:$0xff]  ;;  %1384 = vst [vmem:[#allocation3 + $0xa90] sm:$0xff] %v1383_v2  ;;  %1386 = vst [vmem:[#allocation3 + $0xa98] sm:$0xff] %v1385_v3  ;;  %v1389_v10 = vld [vmem:[%s20462_s3 + $0xaa8] sm:$0xff] }
 0x135   :  { %1388 = vst [vmem:[#allocation3 + $0xaa0] sm:$0xff] %v1387_v14  ;;  %v1391_v7 = vld [vmem:[%s20462_s3 + $0xab0] sm:$0xff]  ;;  %v1393_v6 = vld [vmem:[%s20462_s3 + $0xab8] sm:$0xff]  ;;  %1390 = vst [vmem:[#allocation3 + $0xaa8] sm:$0xff] %v1389_v10 }
 0x136   :  { %1392 = vst [vmem:[#allocation3 + $0xab0] sm:$0xff] %v1391_v7  ;;  %1394 = vst [vmem:[#allocation3 + $0xab8] sm:$0xff] %v1393_v6  ;;  %v1395_v2 = vld [vmem:[%s20462_s3 + $0xac0] sm:$0xff]  ;;  %v1397_v3 = vld [vmem:[%s20462_s3 + $0xac8] sm:$0xff] }
 0x137   :  { %v1399_v14 = vld [vmem:[%s20462_s3 + $0xad0] sm:$0xff]  ;;  %1396 = vst [vmem:[#allocation3 + $0xac0] sm:$0xff] %v1395_v2  ;;  %1398 = vst [vmem:[#allocation3 + $0xac8] sm:$0xff] %v1397_v3  ;;  %v1401_v10 = vld [vmem:[%s20462_s3 + $0xad8] sm:$0xff] }
 0x138   :  { %1400 = vst [vmem:[#allocation3 + $0xad0] sm:$0xff] %v1399_v14  ;;  %v1403_v7 = vld [vmem:[%s20462_s3 + $0xae0] sm:$0xff]  ;;  %v1405_v6 = vld [vmem:[%s20462_s3 + $0xae8] sm:$0xff]  ;;  %1402 = vst [vmem:[#allocation3 + $0xad8] sm:$0xff] %v1401_v10 }
 0x139   :  { %1404 = vst [vmem:[#allocation3 + $0xae0] sm:$0xff] %v1403_v7  ;;  %1406 = vst [vmem:[#allocation3 + $0xae8] sm:$0xff] %v1405_v6  ;;  %v1407_v2 = vld [vmem:[%s20462_s3 + $0xaf0] sm:$0xff]  ;;  %v1409_v3 = vld [vmem:[%s20462_s3 + $0xaf8] sm:$0xff] }
 0x13a   :  { %v1411_v14 = vld [vmem:[%s20462_s3 + $0xb00] sm:$0xff]  ;;  %1408 = vst [vmem:[#allocation3 + $0xaf0] sm:$0xff] %v1407_v2  ;;  %1410 = vst [vmem:[#allocation3 + $0xaf8] sm:$0xff] %v1409_v3  ;;  %v1413_v10 = vld [vmem:[%s20462_s3 + $0xb08] sm:$0xff] }
 0x13b   :  { %1412 = vst [vmem:[#allocation3 + $0xb00] sm:$0xff] %v1411_v14  ;;  %v1415_v7 = vld [vmem:[%s20462_s3 + $0xb10] sm:$0xff]  ;;  %v1417_v6 = vld [vmem:[%s20462_s3 + $0xb18] sm:$0xff]  ;;  %1414 = vst [vmem:[#allocation3 + $0xb08] sm:$0xff] %v1413_v10 }
 0x13c   :  { %1416 = vst [vmem:[#allocation3 + $0xb10] sm:$0xff] %v1415_v7  ;;  %1418 = vst [vmem:[#allocation3 + $0xb18] sm:$0xff] %v1417_v6  ;;  %v1419_v2 = vld [vmem:[%s20462_s3 + $0xb20] sm:$0xff]  ;;  %v1421_v3 = vld [vmem:[%s20462_s3 + $0xb28] sm:$0xff] }
 0x13d   :  { %v1423_v14 = vld [vmem:[%s20462_s3 + $0xb30] sm:$0xff]  ;;  %1420 = vst [vmem:[#allocation3 + $0xb20] sm:$0xff] %v1419_v2  ;;  %1422 = vst [vmem:[#allocation3 + $0xb28] sm:$0xff] %v1421_v3  ;;  %v1425_v10 = vld [vmem:[%s20462_s3 + $0xb38] sm:$0xff] }
 0x13e   :  { %1424 = vst [vmem:[#allocation3 + $0xb30] sm:$0xff] %v1423_v14  ;;  %v1427_v7 = vld [vmem:[%s20462_s3 + $0xb40] sm:$0xff]  ;;  %v1429_v6 = vld [vmem:[%s20462_s3 + $0xb48] sm:$0xff]  ;;  %1426 = vst [vmem:[#allocation3 + $0xb38] sm:$0xff] %v1425_v10 }
 0x13f   :  { %1428 = vst [vmem:[#allocation3 + $0xb40] sm:$0xff] %v1427_v7  ;;  %1430 = vst [vmem:[#allocation3 + $0xb48] sm:$0xff] %v1429_v6  ;;  %v1431_v2 = vld [vmem:[%s20462_s3 + $0xb50] sm:$0xff]  ;;  %v1433_v3 = vld [vmem:[%s20462_s3 + $0xb58] sm:$0xff] }
 0x140   :  { %v1435_v14 = vld [vmem:[%s20462_s3 + $0xb60] sm:$0xff]  ;;  %1432 = vst [vmem:[#allocation3 + $0xb50] sm:$0xff] %v1431_v2  ;;  %1434 = vst [vmem:[#allocation3 + $0xb58] sm:$0xff] %v1433_v3  ;;  %v1437_v10 = vld [vmem:[%s20462_s3 + $0xb68] sm:$0xff] }
 0x141   :  { %1436 = vst [vmem:[#allocation3 + $0xb60] sm:$0xff] %v1435_v14  ;;  %v1439_v7 = vld [vmem:[%s20462_s3 + $0xb70] sm:$0xff]  ;;  %v1441_v6 = vld [vmem:[%s20462_s3 + $0xb78] sm:$0xff]  ;;  %1438 = vst [vmem:[#allocation3 + $0xb68] sm:$0xff] %v1437_v10 }
 0x142   :  { %1440 = vst [vmem:[#allocation3 + $0xb70] sm:$0xff] %v1439_v7  ;;  %1442 = vst [vmem:[#allocation3 + $0xb78] sm:$0xff] %v1441_v6  ;;  %v1443_v2 = vld [vmem:[%s20462_s3 + $0xb80] sm:$0xff]  ;;  %v1445_v3 = vld [vmem:[%s20462_s3 + $0xb88] sm:$0xff] }
 0x143   :  { %v1447_v14 = vld [vmem:[%s20462_s3 + $0xb90] sm:$0xff]  ;;  %1444 = vst [vmem:[#allocation3 + $0xb80] sm:$0xff] %v1443_v2  ;;  %1446 = vst [vmem:[#allocation3 + $0xb88] sm:$0xff] %v1445_v3  ;;  %v1449_v10 = vld [vmem:[%s20462_s3 + $0xb98] sm:$0xff] }
 0x144   :  { %1448 = vst [vmem:[#allocation3 + $0xb90] sm:$0xff] %v1447_v14  ;;  %v1451_v7 = vld [vmem:[%s20462_s3 + $0xba0] sm:$0xff]  ;;  %v1453_v6 = vld [vmem:[%s20462_s3 + $0xba8] sm:$0xff]  ;;  %1450 = vst [vmem:[#allocation3 + $0xb98] sm:$0xff] %v1449_v10 }
 0x145   :  { %1452 = vst [vmem:[#allocation3 + $0xba0] sm:$0xff] %v1451_v7  ;;  %1454 = vst [vmem:[#allocation3 + $0xba8] sm:$0xff] %v1453_v6  ;;  %v1455_v2 = vld [vmem:[%s20462_s3 + $0xbb0] sm:$0xff]  ;;  %v1457_v3 = vld [vmem:[%s20462_s3 + $0xbb8] sm:$0xff] }
 0x146   :  { %v1459_v14 = vld [vmem:[%s20462_s3 + $0xbc0] sm:$0xff]  ;;  %1456 = vst [vmem:[#allocation3 + $0xbb0] sm:$0xff] %v1455_v2  ;;  %1458 = vst [vmem:[#allocation3 + $0xbb8] sm:$0xff] %v1457_v3  ;;  %v1461_v10 = vld [vmem:[%s20462_s3 + $0xbc8] sm:$0xff] }
 0x147   :  { %1460 = vst [vmem:[#allocation3 + $0xbc0] sm:$0xff] %v1459_v14  ;;  %v1463_v7 = vld [vmem:[%s20462_s3 + $0xbd0] sm:$0xff]  ;;  %v1465_v6 = vld [vmem:[%s20462_s3 + $0xbd8] sm:$0xff]  ;;  %1462 = vst [vmem:[#allocation3 + $0xbc8] sm:$0xff] %v1461_v10 }
 0x148   :  { %1464 = vst [vmem:[#allocation3 + $0xbd0] sm:$0xff] %v1463_v7  ;;  %1466 = vst [vmem:[#allocation3 + $0xbd8] sm:$0xff] %v1465_v6  ;;  %v1467_v2 = vld [vmem:[%s20462_s3 + $0xbe0] sm:$0xff]  ;;  %v1469_v3 = vld [vmem:[%s20462_s3 + $0xbe8] sm:$0xff] }
 0x149   :  { %v1471_v14 = vld [vmem:[%s20462_s3 + $0xbf0] sm:$0xff]  ;;  %1468 = vst [vmem:[#allocation3 + $0xbe0] sm:$0xff] %v1467_v2  ;;  %1470 = vst [vmem:[#allocation3 + $0xbe8] sm:$0xff] %v1469_v3  ;;  %v1473_v10 = vld [vmem:[%s20462_s3 + $0xbf8] sm:$0xff] }
 0x14a   :  { %1472 = vst [vmem:[#allocation3 + $0xbf0] sm:$0xff] %v1471_v14  ;;  %v1475_v7 = vld [vmem:[%s20462_s3 + $0xc00] sm:$0xff]  ;;  %v1477_v6 = vld [vmem:[%s20462_s3 + $0xc08] sm:$0xff]  ;;  %1474 = vst [vmem:[#allocation3 + $0xbf8] sm:$0xff] %v1473_v10 }
 0x14b   :  { %1476 = vst [vmem:[#allocation3 + $0xc00] sm:$0xff] %v1475_v7  ;;  %1478 = vst [vmem:[#allocation3 + $0xc08] sm:$0xff] %v1477_v6  ;;  %v1479_v2 = vld [vmem:[%s20462_s3 + $0xc10] sm:$0xff]  ;;  %v1481_v3 = vld [vmem:[%s20462_s3 + $0xc18] sm:$0xff] }
 0x14c   :  { %v1483_v14 = vld [vmem:[%s20462_s3 + $0xc20] sm:$0xff]  ;;  %1480 = vst [vmem:[#allocation3 + $0xc10] sm:$0xff] %v1479_v2  ;;  %1482 = vst [vmem:[#allocation3 + $0xc18] sm:$0xff] %v1481_v3  ;;  %v1485_v10 = vld [vmem:[%s20462_s3 + $0xc28] sm:$0xff] }
 0x14d   :  { %1484 = vst [vmem:[#allocation3 + $0xc20] sm:$0xff] %v1483_v14  ;;  %v1487_v7 = vld [vmem:[%s20462_s3 + $0xc30] sm:$0xff]  ;;  %v1489_v6 = vld [vmem:[%s20462_s3 + $0xc38] sm:$0xff]  ;;  %1486 = vst [vmem:[#allocation3 + $0xc28] sm:$0xff] %v1485_v10 }
 0x14e   :  { %1488 = vst [vmem:[#allocation3 + $0xc30] sm:$0xff] %v1487_v7  ;;  %1490 = vst [vmem:[#allocation3 + $0xc38] sm:$0xff] %v1489_v6  ;;  %v1491_v2 = vld [vmem:[%s20462_s3 + $0xc40] sm:$0xff]  ;;  %v1493_v3 = vld [vmem:[%s20462_s3 + $0xc48] sm:$0xff] }
 0x14f   :  { %v1495_v14 = vld [vmem:[%s20462_s3 + $0xc50] sm:$0xff]  ;;  %1492 = vst [vmem:[#allocation3 + $0xc40] sm:$0xff] %v1491_v2  ;;  %1494 = vst [vmem:[#allocation3 + $0xc48] sm:$0xff] %v1493_v3  ;;  %v1497_v10 = vld [vmem:[%s20462_s3 + $0xc58] sm:$0xff] }
 0x150   :  { %1496 = vst [vmem:[#allocation3 + $0xc50] sm:$0xff] %v1495_v14  ;;  %v1499_v7 = vld [vmem:[%s20462_s3 + $0xc60] sm:$0xff]  ;;  %v1501_v6 = vld [vmem:[%s20462_s3 + $0xc68] sm:$0xff]  ;;  %1498 = vst [vmem:[#allocation3 + $0xc58] sm:$0xff] %v1497_v10 }
 0x151   :  { %1500 = vst [vmem:[#allocation3 + $0xc60] sm:$0xff] %v1499_v7  ;;  %1502 = vst [vmem:[#allocation3 + $0xc68] sm:$0xff] %v1501_v6  ;;  %v1503_v2 = vld [vmem:[%s20462_s3 + $0xc70] sm:$0xff]  ;;  %v1505_v3 = vld [vmem:[%s20462_s3 + $0xc78] sm:$0xff] }
 0x152   :  { %v1507_v14 = vld [vmem:[%s20462_s3 + $0xc80] sm:$0xff]  ;;  %1504 = vst [vmem:[#allocation3 + $0xc70] sm:$0xff] %v1503_v2  ;;  %1506 = vst [vmem:[#allocation3 + $0xc78] sm:$0xff] %v1505_v3  ;;  %v1509_v10 = vld [vmem:[%s20462_s3 + $0xc88] sm:$0xff] }
 0x153   :  { %1508 = vst [vmem:[#allocation3 + $0xc80] sm:$0xff] %v1507_v14  ;;  %v1511_v7 = vld [vmem:[%s20462_s3 + $0xc90] sm:$0xff]  ;;  %v1513_v6 = vld [vmem:[%s20462_s3 + $0xc98] sm:$0xff]  ;;  %1510 = vst [vmem:[#allocation3 + $0xc88] sm:$0xff] %v1509_v10 }
 0x154   :  { %1512 = vst [vmem:[#allocation3 + $0xc90] sm:$0xff] %v1511_v7  ;;  %1514 = vst [vmem:[#allocation3 + $0xc98] sm:$0xff] %v1513_v6  ;;  %v1515_v2 = vld [vmem:[%s20462_s3 + $0xca0] sm:$0xff]  ;;  %v1517_v3 = vld [vmem:[%s20462_s3 + $0xca8] sm:$0xff] }
 0x155   :  { %v1519_v14 = vld [vmem:[%s20462_s3 + $0xcb0] sm:$0xff]  ;;  %1516 = vst [vmem:[#allocation3 + $0xca0] sm:$0xff] %v1515_v2  ;;  %1518 = vst [vmem:[#allocation3 + $0xca8] sm:$0xff] %v1517_v3  ;;  %v1521_v10 = vld [vmem:[%s20462_s3 + $0xcb8] sm:$0xff] }
 0x156   :  { %1520 = vst [vmem:[#allocation3 + $0xcb0] sm:$0xff] %v1519_v14  ;;  %v1523_v7 = vld [vmem:[%s20462_s3 + $0xcc0] sm:$0xff]  ;;  %v1525_v6 = vld [vmem:[%s20462_s3 + $0xcc8] sm:$0xff]  ;;  %1522 = vst [vmem:[#allocation3 + $0xcb8] sm:$0xff] %v1521_v10 }
 0x157   :  { %1524 = vst [vmem:[#allocation3 + $0xcc0] sm:$0xff] %v1523_v7  ;;  %1526 = vst [vmem:[#allocation3 + $0xcc8] sm:$0xff] %v1525_v6  ;;  %v1527_v2 = vld [vmem:[%s20462_s3 + $0xcd0] sm:$0xff]  ;;  %v1529_v3 = vld [vmem:[%s20462_s3 + $0xcd8] sm:$0xff] }
 0x158   :  { %v1531_v14 = vld [vmem:[%s20462_s3 + $0xce0] sm:$0xff]  ;;  %1528 = vst [vmem:[#allocation3 + $0xcd0] sm:$0xff] %v1527_v2  ;;  %1530 = vst [vmem:[#allocation3 + $0xcd8] sm:$0xff] %v1529_v3  ;;  %v1533_v10 = vld [vmem:[%s20462_s3 + $0xce8] sm:$0xff] }
 0x159   :  { %1532 = vst [vmem:[#allocation3 + $0xce0] sm:$0xff] %v1531_v14  ;;  %v1535_v7 = vld [vmem:[%s20462_s3 + $0xcf0] sm:$0xff]  ;;  %v1537_v6 = vld [vmem:[%s20462_s3 + $0xcf8] sm:$0xff]  ;;  %1534 = vst [vmem:[#allocation3 + $0xce8] sm:$0xff] %v1533_v10 }
 0x15a   :  { %1536 = vst [vmem:[#allocation3 + $0xcf0] sm:$0xff] %v1535_v7  ;;  %1538 = vst [vmem:[#allocation3 + $0xcf8] sm:$0xff] %v1537_v6  ;;  %v1539_v2 = vld [vmem:[%s20462_s3 + $0xd00] sm:$0xff]  ;;  %v1541_v3 = vld [vmem:[%s20462_s3 + $0xd08] sm:$0xff] }
 0x15b   :  { %v1543_v14 = vld [vmem:[%s20462_s3 + $0xd10] sm:$0xff]  ;;  %1540 = vst [vmem:[#allocation3 + $0xd00] sm:$0xff] %v1539_v2  ;;  %1542 = vst [vmem:[#allocation3 + $0xd08] sm:$0xff] %v1541_v3  ;;  %v1545_v10 = vld [vmem:[%s20462_s3 + $0xd18] sm:$0xff] }
 0x15c   :  { %1544 = vst [vmem:[#allocation3 + $0xd10] sm:$0xff] %v1543_v14  ;;  %v1547_v7 = vld [vmem:[%s20462_s3 + $0xd20] sm:$0xff]  ;;  %v1549_v6 = vld [vmem:[%s20462_s3 + $0xd28] sm:$0xff]  ;;  %1546 = vst [vmem:[#allocation3 + $0xd18] sm:$0xff] %v1545_v10 }
 0x15d   :  { %1548 = vst [vmem:[#allocation3 + $0xd20] sm:$0xff] %v1547_v7  ;;  %1550 = vst [vmem:[#allocation3 + $0xd28] sm:$0xff] %v1549_v6  ;;  %v1551_v2 = vld [vmem:[%s20462_s3 + $0xd30] sm:$0xff]  ;;  %v1553_v3 = vld [vmem:[%s20462_s3 + $0xd38] sm:$0xff] }
 0x15e   :  { %v1555_v14 = vld [vmem:[%s20462_s3 + $0xd40] sm:$0xff]  ;;  %1552 = vst [vmem:[#allocation3 + $0xd30] sm:$0xff] %v1551_v2  ;;  %1554 = vst [vmem:[#allocation3 + $0xd38] sm:$0xff] %v1553_v3  ;;  %v1557_v10 = vld [vmem:[%s20462_s3 + $0xd48] sm:$0xff] }
 0x15f   :  { %1556 = vst [vmem:[#allocation3 + $0xd40] sm:$0xff] %v1555_v14  ;;  %v1559_v7 = vld [vmem:[%s20462_s3 + $0xd50] sm:$0xff]  ;;  %v1561_v6 = vld [vmem:[%s20462_s3 + $0xd58] sm:$0xff]  ;;  %1558 = vst [vmem:[#allocation3 + $0xd48] sm:$0xff] %v1557_v10 }
 0x160   :  { %1560 = vst [vmem:[#allocation3 + $0xd50] sm:$0xff] %v1559_v7  ;;  %1562 = vst [vmem:[#allocation3 + $0xd58] sm:$0xff] %v1561_v6  ;;  %v1563_v2 = vld [vmem:[%s20462_s3 + $0xd60] sm:$0xff]  ;;  %v1565_v3 = vld [vmem:[%s20462_s3 + $0xd68] sm:$0xff] }
 0x161   :  { %v1567_v14 = vld [vmem:[%s20462_s3 + $0xd70] sm:$0xff]  ;;  %1564 = vst [vmem:[#allocation3 + $0xd60] sm:$0xff] %v1563_v2  ;;  %1566 = vst [vmem:[#allocation3 + $0xd68] sm:$0xff] %v1565_v3  ;;  %v1569_v10 = vld [vmem:[%s20462_s3 + $0xd78] sm:$0xff] }
 0x162   :  { %1568 = vst [vmem:[#allocation3 + $0xd70] sm:$0xff] %v1567_v14  ;;  %v1571_v7 = vld [vmem:[%s20462_s3 + $0xd80] sm:$0xff]  ;;  %v1573_v6 = vld [vmem:[%s20462_s3 + $0xd88] sm:$0xff]  ;;  %1570 = vst [vmem:[#allocation3 + $0xd78] sm:$0xff] %v1569_v10 }
 0x163   :  { %1572 = vst [vmem:[#allocation3 + $0xd80] sm:$0xff] %v1571_v7  ;;  %1574 = vst [vmem:[#allocation3 + $0xd88] sm:$0xff] %v1573_v6  ;;  %v1575_v2 = vld [vmem:[%s20462_s3 + $0xd90] sm:$0xff]  ;;  %v1577_v3 = vld [vmem:[%s20462_s3 + $0xd98] sm:$0xff] }
 0x164   :  { %v1579_v14 = vld [vmem:[%s20462_s3 + $0xda0] sm:$0xff]  ;;  %1576 = vst [vmem:[#allocation3 + $0xd90] sm:$0xff] %v1575_v2  ;;  %1578 = vst [vmem:[#allocation3 + $0xd98] sm:$0xff] %v1577_v3  ;;  %v12163_v10 = vld [vmem:[%s20462_s3 + $0xda8] sm:$0xf] }
 0x165   :  { %1580 = vst [vmem:[#allocation3 + $0xda0] sm:$0xff] %v1579_v14  ;;  %1591 = vst [vmem:[#allocation3 + $0xda8] sm:$0xf] %v12163_v10 }
 0x166   :  { %1595 = vsyncadd [#allocation7 + $0x1], 56000  ;;  %v1614_v7 = vld [vmem:[%s20464_s5] sm:$0xf]  ;;  %v1616_v6 = vld [vmem:[%s20464_s5 + $0x14] sm:$0xf] }
 0x167   :  { %1615 = vst [vmem:[#allocation4] sm:$0xf] %v1614_v7  ;;  %1617 = vst [vmem:[#allocation4 + $0x4] sm:$0xf] %v1616_v6  ;;  %v1618_v2 = vld [vmem:[%s20464_s5 + $0x4] sm:$0xf] }
 0x168   :  { %v1620_v3 = vld [vmem:[%s20464_s5 + $0x18] sm:$0xf]  ;;  %v1622_v14 = vld [vmem:[%s20464_s5 + $0x8] sm:$0xf]  ;;  %1619 = vst [vmem:[#allocation4 + $0x8] sm:$0xf] %v1618_v2 }
 0x169   :  { %1621 = vst [vmem:[#allocation4 + $0xc] sm:$0xf] %v1620_v3  ;;  %1623 = vst [vmem:[#allocation4 + $0x10] sm:$0xf] %v1622_v14  ;;  %v1624_v10 = vld [vmem:[%s20464_s5 + $0x1c] sm:$0xf] }
 0x16a   :  { %v1626_v7 = vld [vmem:[%s20464_s5 + $0xc] sm:$0xf]  ;;  %v1628_v6 = vld [vmem:[%s20464_s5 + $0x20] sm:$0xf]  ;;  %1625 = vst [vmem:[#allocation4 + $0x14] sm:$0xf] %v1624_v10 }
 0x16b   :  { %1627 = vst [vmem:[#allocation4 + $0x18] sm:$0xf] %v1626_v7  ;;  %1629 = vst [vmem:[#allocation4 + $0x1c] sm:$0xf] %v1628_v6  ;;  %v1630_v2 = vld [vmem:[%s20464_s5 + $0x10] sm:$0xf] }
 0x16c   :  { %v1632_v3 = vld [vmem:[%s20464_s5 + $0x24] sm:$0xff]   ;;  %v1636_v14 = vld [vmem:[%s20464_s5 + $0x3c] sm:$0xf]  ;;  %1631 = vst [vmem:[#allocation4 + $0x20] sm:$0xf] %v1630_v2 }
 0x16d   :  { %1633 = vst [vmem:[#allocation4 + $0x24] sm:$0xff] %v1632_v3   ;;  %1637 = vst [vmem:[#allocation4 + $0x2c] sm:$0xf] %v1636_v14  ;;  %v1638_v10 = vld [vmem:[%s20464_s5 + $0x2c] sm:$0xf] }
 0x16e   :  { %v1640_v7 = vld [vmem:[%s20464_s5 + $0x40] sm:$0xf]  ;;  %v1642_v6 = vld [vmem:[%s20464_s5 + $0x30] sm:$0xf]  ;;  %1639 = vst [vmem:[#allocation4 + $0x30] sm:$0xf] %v1638_v10 }
 0x16f   :  { %1641 = vst [vmem:[#allocation4 + $0x34] sm:$0xf] %v1640_v7  ;;  %1643 = vst [vmem:[#allocation4 + $0x38] sm:$0xf] %v1642_v6  ;;  %v1644_v2 = vld [vmem:[%s20464_s5 + $0x44] sm:$0xf] }
 0x170   :  { %v1646_v3 = vld [vmem:[%s20464_s5 + $0x34] sm:$0xf]  ;;  %v1648_v14 = vld [vmem:[%s20464_s5 + $0x48] sm:$0xf]  ;;  %1645 = vst [vmem:[#allocation4 + $0x3c] sm:$0xf] %v1644_v2 }
 0x171   :  { %1647 = vst [vmem:[#allocation4 + $0x40] sm:$0xf] %v1646_v3  ;;  %1649 = vst [vmem:[#allocation4 + $0x44] sm:$0xf] %v1648_v14  ;;  %v1650_v10 = vld [vmem:[%s20464_s5 + $0x38] sm:$0xf] }
 0x172   :  { %v1652_v7 = vld [vmem:[%s20464_s5 + $0x4c] sm:$0xff]   ;;  %v1656_v6 = vld [vmem:[%s20464_s5 + $0x64] sm:$0xf]  ;;  %1651 = vst [vmem:[#allocation4 + $0x48] sm:$0xf] %v1650_v10 }
 0x173   :  { %1653 = vst [vmem:[#allocation4 + $0x4c] sm:$0xff] %v1652_v7   ;;  %1657 = vst [vmem:[#allocation4 + $0x54] sm:$0xf] %v1656_v6  ;;  %v1658_v2 = vld [vmem:[%s20464_s5 + $0x54] sm:$0xf] }
 0x174   :  { %v1660_v3 = vld [vmem:[%s20464_s5 + $0x68] sm:$0xf]  ;;  %v1662_v14 = vld [vmem:[%s20464_s5 + $0x58] sm:$0xf]  ;;  %1659 = vst [vmem:[#allocation4 + $0x58] sm:$0xf] %v1658_v2 }
 0x175   :  { %1661 = vst [vmem:[#allocation4 + $0x5c] sm:$0xf] %v1660_v3  ;;  %1663 = vst [vmem:[#allocation4 + $0x60] sm:$0xf] %v1662_v14  ;;  %v1664_v10 = vld [vmem:[%s20464_s5 + $0x6c] sm:$0xf] }
 0x176   :  { %v1666_v7 = vld [vmem:[%s20464_s5 + $0x5c] sm:$0xf]  ;;  %v1668_v6 = vld [vmem:[%s20464_s5 + $0x70] sm:$0xf]  ;;  %1665 = vst [vmem:[#allocation4 + $0x64] sm:$0xf] %v1664_v10 }
 0x177   :  { %1667 = vst [vmem:[#allocation4 + $0x68] sm:$0xf] %v1666_v7  ;;  %1669 = vst [vmem:[#allocation4 + $0x6c] sm:$0xf] %v1668_v6  ;;  %v1670_v2 = vld [vmem:[%s20464_s5 + $0x60] sm:$0xf] }
 0x178   :  { %v1672_v3 = vld [vmem:[%s20464_s5 + $0x74] sm:$0xff]   ;;  %v1676_v14 = vld [vmem:[%s20464_s5 + $0x8c] sm:$0xf]  ;;  %1671 = vst [vmem:[#allocation4 + $0x70] sm:$0xf] %v1670_v2 }
 0x179   :  { %1673 = vst [vmem:[#allocation4 + $0x74] sm:$0xff] %v1672_v3   ;;  %1677 = vst [vmem:[#allocation4 + $0x7c] sm:$0xf] %v1676_v14  ;;  %v1678_v10 = vld [vmem:[%s20464_s5 + $0x7c] sm:$0xf] }
 0x17a   :  { %v1680_v7 = vld [vmem:[%s20464_s5 + $0x90] sm:$0xf]  ;;  %v1682_v6 = vld [vmem:[%s20464_s5 + $0x80] sm:$0xf]  ;;  %1679 = vst [vmem:[#allocation4 + $0x80] sm:$0xf] %v1678_v10 }
 0x17b   :  { %1681 = vst [vmem:[#allocation4 + $0x84] sm:$0xf] %v1680_v7  ;;  %1683 = vst [vmem:[#allocation4 + $0x88] sm:$0xf] %v1682_v6  ;;  %v1684_v2 = vld [vmem:[%s20464_s5 + $0x94] sm:$0xf] }
 0x17c   :  { %v1686_v3 = vld [vmem:[%s20464_s5 + $0x84] sm:$0xf]  ;;  %v1688_v14 = vld [vmem:[%s20464_s5 + $0x98] sm:$0xf]  ;;  %1685 = vst [vmem:[#allocation4 + $0x8c] sm:$0xf] %v1684_v2 }
 0x17d   :  { %1687 = vst [vmem:[#allocation4 + $0x90] sm:$0xf] %v1686_v3  ;;  %1689 = vst [vmem:[#allocation4 + $0x94] sm:$0xf] %v1688_v14  ;;  %v1690_v10 = vld [vmem:[%s20464_s5 + $0x88] sm:$0xf] }
 0x17e   :  { %v1692_v7 = vld [vmem:[%s20464_s5 + $0x9c] sm:$0xff]   ;;  %v1696_v6 = vld [vmem:[%s20464_s5 + $0xb4] sm:$0xf]  ;;  %1691 = vst [vmem:[#allocation4 + $0x98] sm:$0xf] %v1690_v10 }
 0x17f   :  { %1693 = vst [vmem:[#allocation4 + $0x9c] sm:$0xff] %v1692_v7   ;;  %1697 = vst [vmem:[#allocation4 + $0xa4] sm:$0xf] %v1696_v6  ;;  %v1698_v2 = vld [vmem:[%s20464_s5 + $0xa4] sm:$0xf] }
 0x180   :  { %v1700_v3 = vld [vmem:[%s20464_s5 + $0xb8] sm:$0xf]  ;;  %v1702_v14 = vld [vmem:[%s20464_s5 + $0xa8] sm:$0xf]  ;;  %1699 = vst [vmem:[#allocation4 + $0xa8] sm:$0xf] %v1698_v2 }
 0x181   :  { %1701 = vst [vmem:[#allocation4 + $0xac] sm:$0xf] %v1700_v3  ;;  %1703 = vst [vmem:[#allocation4 + $0xb0] sm:$0xf] %v1702_v14  ;;  %v1704_v10 = vld [vmem:[%s20464_s5 + $0xbc] sm:$0xf] }
 0x182   :  { %v1706_v7 = vld [vmem:[%s20464_s5 + $0xac] sm:$0xf]  ;;  %v1708_v6 = vld [vmem:[%s20464_s5 + $0xc0] sm:$0xf]  ;;  %1705 = vst [vmem:[#allocation4 + $0xb4] sm:$0xf] %v1704_v10 }
 0x183   :  { %1707 = vst [vmem:[#allocation4 + $0xb8] sm:$0xf] %v1706_v7  ;;  %1709 = vst [vmem:[#allocation4 + $0xbc] sm:$0xf] %v1708_v6  ;;  %v1710_v2 = vld [vmem:[%s20464_s5 + $0xb0] sm:$0xf] }
 0x184   :  { %v1712_v3 = vld [vmem:[%s20464_s5 + $0xc4] sm:$0xff]   ;;  %v1716_v14 = vld [vmem:[%s20464_s5 + $0xdc] sm:$0xf]  ;;  %1711 = vst [vmem:[#allocation4 + $0xc0] sm:$0xf] %v1710_v2 }
 0x185   :  { %1713 = vst [vmem:[#allocation4 + $0xc4] sm:$0xff] %v1712_v3   ;;  %1717 = vst [vmem:[#allocation4 + $0xcc] sm:$0xf] %v1716_v14  ;;  %v1718_v10 = vld [vmem:[%s20464_s5 + $0xcc] sm:$0xf] }
 0x186   :  { %v1720_v7 = vld [vmem:[%s20464_s5 + $0xe0] sm:$0xf]  ;;  %v1722_v6 = vld [vmem:[%s20464_s5 + $0xd0] sm:$0xf]  ;;  %1719 = vst [vmem:[#allocation4 + $0xd0] sm:$0xf] %v1718_v10 }
 0x187   :  { %1721 = vst [vmem:[#allocation4 + $0xd4] sm:$0xf] %v1720_v7  ;;  %1723 = vst [vmem:[#allocation4 + $0xd8] sm:$0xf] %v1722_v6  ;;  %v1724_v2 = vld [vmem:[%s20464_s5 + $0xe4] sm:$0xf] }
 0x188   :  { %v1726_v3 = vld [vmem:[%s20464_s5 + $0xd4] sm:$0xf]  ;;  %v1728_v14 = vld [vmem:[%s20464_s5 + $0xe8] sm:$0xf]  ;;  %1725 = vst [vmem:[#allocation4 + $0xdc] sm:$0xf] %v1724_v2 }
 0x189   :  { %1727 = vst [vmem:[#allocation4 + $0xe0] sm:$0xf] %v1726_v3  ;;  %1729 = vst [vmem:[#allocation4 + $0xe4] sm:$0xf] %v1728_v14  ;;  %v1730_v10 = vld [vmem:[%s20464_s5 + $0xd8] sm:$0xf] }
 0x18a   :  { %v1732_v7 = vld [vmem:[%s20464_s5 + $0xec] sm:$0xff]   ;;  %v1736_v6 = vld [vmem:[%s20464_s5 + $0x104] sm:$0xf]  ;;  %1731 = vst [vmem:[#allocation4 + $0xe8] sm:$0xf] %v1730_v10 }
 0x18b   :  { %1733 = vst [vmem:[#allocation4 + $0xec] sm:$0xff] %v1732_v7   ;;  %1737 = vst [vmem:[#allocation4 + $0xf4] sm:$0xf] %v1736_v6  ;;  %v1738_v2 = vld [vmem:[%s20464_s5 + $0xf4] sm:$0xf] }
 0x18c   :  { %v1740_v3 = vld [vmem:[%s20464_s5 + $0x108] sm:$0xf]  ;;  %v1742_v14 = vld [vmem:[%s20464_s5 + $0xf8] sm:$0xf]  ;;  %1739 = vst [vmem:[#allocation4 + $0xf8] sm:$0xf] %v1738_v2 }
 0x18d   :  { %1741 = vst [vmem:[#allocation4 + $0xfc] sm:$0xf] %v1740_v3  ;;  %1743 = vst [vmem:[#allocation4 + $0x100] sm:$0xf] %v1742_v14  ;;  %v1744_v10 = vld [vmem:[%s20464_s5 + $0x10c] sm:$0xf] }
 0x18e   :  { %v1746_v7 = vld [vmem:[%s20464_s5 + $0xfc] sm:$0xf]  ;;  %v1748_v6 = vld [vmem:[%s20464_s5 + $0x110] sm:$0xf]  ;;  %1745 = vst [vmem:[#allocation4 + $0x104] sm:$0xf] %v1744_v10 }
 0x18f   :  { %1747 = vst [vmem:[#allocation4 + $0x108] sm:$0xf] %v1746_v7  ;;  %1749 = vst [vmem:[#allocation4 + $0x10c] sm:$0xf] %v1748_v6  ;;  %v1750_v2 = vld [vmem:[%s20464_s5 + $0x100] sm:$0xf] }
 0x190   :  { %v1752_v3 = vld [vmem:[%s20464_s5 + $0x114] sm:$0xff]   ;;  %v1756_v14 = vld [vmem:[%s20464_s5 + $0x12c] sm:$0xf]  ;;  %1751 = vst [vmem:[#allocation4 + $0x110] sm:$0xf] %v1750_v2 }
 0x191   :  { %1753 = vst [vmem:[#allocation4 + $0x114] sm:$0xff] %v1752_v3   ;;  %1757 = vst [vmem:[#allocation4 + $0x11c] sm:$0xf] %v1756_v14  ;;  %v1758_v10 = vld [vmem:[%s20464_s5 + $0x11c] sm:$0xf] }
 0x192   :  { %v1760_v7 = vld [vmem:[%s20464_s5 + $0x130] sm:$0xf]  ;;  %v1762_v6 = vld [vmem:[%s20464_s5 + $0x120] sm:$0xf]  ;;  %1759 = vst [vmem:[#allocation4 + $0x120] sm:$0xf] %v1758_v10 }
 0x193   :  { %1761 = vst [vmem:[#allocation4 + $0x124] sm:$0xf] %v1760_v7  ;;  %1763 = vst [vmem:[#allocation4 + $0x128] sm:$0xf] %v1762_v6  ;;  %v1764_v2 = vld [vmem:[%s20464_s5 + $0x134] sm:$0xf] }
 0x194   :  { %v1766_v3 = vld [vmem:[%s20464_s5 + $0x124] sm:$0xf]  ;;  %v1768_v14 = vld [vmem:[%s20464_s5 + $0x138] sm:$0xf]  ;;  %1765 = vst [vmem:[#allocation4 + $0x12c] sm:$0xf] %v1764_v2 }
 0x195   :  { %1767 = vst [vmem:[#allocation4 + $0x130] sm:$0xf] %v1766_v3  ;;  %1769 = vst [vmem:[#allocation4 + $0x134] sm:$0xf] %v1768_v14  ;;  %v1770_v10 = vld [vmem:[%s20464_s5 + $0x128] sm:$0xf] }
 0x196   :  { %v1772_v7 = vld [vmem:[%s20464_s5 + $0x13c] sm:$0xff]   ;;  %v1776_v6 = vld [vmem:[%s20464_s5 + $0x154] sm:$0xf]  ;;  %1771 = vst [vmem:[#allocation4 + $0x138] sm:$0xf] %v1770_v10 }
 0x197   :  { %1773 = vst [vmem:[#allocation4 + $0x13c] sm:$0xff] %v1772_v7   ;;  %1777 = vst [vmem:[#allocation4 + $0x144] sm:$0xf] %v1776_v6  ;;  %v1778_v2 = vld [vmem:[%s20464_s5 + $0x144] sm:$0xf] }
 0x198   :  { %v1780_v3 = vld [vmem:[%s20464_s5 + $0x158] sm:$0xf]  ;;  %v1782_v14 = vld [vmem:[%s20464_s5 + $0x148] sm:$0xf]  ;;  %1779 = vst [vmem:[#allocation4 + $0x148] sm:$0xf] %v1778_v2 }
 0x199   :  { %1781 = vst [vmem:[#allocation4 + $0x14c] sm:$0xf] %v1780_v3  ;;  %1783 = vst [vmem:[#allocation4 + $0x150] sm:$0xf] %v1782_v14  ;;  %v1784_v10 = vld [vmem:[%s20464_s5 + $0x15c] sm:$0xf] }
 0x19a   :  { %v1786_v7 = vld [vmem:[%s20464_s5 + $0x14c] sm:$0xf]  ;;  %v1788_v6 = vld [vmem:[%s20464_s5 + $0x160] sm:$0xf]  ;;  %1785 = vst [vmem:[#allocation4 + $0x154] sm:$0xf] %v1784_v10 }
 0x19b   :  { %1787 = vst [vmem:[#allocation4 + $0x158] sm:$0xf] %v1786_v7  ;;  %1789 = vst [vmem:[#allocation4 + $0x15c] sm:$0xf] %v1788_v6  ;;  %v1790_v2 = vld [vmem:[%s20464_s5 + $0x150] sm:$0xf] }
 0x19c   :  { %v1792_v3 = vld [vmem:[%s20464_s5 + $0x164] sm:$0xff]   ;;  %v1796_v14 = vld [vmem:[%s20464_s5 + $0x17c] sm:$0xf]  ;;  %1791 = vst [vmem:[#allocation4 + $0x160] sm:$0xf] %v1790_v2 }
 0x19d   :  { %1793 = vst [vmem:[#allocation4 + $0x164] sm:$0xff] %v1792_v3   ;;  %1797 = vst [vmem:[#allocation4 + $0x16c] sm:$0xf] %v1796_v14  ;;  %v1798_v10 = vld [vmem:[%s20464_s5 + $0x16c] sm:$0xf] }
 0x19e   :  { %v1800_v7 = vld [vmem:[%s20464_s5 + $0x180] sm:$0xf]  ;;  %v1802_v6 = vld [vmem:[%s20464_s5 + $0x170] sm:$0xf]  ;;  %1799 = vst [vmem:[#allocation4 + $0x170] sm:$0xf] %v1798_v10 }
 0x19f   :  { %1801 = vst [vmem:[#allocation4 + $0x174] sm:$0xf] %v1800_v7  ;;  %1803 = vst [vmem:[#allocation4 + $0x178] sm:$0xf] %v1802_v6  ;;  %v1804_v2 = vld [vmem:[%s20464_s5 + $0x184] sm:$0xf] }
 0x1a0   :  { %v1806_v3 = vld [vmem:[%s20464_s5 + $0x174] sm:$0xf]  ;;  %v1808_v14 = vld [vmem:[%s20464_s5 + $0x188] sm:$0xf]  ;;  %1805 = vst [vmem:[#allocation4 + $0x17c] sm:$0xf] %v1804_v2 }
 0x1a1   :  { %1807 = vst [vmem:[#allocation4 + $0x180] sm:$0xf] %v1806_v3  ;;  %1809 = vst [vmem:[#allocation4 + $0x184] sm:$0xf] %v1808_v14  ;;  %v1810_v10 = vld [vmem:[%s20464_s5 + $0x178] sm:$0xf] }
 0x1a2   :  { %v1812_v7 = vld [vmem:[%s20464_s5 + $0x18c] sm:$0xff]   ;;  %v1816_v6 = vld [vmem:[%s20464_s5 + $0x1a4] sm:$0xf]  ;;  %1811 = vst [vmem:[#allocation4 + $0x188] sm:$0xf] %v1810_v10 }
 0x1a3   :  { %1813 = vst [vmem:[#allocation4 + $0x18c] sm:$0xff] %v1812_v7   ;;  %1817 = vst [vmem:[#allocation4 + $0x194] sm:$0xf] %v1816_v6  ;;  %v1818_v2 = vld [vmem:[%s20464_s5 + $0x194] sm:$0xf] }
 0x1a4   :  { %v1820_v3 = vld [vmem:[%s20464_s5 + $0x1a8] sm:$0xf]  ;;  %v1822_v14 = vld [vmem:[%s20464_s5 + $0x198] sm:$0xf]  ;;  %1819 = vst [vmem:[#allocation4 + $0x198] sm:$0xf] %v1818_v2 }
 0x1a5   :  { %1821 = vst [vmem:[#allocation4 + $0x19c] sm:$0xf] %v1820_v3  ;;  %1823 = vst [vmem:[#allocation4 + $0x1a0] sm:$0xf] %v1822_v14  ;;  %v1824_v10 = vld [vmem:[%s20464_s5 + $0x1ac] sm:$0xf] }
 0x1a6   :  { %v1826_v7 = vld [vmem:[%s20464_s5 + $0x19c] sm:$0xf]  ;;  %v1828_v6 = vld [vmem:[%s20464_s5 + $0x1b0] sm:$0xf]  ;;  %1825 = vst [vmem:[#allocation4 + $0x1a4] sm:$0xf] %v1824_v10 }
 0x1a7   :  { %1827 = vst [vmem:[#allocation4 + $0x1a8] sm:$0xf] %v1826_v7  ;;  %1829 = vst [vmem:[#allocation4 + $0x1ac] sm:$0xf] %v1828_v6  ;;  %v1830_v2 = vld [vmem:[%s20464_s5 + $0x1a0] sm:$0xf] }
 0x1a8   :  { %v1832_v3 = vld [vmem:[%s20464_s5 + $0x1b4] sm:$0xff]   ;;  %v1836_v14 = vld [vmem:[%s20464_s5 + $0x1cc] sm:$0xf]  ;;  %1831 = vst [vmem:[#allocation4 + $0x1b0] sm:$0xf] %v1830_v2 }
 0x1a9   :  { %1833 = vst [vmem:[#allocation4 + $0x1b4] sm:$0xff] %v1832_v3   ;;  %1837 = vst [vmem:[#allocation4 + $0x1bc] sm:$0xf] %v1836_v14  ;;  %v1838_v10 = vld [vmem:[%s20464_s5 + $0x1bc] sm:$0xf] }
 0x1aa   :  { %v1840_v7 = vld [vmem:[%s20464_s5 + $0x1d0] sm:$0xf]  ;;  %v1842_v6 = vld [vmem:[%s20464_s5 + $0x1c0] sm:$0xf]  ;;  %1839 = vst [vmem:[#allocation4 + $0x1c0] sm:$0xf] %v1838_v10 }
 0x1ab   :  { %1841 = vst [vmem:[#allocation4 + $0x1c4] sm:$0xf] %v1840_v7  ;;  %1843 = vst [vmem:[#allocation4 + $0x1c8] sm:$0xf] %v1842_v6  ;;  %v1844_v2 = vld [vmem:[%s20464_s5 + $0x1d4] sm:$0xf] }
 0x1ac   :  { %v1846_v3 = vld [vmem:[%s20464_s5 + $0x1c4] sm:$0xf]  ;;  %v1848_v14 = vld [vmem:[%s20464_s5 + $0x1d8] sm:$0xf]  ;;  %1845 = vst [vmem:[#allocation4 + $0x1cc] sm:$0xf] %v1844_v2 }
 0x1ad   :  { %1847 = vst [vmem:[#allocation4 + $0x1d0] sm:$0xf] %v1846_v3  ;;  %1849 = vst [vmem:[#allocation4 + $0x1d4] sm:$0xf] %v1848_v14  ;;  %v1850_v10 = vld [vmem:[%s20464_s5 + $0x1c8] sm:$0xf] }
 0x1ae   :  { %v1852_v7 = vld [vmem:[%s20464_s5 + $0x1dc] sm:$0xff]   ;;  %v1856_v6 = vld [vmem:[%s20464_s5 + $0x1f4] sm:$0xf]  ;;  %1851 = vst [vmem:[#allocation4 + $0x1d8] sm:$0xf] %v1850_v10 }
 0x1af   :  { %1853 = vst [vmem:[#allocation4 + $0x1dc] sm:$0xff] %v1852_v7   ;;  %1857 = vst [vmem:[#allocation4 + $0x1e4] sm:$0xf] %v1856_v6  ;;  %v1858_v2 = vld [vmem:[%s20464_s5 + $0x1e4] sm:$0xf] }
 0x1b0   :  { %v1860_v3 = vld [vmem:[%s20464_s5 + $0x1f8] sm:$0xf]  ;;  %v1862_v14 = vld [vmem:[%s20464_s5 + $0x1e8] sm:$0xf]  ;;  %1859 = vst [vmem:[#allocation4 + $0x1e8] sm:$0xf] %v1858_v2 }
 0x1b1   :  { %1861 = vst [vmem:[#allocation4 + $0x1ec] sm:$0xf] %v1860_v3  ;;  %1863 = vst [vmem:[#allocation4 + $0x1f0] sm:$0xf] %v1862_v14  ;;  %v1864_v10 = vld [vmem:[%s20464_s5 + $0x1fc] sm:$0xf] }
 0x1b2   :  { %v1866_v7 = vld [vmem:[%s20464_s5 + $0x1ec] sm:$0xf]  ;;  %v1868_v6 = vld [vmem:[%s20464_s5 + $0x200] sm:$0xf]  ;;  %1865 = vst [vmem:[#allocation4 + $0x1f4] sm:$0xf] %v1864_v10 }
 0x1b3   :  { %1867 = vst [vmem:[#allocation4 + $0x1f8] sm:$0xf] %v1866_v7  ;;  %1869 = vst [vmem:[#allocation4 + $0x1fc] sm:$0xf] %v1868_v6  ;;  %v1870_v2 = vld [vmem:[%s20464_s5 + $0x1f0] sm:$0xf] }
 0x1b4   :  { %v1872_v3 = vld [vmem:[%s20464_s5 + $0x204] sm:$0xff]   ;;  %v1876_v14 = vld [vmem:[%s20464_s5 + $0x21c] sm:$0xf]  ;;  %1871 = vst [vmem:[#allocation4 + $0x200] sm:$0xf] %v1870_v2 }
 0x1b5   :  { %1873 = vst [vmem:[#allocation4 + $0x204] sm:$0xff] %v1872_v3   ;;  %1877 = vst [vmem:[#allocation4 + $0x20c] sm:$0xf] %v1876_v14  ;;  %v1878_v10 = vld [vmem:[%s20464_s5 + $0x20c] sm:$0xf] }
 0x1b6   :  { %v1880_v7 = vld [vmem:[%s20464_s5 + $0x220] sm:$0xf]  ;;  %v1882_v6 = vld [vmem:[%s20464_s5 + $0x210] sm:$0xf]  ;;  %1879 = vst [vmem:[#allocation4 + $0x210] sm:$0xf] %v1878_v10 }
 0x1b7   :  { %1881 = vst [vmem:[#allocation4 + $0x214] sm:$0xf] %v1880_v7  ;;  %1883 = vst [vmem:[#allocation4 + $0x218] sm:$0xf] %v1882_v6  ;;  %v1884_v2 = vld [vmem:[%s20464_s5 + $0x224] sm:$0xf] }
 0x1b8   :  { %v1886_v3 = vld [vmem:[%s20464_s5 + $0x214] sm:$0xf]  ;;  %v1888_v14 = vld [vmem:[%s20464_s5 + $0x228] sm:$0xf]  ;;  %1885 = vst [vmem:[#allocation4 + $0x21c] sm:$0xf] %v1884_v2 }
 0x1b9   :  { %1887 = vst [vmem:[#allocation4 + $0x220] sm:$0xf] %v1886_v3  ;;  %1889 = vst [vmem:[#allocation4 + $0x224] sm:$0xf] %v1888_v14  ;;  %v1890_v10 = vld [vmem:[%s20464_s5 + $0x218] sm:$0xf] }
 0x1ba   :  { %v1892_v7 = vld [vmem:[%s20464_s5 + $0x22c] sm:$0xff]   ;;  %v1896_v6 = vld [vmem:[%s20464_s5 + $0x244] sm:$0xf]  ;;  %1891 = vst [vmem:[#allocation4 + $0x228] sm:$0xf] %v1890_v10 }
 0x1bb   :  { %1893 = vst [vmem:[#allocation4 + $0x22c] sm:$0xff] %v1892_v7   ;;  %1897 = vst [vmem:[#allocation4 + $0x234] sm:$0xf] %v1896_v6  ;;  %v1898_v2 = vld [vmem:[%s20464_s5 + $0x234] sm:$0xf] }
 0x1bc   :  { %v1900_v3 = vld [vmem:[%s20464_s5 + $0x248] sm:$0xf]  ;;  %v1902_v14 = vld [vmem:[%s20464_s5 + $0x238] sm:$0xf]  ;;  %1899 = vst [vmem:[#allocation4 + $0x238] sm:$0xf] %v1898_v2 }
 0x1bd   :  { %1901 = vst [vmem:[#allocation4 + $0x23c] sm:$0xf] %v1900_v3  ;;  %1903 = vst [vmem:[#allocation4 + $0x240] sm:$0xf] %v1902_v14  ;;  %v1904_v10 = vld [vmem:[%s20464_s5 + $0x24c] sm:$0xf] }
 0x1be   :  { %v1906_v7 = vld [vmem:[%s20464_s5 + $0x23c] sm:$0xf]  ;;  %v1908_v6 = vld [vmem:[%s20464_s5 + $0x250] sm:$0xf]  ;;  %1905 = vst [vmem:[#allocation4 + $0x244] sm:$0xf] %v1904_v10 }
 0x1bf   :  { %1907 = vst [vmem:[#allocation4 + $0x248] sm:$0xf] %v1906_v7  ;;  %1909 = vst [vmem:[#allocation4 + $0x24c] sm:$0xf] %v1908_v6  ;;  %v1910_v2 = vld [vmem:[%s20464_s5 + $0x240] sm:$0xf] }
 0x1c0   :  { %v1912_v3 = vld [vmem:[%s20464_s5 + $0x254] sm:$0xff]   ;;  %v1916_v14 = vld [vmem:[%s20464_s5 + $0x26c] sm:$0xf]  ;;  %1911 = vst [vmem:[#allocation4 + $0x250] sm:$0xf] %v1910_v2 }
 0x1c1   :  { %1913 = vst [vmem:[#allocation4 + $0x254] sm:$0xff] %v1912_v3   ;;  %1917 = vst [vmem:[#allocation4 + $0x25c] sm:$0xf] %v1916_v14  ;;  %v1918_v10 = vld [vmem:[%s20464_s5 + $0x25c] sm:$0xf] }
 0x1c2   :  { %v1920_v7 = vld [vmem:[%s20464_s5 + $0x270] sm:$0xf]  ;;  %v1922_v6 = vld [vmem:[%s20464_s5 + $0x260] sm:$0xf]  ;;  %1919 = vst [vmem:[#allocation4 + $0x260] sm:$0xf] %v1918_v10 }
 0x1c3   :  { %1921 = vst [vmem:[#allocation4 + $0x264] sm:$0xf] %v1920_v7  ;;  %1923 = vst [vmem:[#allocation4 + $0x268] sm:$0xf] %v1922_v6  ;;  %v1924_v2 = vld [vmem:[%s20464_s5 + $0x274] sm:$0xf] }
 0x1c4   :  { %v1926_v3 = vld [vmem:[%s20464_s5 + $0x264] sm:$0xf]  ;;  %v1928_v14 = vld [vmem:[%s20464_s5 + $0x278] sm:$0xf]  ;;  %1925 = vst [vmem:[#allocation4 + $0x26c] sm:$0xf] %v1924_v2 }
 0x1c5   :  { %1927 = vst [vmem:[#allocation4 + $0x270] sm:$0xf] %v1926_v3  ;;  %1929 = vst [vmem:[#allocation4 + $0x274] sm:$0xf] %v1928_v14  ;;  %v1930_v10 = vld [vmem:[%s20464_s5 + $0x268] sm:$0xf] }
 0x1c6   :  { %v1932_v7 = vld [vmem:[%s20464_s5 + $0x27c] sm:$0xff]   ;;  %v1936_v6 = vld [vmem:[%s20464_s5 + $0x294] sm:$0xf]  ;;  %1931 = vst [vmem:[#allocation4 + $0x278] sm:$0xf] %v1930_v10 }
 0x1c7   :  { %1933 = vst [vmem:[#allocation4 + $0x27c] sm:$0xff] %v1932_v7   ;;  %1937 = vst [vmem:[#allocation4 + $0x284] sm:$0xf] %v1936_v6  ;;  %v1938_v2 = vld [vmem:[%s20464_s5 + $0x284] sm:$0xf] }
 0x1c8   :  { %v1940_v3 = vld [vmem:[%s20464_s5 + $0x298] sm:$0xf]  ;;  %v1942_v14 = vld [vmem:[%s20464_s5 + $0x288] sm:$0xf]  ;;  %1939 = vst [vmem:[#allocation4 + $0x288] sm:$0xf] %v1938_v2 }
 0x1c9   :  { %1941 = vst [vmem:[#allocation4 + $0x28c] sm:$0xf] %v1940_v3  ;;  %1943 = vst [vmem:[#allocation4 + $0x290] sm:$0xf] %v1942_v14  ;;  %v1944_v10 = vld [vmem:[%s20464_s5 + $0x29c] sm:$0xf] }
 0x1ca   :  { %v1946_v7 = vld [vmem:[%s20464_s5 + $0x28c] sm:$0xf]  ;;  %v1948_v6 = vld [vmem:[%s20464_s5 + $0x2a0] sm:$0xf]  ;;  %1945 = vst [vmem:[#allocation4 + $0x294] sm:$0xf] %v1944_v10 }
 0x1cb   :  { %1947 = vst [vmem:[#allocation4 + $0x298] sm:$0xf] %v1946_v7  ;;  %1949 = vst [vmem:[#allocation4 + $0x29c] sm:$0xf] %v1948_v6  ;;  %v1950_v2 = vld [vmem:[%s20464_s5 + $0x290] sm:$0xf] }
 0x1cc   :  { %v1952_v3 = vld [vmem:[%s20464_s5 + $0x2a4] sm:$0xff]   ;;  %v1956_v14 = vld [vmem:[%s20464_s5 + $0x2bc] sm:$0xf]  ;;  %1951 = vst [vmem:[#allocation4 + $0x2a0] sm:$0xf] %v1950_v2 }
 0x1cd   :  { %1953 = vst [vmem:[#allocation4 + $0x2a4] sm:$0xff] %v1952_v3   ;;  %1957 = vst [vmem:[#allocation4 + $0x2ac] sm:$0xf] %v1956_v14  ;;  %v1958_v10 = vld [vmem:[%s20464_s5 + $0x2ac] sm:$0xf] }
 0x1ce   :  { %v1960_v7 = vld [vmem:[%s20464_s5 + $0x2c0] sm:$0xf]  ;;  %v1962_v6 = vld [vmem:[%s20464_s5 + $0x2b0] sm:$0xf]  ;;  %1959 = vst [vmem:[#allocation4 + $0x2b0] sm:$0xf] %v1958_v10 }
 0x1cf   :  { %1961 = vst [vmem:[#allocation4 + $0x2b4] sm:$0xf] %v1960_v7  ;;  %1963 = vst [vmem:[#allocation4 + $0x2b8] sm:$0xf] %v1962_v6  ;;  %v1964_v2 = vld [vmem:[%s20464_s5 + $0x2c4] sm:$0xf] }
 0x1d0   :  { %v1966_v3 = vld [vmem:[%s20464_s5 + $0x2b4] sm:$0xf]  ;;  %v1968_v14 = vld [vmem:[%s20464_s5 + $0x2c8] sm:$0xf]  ;;  %1965 = vst [vmem:[#allocation4 + $0x2bc] sm:$0xf] %v1964_v2 }
 0x1d1   :  { %1967 = vst [vmem:[#allocation4 + $0x2c0] sm:$0xf] %v1966_v3  ;;  %1969 = vst [vmem:[#allocation4 + $0x2c4] sm:$0xf] %v1968_v14  ;;  %v1970_v10 = vld [vmem:[%s20464_s5 + $0x2b8] sm:$0xf] }
 0x1d2   :  { %v1972_v7 = vld [vmem:[%s20464_s5 + $0x2cc] sm:$0xff]   ;;  %v1976_v6 = vld [vmem:[%s20464_s5 + $0x2e4] sm:$0xf]  ;;  %1971 = vst [vmem:[#allocation4 + $0x2c8] sm:$0xf] %v1970_v10 }
 0x1d3   :  { %1973 = vst [vmem:[#allocation4 + $0x2cc] sm:$0xff] %v1972_v7   ;;  %1977 = vst [vmem:[#allocation4 + $0x2d4] sm:$0xf] %v1976_v6  ;;  %v1978_v2 = vld [vmem:[%s20464_s5 + $0x2d4] sm:$0xf] }
 0x1d4   :  { %v1980_v3 = vld [vmem:[%s20464_s5 + $0x2e8] sm:$0xf]  ;;  %v1982_v14 = vld [vmem:[%s20464_s5 + $0x2d8] sm:$0xf]  ;;  %1979 = vst [vmem:[#allocation4 + $0x2d8] sm:$0xf] %v1978_v2 }
 0x1d5   :  { %1981 = vst [vmem:[#allocation4 + $0x2dc] sm:$0xf] %v1980_v3  ;;  %1983 = vst [vmem:[#allocation4 + $0x2e0] sm:$0xf] %v1982_v14  ;;  %v1984_v10 = vld [vmem:[%s20464_s5 + $0x2ec] sm:$0xf] }
 0x1d6   :  { %v1986_v7 = vld [vmem:[%s20464_s5 + $0x2dc] sm:$0xf]  ;;  %v1988_v6 = vld [vmem:[%s20464_s5 + $0x2f0] sm:$0xf]  ;;  %1985 = vst [vmem:[#allocation4 + $0x2e4] sm:$0xf] %v1984_v10 }
 0x1d7   :  { %1987 = vst [vmem:[#allocation4 + $0x2e8] sm:$0xf] %v1986_v7  ;;  %1989 = vst [vmem:[#allocation4 + $0x2ec] sm:$0xf] %v1988_v6  ;;  %v1990_v2 = vld [vmem:[%s20464_s5 + $0x2e0] sm:$0xf] }
 0x1d8   :  { %v1992_v3 = vld [vmem:[%s20464_s5 + $0x2f4] sm:$0xff]   ;;  %v1996_v14 = vld [vmem:[%s20464_s5 + $0x30c] sm:$0xf]  ;;  %1991 = vst [vmem:[#allocation4 + $0x2f0] sm:$0xf] %v1990_v2 }
 0x1d9   :  { %1993 = vst [vmem:[#allocation4 + $0x2f4] sm:$0xff] %v1992_v3   ;;  %1997 = vst [vmem:[#allocation4 + $0x2fc] sm:$0xf] %v1996_v14  ;;  %v1998_v10 = vld [vmem:[%s20464_s5 + $0x2fc] sm:$0xf] }
 0x1da   :  { %v2000_v7 = vld [vmem:[%s20464_s5 + $0x310] sm:$0xf]  ;;  %v2002_v6 = vld [vmem:[%s20464_s5 + $0x300] sm:$0xf]  ;;  %1999 = vst [vmem:[#allocation4 + $0x300] sm:$0xf] %v1998_v10 }
 0x1db   :  { %2001 = vst [vmem:[#allocation4 + $0x304] sm:$0xf] %v2000_v7  ;;  %2003 = vst [vmem:[#allocation4 + $0x308] sm:$0xf] %v2002_v6  ;;  %v2004_v2 = vld [vmem:[%s20464_s5 + $0x314] sm:$0xf] }
 0x1dc   :  { %v2006_v3 = vld [vmem:[%s20464_s5 + $0x304] sm:$0xf]  ;;  %v2008_v14 = vld [vmem:[%s20464_s5 + $0x318] sm:$0xf]  ;;  %2005 = vst [vmem:[#allocation4 + $0x30c] sm:$0xf] %v2004_v2 }
 0x1dd   :  { %2007 = vst [vmem:[#allocation4 + $0x310] sm:$0xf] %v2006_v3  ;;  %2009 = vst [vmem:[#allocation4 + $0x314] sm:$0xf] %v2008_v14  ;;  %v2010_v10 = vld [vmem:[%s20464_s5 + $0x308] sm:$0xf] }
 0x1de   :  { %v2012_v7 = vld [vmem:[%s20464_s5 + $0x31c] sm:$0xff]   ;;  %v2016_v6 = vld [vmem:[%s20464_s5 + $0x334] sm:$0xf]  ;;  %2011 = vst [vmem:[#allocation4 + $0x318] sm:$0xf] %v2010_v10 }
 0x1df   :  { %2013 = vst [vmem:[#allocation4 + $0x31c] sm:$0xff] %v2012_v7   ;;  %2017 = vst [vmem:[#allocation4 + $0x324] sm:$0xf] %v2016_v6  ;;  %v2018_v2 = vld [vmem:[%s20464_s5 + $0x324] sm:$0xf] }
 0x1e0   :  { %v2020_v3 = vld [vmem:[%s20464_s5 + $0x338] sm:$0xf]  ;;  %v2022_v14 = vld [vmem:[%s20464_s5 + $0x328] sm:$0xf]  ;;  %2019 = vst [vmem:[#allocation4 + $0x328] sm:$0xf] %v2018_v2 }
 0x1e1   :  { %2021 = vst [vmem:[#allocation4 + $0x32c] sm:$0xf] %v2020_v3  ;;  %2023 = vst [vmem:[#allocation4 + $0x330] sm:$0xf] %v2022_v14  ;;  %v2024_v10 = vld [vmem:[%s20464_s5 + $0x33c] sm:$0xf] }
 0x1e2   :  { %v2026_v7 = vld [vmem:[%s20464_s5 + $0x32c] sm:$0xf]  ;;  %v2028_v6 = vld [vmem:[%s20464_s5 + $0x340] sm:$0xf]  ;;  %2025 = vst [vmem:[#allocation4 + $0x334] sm:$0xf] %v2024_v10 }
 0x1e3   :  { %2027 = vst [vmem:[#allocation4 + $0x338] sm:$0xf] %v2026_v7  ;;  %2029 = vst [vmem:[#allocation4 + $0x33c] sm:$0xf] %v2028_v6  ;;  %v2030_v2 = vld [vmem:[%s20464_s5 + $0x330] sm:$0xf] }
 0x1e4   :  { %v2032_v3 = vld [vmem:[%s20464_s5 + $0x344] sm:$0xff]   ;;  %v2036_v14 = vld [vmem:[%s20464_s5 + $0x35c] sm:$0xf]  ;;  %2031 = vst [vmem:[#allocation4 + $0x340] sm:$0xf] %v2030_v2 }
 0x1e5   :  { %2033 = vst [vmem:[#allocation4 + $0x344] sm:$0xff] %v2032_v3   ;;  %2037 = vst [vmem:[#allocation4 + $0x34c] sm:$0xf] %v2036_v14  ;;  %v2038_v10 = vld [vmem:[%s20464_s5 + $0x34c] sm:$0xf] }
 0x1e6   :  { %v2040_v7 = vld [vmem:[%s20464_s5 + $0x360] sm:$0xf]  ;;  %v2042_v6 = vld [vmem:[%s20464_s5 + $0x350] sm:$0xf]  ;;  %2039 = vst [vmem:[#allocation4 + $0x350] sm:$0xf] %v2038_v10 }
 0x1e7   :  { %2041 = vst [vmem:[#allocation4 + $0x354] sm:$0xf] %v2040_v7  ;;  %2043 = vst [vmem:[#allocation4 + $0x358] sm:$0xf] %v2042_v6  ;;  %v2044_v2 = vld [vmem:[%s20464_s5 + $0x364] sm:$0xf] }
 0x1e8   :  { %v2046_v3 = vld [vmem:[%s20464_s5 + $0x354] sm:$0xf]  ;;  %v2048_v14 = vld [vmem:[%s20464_s5 + $0x368] sm:$0xf]  ;;  %2045 = vst [vmem:[#allocation4 + $0x35c] sm:$0xf] %v2044_v2 }
 0x1e9   :  { %2047 = vst [vmem:[#allocation4 + $0x360] sm:$0xf] %v2046_v3  ;;  %2049 = vst [vmem:[#allocation4 + $0x364] sm:$0xf] %v2048_v14  ;;  %v2050_v10 = vld [vmem:[%s20464_s5 + $0x358] sm:$0xf] }
 0x1ea   :  { %v2052_v7 = vld [vmem:[%s20464_s5 + $0x36c] sm:$0xff]   ;;  %v2056_v6 = vld [vmem:[%s20464_s5 + $0x384] sm:$0xf]  ;;  %2051 = vst [vmem:[#allocation4 + $0x368] sm:$0xf] %v2050_v10 }
 0x1eb   :  { %2053 = vst [vmem:[#allocation4 + $0x36c] sm:$0xff] %v2052_v7   ;;  %2057 = vst [vmem:[#allocation4 + $0x374] sm:$0xf] %v2056_v6  ;;  %v2058_v2 = vld [vmem:[%s20464_s5 + $0x374] sm:$0xf] }
 0x1ec   :  { %v2060_v3 = vld [vmem:[%s20464_s5 + $0x388] sm:$0xf]  ;;  %v2062_v14 = vld [vmem:[%s20464_s5 + $0x378] sm:$0xf]  ;;  %2059 = vst [vmem:[#allocation4 + $0x378] sm:$0xf] %v2058_v2 }
 0x1ed   :  { %2061 = vst [vmem:[#allocation4 + $0x37c] sm:$0xf] %v2060_v3  ;;  %2063 = vst [vmem:[#allocation4 + $0x380] sm:$0xf] %v2062_v14  ;;  %v2064_v10 = vld [vmem:[%s20464_s5 + $0x38c] sm:$0xf] }
 0x1ee   :  { %v2066_v7 = vld [vmem:[%s20464_s5 + $0x37c] sm:$0xf]  ;;  %v2068_v6 = vld [vmem:[%s20464_s5 + $0x390] sm:$0xf]  ;;  %2065 = vst [vmem:[#allocation4 + $0x384] sm:$0xf] %v2064_v10 }
 0x1ef   :  { %2067 = vst [vmem:[#allocation4 + $0x388] sm:$0xf] %v2066_v7  ;;  %2069 = vst [vmem:[#allocation4 + $0x38c] sm:$0xf] %v2068_v6  ;;  %v2070_v2 = vld [vmem:[%s20464_s5 + $0x380] sm:$0xf] }
 0x1f0   :  { %v2072_v3 = vld [vmem:[%s20464_s5 + $0x394] sm:$0xff]   ;;  %v2076_v14 = vld [vmem:[%s20464_s5 + $0x3ac] sm:$0xf]  ;;  %2071 = vst [vmem:[#allocation4 + $0x390] sm:$0xf] %v2070_v2 }
 0x1f1   :  { %2073 = vst [vmem:[#allocation4 + $0x394] sm:$0xff] %v2072_v3   ;;  %2077 = vst [vmem:[#allocation4 + $0x39c] sm:$0xf] %v2076_v14  ;;  %v2078_v10 = vld [vmem:[%s20464_s5 + $0x39c] sm:$0xf] }
 0x1f2   :  { %v2080_v7 = vld [vmem:[%s20464_s5 + $0x3b0] sm:$0xf]  ;;  %v2082_v6 = vld [vmem:[%s20464_s5 + $0x3a0] sm:$0xf]  ;;  %2079 = vst [vmem:[#allocation4 + $0x3a0] sm:$0xf] %v2078_v10 }
 0x1f3   :  { %2081 = vst [vmem:[#allocation4 + $0x3a4] sm:$0xf] %v2080_v7  ;;  %2083 = vst [vmem:[#allocation4 + $0x3a8] sm:$0xf] %v2082_v6  ;;  %v2084_v2 = vld [vmem:[%s20464_s5 + $0x3b4] sm:$0xf] }
 0x1f4   :  { %v2086_v3 = vld [vmem:[%s20464_s5 + $0x3a4] sm:$0xf]  ;;  %v2088_v14 = vld [vmem:[%s20464_s5 + $0x3b8] sm:$0xf]  ;;  %2085 = vst [vmem:[#allocation4 + $0x3ac] sm:$0xf] %v2084_v2 }
 0x1f5   :  { %2087 = vst [vmem:[#allocation4 + $0x3b0] sm:$0xf] %v2086_v3  ;;  %2089 = vst [vmem:[#allocation4 + $0x3b4] sm:$0xf] %v2088_v14  ;;  %v2090_v10 = vld [vmem:[%s20464_s5 + $0x3a8] sm:$0xf] }
 0x1f6   :  { %v2092_v7 = vld [vmem:[%s20464_s5 + $0x3bc] sm:$0xff]   ;;  %v2096_v6 = vld [vmem:[%s20464_s5 + $0x3d4] sm:$0xf]  ;;  %2091 = vst [vmem:[#allocation4 + $0x3b8] sm:$0xf] %v2090_v10 }
 0x1f7   :  { %2093 = vst [vmem:[#allocation4 + $0x3bc] sm:$0xff] %v2092_v7   ;;  %2097 = vst [vmem:[#allocation4 + $0x3c4] sm:$0xf] %v2096_v6  ;;  %v2098_v2 = vld [vmem:[%s20464_s5 + $0x3c4] sm:$0xf] }
 0x1f8   :  { %v2100_v3 = vld [vmem:[%s20464_s5 + $0x3d8] sm:$0xf]  ;;  %v2102_v14 = vld [vmem:[%s20464_s5 + $0x3c8] sm:$0xf]  ;;  %2099 = vst [vmem:[#allocation4 + $0x3c8] sm:$0xf] %v2098_v2 }
 0x1f9   :  { %2101 = vst [vmem:[#allocation4 + $0x3cc] sm:$0xf] %v2100_v3  ;;  %2103 = vst [vmem:[#allocation4 + $0x3d0] sm:$0xf] %v2102_v14  ;;  %v2104_v10 = vld [vmem:[%s20464_s5 + $0x3dc] sm:$0xf] }
 0x1fa   :  { %v2106_v7 = vld [vmem:[%s20464_s5 + $0x3cc] sm:$0xf]  ;;  %v2108_v6 = vld [vmem:[%s20464_s5 + $0x3e0] sm:$0xf]  ;;  %2105 = vst [vmem:[#allocation4 + $0x3d4] sm:$0xf] %v2104_v10 }
 0x1fb   :  { %2107 = vst [vmem:[#allocation4 + $0x3d8] sm:$0xf] %v2106_v7  ;;  %2109 = vst [vmem:[#allocation4 + $0x3dc] sm:$0xf] %v2108_v6  ;;  %v2110_v2 = vld [vmem:[%s20464_s5 + $0x3d0] sm:$0xf] }
 0x1fc   :  { %v2112_v3 = vld [vmem:[%s20464_s5 + $0x3e4] sm:$0xff]   ;;  %v2116_v14 = vld [vmem:[%s20464_s5 + $0x3fc] sm:$0xf]  ;;  %2111 = vst [vmem:[#allocation4 + $0x3e0] sm:$0xf] %v2110_v2 }
 0x1fd   :  { %2113 = vst [vmem:[#allocation4 + $0x3e4] sm:$0xff] %v2112_v3   ;;  %2117 = vst [vmem:[#allocation4 + $0x3ec] sm:$0xf] %v2116_v14  ;;  %v2118_v10 = vld [vmem:[%s20464_s5 + $0x3ec] sm:$0xf] }
 0x1fe   :  { %v2120_v7 = vld [vmem:[%s20464_s5 + $0x400] sm:$0xf]  ;;  %v2122_v6 = vld [vmem:[%s20464_s5 + $0x3f0] sm:$0xf]  ;;  %2119 = vst [vmem:[#allocation4 + $0x3f0] sm:$0xf] %v2118_v10 }
 0x1ff   :  { %2121 = vst [vmem:[#allocation4 + $0x3f4] sm:$0xf] %v2120_v7  ;;  %2123 = vst [vmem:[#allocation4 + $0x3f8] sm:$0xf] %v2122_v6  ;;  %v2124_v2 = vld [vmem:[%s20464_s5 + $0x404] sm:$0xf] }
 0x200   :  { %v2126_v3 = vld [vmem:[%s20464_s5 + $0x3f4] sm:$0xf]  ;;  %v2128_v14 = vld [vmem:[%s20464_s5 + $0x408] sm:$0xf]  ;;  %2125 = vst [vmem:[#allocation4 + $0x3fc] sm:$0xf] %v2124_v2 }
 0x201   :  { %2127 = vst [vmem:[#allocation4 + $0x400] sm:$0xf] %v2126_v3  ;;  %2129 = vst [vmem:[#allocation4 + $0x404] sm:$0xf] %v2128_v14  ;;  %v2130_v10 = vld [vmem:[%s20464_s5 + $0x3f8] sm:$0xf] }
 0x202   :  { %v2132_v7 = vld [vmem:[%s20464_s5 + $0x40c] sm:$0xff]   ;;  %v2136_v6 = vld [vmem:[%s20464_s5 + $0x424] sm:$0xf]  ;;  %2131 = vst [vmem:[#allocation4 + $0x408] sm:$0xf] %v2130_v10 }
 0x203   :  { %2133 = vst [vmem:[#allocation4 + $0x40c] sm:$0xff] %v2132_v7   ;;  %2137 = vst [vmem:[#allocation4 + $0x414] sm:$0xf] %v2136_v6  ;;  %v2138_v2 = vld [vmem:[%s20464_s5 + $0x414] sm:$0xf] }
 0x204   :  { %v2140_v3 = vld [vmem:[%s20464_s5 + $0x428] sm:$0xf]  ;;  %v2142_v14 = vld [vmem:[%s20464_s5 + $0x418] sm:$0xf]  ;;  %2139 = vst [vmem:[#allocation4 + $0x418] sm:$0xf] %v2138_v2 }
 0x205   :  { %2141 = vst [vmem:[#allocation4 + $0x41c] sm:$0xf] %v2140_v3  ;;  %2143 = vst [vmem:[#allocation4 + $0x420] sm:$0xf] %v2142_v14  ;;  %v2144_v10 = vld [vmem:[%s20464_s5 + $0x42c] sm:$0xf] }
 0x206   :  { %v2146_v7 = vld [vmem:[%s20464_s5 + $0x41c] sm:$0xf]  ;;  %v2148_v6 = vld [vmem:[%s20464_s5 + $0x430] sm:$0xf]  ;;  %2145 = vst [vmem:[#allocation4 + $0x424] sm:$0xf] %v2144_v10 }
 0x207   :  { %2147 = vst [vmem:[#allocation4 + $0x428] sm:$0xf] %v2146_v7  ;;  %2149 = vst [vmem:[#allocation4 + $0x42c] sm:$0xf] %v2148_v6  ;;  %v2150_v2 = vld [vmem:[%s20464_s5 + $0x420] sm:$0xf] }
 0x208   :  { %v2152_v3 = vld [vmem:[%s20464_s5 + $0x434] sm:$0xff]   ;;  %v2156_v14 = vld [vmem:[%s20464_s5 + $0x44c] sm:$0xf]  ;;  %2151 = vst [vmem:[#allocation4 + $0x430] sm:$0xf] %v2150_v2 }
 0x209   :  { %2153 = vst [vmem:[#allocation4 + $0x434] sm:$0xff] %v2152_v3   ;;  %2157 = vst [vmem:[#allocation4 + $0x43c] sm:$0xf] %v2156_v14  ;;  %v2158_v10 = vld [vmem:[%s20464_s5 + $0x43c] sm:$0xf] }
 0x20a   :  { %v2160_v7 = vld [vmem:[%s20464_s5 + $0x450] sm:$0xf]  ;;  %v2162_v6 = vld [vmem:[%s20464_s5 + $0x440] sm:$0xf]  ;;  %2159 = vst [vmem:[#allocation4 + $0x440] sm:$0xf] %v2158_v10 }
 0x20b   :  { %2161 = vst [vmem:[#allocation4 + $0x444] sm:$0xf] %v2160_v7  ;;  %2163 = vst [vmem:[#allocation4 + $0x448] sm:$0xf] %v2162_v6  ;;  %v2164_v2 = vld [vmem:[%s20464_s5 + $0x454] sm:$0xf] }
 0x20c   :  { %v2166_v3 = vld [vmem:[%s20464_s5 + $0x444] sm:$0xf]  ;;  %v2168_v14 = vld [vmem:[%s20464_s5 + $0x458] sm:$0xf]  ;;  %2165 = vst [vmem:[#allocation4 + $0x44c] sm:$0xf] %v2164_v2 }
 0x20d   :  { %2167 = vst [vmem:[#allocation4 + $0x450] sm:$0xf] %v2166_v3  ;;  %2169 = vst [vmem:[#allocation4 + $0x454] sm:$0xf] %v2168_v14  ;;  %v2170_v10 = vld [vmem:[%s20464_s5 + $0x448] sm:$0xf] }
 0x20e   :  { %v2172_v7 = vld [vmem:[%s20464_s5 + $0x45c] sm:$0xff]   ;;  %v2176_v6 = vld [vmem:[%s20464_s5 + $0x474] sm:$0xf]  ;;  %2171 = vst [vmem:[#allocation4 + $0x458] sm:$0xf] %v2170_v10 }
 0x20f   :  { %2173 = vst [vmem:[#allocation4 + $0x45c] sm:$0xff] %v2172_v7   ;;  %2177 = vst [vmem:[#allocation4 + $0x464] sm:$0xf] %v2176_v6  ;;  %v2178_v2 = vld [vmem:[%s20464_s5 + $0x464] sm:$0xf] }
 0x210   :  { %v2180_v3 = vld [vmem:[%s20464_s5 + $0x478] sm:$0xf]  ;;  %v2182_v14 = vld [vmem:[%s20464_s5 + $0x468] sm:$0xf]  ;;  %2179 = vst [vmem:[#allocation4 + $0x468] sm:$0xf] %v2178_v2 }
 0x211   :  { %2181 = vst [vmem:[#allocation4 + $0x46c] sm:$0xf] %v2180_v3  ;;  %2183 = vst [vmem:[#allocation4 + $0x470] sm:$0xf] %v2182_v14  ;;  %v2184_v10 = vld [vmem:[%s20464_s5 + $0x47c] sm:$0xf] }
 0x212   :  { %v2186_v7 = vld [vmem:[%s20464_s5 + $0x46c] sm:$0xf]  ;;  %v2188_v6 = vld [vmem:[%s20464_s5 + $0x480] sm:$0xf]  ;;  %2185 = vst [vmem:[#allocation4 + $0x474] sm:$0xf] %v2184_v10 }
 0x213   :  { %2187 = vst [vmem:[#allocation4 + $0x478] sm:$0xf] %v2186_v7  ;;  %2189 = vst [vmem:[#allocation4 + $0x47c] sm:$0xf] %v2188_v6  ;;  %v2190_v2 = vld [vmem:[%s20464_s5 + $0x470] sm:$0xf] }
 0x214   :  { %v2192_v3 = vld [vmem:[%s20464_s5 + $0x484] sm:$0xff]   ;;  %v2196_v14 = vld [vmem:[%s20464_s5 + $0x49c] sm:$0xf]  ;;  %2191 = vst [vmem:[#allocation4 + $0x480] sm:$0xf] %v2190_v2 }
 0x215   :  { %2193 = vst [vmem:[#allocation4 + $0x484] sm:$0xff] %v2192_v3   ;;  %2197 = vst [vmem:[#allocation4 + $0x48c] sm:$0xf] %v2196_v14  ;;  %v2198_v10 = vld [vmem:[%s20464_s5 + $0x48c] sm:$0xf] }
 0x216   :  { %v2200_v7 = vld [vmem:[%s20464_s5 + $0x4a0] sm:$0xf]  ;;  %v2202_v6 = vld [vmem:[%s20464_s5 + $0x490] sm:$0xf]  ;;  %2199 = vst [vmem:[#allocation4 + $0x490] sm:$0xf] %v2198_v10 }
 0x217   :  { %2201 = vst [vmem:[#allocation4 + $0x494] sm:$0xf] %v2200_v7  ;;  %2203 = vst [vmem:[#allocation4 + $0x498] sm:$0xf] %v2202_v6  ;;  %v2204_v2 = vld [vmem:[%s20464_s5 + $0x4a4] sm:$0xf] }
 0x218   :  { %v2206_v3 = vld [vmem:[%s20464_s5 + $0x494] sm:$0xf]  ;;  %v2208_v14 = vld [vmem:[%s20464_s5 + $0x4a8] sm:$0xf]  ;;  %2205 = vst [vmem:[#allocation4 + $0x49c] sm:$0xf] %v2204_v2 }
 0x219   :  { %2207 = vst [vmem:[#allocation4 + $0x4a0] sm:$0xf] %v2206_v3  ;;  %2209 = vst [vmem:[#allocation4 + $0x4a4] sm:$0xf] %v2208_v14  ;;  %v2210_v10 = vld [vmem:[%s20464_s5 + $0x498] sm:$0xf] }
 0x21a   :  { %v2212_v7 = vld [vmem:[%s20464_s5 + $0x4ac] sm:$0xff]   ;;  %v2216_v6 = vld [vmem:[%s20464_s5 + $0x4c4] sm:$0xf]  ;;  %2211 = vst [vmem:[#allocation4 + $0x4a8] sm:$0xf] %v2210_v10 }
 0x21b   :  { %2213 = vst [vmem:[#allocation4 + $0x4ac] sm:$0xff] %v2212_v7   ;;  %2217 = vst [vmem:[#allocation4 + $0x4b4] sm:$0xf] %v2216_v6  ;;  %v2218_v2 = vld [vmem:[%s20464_s5 + $0x4b4] sm:$0xf] }
 0x21c   :  { %v2220_v3 = vld [vmem:[%s20464_s5 + $0x4c8] sm:$0xf]  ;;  %v2222_v14 = vld [vmem:[%s20464_s5 + $0x4b8] sm:$0xf]  ;;  %2219 = vst [vmem:[#allocation4 + $0x4b8] sm:$0xf] %v2218_v2 }
 0x21d   :  { %2221 = vst [vmem:[#allocation4 + $0x4bc] sm:$0xf] %v2220_v3  ;;  %2223 = vst [vmem:[#allocation4 + $0x4c0] sm:$0xf] %v2222_v14  ;;  %v2224_v10 = vld [vmem:[%s20464_s5 + $0x4cc] sm:$0xf] }
 0x21e   :  { %v2226_v7 = vld [vmem:[%s20464_s5 + $0x4bc] sm:$0xf]  ;;  %v2228_v6 = vld [vmem:[%s20464_s5 + $0x4d0] sm:$0xf]  ;;  %2225 = vst [vmem:[#allocation4 + $0x4c4] sm:$0xf] %v2224_v10 }
 0x21f   :  { %2227 = vst [vmem:[#allocation4 + $0x4c8] sm:$0xf] %v2226_v7  ;;  %2229 = vst [vmem:[#allocation4 + $0x4cc] sm:$0xf] %v2228_v6  ;;  %v2230_v2 = vld [vmem:[%s20464_s5 + $0x4c0] sm:$0xf] }
 0x220   :  { %v2232_v3 = vld [vmem:[%s20464_s5 + $0x4d4] sm:$0xff]   ;;  %v2236_v14 = vld [vmem:[%s20464_s5 + $0x4ec] sm:$0xf]  ;;  %2231 = vst [vmem:[#allocation4 + $0x4d0] sm:$0xf] %v2230_v2 }
 0x221   :  { %2233 = vst [vmem:[#allocation4 + $0x4d4] sm:$0xff] %v2232_v3   ;;  %2237 = vst [vmem:[#allocation4 + $0x4dc] sm:$0xf] %v2236_v14  ;;  %v2238_v10 = vld [vmem:[%s20464_s5 + $0x4dc] sm:$0xf] }
 0x222   :  { %v2240_v7 = vld [vmem:[%s20464_s5 + $0x4f0] sm:$0xf]  ;;  %v2242_v6 = vld [vmem:[%s20464_s5 + $0x4e0] sm:$0xf]  ;;  %2239 = vst [vmem:[#allocation4 + $0x4e0] sm:$0xf] %v2238_v10 }
 0x223   :  { %2241 = vst [vmem:[#allocation4 + $0x4e4] sm:$0xf] %v2240_v7  ;;  %2243 = vst [vmem:[#allocation4 + $0x4e8] sm:$0xf] %v2242_v6  ;;  %v2244_v2 = vld [vmem:[%s20464_s5 + $0x4f4] sm:$0xf] }
 0x224   :  { %v2246_v3 = vld [vmem:[%s20464_s5 + $0x4e4] sm:$0xf]  ;;  %v2248_v14 = vld [vmem:[%s20464_s5 + $0x4f8] sm:$0xf]  ;;  %2245 = vst [vmem:[#allocation4 + $0x4ec] sm:$0xf] %v2244_v2 }
 0x225   :  { %2247 = vst [vmem:[#allocation4 + $0x4f0] sm:$0xf] %v2246_v3  ;;  %2249 = vst [vmem:[#allocation4 + $0x4f4] sm:$0xf] %v2248_v14  ;;  %v2250_v10 = vld [vmem:[%s20464_s5 + $0x4e8] sm:$0xf] }
 0x226   :  { %v2252_v7 = vld [vmem:[%s20464_s5 + $0x4fc] sm:$0xff]   ;;  %v2256_v6 = vld [vmem:[%s20464_s5 + $0x514] sm:$0xf]  ;;  %2251 = vst [vmem:[#allocation4 + $0x4f8] sm:$0xf] %v2250_v10 }
 0x227   :  { %2253 = vst [vmem:[#allocation4 + $0x4fc] sm:$0xff] %v2252_v7   ;;  %2257 = vst [vmem:[#allocation4 + $0x504] sm:$0xf] %v2256_v6  ;;  %v2258_v2 = vld [vmem:[%s20464_s5 + $0x504] sm:$0xf] }
 0x228   :  { %v2260_v3 = vld [vmem:[%s20464_s5 + $0x518] sm:$0xf]  ;;  %v2262_v14 = vld [vmem:[%s20464_s5 + $0x508] sm:$0xf]  ;;  %2259 = vst [vmem:[#allocation4 + $0x508] sm:$0xf] %v2258_v2 }
 0x229   :  { %2261 = vst [vmem:[#allocation4 + $0x50c] sm:$0xf] %v2260_v3  ;;  %2263 = vst [vmem:[#allocation4 + $0x510] sm:$0xf] %v2262_v14  ;;  %v2264_v10 = vld [vmem:[%s20464_s5 + $0x51c] sm:$0xf] }
 0x22a   :  { %v2266_v7 = vld [vmem:[%s20464_s5 + $0x50c] sm:$0xf]  ;;  %v2268_v6 = vld [vmem:[%s20464_s5 + $0x520] sm:$0xf]  ;;  %2265 = vst [vmem:[#allocation4 + $0x514] sm:$0xf] %v2264_v10 }
 0x22b   :  { %2267 = vst [vmem:[#allocation4 + $0x518] sm:$0xf] %v2266_v7  ;;  %2269 = vst [vmem:[#allocation4 + $0x51c] sm:$0xf] %v2268_v6  ;;  %v2270_v2 = vld [vmem:[%s20464_s5 + $0x510] sm:$0xf] }
 0x22c   :  { %v2272_v3 = vld [vmem:[%s20464_s5 + $0x524] sm:$0xff]   ;;  %v2276_v14 = vld [vmem:[%s20464_s5 + $0x53c] sm:$0xf]  ;;  %2271 = vst [vmem:[#allocation4 + $0x520] sm:$0xf] %v2270_v2 }
 0x22d   :  { %2273 = vst [vmem:[#allocation4 + $0x524] sm:$0xff] %v2272_v3   ;;  %2277 = vst [vmem:[#allocation4 + $0x52c] sm:$0xf] %v2276_v14  ;;  %v2278_v10 = vld [vmem:[%s20464_s5 + $0x52c] sm:$0xf] }
 0x22e   :  { %v2280_v7 = vld [vmem:[%s20464_s5 + $0x540] sm:$0xf]  ;;  %v2282_v6 = vld [vmem:[%s20464_s5 + $0x530] sm:$0xf]  ;;  %2279 = vst [vmem:[#allocation4 + $0x530] sm:$0xf] %v2278_v10 }
 0x22f   :  { %2281 = vst [vmem:[#allocation4 + $0x534] sm:$0xf] %v2280_v7  ;;  %2283 = vst [vmem:[#allocation4 + $0x538] sm:$0xf] %v2282_v6  ;;  %v2284_v2 = vld [vmem:[%s20464_s5 + $0x544] sm:$0xf] }
 0x230   :  { %v2286_v3 = vld [vmem:[%s20464_s5 + $0x534] sm:$0xf]  ;;  %v2288_v14 = vld [vmem:[%s20464_s5 + $0x548] sm:$0xf]  ;;  %2285 = vst [vmem:[#allocation4 + $0x53c] sm:$0xf] %v2284_v2 }
 0x231   :  { %2287 = vst [vmem:[#allocation4 + $0x540] sm:$0xf] %v2286_v3  ;;  %2289 = vst [vmem:[#allocation4 + $0x544] sm:$0xf] %v2288_v14  ;;  %v2290_v10 = vld [vmem:[%s20464_s5 + $0x538] sm:$0xf] }
 0x232   :  { %v2292_v7 = vld [vmem:[%s20464_s5 + $0x54c] sm:$0xff]   ;;  %v2296_v6 = vld [vmem:[%s20464_s5 + $0x564] sm:$0xf]  ;;  %2291 = vst [vmem:[#allocation4 + $0x548] sm:$0xf] %v2290_v10 }
 0x233   :  { %2293 = vst [vmem:[#allocation4 + $0x54c] sm:$0xff] %v2292_v7   ;;  %2297 = vst [vmem:[#allocation4 + $0x554] sm:$0xf] %v2296_v6  ;;  %v2298_v2 = vld [vmem:[%s20464_s5 + $0x554] sm:$0xf] }
 0x234   :  { %v2300_v3 = vld [vmem:[%s20464_s5 + $0x568] sm:$0xf]  ;;  %v2302_v14 = vld [vmem:[%s20464_s5 + $0x558] sm:$0xf]  ;;  %2299 = vst [vmem:[#allocation4 + $0x558] sm:$0xf] %v2298_v2 }
 0x235   :  { %2301 = vst [vmem:[#allocation4 + $0x55c] sm:$0xf] %v2300_v3  ;;  %2303 = vst [vmem:[#allocation4 + $0x560] sm:$0xf] %v2302_v14  ;;  %v2304_v10 = vld [vmem:[%s20464_s5 + $0x56c] sm:$0xf] }
 0x236   :  { %v2306_v7 = vld [vmem:[%s20464_s5 + $0x55c] sm:$0xf]  ;;  %v2308_v6 = vld [vmem:[%s20464_s5 + $0x570] sm:$0xf]  ;;  %2305 = vst [vmem:[#allocation4 + $0x564] sm:$0xf] %v2304_v10 }
 0x237   :  { %2307 = vst [vmem:[#allocation4 + $0x568] sm:$0xf] %v2306_v7  ;;  %2309 = vst [vmem:[#allocation4 + $0x56c] sm:$0xf] %v2308_v6  ;;  %v2310_v2 = vld [vmem:[%s20464_s5 + $0x560] sm:$0xf] }
 0x238   :  { %v2312_v3 = vld [vmem:[%s20464_s5 + $0x574] sm:$0xff]   ;;  %v2316_v14 = vld [vmem:[%s20464_s5 + $0x58c] sm:$0xf]  ;;  %2311 = vst [vmem:[#allocation4 + $0x570] sm:$0xf] %v2310_v2 }
 0x239   :  { %2313 = vst [vmem:[#allocation4 + $0x574] sm:$0xff] %v2312_v3   ;;  %2317 = vst [vmem:[#allocation4 + $0x57c] sm:$0xf] %v2316_v14  ;;  %v2318_v10 = vld [vmem:[%s20464_s5 + $0x57c] sm:$0xf] }
 0x23a   :  { %v2320_v7 = vld [vmem:[%s20464_s5 + $0x590] sm:$0xf]  ;;  %v2322_v6 = vld [vmem:[%s20464_s5 + $0x580] sm:$0xf]  ;;  %2319 = vst [vmem:[#allocation4 + $0x580] sm:$0xf] %v2318_v10 }
 0x23b   :  { %2321 = vst [vmem:[#allocation4 + $0x584] sm:$0xf] %v2320_v7  ;;  %2323 = vst [vmem:[#allocation4 + $0x588] sm:$0xf] %v2322_v6  ;;  %v2324_v2 = vld [vmem:[%s20464_s5 + $0x594] sm:$0xf] }
 0x23c   :  { %v2326_v3 = vld [vmem:[%s20464_s5 + $0x584] sm:$0xf]  ;;  %v2328_v14 = vld [vmem:[%s20464_s5 + $0x598] sm:$0xf]  ;;  %2325 = vst [vmem:[#allocation4 + $0x58c] sm:$0xf] %v2324_v2 }
 0x23d   :  { %2327 = vst [vmem:[#allocation4 + $0x590] sm:$0xf] %v2326_v3  ;;  %2329 = vst [vmem:[#allocation4 + $0x594] sm:$0xf] %v2328_v14  ;;  %v2330_v10 = vld [vmem:[%s20464_s5 + $0x588] sm:$0xf] }
 0x23e   :  { %v2332_v7 = vld [vmem:[%s20464_s5 + $0x59c] sm:$0xff]   ;;  %v2336_v6 = vld [vmem:[%s20464_s5 + $0x5b4] sm:$0xf]  ;;  %2331 = vst [vmem:[#allocation4 + $0x598] sm:$0xf] %v2330_v10 }
 0x23f   :  { %2333 = vst [vmem:[#allocation4 + $0x59c] sm:$0xff] %v2332_v7   ;;  %2337 = vst [vmem:[#allocation4 + $0x5a4] sm:$0xf] %v2336_v6  ;;  %v2338_v2 = vld [vmem:[%s20464_s5 + $0x5a4] sm:$0xf] }
 0x240   :  { %v2340_v3 = vld [vmem:[%s20464_s5 + $0x5b8] sm:$0xf]  ;;  %v2342_v14 = vld [vmem:[%s20464_s5 + $0x5a8] sm:$0xf]  ;;  %2339 = vst [vmem:[#allocation4 + $0x5a8] sm:$0xf] %v2338_v2 }
 0x241   :  { %2341 = vst [vmem:[#allocation4 + $0x5ac] sm:$0xf] %v2340_v3  ;;  %2343 = vst [vmem:[#allocation4 + $0x5b0] sm:$0xf] %v2342_v14  ;;  %v2344_v10 = vld [vmem:[%s20464_s5 + $0x5bc] sm:$0xf] }
 0x242   :  { %v2346_v7 = vld [vmem:[%s20464_s5 + $0x5ac] sm:$0xf]  ;;  %v2348_v6 = vld [vmem:[%s20464_s5 + $0x5c0] sm:$0xf]  ;;  %2345 = vst [vmem:[#allocation4 + $0x5b4] sm:$0xf] %v2344_v10 }
 0x243   :  { %2347 = vst [vmem:[#allocation4 + $0x5b8] sm:$0xf] %v2346_v7  ;;  %2349 = vst [vmem:[#allocation4 + $0x5bc] sm:$0xf] %v2348_v6  ;;  %v2350_v2 = vld [vmem:[%s20464_s5 + $0x5b0] sm:$0xf] }
 0x244   :  { %v2352_v3 = vld [vmem:[%s20464_s5 + $0x5c4] sm:$0xff]   ;;  %v2356_v14 = vld [vmem:[%s20464_s5 + $0x5dc] sm:$0xf]  ;;  %2351 = vst [vmem:[#allocation4 + $0x5c0] sm:$0xf] %v2350_v2 }
 0x245   :  { %2353 = vst [vmem:[#allocation4 + $0x5c4] sm:$0xff] %v2352_v3   ;;  %2357 = vst [vmem:[#allocation4 + $0x5cc] sm:$0xf] %v2356_v14  ;;  %v2358_v10 = vld [vmem:[%s20464_s5 + $0x5cc] sm:$0xf] }
 0x246   :  { %v2360_v7 = vld [vmem:[%s20464_s5 + $0x5e0] sm:$0xf]  ;;  %v2362_v6 = vld [vmem:[%s20464_s5 + $0x5d0] sm:$0xf]  ;;  %2359 = vst [vmem:[#allocation4 + $0x5d0] sm:$0xf] %v2358_v10 }
 0x247   :  { %2361 = vst [vmem:[#allocation4 + $0x5d4] sm:$0xf] %v2360_v7  ;;  %2363 = vst [vmem:[#allocation4 + $0x5d8] sm:$0xf] %v2362_v6  ;;  %v2364_v2 = vld [vmem:[%s20464_s5 + $0x5e4] sm:$0xf] }
 0x248   :  { %v2366_v3 = vld [vmem:[%s20464_s5 + $0x5d4] sm:$0xf]  ;;  %v2368_v14 = vld [vmem:[%s20464_s5 + $0x5e8] sm:$0xf]  ;;  %2365 = vst [vmem:[#allocation4 + $0x5dc] sm:$0xf] %v2364_v2 }
 0x249   :  { %2367 = vst [vmem:[#allocation4 + $0x5e0] sm:$0xf] %v2366_v3  ;;  %2369 = vst [vmem:[#allocation4 + $0x5e4] sm:$0xf] %v2368_v14  ;;  %v2370_v10 = vld [vmem:[%s20464_s5 + $0x5d8] sm:$0xf] }
 0x24a   :  { %v2372_v7 = vld [vmem:[%s20464_s5 + $0x5ec] sm:$0xff]   ;;  %v2376_v6 = vld [vmem:[%s20464_s5 + $0x604] sm:$0xf]  ;;  %2371 = vst [vmem:[#allocation4 + $0x5e8] sm:$0xf] %v2370_v10 }
 0x24b   :  { %2373 = vst [vmem:[#allocation4 + $0x5ec] sm:$0xff] %v2372_v7   ;;  %2377 = vst [vmem:[#allocation4 + $0x5f4] sm:$0xf] %v2376_v6  ;;  %v2378_v2 = vld [vmem:[%s20464_s5 + $0x5f4] sm:$0xf] }
 0x24c   :  { %v2380_v3 = vld [vmem:[%s20464_s5 + $0x608] sm:$0xf]  ;;  %v2382_v14 = vld [vmem:[%s20464_s5 + $0x5f8] sm:$0xf]  ;;  %2379 = vst [vmem:[#allocation4 + $0x5f8] sm:$0xf] %v2378_v2 }
 0x24d   :  { %2381 = vst [vmem:[#allocation4 + $0x5fc] sm:$0xf] %v2380_v3  ;;  %2383 = vst [vmem:[#allocation4 + $0x600] sm:$0xf] %v2382_v14  ;;  %v2384_v10 = vld [vmem:[%s20464_s5 + $0x60c] sm:$0xf] }
 0x24e   :  { %v2386_v7 = vld [vmem:[%s20464_s5 + $0x5fc] sm:$0xf]  ;;  %v2388_v6 = vld [vmem:[%s20464_s5 + $0x610] sm:$0xf]  ;;  %2385 = vst [vmem:[#allocation4 + $0x604] sm:$0xf] %v2384_v10 }
 0x24f   :  { %2387 = vst [vmem:[#allocation4 + $0x608] sm:$0xf] %v2386_v7  ;;  %2389 = vst [vmem:[#allocation4 + $0x60c] sm:$0xf] %v2388_v6  ;;  %v2390_v2 = vld [vmem:[%s20464_s5 + $0x600] sm:$0xf] }
 0x250   :  { %v2392_v3 = vld [vmem:[%s20464_s5 + $0x614] sm:$0xff]   ;;  %v2396_v14 = vld [vmem:[%s20464_s5 + $0x62c] sm:$0xf]  ;;  %2391 = vst [vmem:[#allocation4 + $0x610] sm:$0xf] %v2390_v2 }
 0x251   :  { %2393 = vst [vmem:[#allocation4 + $0x614] sm:$0xff] %v2392_v3   ;;  %2397 = vst [vmem:[#allocation4 + $0x61c] sm:$0xf] %v2396_v14  ;;  %v2398_v10 = vld [vmem:[%s20464_s5 + $0x61c] sm:$0xf] }
 0x252   :  { %v2400_v7 = vld [vmem:[%s20464_s5 + $0x630] sm:$0xf]  ;;  %v2402_v6 = vld [vmem:[%s20464_s5 + $0x620] sm:$0xf]  ;;  %2399 = vst [vmem:[#allocation4 + $0x620] sm:$0xf] %v2398_v10 }
 0x253   :  { %2401 = vst [vmem:[#allocation4 + $0x624] sm:$0xf] %v2400_v7  ;;  %2403 = vst [vmem:[#allocation4 + $0x628] sm:$0xf] %v2402_v6  ;;  %v2404_v2 = vld [vmem:[%s20464_s5 + $0x634] sm:$0xf] }
 0x254   :  { %v2406_v3 = vld [vmem:[%s20464_s5 + $0x624] sm:$0xf]  ;;  %v2408_v14 = vld [vmem:[%s20464_s5 + $0x638] sm:$0xf]  ;;  %2405 = vst [vmem:[#allocation4 + $0x62c] sm:$0xf] %v2404_v2 }
 0x255   :  { %2407 = vst [vmem:[#allocation4 + $0x630] sm:$0xf] %v2406_v3  ;;  %2409 = vst [vmem:[#allocation4 + $0x634] sm:$0xf] %v2408_v14  ;;  %v2410_v10 = vld [vmem:[%s20464_s5 + $0x628] sm:$0xf] }
 0x256   :  { %v2412_v7 = vld [vmem:[%s20464_s5 + $0x63c] sm:$0xff]   ;;  %v2416_v6 = vld [vmem:[%s20464_s5 + $0x654] sm:$0xf]  ;;  %2411 = vst [vmem:[#allocation4 + $0x638] sm:$0xf] %v2410_v10 }
 0x257   :  { %2413 = vst [vmem:[#allocation4 + $0x63c] sm:$0xff] %v2412_v7   ;;  %2417 = vst [vmem:[#allocation4 + $0x644] sm:$0xf] %v2416_v6  ;;  %v2418_v2 = vld [vmem:[%s20464_s5 + $0x644] sm:$0xf] }
 0x258   :  { %v2420_v3 = vld [vmem:[%s20464_s5 + $0x658] sm:$0xf]  ;;  %v2422_v14 = vld [vmem:[%s20464_s5 + $0x648] sm:$0xf]  ;;  %2419 = vst [vmem:[#allocation4 + $0x648] sm:$0xf] %v2418_v2 }
 0x259   :  { %2421 = vst [vmem:[#allocation4 + $0x64c] sm:$0xf] %v2420_v3  ;;  %2423 = vst [vmem:[#allocation4 + $0x650] sm:$0xf] %v2422_v14  ;;  %v2424_v10 = vld [vmem:[%s20464_s5 + $0x65c] sm:$0xf] }
 0x25a   :  { %v2426_v7 = vld [vmem:[%s20464_s5 + $0x64c] sm:$0xf]  ;;  %v2428_v6 = vld [vmem:[%s20464_s5 + $0x660] sm:$0xf]  ;;  %2425 = vst [vmem:[#allocation4 + $0x654] sm:$0xf] %v2424_v10 }
 0x25b   :  { %2427 = vst [vmem:[#allocation4 + $0x658] sm:$0xf] %v2426_v7  ;;  %2429 = vst [vmem:[#allocation4 + $0x65c] sm:$0xf] %v2428_v6  ;;  %v2430_v2 = vld [vmem:[%s20464_s5 + $0x650] sm:$0xf] }
 0x25c   :  { %v2432_v3 = vld [vmem:[%s20464_s5 + $0x664] sm:$0xff]   ;;  %v2436_v14 = vld [vmem:[%s20464_s5 + $0x67c] sm:$0xf]  ;;  %2431 = vst [vmem:[#allocation4 + $0x660] sm:$0xf] %v2430_v2 }
 0x25d   :  { %2433 = vst [vmem:[#allocation4 + $0x664] sm:$0xff] %v2432_v3   ;;  %2437 = vst [vmem:[#allocation4 + $0x66c] sm:$0xf] %v2436_v14  ;;  %v2438_v10 = vld [vmem:[%s20464_s5 + $0x66c] sm:$0xf] }
 0x25e   :  { %v2440_v7 = vld [vmem:[%s20464_s5 + $0x680] sm:$0xf]  ;;  %v2442_v6 = vld [vmem:[%s20464_s5 + $0x670] sm:$0xf]  ;;  %2439 = vst [vmem:[#allocation4 + $0x670] sm:$0xf] %v2438_v10 }
 0x25f   :  { %2441 = vst [vmem:[#allocation4 + $0x674] sm:$0xf] %v2440_v7  ;;  %2443 = vst [vmem:[#allocation4 + $0x678] sm:$0xf] %v2442_v6  ;;  %v2444_v2 = vld [vmem:[%s20464_s5 + $0x684] sm:$0xf] }
 0x260   :  { %v2446_v3 = vld [vmem:[%s20464_s5 + $0x674] sm:$0xf]  ;;  %v2448_v14 = vld [vmem:[%s20464_s5 + $0x688] sm:$0xf]  ;;  %2445 = vst [vmem:[#allocation4 + $0x67c] sm:$0xf] %v2444_v2 }
 0x261   :  { %2447 = vst [vmem:[#allocation4 + $0x680] sm:$0xf] %v2446_v3  ;;  %2449 = vst [vmem:[#allocation4 + $0x684] sm:$0xf] %v2448_v14  ;;  %v2450_v10 = vld [vmem:[%s20464_s5 + $0x678] sm:$0xf] }
 0x262   :  { %v2452_v7 = vld [vmem:[%s20464_s5 + $0x68c] sm:$0xff]   ;;  %v2456_v6 = vld [vmem:[%s20464_s5 + $0x6a4] sm:$0xf]  ;;  %2451 = vst [vmem:[#allocation4 + $0x688] sm:$0xf] %v2450_v10 }
 0x263   :  { %2453 = vst [vmem:[#allocation4 + $0x68c] sm:$0xff] %v2452_v7   ;;  %2457 = vst [vmem:[#allocation4 + $0x694] sm:$0xf] %v2456_v6  ;;  %v2458_v2 = vld [vmem:[%s20464_s5 + $0x694] sm:$0xf] }
 0x264   :  { %v2460_v3 = vld [vmem:[%s20464_s5 + $0x6a8] sm:$0xf]  ;;  %v2462_v14 = vld [vmem:[%s20464_s5 + $0x698] sm:$0xf]  ;;  %2459 = vst [vmem:[#allocation4 + $0x698] sm:$0xf] %v2458_v2 }
 0x265   :  { %2461 = vst [vmem:[#allocation4 + $0x69c] sm:$0xf] %v2460_v3  ;;  %2463 = vst [vmem:[#allocation4 + $0x6a0] sm:$0xf] %v2462_v14  ;;  %v2464_v10 = vld [vmem:[%s20464_s5 + $0x6ac] sm:$0xf] }
 0x266   :  { %v2466_v7 = vld [vmem:[%s20464_s5 + $0x69c] sm:$0xf]  ;;  %v2468_v6 = vld [vmem:[%s20464_s5 + $0x6b0] sm:$0xf]  ;;  %2465 = vst [vmem:[#allocation4 + $0x6a4] sm:$0xf] %v2464_v10 }
 0x267   :  { %2467 = vst [vmem:[#allocation4 + $0x6a8] sm:$0xf] %v2466_v7  ;;  %2469 = vst [vmem:[#allocation4 + $0x6ac] sm:$0xf] %v2468_v6  ;;  %v2470_v2 = vld [vmem:[%s20464_s5 + $0x6a0] sm:$0xf] }
 0x268   :  { %v2472_v3 = vld [vmem:[%s20464_s5 + $0x6b4] sm:$0xff]   ;;  %v2476_v14 = vld [vmem:[%s20464_s5 + $0x6cc] sm:$0xf]  ;;  %2471 = vst [vmem:[#allocation4 + $0x6b0] sm:$0xf] %v2470_v2 }
 0x269   :  { %2473 = vst [vmem:[#allocation4 + $0x6b4] sm:$0xff] %v2472_v3   ;;  %2477 = vst [vmem:[#allocation4 + $0x6bc] sm:$0xf] %v2476_v14  ;;  %v2478_v10 = vld [vmem:[%s20464_s5 + $0x6bc] sm:$0xf] }
 0x26a   :  { %v2480_v7 = vld [vmem:[%s20464_s5 + $0x6d0] sm:$0xf]  ;;  %v2482_v6 = vld [vmem:[%s20464_s5 + $0x6c0] sm:$0xf]  ;;  %2479 = vst [vmem:[#allocation4 + $0x6c0] sm:$0xf] %v2478_v10 }
 0x26b   :  { %2481 = vst [vmem:[#allocation4 + $0x6c4] sm:$0xf] %v2480_v7  ;;  %2483 = vst [vmem:[#allocation4 + $0x6c8] sm:$0xf] %v2482_v6  ;;  %v2484_v2 = vld [vmem:[%s20464_s5 + $0x6d4] sm:$0xf] }
 0x26c   :  { %v2486_v3 = vld [vmem:[%s20464_s5 + $0x6c4] sm:$0xf]  ;;  %v2488_v14 = vld [vmem:[%s20464_s5 + $0x6d8] sm:$0xf]  ;;  %2485 = vst [vmem:[#allocation4 + $0x6cc] sm:$0xf] %v2484_v2 }
 0x26d   :  { %2487 = vst [vmem:[#allocation4 + $0x6d0] sm:$0xf] %v2486_v3  ;;  %2489 = vst [vmem:[#allocation4 + $0x6d4] sm:$0xf] %v2488_v14  ;;  %v2490_v10 = vld [vmem:[%s20464_s5 + $0x6c8] sm:$0xf] }
 0x26e   :  { %v2492_v7 = vld [vmem:[%s20464_s5 + $0x6dc] sm:$0xff]   ;;  %v2496_v6 = vld [vmem:[%s20464_s5 + $0x6f4] sm:$0xf]  ;;  %2491 = vst [vmem:[#allocation4 + $0x6d8] sm:$0xf] %v2490_v10 }
 0x26f   :  { %2493 = vst [vmem:[#allocation4 + $0x6dc] sm:$0xff] %v2492_v7   ;;  %2497 = vst [vmem:[#allocation4 + $0x6e4] sm:$0xf] %v2496_v6  ;;  %v2498_v2 = vld [vmem:[%s20464_s5 + $0x6e4] sm:$0xf] }
 0x270   :  { %v2500_v3 = vld [vmem:[%s20464_s5 + $0x6f8] sm:$0xf]  ;;  %v2502_v14 = vld [vmem:[%s20464_s5 + $0x6e8] sm:$0xf]  ;;  %2499 = vst [vmem:[#allocation4 + $0x6e8] sm:$0xf] %v2498_v2 }
 0x271   :  { %2501 = vst [vmem:[#allocation4 + $0x6ec] sm:$0xf] %v2500_v3  ;;  %2503 = vst [vmem:[#allocation4 + $0x6f0] sm:$0xf] %v2502_v14  ;;  %v2504_v10 = vld [vmem:[%s20464_s5 + $0x6fc] sm:$0xf] }
 0x272   :  { %v2506_v7 = vld [vmem:[%s20464_s5 + $0x6ec] sm:$0xf]  ;;  %v2508_v6 = vld [vmem:[%s20464_s5 + $0x700] sm:$0xf]  ;;  %2505 = vst [vmem:[#allocation4 + $0x6f4] sm:$0xf] %v2504_v10 }
 0x273   :  { %2507 = vst [vmem:[#allocation4 + $0x6f8] sm:$0xf] %v2506_v7  ;;  %2509 = vst [vmem:[#allocation4 + $0x6fc] sm:$0xf] %v2508_v6  ;;  %v2510_v2 = vld [vmem:[%s20464_s5 + $0x6f0] sm:$0xf] }
 0x274   :  { %v2512_v3 = vld [vmem:[%s20464_s5 + $0x704] sm:$0xff]   ;;  %v2516_v14 = vld [vmem:[%s20464_s5 + $0x71c] sm:$0xf]  ;;  %2511 = vst [vmem:[#allocation4 + $0x700] sm:$0xf] %v2510_v2 }
 0x275   :  { %2513 = vst [vmem:[#allocation4 + $0x704] sm:$0xff] %v2512_v3   ;;  %2517 = vst [vmem:[#allocation4 + $0x70c] sm:$0xf] %v2516_v14  ;;  %v2518_v10 = vld [vmem:[%s20464_s5 + $0x70c] sm:$0xf] }
 0x276   :  { %v2520_v7 = vld [vmem:[%s20464_s5 + $0x720] sm:$0xf]  ;;  %v2522_v6 = vld [vmem:[%s20464_s5 + $0x710] sm:$0xf]  ;;  %2519 = vst [vmem:[#allocation4 + $0x710] sm:$0xf] %v2518_v10 }
 0x277   :  { %2521 = vst [vmem:[#allocation4 + $0x714] sm:$0xf] %v2520_v7  ;;  %2523 = vst [vmem:[#allocation4 + $0x718] sm:$0xf] %v2522_v6  ;;  %v2524_v2 = vld [vmem:[%s20464_s5 + $0x724] sm:$0xf] }
 0x278   :  { %v2526_v3 = vld [vmem:[%s20464_s5 + $0x714] sm:$0xf]  ;;  %v2528_v14 = vld [vmem:[%s20464_s5 + $0x728] sm:$0xf]  ;;  %2525 = vst [vmem:[#allocation4 + $0x71c] sm:$0xf] %v2524_v2 }
 0x279   :  { %2527 = vst [vmem:[#allocation4 + $0x720] sm:$0xf] %v2526_v3  ;;  %2529 = vst [vmem:[#allocation4 + $0x724] sm:$0xf] %v2528_v14  ;;  %v2530_v10 = vld [vmem:[%s20464_s5 + $0x718] sm:$0xf] }
 0x27a   :  { %v2532_v7 = vld [vmem:[%s20464_s5 + $0x72c] sm:$0xff]   ;;  %v2536_v6 = vld [vmem:[%s20464_s5 + $0x744] sm:$0xf]  ;;  %2531 = vst [vmem:[#allocation4 + $0x728] sm:$0xf] %v2530_v10 }
 0x27b   :  { %2533 = vst [vmem:[#allocation4 + $0x72c] sm:$0xff] %v2532_v7   ;;  %2537 = vst [vmem:[#allocation4 + $0x734] sm:$0xf] %v2536_v6  ;;  %v2538_v2 = vld [vmem:[%s20464_s5 + $0x734] sm:$0xf] }
 0x27c   :  { %v2540_v3 = vld [vmem:[%s20464_s5 + $0x748] sm:$0xf]  ;;  %v2542_v14 = vld [vmem:[%s20464_s5 + $0x738] sm:$0xf]  ;;  %2539 = vst [vmem:[#allocation4 + $0x738] sm:$0xf] %v2538_v2 }
 0x27d   :  { %2541 = vst [vmem:[#allocation4 + $0x73c] sm:$0xf] %v2540_v3  ;;  %2543 = vst [vmem:[#allocation4 + $0x740] sm:$0xf] %v2542_v14  ;;  %v2544_v10 = vld [vmem:[%s20464_s5 + $0x74c] sm:$0xf] }
 0x27e   :  { %v2546_v7 = vld [vmem:[%s20464_s5 + $0x73c] sm:$0xf]  ;;  %v2548_v6 = vld [vmem:[%s20464_s5 + $0x750] sm:$0xf]  ;;  %2545 = vst [vmem:[#allocation4 + $0x744] sm:$0xf] %v2544_v10 }
 0x27f   :  { %2547 = vst [vmem:[#allocation4 + $0x748] sm:$0xf] %v2546_v7  ;;  %2549 = vst [vmem:[#allocation4 + $0x74c] sm:$0xf] %v2548_v6  ;;  %v2550_v2 = vld [vmem:[%s20464_s5 + $0x740] sm:$0xf] }
 0x280   :  { %v2552_v3 = vld [vmem:[%s20464_s5 + $0x754] sm:$0xff]   ;;  %v2556_v14 = vld [vmem:[%s20464_s5 + $0x76c] sm:$0xf]  ;;  %2551 = vst [vmem:[#allocation4 + $0x750] sm:$0xf] %v2550_v2 }
 0x281   :  { %2553 = vst [vmem:[#allocation4 + $0x754] sm:$0xff] %v2552_v3   ;;  %2557 = vst [vmem:[#allocation4 + $0x75c] sm:$0xf] %v2556_v14  ;;  %v2558_v10 = vld [vmem:[%s20464_s5 + $0x75c] sm:$0xf] }
 0x282   :  { %v2560_v7 = vld [vmem:[%s20464_s5 + $0x770] sm:$0xf]  ;;  %v2562_v6 = vld [vmem:[%s20464_s5 + $0x760] sm:$0xf]  ;;  %2559 = vst [vmem:[#allocation4 + $0x760] sm:$0xf] %v2558_v10 }
 0x283   :  { %2561 = vst [vmem:[#allocation4 + $0x764] sm:$0xf] %v2560_v7  ;;  %2563 = vst [vmem:[#allocation4 + $0x768] sm:$0xf] %v2562_v6  ;;  %v2564_v2 = vld [vmem:[%s20464_s5 + $0x774] sm:$0xf] }
 0x284   :  { %v2566_v3 = vld [vmem:[%s20464_s5 + $0x764] sm:$0xf]  ;;  %v2568_v14 = vld [vmem:[%s20464_s5 + $0x778] sm:$0xf]  ;;  %2565 = vst [vmem:[#allocation4 + $0x76c] sm:$0xf] %v2564_v2 }
 0x285   :  { %2567 = vst [vmem:[#allocation4 + $0x770] sm:$0xf] %v2566_v3  ;;  %2569 = vst [vmem:[#allocation4 + $0x774] sm:$0xf] %v2568_v14  ;;  %v2570_v10 = vld [vmem:[%s20464_s5 + $0x768] sm:$0xf] }
 0x286   :  { %v2572_v7 = vld [vmem:[%s20464_s5 + $0x77c] sm:$0xff]   ;;  %v2576_v6 = vld [vmem:[%s20464_s5 + $0x794] sm:$0xf]  ;;  %2571 = vst [vmem:[#allocation4 + $0x778] sm:$0xf] %v2570_v10 }
 0x287   :  { %2573 = vst [vmem:[#allocation4 + $0x77c] sm:$0xff] %v2572_v7   ;;  %2577 = vst [vmem:[#allocation4 + $0x784] sm:$0xf] %v2576_v6  ;;  %v2578_v2 = vld [vmem:[%s20464_s5 + $0x784] sm:$0xf] }
 0x288   :  { %v2580_v3 = vld [vmem:[%s20464_s5 + $0x798] sm:$0xf]  ;;  %v2582_v14 = vld [vmem:[%s20464_s5 + $0x788] sm:$0xf]  ;;  %2579 = vst [vmem:[#allocation4 + $0x788] sm:$0xf] %v2578_v2 }
 0x289   :  { %2581 = vst [vmem:[#allocation4 + $0x78c] sm:$0xf] %v2580_v3  ;;  %2583 = vst [vmem:[#allocation4 + $0x790] sm:$0xf] %v2582_v14  ;;  %v2584_v10 = vld [vmem:[%s20464_s5 + $0x79c] sm:$0xf] }
 0x28a   :  { %v2586_v7 = vld [vmem:[%s20464_s5 + $0x78c] sm:$0xf]  ;;  %v2588_v6 = vld [vmem:[%s20464_s5 + $0x7a0] sm:$0xf]  ;;  %2585 = vst [vmem:[#allocation4 + $0x794] sm:$0xf] %v2584_v10 }
 0x28b   :  { %2587 = vst [vmem:[#allocation4 + $0x798] sm:$0xf] %v2586_v7  ;;  %2589 = vst [vmem:[#allocation4 + $0x79c] sm:$0xf] %v2588_v6  ;;  %v2590_v2 = vld [vmem:[%s20464_s5 + $0x790] sm:$0xf] }
 0x28c   :  { %v2592_v3 = vld [vmem:[%s20464_s5 + $0x7a4] sm:$0xff]   ;;  %v2596_v14 = vld [vmem:[%s20464_s5 + $0x7bc] sm:$0xf]  ;;  %2591 = vst [vmem:[#allocation4 + $0x7a0] sm:$0xf] %v2590_v2 }
 0x28d   :  { %2593 = vst [vmem:[#allocation4 + $0x7a4] sm:$0xff] %v2592_v3   ;;  %2597 = vst [vmem:[#allocation4 + $0x7ac] sm:$0xf] %v2596_v14  ;;  %v2598_v10 = vld [vmem:[%s20464_s5 + $0x7ac] sm:$0xf] }
 0x28e   :  { %v2600_v7 = vld [vmem:[%s20464_s5 + $0x7c0] sm:$0xf]  ;;  %v2602_v6 = vld [vmem:[%s20464_s5 + $0x7b0] sm:$0xf]  ;;  %2599 = vst [vmem:[#allocation4 + $0x7b0] sm:$0xf] %v2598_v10 }
 0x28f   :  { %2601 = vst [vmem:[#allocation4 + $0x7b4] sm:$0xf] %v2600_v7  ;;  %2603 = vst [vmem:[#allocation4 + $0x7b8] sm:$0xf] %v2602_v6  ;;  %v2604_v2 = vld [vmem:[%s20464_s5 + $0x7c4] sm:$0xf] }
 0x290   :  { %v2606_v3 = vld [vmem:[%s20464_s5 + $0x7b4] sm:$0xf]  ;;  %v2608_v14 = vld [vmem:[%s20464_s5 + $0x7c8] sm:$0xf]  ;;  %2605 = vst [vmem:[#allocation4 + $0x7bc] sm:$0xf] %v2604_v2 }
 0x291   :  { %2607 = vst [vmem:[#allocation4 + $0x7c0] sm:$0xf] %v2606_v3  ;;  %2609 = vst [vmem:[#allocation4 + $0x7c4] sm:$0xf] %v2608_v14  ;;  %v2610_v10 = vld [vmem:[%s20464_s5 + $0x7b8] sm:$0xf] }
 0x292   :  { %v2612_v7 = vld [vmem:[%s20464_s5 + $0x7cc] sm:$0xf]  ;;  %2611 = vst [vmem:[#allocation4 + $0x7c8] sm:$0xf] %v2610_v10 }
 0x293   :  { %2613 = vst [vmem:[#allocation4 + $0x7cc] sm:$0xf] %v2612_v7 }
 0x294   :  { %3644 = vsyncadd [#allocation7 + $0x2], 32000  ;;  %v18265_v6 = vld [vmem:[%s20466_s7] sm:$0xff]  ;;  %v18270_v2 = vld [vmem:[%s20466_s7 + $0x8] sm:$0xff] }
 0x295   :  { %21110 = vst [vmem:[#allocation262_spill] sm:$0xff] %v18265_v6  ;;  %21111 = vst [vmem:[#allocation263_spill] sm:$0xff] %v18270_v2  ;;  %v18275_v3 = vld [vmem:[%s20466_s7 + $0x10] sm:$0xff]  ;;  %v18280_v14 = vld [vmem:[%s20466_s7 + $0x18] sm:$0xff] }
 0x296   :  { %21112 = vst [vmem:[#allocation264_spill] sm:$0xff] %v18275_v3  ;;  %21113 = vst [vmem:[#allocation265_spill] sm:$0xff] %v18280_v14  ;;  %v18285_v10 = vld [vmem:[%s20466_s7 + $0x20] sm:$0xff]  ;;  %v18290_v7 = vld [vmem:[%s20466_s7 + $0x28] sm:$0xff] }
 0x297   :  { %21114 = vst [vmem:[#allocation266_spill] sm:$0xff] %v18285_v10  ;;  %21115 = vst [vmem:[#allocation267_spill] sm:$0xff] %v18290_v7  ;;  %v18295_v2 = vld [vmem:[%s20466_s7 + $0x30] sm:$0xff]  ;;  %v18300_v6 = vld [vmem:[%s20466_s7 + $0x38] sm:$0xff] }
 0x298   :  { %21116 = vst [vmem:[#allocation268_spill] sm:$0xff] %v18295_v2  ;;  %21117 = vst [vmem:[#allocation269_spill] sm:$0xff] %v18300_v6  ;;  %v18305_v14 = vld [vmem:[%s20466_s7 + $0x40] sm:$0xff]  ;;  %v18310_v10 = vld [vmem:[%s20466_s7 + $0x48] sm:$0xff] }
 0x299   :  { %21118 = vst [vmem:[#allocation270_spill] sm:$0xff] %v18305_v14  ;;  %21119 = vst [vmem:[#allocation271_spill] sm:$0xff] %v18310_v10  ;;  %v18315_v7 = vld [vmem:[%s20466_s7 + $0x50] sm:$0xff]  ;;  %v18320_v2 = vld [vmem:[%s20466_s7 + $0x58] sm:$0xff] }
 0x29a   :  { %21120 = vst [vmem:[#allocation272_spill] sm:$0xff] %v18315_v7  ;;  %21121 = vst [vmem:[#allocation273_spill] sm:$0xff] %v18320_v2  ;;  %v18325_v6 = vld [vmem:[%s20466_s7 + $0x60] sm:$0xff]  ;;  %v18330_v14 = vld [vmem:[%s20466_s7 + $0x68] sm:$0xff] }
 0x29b   :  { %21122 = vst [vmem:[#allocation274_spill] sm:$0xff] %v18325_v6  ;;  %21123 = vst [vmem:[#allocation275_spill] sm:$0xff] %v18330_v14  ;;  %v18335_v10 = vld [vmem:[%s20466_s7 + $0x70] sm:$0xff]  ;;  %v18340_v7 = vld [vmem:[%s20466_s7 + $0x78] sm:$0xff] }
 0x29c   :  { %21124 = vst [vmem:[#allocation276_spill] sm:$0xff] %v18335_v10  ;;  %21125 = vst [vmem:[#allocation277_spill] sm:$0xff] %v18340_v7  ;;  %v18345_v2 = vld [vmem:[%s20466_s7 + $0x80] sm:$0xff]  ;;  %v18350_v6 = vld [vmem:[%s20466_s7 + $0x88] sm:$0xff] }
 0x29d   :  { %21126 = vst [vmem:[#allocation278_spill] sm:$0xff] %v18345_v2  ;;  %21127 = vst [vmem:[#allocation279_spill] sm:$0xff] %v18350_v6  ;;  %v18355_v14 = vld [vmem:[%s20466_s7 + $0x90] sm:$0xff]  ;;  %v18360_v10 = vld [vmem:[%s20466_s7 + $0x98] sm:$0xff] }
 0x29e   :  { %21128 = vst [vmem:[#allocation280_spill] sm:$0xff] %v18355_v14  ;;  %21129 = vst [vmem:[#allocation281_spill] sm:$0xff] %v18360_v10  ;;  %v18365_v7 = vld [vmem:[%s20466_s7 + $0xa0] sm:$0xff]  ;;  %v18370_v2 = vld [vmem:[%s20466_s7 + $0xa8] sm:$0xff] }
 0x29f   :  { %21130 = vst [vmem:[#allocation282_spill] sm:$0xff] %v18365_v7  ;;  %21131 = vst [vmem:[#allocation283_spill] sm:$0xff] %v18370_v2  ;;  %v18375_v6 = vld [vmem:[%s20466_s7 + $0xb0] sm:$0xff]  ;;  %v18380_v14 = vld [vmem:[%s20466_s7 + $0xb8] sm:$0xff] }
 0x2a0   :  { %21132 = vst [vmem:[#allocation284_spill] sm:$0xff] %v18375_v6  ;;  %21133 = vst [vmem:[#allocation285_spill] sm:$0xff] %v18380_v14  ;;  %v18385_v10 = vld [vmem:[%s20466_s7 + $0xc0] sm:$0xff]  ;;  %v18390_v7 = vld [vmem:[%s20466_s7 + $0xc8] sm:$0xff] }
 0x2a1   :  { %21134 = vst [vmem:[#allocation286_spill] sm:$0xff] %v18385_v10  ;;  %21135 = vst [vmem:[#allocation287_spill] sm:$0xff] %v18390_v7  ;;  %v18395_v2 = vld [vmem:[%s20466_s7 + $0xd0] sm:$0xff]  ;;  %v18400_v6 = vld [vmem:[%s20466_s7 + $0xd8] sm:$0xff] }
 0x2a2   :  { %21136 = vst [vmem:[#allocation288_spill] sm:$0xff] %v18395_v2  ;;  %21137 = vst [vmem:[#allocation289_spill] sm:$0xff] %v18400_v6  ;;  %v18405_v14 = vld [vmem:[%s20466_s7 + $0xe0] sm:$0xff]  ;;  %v18410_v10 = vld [vmem:[%s20466_s7 + $0xe8] sm:$0xff] }
 0x2a3   :  { %21138 = vst [vmem:[#allocation290_spill] sm:$0xff] %v18405_v14  ;;  %21139 = vst [vmem:[#allocation291_spill] sm:$0xff] %v18410_v10  ;;  %v18415_v7 = vld [vmem:[%s20466_s7 + $0xf0] sm:$0xff]  ;;  %v18420_v2 = vld [vmem:[%s20466_s7 + $0xf8] sm:$0xff] }
 0x2a4   :  { %21140 = vst [vmem:[#allocation292_spill] sm:$0xff] %v18415_v7  ;;  %21141 = vst [vmem:[#allocation293_spill] sm:$0xff] %v18420_v2  ;;  %v18425_v6 = vld [vmem:[%s20466_s7 + $0x100] sm:$0xff]  ;;  %v18430_v14 = vld [vmem:[%s20466_s7 + $0x108] sm:$0xff] }
 0x2a5   :  { %21142 = vst [vmem:[#allocation294_spill] sm:$0xff] %v18425_v6  ;;  %21143 = vst [vmem:[#allocation295_spill] sm:$0xff] %v18430_v14  ;;  %v18435_v10 = vld [vmem:[%s20466_s7 + $0x110] sm:$0xff]  ;;  %v18440_v7 = vld [vmem:[%s20466_s7 + $0x118] sm:$0xff] }
 0x2a6   :  { %21144 = vst [vmem:[#allocation296_spill] sm:$0xff] %v18435_v10  ;;  %21145 = vst [vmem:[#allocation297_spill] sm:$0xff] %v18440_v7  ;;  %v18445_v2 = vld [vmem:[%s20466_s7 + $0x120] sm:$0xff]  ;;  %v18450_v6 = vld [vmem:[%s20466_s7 + $0x128] sm:$0xff] }
 0x2a7   :  { %21146 = vst [vmem:[#allocation298_spill] sm:$0xff] %v18445_v2  ;;  %21147 = vst [vmem:[#allocation299_spill] sm:$0xff] %v18450_v6  ;;  %v18455_v14 = vld [vmem:[%s20466_s7 + $0x130] sm:$0xff]  ;;  %v18460_v10 = vld [vmem:[%s20466_s7 + $0x138] sm:$0xff] }
 0x2a8   :  { %21148 = vst [vmem:[#allocation300_spill] sm:$0xff] %v18455_v14  ;;  %21149 = vst [vmem:[#allocation301_spill] sm:$0xff] %v18460_v10  ;;  %v18465_v7 = vld [vmem:[%s20466_s7 + $0x140] sm:$0xff]  ;;  %v18470_v2 = vld [vmem:[%s20466_s7 + $0x148] sm:$0xff] }
 0x2a9   :  { %21150 = vst [vmem:[#allocation302_spill] sm:$0xff] %v18465_v7  ;;  %21151 = vst [vmem:[#allocation303_spill] sm:$0xff] %v18470_v2  ;;  %v18475_v6 = vld [vmem:[%s20466_s7 + $0x150] sm:$0xff]  ;;  %v18480_v14 = vld [vmem:[%s20466_s7 + $0x158] sm:$0xff] }
 0x2aa   :  { %21152 = vst [vmem:[#allocation304_spill] sm:$0xff] %v18475_v6  ;;  %21153 = vst [vmem:[#allocation305_spill] sm:$0xff] %v18480_v14  ;;  %v18485_v10 = vld [vmem:[%s20466_s7 + $0x160] sm:$0xff]  ;;  %v18490_v7 = vld [vmem:[%s20466_s7 + $0x168] sm:$0xff] }
 0x2ab   :  { %21154 = vst [vmem:[#allocation306_spill] sm:$0xff] %v18485_v10  ;;  %21155 = vst [vmem:[#allocation307_spill] sm:$0xff] %v18490_v7  ;;  %v18495_v2 = vld [vmem:[%s20466_s7 + $0x170] sm:$0xff]  ;;  %v18500_v6 = vld [vmem:[%s20466_s7 + $0x178] sm:$0xff] }
 0x2ac   :  { %21156 = vst [vmem:[#allocation308_spill] sm:$0xff] %v18495_v2  ;;  %21157 = vst [vmem:[#allocation309_spill] sm:$0xff] %v18500_v6  ;;  %v18505_v14 = vld [vmem:[%s20466_s7 + $0x180] sm:$0xff]  ;;  %v18510_v10 = vld [vmem:[%s20466_s7 + $0x188] sm:$0xff] }
 0x2ad   :  { %21158 = vst [vmem:[#allocation310_spill] sm:$0xff] %v18505_v14  ;;  %21159 = vst [vmem:[#allocation311_spill] sm:$0xff] %v18510_v10  ;;  %v18515_v7 = vld [vmem:[%s20466_s7 + $0x190] sm:$0xff]  ;;  %v18520_v2 = vld [vmem:[%s20466_s7 + $0x198] sm:$0xff] }
 0x2ae   :  { %21160 = vst [vmem:[#allocation312_spill] sm:$0xff] %v18515_v7  ;;  %21161 = vst [vmem:[#allocation313_spill] sm:$0xff] %v18520_v2  ;;  %v18525_v6 = vld [vmem:[%s20466_s7 + $0x1a0] sm:$0xff]  ;;  %v18530_v14 = vld [vmem:[%s20466_s7 + $0x1a8] sm:$0xff] }
 0x2af   :  { %21162 = vst [vmem:[#allocation314_spill] sm:$0xff] %v18525_v6  ;;  %21163 = vst [vmem:[#allocation315_spill] sm:$0xff] %v18530_v14  ;;  %v18535_v10 = vld [vmem:[%s20466_s7 + $0x1b0] sm:$0xff]  ;;  %v18540_v7 = vld [vmem:[%s20466_s7 + $0x1b8] sm:$0xff] }
 0x2b0   :  { %21164 = vst [vmem:[#allocation316_spill] sm:$0xff] %v18535_v10  ;;  %21165 = vst [vmem:[#allocation317_spill] sm:$0xff] %v18540_v7  ;;  %v18545_v2 = vld [vmem:[%s20466_s7 + $0x1c0] sm:$0xff]  ;;  %v18550_v6 = vld [vmem:[%s20466_s7 + $0x1c8] sm:$0xff] }
 0x2b1   :  { %21166 = vst [vmem:[#allocation318_spill] sm:$0xff] %v18545_v2  ;;  %21167 = vst [vmem:[#allocation319_spill] sm:$0xff] %v18550_v6  ;;  %v18555_v14 = vld [vmem:[%s20466_s7 + $0x1d0] sm:$0xff]  ;;  %v18560_v10 = vld [vmem:[%s20466_s7 + $0x1d8] sm:$0xff] }
 0x2b2   :  { %21168 = vst [vmem:[#allocation320_spill] sm:$0xff] %v18555_v14  ;;  %21169 = vst [vmem:[#allocation321_spill] sm:$0xff] %v18560_v10  ;;  %v18565_v7 = vld [vmem:[%s20466_s7 + $0x1e0] sm:$0xff]  ;;  %v18570_v2 = vld [vmem:[%s20466_s7 + $0x1e8] sm:$0xff] }
 0x2b3   :  { %21170 = vst [vmem:[#allocation322_spill] sm:$0xff] %v18565_v7  ;;  %21171 = vst [vmem:[#allocation323_spill] sm:$0xff] %v18570_v2  ;;  %v18575_v6 = vld [vmem:[%s20466_s7 + $0x1f0] sm:$0xff]  ;;  %v18580_v14 = vld [vmem:[%s20466_s7 + $0x1f8] sm:$0xff] }
 0x2b4   :  { %21172 = vst [vmem:[#allocation324_spill] sm:$0xff] %v18575_v6  ;;  %21173 = vst [vmem:[#allocation325_spill] sm:$0xff] %v18580_v14  ;;  %v18585_v10 = vld [vmem:[%s20466_s7 + $0x200] sm:$0xff]  ;;  %v18590_v7 = vld [vmem:[%s20466_s7 + $0x208] sm:$0xff] }
 0x2b5   :  { %21174 = vst [vmem:[#allocation326_spill] sm:$0xff] %v18585_v10  ;;  %21175 = vst [vmem:[#allocation327_spill] sm:$0xff] %v18590_v7  ;;  %v18595_v2 = vld [vmem:[%s20466_s7 + $0x210] sm:$0xff]  ;;  %v18600_v6 = vld [vmem:[%s20466_s7 + $0x218] sm:$0xff] }
 0x2b6   :  { %21176 = vst [vmem:[#allocation328_spill] sm:$0xff] %v18595_v2  ;;  %21177 = vst [vmem:[#allocation329_spill] sm:$0xff] %v18600_v6  ;;  %v18605_v14 = vld [vmem:[%s20466_s7 + $0x220] sm:$0xff]  ;;  %v18610_v10 = vld [vmem:[%s20466_s7 + $0x228] sm:$0xff] }
 0x2b7   :  { %21178 = vst [vmem:[#allocation330_spill] sm:$0xff] %v18605_v14  ;;  %21179 = vst [vmem:[#allocation331_spill] sm:$0xff] %v18610_v10  ;;  %v18615_v7 = vld [vmem:[%s20466_s7 + $0x230] sm:$0xff]  ;;  %v18620_v2 = vld [vmem:[%s20466_s7 + $0x238] sm:$0xff] }
 0x2b8   :  { %21180 = vst [vmem:[#allocation332_spill] sm:$0xff] %v18615_v7  ;;  %21181 = vst [vmem:[#allocation333_spill] sm:$0xff] %v18620_v2  ;;  %v18625_v6 = vld [vmem:[%s20466_s7 + $0x240] sm:$0xff]  ;;  %v18630_v14 = vld [vmem:[%s20466_s7 + $0x248] sm:$0xff] }
 0x2b9   :  { %21182 = vst [vmem:[#allocation334_spill] sm:$0xff] %v18625_v6  ;;  %21183 = vst [vmem:[#allocation335_spill] sm:$0xff] %v18630_v14  ;;  %v18635_v10 = vld [vmem:[%s20466_s7 + $0x250] sm:$0xff]  ;;  %v18640_v7 = vld [vmem:[%s20466_s7 + $0x258] sm:$0xff] }
 0x2ba   :  { %21184 = vst [vmem:[#allocation336_spill] sm:$0xff] %v18635_v10  ;;  %21185 = vst [vmem:[#allocation337_spill] sm:$0xff] %v18640_v7  ;;  %v18645_v2 = vld [vmem:[%s20466_s7 + $0x260] sm:$0xff]  ;;  %v18650_v6 = vld [vmem:[%s20466_s7 + $0x268] sm:$0xff] }
 0x2bb   :  { %21186 = vst [vmem:[#allocation338_spill] sm:$0xff] %v18645_v2  ;;  %21187 = vst [vmem:[#allocation339_spill] sm:$0xff] %v18650_v6  ;;  %v18655_v14 = vld [vmem:[%s20466_s7 + $0x270] sm:$0xff]  ;;  %v18660_v10 = vld [vmem:[%s20466_s7 + $0x278] sm:$0xff] }
 0x2bc   :  { %21188 = vst [vmem:[#allocation340_spill] sm:$0xff] %v18655_v14  ;;  %21189 = vst [vmem:[#allocation341_spill] sm:$0xff] %v18660_v10  ;;  %v18665_v7 = vld [vmem:[%s20466_s7 + $0x280] sm:$0xff]  ;;  %v18670_v2 = vld [vmem:[%s20466_s7 + $0x288] sm:$0xff] }
 0x2bd   :  { %21190 = vst [vmem:[#allocation342_spill] sm:$0xff] %v18665_v7  ;;  %21191 = vst [vmem:[#allocation343_spill] sm:$0xff] %v18670_v2  ;;  %v18675_v6 = vld [vmem:[%s20466_s7 + $0x290] sm:$0xff]  ;;  %v18680_v14 = vld [vmem:[%s20466_s7 + $0x298] sm:$0xff] }
 0x2be   :  { %21192 = vst [vmem:[#allocation344_spill] sm:$0xff] %v18675_v6  ;;  %21193 = vst [vmem:[#allocation345_spill] sm:$0xff] %v18680_v14  ;;  %v18685_v10 = vld [vmem:[%s20466_s7 + $0x2a0] sm:$0xff]  ;;  %v18690_v7 = vld [vmem:[%s20466_s7 + $0x2a8] sm:$0xff] }
 0x2bf   :  { %21194 = vst [vmem:[#allocation346_spill] sm:$0xff] %v18685_v10  ;;  %21195 = vst [vmem:[#allocation347_spill] sm:$0xff] %v18690_v7  ;;  %v18695_v2 = vld [vmem:[%s20466_s7 + $0x2b0] sm:$0xff]  ;;  %v18700_v6 = vld [vmem:[%s20466_s7 + $0x2b8] sm:$0xff] }
 0x2c0   :  { %21196 = vst [vmem:[#allocation348_spill] sm:$0xff] %v18695_v2  ;;  %21197 = vst [vmem:[#allocation349_spill] sm:$0xff] %v18700_v6  ;;  %v18705_v14 = vld [vmem:[%s20466_s7 + $0x2c0] sm:$0xff]  ;;  %v18710_v10 = vld [vmem:[%s20466_s7 + $0x2c8] sm:$0xff] }
 0x2c1   :  { %21198 = vst [vmem:[#allocation350_spill] sm:$0xff] %v18705_v14  ;;  %21199 = vst [vmem:[#allocation351_spill] sm:$0xff] %v18710_v10  ;;  %v18715_v7 = vld [vmem:[%s20466_s7 + $0x2d0] sm:$0xff]  ;;  %v18720_v2 = vld [vmem:[%s20466_s7 + $0x2d8] sm:$0xff] }
 0x2c2   :  { %21200 = vst [vmem:[#allocation352_spill] sm:$0xff] %v18715_v7  ;;  %21201 = vst [vmem:[#allocation353_spill] sm:$0xff] %v18720_v2  ;;  %v18725_v6 = vld [vmem:[%s20466_s7 + $0x2e0] sm:$0xff]  ;;  %v18730_v14 = vld [vmem:[%s20466_s7 + $0x2e8] sm:$0xff] }
 0x2c3   :  { %21202 = vst [vmem:[#allocation354_spill] sm:$0xff] %v18725_v6  ;;  %21203 = vst [vmem:[#allocation355_spill] sm:$0xff] %v18730_v14  ;;  %v18735_v10 = vld [vmem:[%s20466_s7 + $0x2f0] sm:$0xff]  ;;  %v18740_v7 = vld [vmem:[%s20466_s7 + $0x2f8] sm:$0xff] }
 0x2c4   :  { %21204 = vst [vmem:[#allocation356_spill] sm:$0xff] %v18735_v10  ;;  %21205 = vst [vmem:[#allocation357_spill] sm:$0xff] %v18740_v7  ;;  %v18745_v2 = vld [vmem:[%s20466_s7 + $0x300] sm:$0xff]  ;;  %v18750_v6 = vld [vmem:[%s20466_s7 + $0x308] sm:$0xff] }
 0x2c5   :  { %21206 = vst [vmem:[#allocation358_spill] sm:$0xff] %v18745_v2  ;;  %21207 = vst [vmem:[#allocation359_spill] sm:$0xff] %v18750_v6  ;;  %v18755_v14 = vld [vmem:[%s20466_s7 + $0x310] sm:$0xff]  ;;  %v18760_v10 = vld [vmem:[%s20466_s7 + $0x318] sm:$0xff] }
 0x2c6   :  { %21208 = vst [vmem:[#allocation360_spill] sm:$0xff] %v18755_v14  ;;  %21209 = vst [vmem:[#allocation361_spill] sm:$0xff] %v18760_v10  ;;  %v18765_v7 = vld [vmem:[%s20466_s7 + $0x320] sm:$0xff]  ;;  %v18770_v2 = vld [vmem:[%s20466_s7 + $0x328] sm:$0xff] }
 0x2c7   :  { %21210 = vst [vmem:[#allocation362_spill] sm:$0xff] %v18765_v7  ;;  %21211 = vst [vmem:[#allocation363_spill] sm:$0xff] %v18770_v2  ;;  %v18775_v6 = vld [vmem:[%s20466_s7 + $0x330] sm:$0xff]  ;;  %v18780_v14 = vld [vmem:[%s20466_s7 + $0x338] sm:$0xff] }
 0x2c8   :  { %21212 = vst [vmem:[#allocation364_spill] sm:$0xff] %v18775_v6  ;;  %21213 = vst [vmem:[#allocation365_spill] sm:$0xff] %v18780_v14  ;;  %v18785_v10 = vld [vmem:[%s20466_s7 + $0x340] sm:$0xff]  ;;  %v18790_v7 = vld [vmem:[%s20466_s7 + $0x348] sm:$0xff] }
 0x2c9   :  { %21214 = vst [vmem:[#allocation366_spill] sm:$0xff] %v18785_v10  ;;  %21215 = vst [vmem:[#allocation367_spill] sm:$0xff] %v18790_v7  ;;  %v18795_v2 = vld [vmem:[%s20466_s7 + $0x350] sm:$0xff]  ;;  %v18800_v6 = vld [vmem:[%s20466_s7 + $0x358] sm:$0xff] }
 0x2ca   :  { %21216 = vst [vmem:[#allocation368_spill] sm:$0xff] %v18795_v2  ;;  %21217 = vst [vmem:[#allocation369_spill] sm:$0xff] %v18800_v6  ;;  %v18805_v14 = vld [vmem:[%s20466_s7 + $0x360] sm:$0xff]  ;;  %v18810_v10 = vld [vmem:[%s20466_s7 + $0x368] sm:$0xff] }
 0x2cb   :  { %21218 = vst [vmem:[#allocation370_spill] sm:$0xff] %v18805_v14  ;;  %21219 = vst [vmem:[#allocation371_spill] sm:$0xff] %v18810_v10  ;;  %v18815_v7 = vld [vmem:[%s20466_s7 + $0x370] sm:$0xff]  ;;  %v18820_v2 = vld [vmem:[%s20466_s7 + $0x378] sm:$0xff] }
 0x2cc   :  { %21220 = vst [vmem:[#allocation372_spill] sm:$0xff] %v18815_v7  ;;  %21221 = vst [vmem:[#allocation373_spill] sm:$0xff] %v18820_v2  ;;  %v18825_v6 = vld [vmem:[%s20466_s7 + $0x380] sm:$0xff]  ;;  %v18830_v14 = vld [vmem:[%s20466_s7 + $0x388] sm:$0xff] }
 0x2cd   :  { %21222 = vst [vmem:[#allocation374_spill] sm:$0xff] %v18825_v6  ;;  %21223 = vst [vmem:[#allocation375_spill] sm:$0xff] %v18830_v14  ;;  %v18835_v10 = vld [vmem:[%s20466_s7 + $0x390] sm:$0xff]  ;;  %v18840_v7 = vld [vmem:[%s20466_s7 + $0x398] sm:$0xff] }
 0x2ce   :  { %21224 = vst [vmem:[#allocation376_spill] sm:$0xff] %v18835_v10  ;;  %21225 = vst [vmem:[#allocation377_spill] sm:$0xff] %v18840_v7  ;;  %v18845_v2 = vld [vmem:[%s20466_s7 + $0x3a0] sm:$0xff]  ;;  %v18850_v6 = vld [vmem:[%s20466_s7 + $0x3a8] sm:$0xff] }
 0x2cf   :  { %21226 = vst [vmem:[#allocation378_spill] sm:$0xff] %v18845_v2  ;;  %21227 = vst [vmem:[#allocation379_spill] sm:$0xff] %v18850_v6  ;;  %v18855_v14 = vld [vmem:[%s20466_s7 + $0x3b0] sm:$0xff]  ;;  %v18860_v10 = vld [vmem:[%s20466_s7 + $0x3b8] sm:$0xff] }
 0x2d0   :  { %21228 = vst [vmem:[#allocation380_spill] sm:$0xff] %v18855_v14  ;;  %21229 = vst [vmem:[#allocation381_spill] sm:$0xff] %v18860_v10  ;;  %v18865_v7 = vld [vmem:[%s20466_s7 + $0x3c0] sm:$0xff]  ;;  %v18870_v2 = vld [vmem:[%s20466_s7 + $0x3c8] sm:$0xff] }
 0x2d1   :  { %21230 = vst [vmem:[#allocation382_spill] sm:$0xff] %v18865_v7  ;;  %21231 = vst [vmem:[#allocation383_spill] sm:$0xff] %v18870_v2  ;;  %v18875_v6 = vld [vmem:[%s20466_s7 + $0x3d0] sm:$0xff]  ;;  %v18880_v14 = vld [vmem:[%s20466_s7 + $0x3d8] sm:$0xff] }
 0x2d2   :  { %21232 = vst [vmem:[#allocation384_spill] sm:$0xff] %v18875_v6  ;;  %21233 = vst [vmem:[#allocation385_spill] sm:$0xff] %v18880_v14  ;;  %v18885_v10 = vld [vmem:[%s20466_s7 + $0x3e0] sm:$0xff]  ;;  %v18890_v7 = vld [vmem:[%s20466_s7 + $0x3e8] sm:$0xff] }
 0x2d3   :  { %21234 = vst [vmem:[#allocation386_spill] sm:$0xff] %v18885_v10  ;;  %21235 = vst [vmem:[#allocation387_spill] sm:$0xff] %v18890_v7  ;;  %v18895_v2 = vld [vmem:[%s20466_s7 + $0x3f0] sm:$0xff]  ;;  %v18900_v6 = vld [vmem:[%s20466_s7 + $0x3f8] sm:$0xff] }
 0x2d4   :  { %21236 = vst [vmem:[#allocation388_spill] sm:$0xff] %v18895_v2  ;;  %21237 = vst [vmem:[#allocation389_spill] sm:$0xff] %v18900_v6  ;;  %v18905_v14 = vld [vmem:[%s20466_s7 + $0x400] sm:$0xff]  ;;  %v18910_v10 = vld [vmem:[%s20466_s7 + $0x408] sm:$0xff] }
 0x2d5   :  { %21238 = vst [vmem:[#allocation390_spill] sm:$0xff] %v18905_v14  ;;  %21239 = vst [vmem:[#allocation391_spill] sm:$0xff] %v18910_v10  ;;  %v18915_v7 = vld [vmem:[%s20466_s7 + $0x410] sm:$0xff]  ;;  %v18920_v2 = vld [vmem:[%s20466_s7 + $0x418] sm:$0xff] }
 0x2d6   :  { %21240 = vst [vmem:[#allocation392_spill] sm:$0xff] %v18915_v7  ;;  %21241 = vst [vmem:[#allocation393_spill] sm:$0xff] %v18920_v2  ;;  %v18925_v6 = vld [vmem:[%s20466_s7 + $0x420] sm:$0xff]  ;;  %v18930_v14 = vld [vmem:[%s20466_s7 + $0x428] sm:$0xff] }
 0x2d7   :  { %21242 = vst [vmem:[#allocation394_spill] sm:$0xff] %v18925_v6  ;;  %21243 = vst [vmem:[#allocation395_spill] sm:$0xff] %v18930_v14  ;;  %v18935_v10 = vld [vmem:[%s20466_s7 + $0x430] sm:$0xff]  ;;  %v18940_v7 = vld [vmem:[%s20466_s7 + $0x438] sm:$0xff] }
 0x2d8   :  { %21244 = vst [vmem:[#allocation396_spill] sm:$0xff] %v18935_v10  ;;  %21245 = vst [vmem:[#allocation397_spill] sm:$0xff] %v18940_v7  ;;  %v18945_v2 = vld [vmem:[%s20466_s7 + $0x440] sm:$0xff]  ;;  %v18950_v6 = vld [vmem:[%s20466_s7 + $0x448] sm:$0xff] }
 0x2d9   :  { %21246 = vst [vmem:[#allocation398_spill] sm:$0xff] %v18945_v2  ;;  %21247 = vst [vmem:[#allocation399_spill] sm:$0xff] %v18950_v6  ;;  %v18955_v14 = vld [vmem:[%s20466_s7 + $0x450] sm:$0xff]  ;;  %v18960_v10 = vld [vmem:[%s20466_s7 + $0x458] sm:$0xff] }
 0x2da   :  { %21248 = vst [vmem:[#allocation400_spill] sm:$0xff] %v18955_v14  ;;  %21249 = vst [vmem:[#allocation401_spill] sm:$0xff] %v18960_v10  ;;  %v18965_v7 = vld [vmem:[%s20466_s7 + $0x460] sm:$0xff]  ;;  %v18970_v2 = vld [vmem:[%s20466_s7 + $0x468] sm:$0xff] }
 0x2db   :  { %21250 = vst [vmem:[#allocation402_spill] sm:$0xff] %v18965_v7  ;;  %21251 = vst [vmem:[#allocation403_spill] sm:$0xff] %v18970_v2  ;;  %v18975_v6 = vld [vmem:[%s20466_s7 + $0x470] sm:$0xff]  ;;  %v18980_v14 = vld [vmem:[%s20466_s7 + $0x478] sm:$0xff] }
 0x2dc   :  { %21252 = vst [vmem:[#allocation404_spill] sm:$0xff] %v18975_v6  ;;  %21253 = vst [vmem:[#allocation405_spill] sm:$0xff] %v18980_v14  ;;  %v18985_v10 = vld [vmem:[%s20466_s7 + $0x480] sm:$0xff]  ;;  %v18990_v7 = vld [vmem:[%s20466_s7 + $0x488] sm:$0xff] }
 0x2dd   :  { %21254 = vst [vmem:[#allocation406_spill] sm:$0xff] %v18985_v10  ;;  %21255 = vst [vmem:[#allocation407_spill] sm:$0xff] %v18990_v7  ;;  %v18995_v2 = vld [vmem:[%s20466_s7 + $0x490] sm:$0xff]  ;;  %v19000_v6 = vld [vmem:[%s20466_s7 + $0x498] sm:$0xff] }
 0x2de   :  { %21256 = vst [vmem:[#allocation408_spill] sm:$0xff] %v18995_v2  ;;  %21257 = vst [vmem:[#allocation409_spill] sm:$0xff] %v19000_v6  ;;  %v19005_v14 = vld [vmem:[%s20466_s7 + $0x4a0] sm:$0xff]  ;;  %v19010_v10 = vld [vmem:[%s20466_s7 + $0x4a8] sm:$0xff] }
 0x2df   :  { %21258 = vst [vmem:[#allocation410_spill] sm:$0xff] %v19005_v14  ;;  %21259 = vst [vmem:[#allocation411_spill] sm:$0xff] %v19010_v10 }
 0x2e0   :  { %3985 = vsyncadd [#allocation7 + $0x3], 19200  ;;  %v19015_v7 = vld [vmem:[%s20468_s9] sm:$0xff]  ;;  %v19020_v6 = vld [vmem:[%s20468_s9 + $0x8] sm:$0xff] }
 0x2e1   :  { %21260 = vst [vmem:[#allocation412_spill] sm:$0xff] %v19015_v7  ;;  %21261 = vst [vmem:[#allocation413_spill] sm:$0xff] %v19020_v6  ;;  %v19025_v14 = vld [vmem:[%s20468_s9 + $0x10] sm:$0xff]  ;;  %v19030_v10 = vld [vmem:[%s20468_s9 + $0x18] sm:$0xff] }
 0x2e2   :  { %21262 = vst [vmem:[#allocation414_spill] sm:$0xff] %v19025_v14  ;;  %21263 = vst [vmem:[#allocation415_spill] sm:$0xff] %v19030_v10  ;;  %v19035_v2 = vld [vmem:[%s20468_s9 + $0x20] sm:$0xff]  ;;  %v19040_v7 = vld [vmem:[%s20468_s9 + $0x28] sm:$0xff] }
 0x2e3   :  { %21264 = vst [vmem:[#allocation416_spill] sm:$0xff] %v19035_v2  ;;  %21265 = vst [vmem:[#allocation417_spill] sm:$0xff] %v19040_v7  ;;  %v19045_v6 = vld [vmem:[%s20468_s9 + $0x30] sm:$0xff]  ;;  %v19050_v14 = vld [vmem:[%s20468_s9 + $0x38] sm:$0xff] }
 0x2e4   :  { %21266 = vst [vmem:[#allocation418_spill] sm:$0xff] %v19045_v6  ;;  %21267 = vst [vmem:[#allocation419_spill] sm:$0xff] %v19050_v14  ;;  %v19055_v10 = vld [vmem:[%s20468_s9 + $0x40] sm:$0xff]  ;;  %v19060_v2 = vld [vmem:[%s20468_s9 + $0x48] sm:$0xff] }
 0x2e5   :  { %21268 = vst [vmem:[#allocation420_spill] sm:$0xff] %v19055_v10  ;;  %21269 = vst [vmem:[#allocation421_spill] sm:$0xff] %v19060_v2  ;;  %v19065_v7 = vld [vmem:[%s20468_s9 + $0x50] sm:$0xff]  ;;  %v19070_v6 = vld [vmem:[%s20468_s9 + $0x58] sm:$0xff] }
 0x2e6   :  { %21270 = vst [vmem:[#allocation422_spill] sm:$0xff] %v19065_v7  ;;  %21271 = vst [vmem:[#allocation423_spill] sm:$0xff] %v19070_v6  ;;  %v19075_v14 = vld [vmem:[%s20468_s9 + $0x60] sm:$0xff]  ;;  %v19080_v10 = vld [vmem:[%s20468_s9 + $0x68] sm:$0xff] }
 0x2e7   :  { %21272 = vst [vmem:[#allocation424_spill] sm:$0xff] %v19075_v14  ;;  %21273 = vst [vmem:[#allocation425_spill] sm:$0xff] %v19080_v10  ;;  %v19085_v2 = vld [vmem:[%s20468_s9 + $0x70] sm:$0xff]  ;;  %v19090_v7 = vld [vmem:[%s20468_s9 + $0x78] sm:$0xff] }
 0x2e8   :  { %21274 = vst [vmem:[#allocation426_spill] sm:$0xff] %v19085_v2  ;;  %21275 = vst [vmem:[#allocation427_spill] sm:$0xff] %v19090_v7  ;;  %v19095_v6 = vld [vmem:[%s20468_s9 + $0x80] sm:$0xff]  ;;  %v19100_v14 = vld [vmem:[%s20468_s9 + $0x88] sm:$0xff] }
 0x2e9   :  { %21276 = vst [vmem:[#allocation428_spill] sm:$0xff] %v19095_v6  ;;  %21277 = vst [vmem:[#allocation429_spill] sm:$0xff] %v19100_v14  ;;  %v19105_v10 = vld [vmem:[%s20468_s9 + $0x90] sm:$0xff]  ;;  %v19110_v2 = vld [vmem:[%s20468_s9 + $0x98] sm:$0xff] }
 0x2ea   :  { %21278 = vst [vmem:[#allocation430_spill] sm:$0xff] %v19105_v10  ;;  %21279 = vst [vmem:[#allocation431_spill] sm:$0xff] %v19110_v2  ;;  %v19115_v7 = vld [vmem:[%s20468_s9 + $0xa0] sm:$0xff]  ;;  %v19120_v6 = vld [vmem:[%s20468_s9 + $0xa8] sm:$0xff] }
 0x2eb   :  { %21280 = vst [vmem:[#allocation432_spill] sm:$0xff] %v19115_v7  ;;  %21281 = vst [vmem:[#allocation433_spill] sm:$0xff] %v19120_v6  ;;  %v19125_v14 = vld [vmem:[%s20468_s9 + $0xb0] sm:$0xff]  ;;  %v19130_v10 = vld [vmem:[%s20468_s9 + $0xb8] sm:$0xff] }
 0x2ec   :  { %21282 = vst [vmem:[#allocation434_spill] sm:$0xff] %v19125_v14  ;;  %21283 = vst [vmem:[#allocation435_spill] sm:$0xff] %v19130_v10  ;;  %v19135_v2 = vld [vmem:[%s20468_s9 + $0xc0] sm:$0xff] }
 0x2ed   :  { %21284 = vst [vmem:[#allocation436_spill] sm:$0xff] %v19135_v2 }
 0x2ee   :  { %4076 = vsyncadd [#allocation7 + $0x4], 3200  ;;  %v19140_v6 = vld [vmem:[%s20459_s0] sm:$0xff]  ;;  %v19145_v14 = vld [vmem:[%s20459_s0 + $0x8] sm:$0xff]  ;;  %v12170_v7 = vcombine.high %v14098_v0, %v14118_v4  ;;  %v12172_v2 = vcombine.high %v14103_v1, %v14123_v5  ;;  %v12169_v3 = vcombine.low %v14098_v0, %v14118_v4  ;;  %v12171_v18 = vcombine.low %v14103_v1, %v14123_v5 }
 0x2ef   :  { %21285 = vst [vmem:[#allocation437_spill] sm:$0xff] %v19145_v14  ;;  %v19150_v10 = vld [vmem:[%s20459_s0 + $0x10] sm:$0xf] }
 0x2f0   :  { %21286 = vst [vmem:[#allocation438_spill] sm:$0xff] %v19150_v10 }
 0x2f1   :  { %14022 = dma.done.wait [#allocation7], 38400 }
 0x2f2   :  { %14023 = vsyncadd [#allocation7], 4294928896  ;;  %v12178_v14 = vcombine.high %v14138_v8, %v14158_v12  ;;  %v12180_v10 = vcombine.high %v14143_v9, %v14163_v13  ;;  %5972 = vmatprep.subr.bf16.mxu0 %v12170_v7  ;;  %6095 = vmatprep.subr.bf16.mxu1 %v12172_v2  ;;  %v12177_v11 = vcombine.low %v14138_v8, %v14158_v12  ;;  %v21290_v2 = vld [vmem:[#allocation75_spill] sm:$0xff]  ;;  %vm5947_vm0 = vcmask 1043456  }
 0x2f3   :  { %5973 = vmatpush1.bf16.msra.mxu0 %v12169_v3  ;;  %6096 = vmatpush1.bf16.msra.mxu1 %v12171_v18  ;;  %v12179_v0 = vcombine.low %v14143_v9, %v14163_v13  ;;  %v12186_v1 = vcombine.high %v14178_v16, %v14198_v20  ;;  %v12188_v4 = vcombine.high %v14183_v17, %v14203_v21  ;;  %v21294_v7 = vld [vmem:[#allocation83_spill] sm:$0xff]  ;;  %vm5943_vm1 = vcmask 719872  }
 0x2f4   :  { %5974 = vmatprep.subr.bf16.mxu0 %v12178_v14  ;;  %6097 = vmatprep.subr.bf16.mxu1 %v12180_v10  ;;  %v12185_v5 = vcombine.low %v14178_v16, %v14198_v20  ;;  %v12187_v18 = vcombine.low %v14183_v17, %v14203_v21  ;;  %v12194_v8 = vcombine.high %v14218_v24, %v14238_v28 }
 0x2f5   :  { %v12196_v9 = vcombine.high %v14223_v25, %v14243_v29  ;;  %v12195_v12 = vcombine.low %v14223_v25, %v14243_v29  ;;  %v12202_v13 = vcombine.high %v14258_v32, %v14278_v36  ;;  %v12204_v16 = vcombine.high %v14263_v33, %v14283_v37 }
 0x2f6   :  { %v12201_v17 = vcombine.low %v14258_v32, %v14278_v36  ;;  %v12203_v20 = vcombine.low %v14263_v33, %v14283_v37  ;;  %v12210_v21 = vcombine.high %v14298_v40, %v14318_v44  ;;  %v19198_v25 = vcombine.high %v19140_v6, %v19140_v6 }
 0x2f7   :  { %5975 = vmatpush1.bf16.msra.mxu0 %v12177_v11  ;;  %6098 = vmatpush1.bf16.msra.mxu1 %v12179_v0  ;;  %v12193_v11 = vcombine.low %v14218_v24, %v14238_v28  ;;  %v12212_v24 = vcombine.high %v14303_v41, %v14323_v45  ;;  %v12209_v28 = vcombine.low %v14298_v40, %v14318_v44 }
 0x2f8   :  { %5976 = vmatprep.subr.bf16.mxu0 %v12186_v1  ;;  %6099 = vmatprep.subr.bf16.mxu1 %v12188_v4  ;;  %v12211_v29 = vcombine.low %v14303_v41, %v14323_v45  ;;  %v12218_v32 = vcombine.high %v14338_v48, %v14358_v52  ;;  %v12220_v33 = vcombine.high %v14343_v49, %v14363_v53 }
 0x2f9   :  { %6004 = vmatprep.mubr.bf16.mxu0 %v19198_v25  ;;  %6127 = vmatprep.mubr.bf16.mxu1 %v19198_v25  ;;  %v12217_v36 = vcombine.low %v14338_v48, %v14358_v52  ;;  %v12219_v37 = vcombine.low %v14343_v49, %v14363_v53  ;;  %v12226_v40 = vcombine.high %v14378_v56, %v14398_v60 }
 0x2fa   :  { %v12228_v41 = vcombine.high %v14383_v57, %v14403_v61  ;;  %v12225_v44 = vcombine.low %v14378_v56, %v14398_v60  ;;  %v12227_v45 = vcombine.low %v14383_v57, %v14403_v61  ;;  %v12234_v48 = vcombine.high %v14418_v59, %v14438_v63 }
 0x2fb   :  { %5977 = vmatpush1.bf16.msra.mxu0 %v12185_v5  ;;  %6100 = vmatpush1.bf16.msra.mxu1 %v12187_v18  ;;  %v12236_v49 = vcombine.high %v14423_v58, %v14443_v55  ;;  %v12233_v52 = vcombine.low %v14418_v59, %v14438_v63  ;;  %v12235_v53 = vcombine.low %v14423_v58, %v14443_v55  ;;  %v21295_v5 = vld [vmem:[#allocation94_spill] sm:$0xff] }
 0x2fc   :  { %5978 = vmatprep.subr.bf16.mxu0 %v12194_v8  ;;  %6101 = vmatprep.subr.bf16.mxu1 %v12196_v9  ;;  %v12242_v56 = vcombine.high %v14458_v62, %v14478_v51  ;;  %v12244_v57 = vcombine.high %v14463_v54, %v14483_v47  ;;  %v12241_v60 = vcombine.low %v14458_v62, %v14478_v51  ;;  %v21296_v18 = vld [vmem:[#allocation90_spill] sm:$0xff]  ;;  %v21297_v9 = vld [vmem:[#allocation95_spill] sm:$0xff] }
 0x2fd   :  { %v12243_v61 = vcombine.low %v14463_v54, %v14483_v47  ;;  %v12250_v55 = vcombine.high %v14498_v50, %v14518_v43  ;;  %v12252_v58 = vcombine.high %v14503_v46, %v14523_v39  ;;  %v12249_v59 = vcombine.low %v14498_v50, %v14518_v43 }
 0x2fe   :  { %v12251_v63 = vcombine.low %v14503_v46, %v14523_v39  ;;  %v12258_v47 = vcombine.high %v14538_v42, %v14558_v35  ;;  %v12260_v51 = vcombine.high %v14543_v38, %v14563_v31  ;;  %v12257_v54 = vcombine.low %v14538_v42, %v14558_v35 }
 0x2ff   :  { %5979 = vmatpush1.bf16.msra.mxu0 %v12193_v11  ;;  %6102 = vmatpush1.bf16.msra.mxu1 %v12195_v12  ;;  %v12259_v62 = vcombine.low %v14543_v38, %v14563_v31  ;;  %v12266_v39 = vcombine.high %v14578_v34, %v14598_v27  ;;  %v12268_v43 = vcombine.high %v14583_v30, %v14603_v23  ;;  %v21298_v11 = vld [vmem:[#allocation91_spill] sm:$0xff] }
 0x300   :  { %5980 = vmatprep.subr.bf16.mxu0 %v12202_v13  ;;  %6103 = vmatprep.subr.bf16.mxu1 %v12204_v16  ;;  %v12265_v46 = vcombine.low %v14578_v34, %v14598_v27  ;;  %v12267_v50 = vcombine.low %v14583_v30, %v14603_v23  ;;  %v12274_v31 = vcombine.high %v14618_v26, %v14638_v19  ;;  %v21287_v27 = vld [vmem:[#allocation78_spill] sm:$0xff]  ;;  %v21289_v34 = vld [vmem:[#allocation79_spill] sm:$0xff] }
 0x301   :  { %v12276_v35 = vcombine.high %v14623_v22, %v14643_v15  ;;  %v12273_v38 = vcombine.low %v14618_v26, %v14638_v19  ;;  %v12275_v42 = vcombine.low %v14623_v22, %v14643_v15  ;;  %v21288_v23 = vld [vmem:[#allocation74_spill] sm:$0xff]  ;;  %v12284_v3 = vcombine.high %v21290_v2, %v21289_v34  ;;  %v21293_v26 = vld [vmem:[#allocation87_spill] sm:$0xff] }
 0x302   :  { %v12282_v30 = vcombine.high %v21288_v23, %v21287_v27  ;;  %v12281_v14 = vcombine.low %v21288_v23, %v21287_v27  ;;  %v12283_v10 = vcombine.low %v21290_v2, %v21289_v34  ;;  %v21291_v19 = vld [vmem:[#allocation86_spill] sm:$0xff]  ;;  %v12292_v0 = vcombine.high %v21294_v7, %v21293_v26  ;;  %v21319_v27 = vld [vmem:[#allocation131_spill] sm:$0xff] }
 0x303   :  { %5981 = vmatpush1.bf16.msra.mxu0 %v12201_v17  ;;  %6104 = vmatpush1.bf16.msra.mxu1 %v12203_v20  ;;  %v21292_v15 = vld [vmem:[#allocation82_spill] sm:$0xff]  ;;  %v12291_v4 = vcombine.low %v21294_v7, %v21293_v26  ;;  %v12298_v8 = vcombine.high %v21296_v18, %v21295_v5  ;;  %v12300_v12 = vcombine.high %v21298_v11, %v21297_v9 }
 0x304   :  { %5982 = vmatprep.subr.bf16.mxu0 %v12210_v21  ;;  %6105 = vmatprep.subr.bf16.mxu1 %v12212_v24  ;;  %v12290_v22 = vcombine.high %v21292_v15, %v21291_v19  ;;  %v12289_v1 = vcombine.low %v21292_v15, %v21291_v19  ;;  %v19292_v13 = vcombine.low %v19140_v6, %v19140_v6  ;;  %v21299_v20 = vld [vmem:[#allocation102_spill] sm:$0xff]  ;;  %v21323_v19 = vld [vmem:[#allocation139_spill] sm:$0xff] }
 0x305   :  { %v12297_v16 = vcombine.low %v21296_v18, %v21295_v5  ;;  %v12299_v17 = vcombine.low %v21298_v11, %v21297_v9  ;;  %v21300_v21 = vld [vmem:[#allocation98_spill] sm:$0xff]  ;;  %v21327_v5 = vld [vmem:[#allocation147_spill] sm:$0xff] }
 0x306   :  { %v12306_v24 = vcombine.high %v21300_v21, %v21299_v20  ;;  %v21320_v2 = vld [vmem:[#allocation142_spill] sm:$0xff] }
 0x307   :  { %5983 = vmatpush1.bf16.msra.mxu0 %v12209_v28  ;;  %6106 = vmatpush1.bf16.msra.mxu1 %v12211_v29  ;;  %v21301_v28 = vld [vmem:[#allocation103_spill] sm:$0xff]  ;;  %v21324_v7 = vld [vmem:[#allocation150_spill] sm:$0xff] }
 0x308   :  { %5984 = vmatprep.subr.bf16.mxu0 %v12218_v32  ;;  %6107 = vmatprep.subr.bf16.mxu1 %v12220_v33  ;;  %v21302_v29 = vld [vmem:[#allocation99_spill] sm:$0xff]  ;;  %v21303_v33 = vld [vmem:[#allocation437_spill] sm:$0xff]  ;;  %v21328_v11 = vld [vmem:[#allocation158_spill] sm:$0xff] }
 0x309   :  { %v12308_v32 = vcombine.high %v21302_v29, %v21301_v28  ;;  %v19304_v6 = vcombine.high %v21303_v33, %v21303_v33 }
 0x30b   :  { %5985 = vmatpush1.bf16.msra.mxu0 %v12217_v36  ;;  %6108 = vmatpush1.bf16.msra.mxu1 %v12219_v37  ;;  %v12305_v36 = vcombine.low %v21300_v21, %v21299_v20  ;;  %v12307_v37 = vcombine.low %v21302_v29, %v21301_v28  ;;  %v21331_v20 = vld [vmem:[#allocation155_spill] sm:$0xff]  ;;  %v21332_v29 = vld [vmem:[#allocation166_spill] sm:$0xff] }
 0x30c   :  { %5986 = vmatprep.subr.bf16.mxu0 %v12226_v40  ;;  %6109 = vmatprep.subr.bf16.mxu1 %v12228_v41  ;;  %v21304_v40 = vld [vmem:[#allocation110_spill] sm:$0xff] }
 0x30d   :  { %v21305_v41 = vld [vmem:[#allocation106_spill] sm:$0xff] }
 0x30f   :  { %5987 = vmatpush1.bf16.msra.mxu0 %v12225_v44  ;;  %6110 = vmatpush1.bf16.msra.mxu1 %v12227_v45  ;;  %v12314_v44 = vcombine.high %v21305_v41, %v21304_v40  ;;  %v21306_v45 = vld [vmem:[#allocation111_spill] sm:$0xff] }
 0x310   :  { %5988 = vmatprep.subr.bf16.mxu0 %v12234_v48  ;;  %6111 = vmatprep.subr.bf16.mxu1 %v12236_v49  ;;  %v21307_v48 = vld [vmem:[#allocation107_spill] sm:$0xff] }
 0x311   :  { %v12316_v49 = vcombine.high %v21307_v48, %v21306_v45 }
 0x313   :  { %5989 = vmatpush1.bf16.msra.mxu0 %v12233_v52  ;;  %6112 = vmatpush1.bf16.msra.mxu1 %v12235_v53  ;;  %v12313_v52 = vcombine.low %v21305_v41, %v21304_v40  ;;  %v12315_v53 = vcombine.low %v21307_v48, %v21306_v45  ;;  %v21335_v40 = vld [vmem:[#allocation163_spill] sm:$0xff]  ;;  %v21336_v48 = vld [vmem:[#allocation174_spill] sm:$0xff] }
 0x314   :  { %5990 = vmatprep.subr.bf16.mxu0 %v12242_v56  ;;  %6113 = vmatprep.subr.bf16.mxu1 %v12244_v57  ;;  %v21308_v56 = vld [vmem:[#allocation118_spill] sm:$0xff] }
 0x315   :  { %v21309_v57 = vld [vmem:[#allocation114_spill] sm:$0xff] }
 0x317   :  { %5991 = vmatpush1.bf16.msra.mxu0 %v12241_v60  ;;  %6114 = vmatpush1.bf16.msra.mxu1 %v12243_v61  ;;  %v12322_v60 = vcombine.high %v21309_v57, %v21308_v56  ;;  %v21310_v61 = vld [vmem:[#allocation119_spill] sm:$0xff] }
 0x318   :  { %5992 = vmatprep.subr.bf16.mxu0 %v12250_v55  ;;  %6115 = vmatprep.subr.bf16.mxu1 %v12252_v58  ;;  %v21311_v55 = vld [vmem:[#allocation115_spill] sm:$0xff] }
 0x319   :  { %v12324_v58 = vcombine.high %v21311_v55, %v21310_v61 }
 0x31b   :  { %5993 = vmatpush1.bf16.msra.mxu0 %v12249_v59  ;;  %6116 = vmatpush1.bf16.msra.mxu1 %v12251_v63  ;;  %v12321_v59 = vcombine.low %v21309_v57, %v21308_v56  ;;  %v12323_v63 = vcombine.low %v21311_v55, %v21310_v61  ;;  %v21339_v56 = vld [vmem:[#allocation171_spill] sm:$0xff]  ;;  %v21340_v55 = vld [vmem:[#allocation182_spill] sm:$0xff] }
 0x31c   :  { %5994 = vmatprep.subr.bf16.mxu0 %v12258_v47  ;;  %6117 = vmatprep.subr.bf16.mxu1 %v12260_v51  ;;  %v21312_v47 = vld [vmem:[#allocation126_spill] sm:$0xff] }
 0x31d   :  { %v21313_v51 = vld [vmem:[#allocation122_spill] sm:$0xff] }
 0x31f   :  { %5995 = vmatpush1.bf16.msra.mxu0 %v12257_v54  ;;  %6118 = vmatpush1.bf16.msra.mxu1 %v12259_v62  ;;  %v12330_v54 = vcombine.high %v21313_v51, %v21312_v47  ;;  %v21314_v62 = vld [vmem:[#allocation127_spill] sm:$0xff] }
 0x320   :  { %5996 = vmatprep.subr.bf16.mxu0 %v12266_v39  ;;  %6119 = vmatprep.subr.bf16.mxu1 %v12268_v43  ;;  %v21315_v39 = vld [vmem:[#allocation123_spill] sm:$0xff] }
 0x321   :  { %v12332_v43 = vcombine.high %v21315_v39, %v21314_v62 }
 0x323   :  { %5997 = vmatpush1.bf16.msra.mxu0 %v12265_v46  ;;  %6120 = vmatpush1.bf16.msra.mxu1 %v12267_v50  ;;  %v12329_v46 = vcombine.low %v21313_v51, %v21312_v47  ;;  %v12331_v50 = vcombine.low %v21315_v39, %v21314_v62  ;;  %v21343_v47 = vld [vmem:[#allocation179_spill] sm:$0xff]  ;;  %v21344_v39 = vld [vmem:[#allocation190_spill] sm:$0xff] }
 0x324   :  { %5998 = vmatprep.subr.bf16.mxu0 %v12274_v31  ;;  %6121 = vmatprep.subr.bf16.mxu1 %v12276_v35  ;;  %v21316_v31 = vld [vmem:[#allocation134_spill] sm:$0xff] }
 0x325   :  { %v21317_v35 = vld [vmem:[#allocation130_spill] sm:$0xff] }
 0x327   :  { %5999 = vmatpush1.bf16.msra.mxu0 %v12273_v38  ;;  %6122 = vmatpush1.bf16.msra.mxu1 %v12275_v42  ;;  %v12338_v38 = vcombine.high %v21317_v35, %v21316_v31  ;;  %v21318_v42 = vld [vmem:[#allocation135_spill] sm:$0xff] }
 0x328   :  { %6000 = vmatprep.subr.bf16.mxu0 %v12282_v30  ;;  %6123 = vmatprep.subr.bf16.mxu1 %v12284_v3  ;;  %v12340_v23 = vcombine.high %v21319_v27, %v21318_v42  ;;  %v12337_v30 = vcombine.low %v21317_v35, %v21316_v31  ;;  %v12339_v34 = vcombine.low %v21319_v27, %v21318_v42  ;;  %v21321_v3 = vld [vmem:[#allocation138_spill] sm:$0xff]  ;;  %v21347_v31 = vld [vmem:[#allocation187_spill] sm:$0xff] }
 0x329   :  { %v21348_v27 = vld [vmem:[#allocation198_spill] sm:$0xff] }
 0x32b   :  { %6001 = vmatpush1.bf16.msra.mxu0 %v12281_v14  ;;  %6124 = vmatpush1.bf16.msra.mxu1 %v12283_v10  ;;  %v12346_v14 = vcombine.high %v21321_v3, %v21320_v2  ;;  %v21322_v10 = vld [vmem:[#allocation143_spill] sm:$0xff] }
 0x32c   :  { %6002 = vmatprep.subr.bf16.mxu0 %v12290_v22  ;;  %6125 = vmatprep.subr.bf16.mxu1 %v12292_v0  ;;  %v12348_v15 = vcombine.high %v21323_v19, %v21322_v10  ;;  %v12345_v22 = vcombine.low %v21321_v3, %v21320_v2  ;;  %v12347_v26 = vcombine.low %v21323_v19, %v21322_v10  ;;  %v21325_v0 = vld [vmem:[#allocation146_spill] sm:$0xff]  ;;  %v21351_v2 = vld [vmem:[#allocation195_spill] sm:$0xff] }
 0x32d   :  { %v21352_v19 = vld [vmem:[#allocation206_spill] sm:$0xff] }
 0x32f   :  { %6003 = vmatpush1.bf16.msra.mxu0 %v12289_v1  ;;  %6126 = vmatpush1.bf16.msra.mxu1 %v12291_v4  ;;  %v12354_v1 = vcombine.high %v21325_v0, %v21324_v7  ;;  %v21326_v4 = vld [vmem:[#allocation151_spill] sm:$0xff] }
 0x330   :  { %6013 = vmatprep.subr.bf16.mxu0 %v12298_v8  ;;  %6136 = vmatprep.subr.bf16.mxu1 %v12300_v12  ;;  %v12356_v18 = vcombine.high %v21327_v5, %v21326_v4  ;;  %v12353_v8 = vcombine.low %v21325_v0, %v21324_v7  ;;  %v12355_v9 = vcombine.low %v21327_v5, %v21326_v4  ;;  %v21329_v12 = vld [vmem:[#allocation154_spill] sm:$0xff]  ;;  %v21355_v7 = vld [vmem:[#allocation203_spill] sm:$0xff] }
 0x331   :  { %v21356_v5 = vld [vmem:[#allocation214_spill] sm:$0xff] }
 0x332   :  { %6005 = vmatmul.mubr.bf16.vlgmr.msra.gmra.mrb[0].mxu0 %v19292_v13  ;;  %6128 = vmatmul.mubr.bf16.vlgmr.msra.gmra.mrb[0].mxu1 %v19292_v13 }
 0x333   :  { %6014 = vmatpush1.bf16.msra.mxu0 %v12297_v16  ;;  %6137 = vmatpush1.bf16.msra.mxu1 %v12299_v17  ;;  %v12362_v16 = vcombine.high %v21329_v12, %v21328_v11  ;;  %v21330_v17 = vld [vmem:[#allocation159_spill] sm:$0xff] }
 0x334   :  { %6015 = vmatprep.subr.bf16.mxu0 %v12306_v24  ;;  %6138 = vmatprep.subr.bf16.mxu1 %v12308_v32  ;;  %v12364_v21 = vcombine.high %v21331_v20, %v21330_v17  ;;  %v12361_v24 = vcombine.low %v21329_v12, %v21328_v11  ;;  %v12363_v28 = vcombine.low %v21331_v20, %v21330_v17  ;;  %v21333_v32 = vld [vmem:[#allocation162_spill] sm:$0xff]  ;;  %v21359_v11 = vld [vmem:[#allocation211_spill] sm:$0xff] }
 0x335   :  { %6045 = vmatprep.mubr.bf16.mxu0 %v19304_v6  ;;  %6168 = vmatprep.mubr.bf16.mxu1 %v19304_v6  ;;  %v21360_v20 = vld [vmem:[#allocation222_spill] sm:$0xff] }
 0x337   :  { %6016 = vmatpush1.bf16.msra.mxu0 %v12305_v36  ;;  %6139 = vmatpush1.bf16.msra.mxu1 %v12307_v37  ;;  %v12370_v36 = vcombine.high %v21333_v32, %v21332_v29  ;;  %v21334_v37 = vld [vmem:[#allocation167_spill] sm:$0xff] }
 0x338   :  { %6017 = vmatprep.subr.bf16.mxu0 %v12314_v44  ;;  %6140 = vmatprep.subr.bf16.mxu1 %v12316_v49  ;;  %v12372_v41 = vcombine.high %v21335_v40, %v21334_v37  ;;  %v12369_v44 = vcombine.low %v21333_v32, %v21332_v29  ;;  %v12371_v45 = vcombine.low %v21335_v40, %v21334_v37  ;;  %v21337_v49 = vld [vmem:[#allocation170_spill] sm:$0xff]  ;;  %v21363_v29 = vld [vmem:[#allocation219_spill] sm:$0xff] }
 0x33b   :  { %6018 = vmatpush1.bf16.msra.mxu0 %v12313_v52  ;;  %6141 = vmatpush1.bf16.msra.mxu1 %v12315_v53  ;;  %v12378_v52 = vcombine.high %v21337_v49, %v21336_v48  ;;  %v21338_v53 = vld [vmem:[#allocation175_spill] sm:$0xff] }
 0x33c   :  { %6019 = vmatprep.subr.bf16.mxu0 %v12322_v60  ;;  %6142 = vmatprep.subr.bf16.mxu1 %v12324_v58  ;;  %v12380_v57 = vcombine.high %v21339_v56, %v21338_v53  ;;  %v12377_v60 = vcombine.low %v21337_v49, %v21336_v48  ;;  %v12379_v61 = vcombine.low %v21339_v56, %v21338_v53  ;;  %v21341_v58 = vld [vmem:[#allocation178_spill] sm:$0xff]  ;;  %v21366_v48 = vld [vmem:[#allocation231_spill] sm:$0xff] }
 0x33d   :  { %v21367_v49 = vld [vmem:[#allocation227_spill] sm:$0xff]  ;;  %v21368_v56 = vld [vmem:[#allocation238_spill] sm:$0xff] }
 0x33e   :  { %v12435_v53 = vcombine.low %v21367_v49, %v21366_v48 }
 0x33f   :  { %6020 = vmatpush1.bf16.msra.mxu0 %v12321_v59  ;;  %6143 = vmatpush1.bf16.msra.mxu1 %v12323_v63  ;;  %v12386_v59 = vcombine.high %v21341_v58, %v21340_v55  ;;  %v21342_v63 = vld [vmem:[#allocation183_spill] sm:$0xff] }
 0x340   :  { %6021 = vmatprep.subr.bf16.mxu0 %v12330_v54  ;;  %6144 = vmatprep.subr.bf16.mxu1 %v12332_v43  ;;  %v12388_v51 = vcombine.high %v21343_v47, %v21342_v63  ;;  %v12385_v54 = vcombine.low %v21341_v58, %v21340_v55  ;;  %v12387_v62 = vcombine.low %v21343_v47, %v21342_v63  ;;  %v21345_v43 = vld [vmem:[#allocation186_spill] sm:$0xff]  ;;  %v21371_v55 = vld [vmem:[#allocation235_spill] sm:$0xff] }
 0x343   :  { %6022 = vmatpush1.bf16.msra.mxu0 %v12329_v46  ;;  %6145 = vmatpush1.bf16.msra.mxu1 %v12331_v50  ;;  %v12394_v46 = vcombine.high %v21345_v43, %v21344_v39  ;;  %v21346_v50 = vld [vmem:[#allocation191_spill] sm:$0xff] }
 0x344   :  { %6023 = vmatprep.subr.bf16.mxu0 %v12338_v38  ;;  %6146 = vmatprep.subr.bf16.mxu1 %v12340_v23  ;;  %v12396_v35 = vcombine.high %v21347_v31, %v21346_v50  ;;  %v12393_v38 = vcombine.low %v21345_v43, %v21344_v39  ;;  %v12395_v42 = vcombine.low %v21347_v31, %v21346_v50  ;;  %v21349_v23 = vld [vmem:[#allocation194_spill] sm:$0xff]  ;;  %v21374_v39 = vld [vmem:[#allocation247_spill] sm:$0xff] }
 0x345   :  { %v21375_v43 = vld [vmem:[#allocation243_spill] sm:$0xff] }
 0x346   :  { %v12451_v31 = vcombine.low %v21375_v43, %v21374_v39 }
 0x347   :  { %6024 = vmatpush1.bf16.msra.mxu0 %v12337_v30  ;;  %6147 = vmatpush1.bf16.msra.mxu1 %v12339_v34  ;;  %v12402_v30 = vcombine.high %v21349_v23, %v21348_v27  ;;  %v21350_v34 = vld [vmem:[#allocation199_spill] sm:$0xff] }
 0x348   :  { %6025 = vmatprep.subr.bf16.mxu0 %v12346_v14  ;;  %6148 = vmatprep.subr.bf16.mxu1 %v12348_v15  ;;  %v12404_v3 = vcombine.high %v21351_v2, %v21350_v34  ;;  %v12401_v14 = vcombine.low %v21349_v23, %v21348_v27  ;;  %v12403_v10 = vcombine.low %v21351_v2, %v21350_v34  ;;  %v21353_v15 = vld [vmem:[#allocation202_spill] sm:$0xff]  ;;  %v21378_v27 = vld [vmem:[#allocation255_spill] sm:$0xff] }
 0x349   :  { %v21379_v23 = vld [vmem:[#allocation251_spill] sm:$0xff] }
 0x34a   :  { %v12459_v2 = vcombine.low %v21379_v23, %v21378_v27 }
 0x34b   :  { %6026 = vmatpush1.bf16.msra.mxu0 %v12345_v22  ;;  %6149 = vmatpush1.bf16.msra.mxu1 %v12347_v26  ;;  %v12410_v22 = vcombine.high %v21353_v15, %v21352_v19  ;;  %v21354_v26 = vld [vmem:[#allocation207_spill] sm:$0xff] }
 0x34c   :  { %6027 = vmatprep.subr.bf16.mxu0 %v12354_v1  ;;  %6150 = vmatprep.subr.bf16.mxu1 %v12356_v18  ;;  %v12412_v0 = vcombine.high %v21355_v7, %v21354_v26  ;;  %v12409_v1 = vcombine.low %v21353_v15, %v21352_v19  ;;  %v12411_v4 = vcombine.low %v21355_v7, %v21354_v26  ;;  %v21357_v18 = vld [vmem:[#allocation210_spill] sm:$0xff] }
 0x34f   :  { %6028 = vmatpush1.bf16.msra.mxu0 %v12353_v8  ;;  %6151 = vmatpush1.bf16.msra.mxu1 %v12355_v9  ;;  %v12418_v8 = vcombine.high %v21357_v18, %v21356_v5  ;;  %v21358_v9 = vld [vmem:[#allocation215_spill] sm:$0xff] }
 0x350   :  { %6029 = vmatprep.subr.bf16.mxu0 %v12362_v16  ;;  %6152 = vmatprep.subr.bf16.mxu1 %v12364_v21  ;;  %v12420_v12 = vcombine.high %v21359_v11, %v21358_v9  ;;  %v12417_v16 = vcombine.low %v21357_v18, %v21356_v5  ;;  %v12419_v17 = vcombine.low %v21359_v11, %v21358_v9  ;;  %v21361_v21 = vld [vmem:[#allocation218_spill] sm:$0xff]  ;;  %v21384_v5 = vld [vmem:[#allocation21_spill] sm:$0xff]  ;;  %v21385_v18 = vld [vmem:[#allocation19_spill] sm:$0xff] }
 0x351   :  { %v12425_v37 = vcombine.low %v21361_v21, %v21360_v20  ;;  %v21386_v9 = vld [vmem:[#allocation438_spill] sm:$0xff] }
 0x352   :  { %v19492_v11 = vcombine.low %v21386_v9, %v21386_v9  ;;  %v21415_v9 = vld [vmem:[#allocation52_spill] sm:$0xff] }
 0x353   :  { %6030 = vmatpush1.bf16.msra.mxu0 %v12361_v24  ;;  %6153 = vmatpush1.bf16.msra.mxu1 %v12363_v28  ;;  %v12426_v24 = vcombine.high %v21361_v21, %v21360_v20  ;;  %v21362_v28 = vld [vmem:[#allocation223_spill] sm:$0xff]  ;;  %v21388_v20 = vld [vmem:[#allocation22_spill] sm:$0xff] }
 0x354   :  { %6031 = vmatprep.subr.bf16.mxu0 %v12370_v36  ;;  %6154 = vmatprep.subr.bf16.mxu1 %v12372_v41  ;;  %v12428_v32 = vcombine.high %v21363_v29, %v21362_v28  ;;  %v19432_v36 = vcombine.low %v21303_v33, %v21303_v33  ;;  %v12427_v40 = vcombine.low %v21363_v29, %v21362_v28  ;;  %v21364_v41 = vld [vmem:[#allocation230_spill] sm:$0xff]  ;;  %v21390_v28 = vld [vmem:[#allocation23_spill] sm:$0xff] }
 0x357   :  { %6032 = vmatpush1.bf16.msra.mxu0 %v12369_v44  ;;  %6155 = vmatpush1.bf16.msra.mxu1 %v12371_v45  ;;  %v21365_v44 = vld [vmem:[#allocation226_spill] sm:$0xff] }
 0x358   :  { %6033 = vmatprep.subr.bf16.mxu0 %v12378_v52  ;;  %6156 = vmatprep.subr.bf16.mxu1 %v12380_v57  ;;  %v12434_v45 = vcombine.high %v21365_v44, %v21364_v41  ;;  %v12436_v52 = vcombine.high %v21367_v49, %v21366_v48  ;;  %v12433_v33 = vcombine.low %v21365_v44, %v21364_v41  ;;  %v21369_v57 = vld [vmem:[#allocation234_spill] sm:$0xff]  ;;  %v21394_v48 = vld [vmem:[#allocation27_spill] sm:$0xff] }
 0x359   :  { %v12441_v63 = vcombine.low %v21369_v57, %v21368_v56  ;;  %v21392_v41 = vld [vmem:[#allocation26_spill] sm:$0xff] }
 0x35b   :  { %6034 = vmatpush1.bf16.msra.mxu0 %v12377_v60  ;;  %6157 = vmatpush1.bf16.msra.mxu1 %v12379_v61  ;;  %v12442_v60 = vcombine.high %v21369_v57, %v21368_v56  ;;  %v21370_v61 = vld [vmem:[#allocation239_spill] sm:$0xff]  ;;  %v21396_v56 = vld [vmem:[#allocation30_spill] sm:$0xff] }
 0x35c   :  { %6035 = vmatprep.subr.bf16.mxu0 %v12386_v59  ;;  %6158 = vmatprep.subr.bf16.mxu1 %v12388_v51  ;;  %v12444_v58 = vcombine.high %v21371_v55, %v21370_v61  ;;  %v14032_v59 = vmov 0   ;;  %v12443_v47 = vcombine.low %v21371_v55, %v21370_v61  ;;  %v21372_v51 = vld [vmem:[#allocation246_spill] sm:$0xff]  ;;  %v21398_v61 = vld [vmem:[#allocation31_spill] sm:$0xff] }
 0x35f   :  { %6036 = vmatpush1.bf16.msra.mxu0 %v12385_v54  ;;  %6159 = vmatpush1.bf16.msra.mxu1 %v12387_v62  ;;  %v21373_v54 = vld [vmem:[#allocation242_spill] sm:$0xff] }
 0x360   :  { %6037 = vmatprep.subr.bf16.mxu0 %v12394_v46  ;;  %6160 = vmatprep.subr.bf16.mxu1 %v12396_v35  ;;  %v12450_v62 = vcombine.high %v21373_v54, %v21372_v51  ;;  %v12452_v46 = vcombine.high %v21375_v43, %v21374_v39  ;;  %v12449_v50 = vcombine.low %v21373_v54, %v21372_v51  ;;  %v21376_v35 = vld [vmem:[#allocation254_spill] sm:$0xff]  ;;  %v21401_v54 = vld [vmem:[#allocation37_spill] sm:$0xff] }
 0x363   :  { %6038 = vmatpush1.bf16.msra.mxu0 %v12393_v38  ;;  %6161 = vmatpush1.bf16.msra.mxu1 %v12395_v42  ;;  %v21377_v38 = vld [vmem:[#allocation250_spill] sm:$0xff] }
 0x364   :  { %6039 = vmatprep.subr.bf16.mxu0 %v12402_v30  ;;  %6162 = vmatprep.subr.bf16.mxu1 %v12404_v3  ;;  %v12458_v42 = vcombine.high %v21377_v38, %v21376_v35  ;;  %v12460_v30 = vcombine.high %v21379_v23, %v21378_v27  ;;  %v12457_v34 = vcombine.low %v21377_v38, %v21376_v35  ;;  %v21380_v3 = vld [vmem:[#allocation258_spill] sm:$0xff]  ;;  %v21405_v38 = vld [vmem:[#allocation41_spill] sm:$0xff] }
 0x365   :  { %v12465_v15 = vcombine.low %v21380_v3, %v21380_v3 }
 0x367   :  { %6040 = vmatpush1.bf16.msra.mxu0 %v12401_v14  ;;  %6163 = vmatpush1.bf16.msra.mxu1 %v12403_v10  ;;  %v12466_v14 = vcombine.high %v21380_v3, %v21380_v3  ;;  %v21381_v10 = vld [vmem:[#allocation259_spill] sm:$0xff]  ;;  %v5949_v26 = vsel %vm5947_vm0, %v12465_v15, 0 }
 0x368   :  { %6041 = vmatprep.subr.bf16.mxu0 %v12410_v22  ;;  %6164 = vmatprep.subr.bf16.mxu1 %v12412_v0  ;;  %v12468_v19 = vcombine.high %v21381_v10, %v21381_v10  ;;  %v12467_v22 = vcombine.low %v21381_v10, %v21381_v10  ;;  %v21382_v0 = vld [vmem:[#allocation20_spill] sm:$0xff]  ;;  %v21410_v10 = vld [vmem:[#allocation43_spill] sm:$0xff] }
 0x36a   :  { %v5955_v7 = vsel %vm5947_vm0, %v12467_v22, 0 }
 0x36b   :  { %6042 = vmatpush1.bf16.msra.mxu0 %v12409_v1  ;;  %6165 = vmatpush1.bf16.msra.mxu1 %v12411_v4  ;;  %v21383_v1 = vld [vmem:[#allocation18_spill] sm:$0xff] }
 0x36c   :  { %6043 = vmatprep.subr.bf16.mxu0 %v12418_v8  ;;  %6166 = vmatprep.subr.bf16.mxu1 %v12420_v12  ;;  %v12174_v4 = vcombine.high %v21383_v1, %v21382_v0  ;;  %v12176_v8 = vcombine.high %v21385_v18, %v21384_v5  ;;  %v12173_v12 = vcombine.low %v21383_v1, %v21382_v0  ;;  %v21413_v1 = vld [vmem:[#allocation49_spill] sm:$0xff] }
 0x36f   :  { %6044 = vmatpush1.bf16.msra.mxu0 %v12417_v16  ;;  %6167 = vmatpush1.bf16.msra.mxu1 %v12419_v17  ;;  %v12175_v16 = vcombine.low %v21385_v18, %v21384_v5  ;;  %v21387_v17 = vld [vmem:[#allocation24_spill] sm:$0xff] }
 0x370   :  { %6054 = vmatprep.subr.bf16.mxu0 %v12426_v24  ;;  %6177 = vmatprep.subr.bf16.mxu1 %v12428_v32  ;;  %v12182_v21 = vcombine.high %v21388_v20, %v21387_v17  ;;  %v21389_v24 = vld [vmem:[#allocation25_spill] sm:$0xff]  ;;  %v12181_v32 = vcombine.low %v21388_v20, %v21387_v17  ;;  %v21418_v20 = vld [vmem:[#allocation51_spill] sm:$0xff] }
 0x371   :  { %v12184_v29 = vcombine.high %v21390_v28, %v21389_v24  ;;  %v21417_v17 = vld [vmem:[#allocation53_spill] sm:$0xff] }
 0x372   :  { %6046 = vmatmul.mubr.bf16.vlgmr.msra.gmra.mrb[0].mxu0 %v19432_v36  ;;  %6169 = vmatmul.mubr.bf16.vlgmr.msra.gmra.mrb[0].mxu1 %v19432_v36 }
 0x373   :  { %6055 = vmatpush1.bf16.msra.mxu0 %v12425_v37  ;;  %6178 = vmatpush1.bf16.msra.mxu1 %v12427_v40  ;;  %v12183_v37 = vcombine.low %v21390_v28, %v21389_v24  ;;  %v21391_v40 = vld [vmem:[#allocation28_spill] sm:$0xff]  ;;  %v12239_v28 = vcombine.low %v21418_v20, %v21417_v17 }
 0x374   :  { %6056 = vmatprep.subr.bf16.mxu0 %v12434_v45  ;;  %6179 = vmatprep.subr.bf16.mxu1 %v12436_v52  ;;  %v12190_v44 = vcombine.high %v21392_v41, %v21391_v40  ;;  %v21393_v45 = vld [vmem:[#allocation29_spill] sm:$0xff]  ;;  %v12189_v52 = vcombine.low %v21392_v41, %v21391_v40  ;;  %v21422_v41 = vld [vmem:[#allocation55_spill] sm:$0xff] }
 0x375   :  { %6086 = vmatprep.mubr.bf16.mxu0 %v14032_v59  ;;  %6209 = vmatprep.mubr.bf16.mxu1 %v14032_v59  ;;  %v12192_v49 = vcombine.high %v21394_v48, %v21393_v45  ;;  %v21421_v40 = vld [vmem:[#allocation57_spill] sm:$0xff] }
 0x377   :  { %6057 = vmatpush1.bf16.msra.mxu0 %v12433_v33  ;;  %6180 = vmatpush1.bf16.msra.mxu1 %v12435_v53  ;;  %v12191_v33 = vcombine.low %v21394_v48, %v21393_v45  ;;  %v21395_v53 = vld [vmem:[#allocation32_spill] sm:$0xff]  ;;  %v12247_v48 = vcombine.low %v21422_v41, %v21421_v40 }
 0x378   :  { %6058 = vmatprep.subr.bf16.mxu0 %v12442_v60  ;;  %6181 = vmatprep.subr.bf16.mxu1 %v12444_v58  ;;  %v12198_v57 = vcombine.high %v21396_v56, %v21395_v53  ;;  %v21397_v60 = vld [vmem:[#allocation33_spill] sm:$0xff] }
 0x379   :  { %v12200_v55 = vcombine.high %v21398_v61, %v21397_v60  ;;  %v12199_v58 = vcombine.low %v21398_v61, %v21397_v60 }
 0x37b   :  { %6059 = vmatpush1.bf16.msra.mxu0 %v12441_v63  ;;  %6182 = vmatpush1.bf16.msra.mxu1 %v12443_v47  ;;  %v21399_v63 = vld [vmem:[#allocation36_spill] sm:$0xff]  ;;  %v21400_v47 = vld [vmem:[#allocation34_spill] sm:$0xff] }
 0x37c   :  { %6060 = vmatprep.subr.bf16.mxu0 %v12450_v62  ;;  %6183 = vmatprep.subr.bf16.mxu1 %v12452_v46  ;;  %v12206_v51 = vcombine.high %v21400_v47, %v21399_v63  ;;  %v21402_v62 = vld [vmem:[#allocation35_spill] sm:$0xff]  ;;  %v12205_v43 = vcombine.low %v21400_v47, %v21399_v63  ;;  %v21429_v63 = vld [vmem:[#allocation65_spill] sm:$0xff] }
 0x37d   :  { %v12208_v39 = vcombine.high %v21402_v62, %v21401_v54  ;;  %v12207_v46 = vcombine.low %v21402_v62, %v21401_v54  ;;  %v21430_v47 = vld [vmem:[#allocation63_spill] sm:$0xff] }
 0x37e   :  { %v12263_v62 = vcombine.low %v21430_v47, %v21429_v63 }
 0x37f   :  { %6061 = vmatpush1.bf16.msra.mxu0 %v12449_v50  ;;  %6184 = vmatpush1.bf16.msra.mxu1 %v12451_v31  ;;  %v21403_v50 = vld [vmem:[#allocation40_spill] sm:$0xff]  ;;  %v21404_v31 = vld [vmem:[#allocation38_spill] sm:$0xff] }
 0x380   :  { %6062 = vmatprep.subr.bf16.mxu0 %v12458_v42  ;;  %6185 = vmatprep.subr.bf16.mxu1 %v12460_v30  ;;  %v12214_v35 = vcombine.high %v21404_v31, %v21403_v50  ;;  %v21406_v42 = vld [vmem:[#allocation39_spill] sm:$0xff]  ;;  %v12213_v23 = vcombine.low %v21404_v31, %v21403_v50  ;;  %v21433_v50 = vld [vmem:[#allocation69_spill] sm:$0xff] }
 0x381   :  { %v12216_v27 = vcombine.high %v21406_v42, %v21405_v38  ;;  %v12215_v30 = vcombine.low %v21406_v42, %v21405_v38  ;;  %v21434_v31 = vld [vmem:[#allocation67_spill] sm:$0xff] }
 0x382   :  { %v12271_v42 = vcombine.low %v21434_v31, %v21433_v50 }
 0x383   :  { %6063 = vmatpush1.bf16.msra.mxu0 %v12457_v34  ;;  %6186 = vmatpush1.bf16.msra.mxu1 %v12459_v2  ;;  %v21407_v34 = vld [vmem:[#allocation44_spill] sm:$0xff]  ;;  %v21408_v2 = vld [vmem:[#allocation42_spill] sm:$0xff] }
 0x384   :  { %12473 = vmatprep.subr.msk.bf16.mxu0 %vm5947_vm0, %v12466_v14  ;;  %12475 = vmatprep.subr.msk.bf16.mxu1 %vm5947_vm0, %v12468_v19  ;;  %v12222_v3 = vcombine.high %v21408_v2, %v21407_v34  ;;  %v21409_v14 = vld [vmem:[#allocation45_spill] sm:$0xff]  ;;  %v12221_v15 = vcombine.low %v21408_v2, %v21407_v34  ;;  %v21438_v2 = vld [vmem:[#allocation71_spill] sm:$0xff] }
 0x385   :  { %v12224_v19 = vcombine.high %v21410_v10, %v21409_v14  ;;  %v12223_v22 = vcombine.low %v21410_v10, %v21409_v14  ;;  %v21437_v34 = vld [vmem:[#allocation73_spill] sm:$0xff] }
 0x386   :  { %v12279_v10 = vcombine.low %v21438_v2, %v21437_v34 }
 0x387   :  { %6065 = vmatpush1.bf16.msra.mxu0 %v5949_v26  ;;  %6188 = vmatpush1.bf16.msra.mxu1 %v5955_v7  ;;  %v21411_v26 = vld [vmem:[#allocation48_spill] sm:$0xff]  ;;  %v21412_v7 = vld [vmem:[#allocation46_spill] sm:$0xff] }
 0x388   :  { %6218 = vmatprep.subr.bf16.mxu0 %v12174_v4  ;;  %6341 = vmatprep.subr.bf16.mxu1 %v12176_v8  ;;  %v12230_v0 = vcombine.high %v21412_v7, %v21411_v26  ;;  %v21414_v4 = vld [vmem:[#allocation47_spill] sm:$0xff]  ;;  %v12229_v18 = vcombine.low %v21412_v7, %v21411_v26  ;;  %v21441_v26 = vld [vmem:[#allocation81_spill] sm:$0xff] }
 0x389   :  { %v12232_v5 = vcombine.high %v21414_v4, %v21413_v1  ;;  %v12231_v8 = vcombine.low %v21414_v4, %v21413_v1  ;;  %v21442_v7 = vld [vmem:[#allocation77_spill] sm:$0xff] }
 0x38a   :  { %12474 = vmatmul.mubr.msk.bf16.vlgmr.msra.gmra.mrb[0].mxu0 %vm5943_vm1, %v19492_v11  ;;  %12476 = vmatmul.mubr.msk.bf16.vlgmr.msra.gmra.mrb[0].mxu1 %vm5943_vm1, %v19492_v11  ;;  %v12287_v4 = vcombine.low %v21442_v7, %v21441_v26 }
 0x38b   :  { %6219 = vmatpush1.bf16.msra.mxu0 %v12173_v12  ;;  %6342 = vmatpush1.bf16.msra.mxu1 %v12175_v16  ;;  %v21416_v12 = vld [vmem:[#allocation50_spill] sm:$0xff] }
 0x38c   :  { %6220 = vmatprep.subr.bf16.mxu0 %v12182_v21  ;;  %6343 = vmatprep.subr.bf16.mxu1 %v12184_v29  ;;  %v12238_v16 = vcombine.high %v21416_v12, %v21415_v9  ;;  %v12240_v21 = vcombine.high %v21418_v20, %v21417_v17  ;;  %v12237_v24 = vcombine.low %v21416_v12, %v21415_v9  ;;  %v21419_v29 = vld [vmem:[#allocation56_spill] sm:$0xff]  ;;  %v21445_v9 = vld [vmem:[#allocation89_spill] sm:$0xff] }
 0x38d   :  { %6250 = vmatprep.mubr.bf16.mxu0 %v19198_v25  ;;  %6373 = vmatprep.mubr.bf16.mxu1 %v19198_v25  ;;  %v12197_v25 = vcombine.low %v21396_v56, %v21395_v53  ;;  %v21425_v53 = vld [vmem:[#allocation61_spill] sm:$0xff]  ;;  %v21426_v56 = vld [vmem:[#allocation59_spill] sm:$0xff] }
 0x38e   :  { %v12255_v61 = vcombine.low %v21426_v56, %v21425_v53  ;;  %v21446_v12 = vld [vmem:[#allocation85_spill] sm:$0xff] }
 0x38f   :  { %6221 = vmatpush1.bf16.msra.mxu0 %v12181_v32  ;;  %6344 = vmatpush1.bf16.msra.mxu1 %v12183_v37  ;;  %v21420_v32 = vld [vmem:[#allocation54_spill] sm:$0xff]  ;;  %v12295_v20 = vcombine.low %v21446_v12, %v21445_v9 }
 0x390   :  { %6222 = vmatprep.subr.bf16.mxu0 %v12190_v44  ;;  %6345 = vmatprep.subr.bf16.mxu1 %v12192_v49  ;;  %v12246_v37 = vcombine.high %v21420_v32, %v21419_v29  ;;  %v12248_v44 = vcombine.high %v21422_v41, %v21421_v40  ;;  %v12245_v45 = vcombine.low %v21420_v32, %v21419_v29  ;;  %v21423_v49 = vld [vmem:[#allocation60_spill] sm:$0xff]  ;;  %v21449_v29 = vld [vmem:[#allocation97_spill] sm:$0xff] }
 0x391   :  { %v21450_v32 = vld [vmem:[#allocation93_spill] sm:$0xff] }
 0x392   :  { %v12303_v41 = vcombine.low %v21450_v32, %v21449_v29 }
 0x393   :  { %6223 = vmatpush1.bf16.msra.mxu0 %v12189_v52  ;;  %6346 = vmatpush1.bf16.msra.mxu1 %v12191_v33  ;;  %v21424_v52 = vld [vmem:[#allocation58_spill] sm:$0xff] }
 0x394   :  { %6224 = vmatprep.subr.bf16.mxu0 %v12198_v57  ;;  %6347 = vmatprep.subr.bf16.mxu1 %v12200_v55  ;;  %v12254_v33 = vcombine.high %v21424_v52, %v21423_v49  ;;  %v12256_v57 = vcombine.high %v21426_v56, %v21425_v53  ;;  %v12253_v60 = vcombine.low %v21424_v52, %v21423_v49  ;;  %v21427_v55 = vld [vmem:[#allocation64_spill] sm:$0xff]  ;;  %v21453_v49 = vld [vmem:[#allocation105_spill] sm:$0xff] }
 0x395   :  { %v21454_v52 = vld [vmem:[#allocation101_spill] sm:$0xff] }
 0x396   :  { %v12311_v56 = vcombine.low %v21454_v52, %v21453_v49 }
 0x397   :  { %6225 = vmatpush1.bf16.msra.mxu0 %v12197_v25  ;;  %6348 = vmatpush1.bf16.msra.mxu1 %v12199_v58  ;;  %v21428_v25 = vld [vmem:[#allocation62_spill] sm:$0xff] }
 0x398   :  { %6226 = vmatprep.subr.bf16.mxu0 %v12206_v51  ;;  %6349 = vmatprep.subr.bf16.mxu1 %v12208_v39  ;;  %v12262_v58 = vcombine.high %v21428_v25, %v21427_v55  ;;  %v12264_v51 = vcombine.high %v21430_v47, %v21429_v63  ;;  %v12261_v54 = vcombine.low %v21428_v25, %v21427_v55  ;;  %v21431_v39 = vld [vmem:[#allocation68_spill] sm:$0xff]  ;;  %v21457_v55 = vld [vmem:[#allocation113_spill] sm:$0xff] }
 0x399   :  { %v21458_v25 = vld [vmem:[#allocation109_spill] sm:$0xff]  ;;  %v21459_v47 = vld [vmem:[#allocation120_spill] sm:$0xff] }
 0x39a   :  { %v12319_v63 = vcombine.low %v21458_v25, %v21457_v55 }
 0x39b   :  { %6227 = vmatpush1.bf16.msra.mxu0 %v12205_v43  ;;  %6350 = vmatpush1.bf16.msra.mxu1 %v12207_v46  ;;  %v21432_v43 = vld [vmem:[#allocation66_spill] sm:$0xff] }
 0x39c   :  { %6228 = vmatprep.subr.bf16.mxu0 %v12214_v35  ;;  %6351 = vmatprep.subr.bf16.mxu1 %v12216_v27  ;;  %v12270_v46 = vcombine.high %v21432_v43, %v21431_v39  ;;  %v12272_v35 = vcombine.high %v21434_v31, %v21433_v50  ;;  %v12269_v38 = vcombine.low %v21432_v43, %v21431_v39  ;;  %v21435_v27 = vld [vmem:[#allocation72_spill] sm:$0xff]  ;;  %v21462_v39 = vld [vmem:[#allocation117_spill] sm:$0xff] }
 0x39d   :  { %v21463_v50 = vld [vmem:[#allocation128_spill] sm:$0xff] }
 0x39e   :  { %v21464_v31 = vld [vmem:[#allocation124_spill] sm:$0xff] }
 0x39f   :  { %6229 = vmatpush1.bf16.msra.mxu0 %v12213_v23  ;;  %6352 = vmatpush1.bf16.msra.mxu1 %v12215_v30  ;;  %v21436_v23 = vld [vmem:[#allocation70_spill] sm:$0xff] }
 0x3a0   :  { %6230 = vmatprep.subr.bf16.mxu0 %v12222_v3  ;;  %6353 = vmatprep.subr.bf16.mxu1 %v12224_v19  ;;  %v12278_v30 = vcombine.high %v21436_v23, %v21435_v27  ;;  %v12280_v3 = vcombine.high %v21438_v2, %v21437_v34  ;;  %v12277_v14 = vcombine.low %v21436_v23, %v21435_v27  ;;  %v21439_v19 = vld [vmem:[#allocation80_spill] sm:$0xff] }
 0x3a1   :  { %v12333_v23 = vcombine.low %v21464_v31, %v21463_v50  ;;  %v21467_v34 = vld [vmem:[#allocation136_spill] sm:$0xff] }
 0x3a2   :  { %v21468_v2 = vld [vmem:[#allocation132_spill] sm:$0xff] }
 0x3a3   :  { %6231 = vmatpush1.bf16.msra.mxu0 %v12221_v15  ;;  %6354 = vmatpush1.bf16.msra.mxu1 %v12223_v22  ;;  %v21440_v15 = vld [vmem:[#allocation76_spill] sm:$0xff] }
 0x3a4   :  { %6232 = vmatprep.subr.bf16.mxu0 %v12230_v0  ;;  %6355 = vmatprep.subr.bf16.mxu1 %v12232_v5  ;;  %v12286_v22 = vcombine.high %v21440_v15, %v21439_v19  ;;  %v12288_v0 = vcombine.high %v21442_v7, %v21441_v26  ;;  %v12285_v1 = vcombine.low %v21440_v15, %v21439_v19  ;;  %v21443_v5 = vld [vmem:[#allocation88_spill] sm:$0xff] }
 0x3a5   :  { %v12341_v15 = vcombine.low %v21468_v2, %v21467_v34  ;;  %v21471_v26 = vld [vmem:[#allocation144_spill] sm:$0xff] }
 0x3a6   :  { %v21472_v7 = vld [vmem:[#allocation140_spill] sm:$0xff] }
 0x3a7   :  { %6233 = vmatpush1.bf16.msra.mxu0 %v12229_v18  ;;  %6356 = vmatpush1.bf16.msra.mxu1 %v12231_v8  ;;  %v21444_v18 = vld [vmem:[#allocation84_spill] sm:$0xff] }
 0x3a8   :  { %6234 = vmatprep.subr.bf16.mxu0 %v12238_v16  ;;  %6357 = vmatprep.subr.bf16.mxu1 %v12240_v21  ;;  %v12294_v8 = vcombine.high %v21444_v18, %v21443_v5  ;;  %v12296_v16 = vcombine.high %v21446_v12, %v21445_v9  ;;  %v12293_v17 = vcombine.low %v21444_v18, %v21443_v5  ;;  %v21447_v21 = vld [vmem:[#allocation96_spill] sm:$0xff] }
 0x3a9   :  { %v12349_v18 = vcombine.low %v21472_v7, %v21471_v26  ;;  %v21475_v9 = vld [vmem:[#allocation152_spill] sm:$0xff] }
 0x3aa   :  { %v21476_v12 = vld [vmem:[#allocation148_spill] sm:$0xff] }
 0x3ab   :  { %6235 = vmatpush1.bf16.msra.mxu0 %v12237_v24  ;;  %6358 = vmatpush1.bf16.msra.mxu1 %v12239_v28  ;;  %v21448_v24 = vld [vmem:[#allocation92_spill] sm:$0xff] }
 0x3ac   :  { %6236 = vmatprep.subr.bf16.mxu0 %v12246_v37  ;;  %6359 = vmatprep.subr.bf16.mxu1 %v12248_v44  ;;  %v12302_v28 = vcombine.high %v21448_v24, %v21447_v21  ;;  %v12304_v37 = vcombine.high %v21450_v32, %v21449_v29  ;;  %v12301_v40 = vcombine.low %v21448_v24, %v21447_v21  ;;  %v21451_v44 = vld [vmem:[#allocation104_spill] sm:$0xff] }
 0x3ad   :  { %v12357_v24 = vcombine.low %v21476_v12, %v21475_v9  ;;  %v21479_v29 = vld [vmem:[#allocation160_spill] sm:$0xff] }
 0x3ae   :  { %v21480_v32 = vld [vmem:[#allocation156_spill] sm:$0xff] }
 0x3af   :  { %6237 = vmatpush1.bf16.msra.mxu0 %v12245_v45  ;;  %6360 = vmatpush1.bf16.msra.mxu1 %v12247_v48  ;;  %v21452_v45 = vld [vmem:[#allocation100_spill] sm:$0xff] }
 0x3b0   :  { %6238 = vmatprep.subr.bf16.mxu0 %v12254_v33  ;;  %6361 = vmatprep.subr.bf16.mxu1 %v12256_v57  ;;  %v12310_v48 = vcombine.high %v21452_v45, %v21451_v44  ;;  %v12312_v33 = vcombine.high %v21454_v52, %v21453_v49  ;;  %v12309_v53 = vcombine.low %v21452_v45, %v21451_v44  ;;  %v21455_v57 = vld [vmem:[#allocation112_spill] sm:$0xff] }
 0x3b1   :  { %v12365_v45 = vcombine.low %v21480_v32, %v21479_v29  ;;  %v21483_v49 = vld [vmem:[#allocation168_spill] sm:$0xff] }
 0x3b2   :  { %v21484_v52 = vld [vmem:[#allocation164_spill] sm:$0xff] }
 0x3b3   :  { %6239 = vmatpush1.bf16.msra.mxu0 %v12253_v60  ;;  %6362 = vmatpush1.bf16.msra.mxu1 %v12255_v61  ;;  %v21456_v60 = vld [vmem:[#allocation108_spill] sm:$0xff] }
 0x3b4   :  { %6240 = vmatprep.subr.bf16.mxu0 %v12262_v58  ;;  %6363 = vmatprep.subr.bf16.mxu1 %v12264_v51  ;;  %v12318_v61 = vcombine.high %v21456_v60, %v21455_v57  ;;  %v12320_v58 = vcombine.high %v21458_v25, %v21457_v55  ;;  %v21460_v51 = vld [vmem:[#allocation116_spill] sm:$0xff] }
 0x3b5   :  { %v21487_v55 = vld [vmem:[#allocation176_spill] sm:$0xff] }
 0x3b6   :  { %v21488_v25 = vld [vmem:[#allocation172_spill] sm:$0xff] }
 0x3b7   :  { %6241 = vmatpush1.bf16.msra.mxu0 %v12261_v54  ;;  %6364 = vmatpush1.bf16.msra.mxu1 %v12263_v62  ;;  %v12326_v54 = vcombine.high %v21460_v51, %v21459_v47  ;;  %v21461_v62 = vld [vmem:[#allocation121_spill] sm:$0xff] }
 0x3b8   :  { %6242 = vmatprep.subr.bf16.mxu0 %v12270_v46  ;;  %6365 = vmatprep.subr.bf16.mxu1 %v12272_v35  ;;  %v12328_v43 = vcombine.high %v21462_v39, %v21461_v62  ;;  %v12327_v46 = vcombine.low %v21462_v39, %v21461_v62  ;;  %v12334_v35 = vcombine.high %v21464_v31, %v21463_v50  ;;  %v21491_v62 = vld [vmem:[#allocation184_spill] sm:$0xff] }
 0x3b9   :  { %v21492_v39 = vld [vmem:[#allocation180_spill] sm:$0xff] }
 0x3ba   :  { %v12389_v31 = vcombine.low %v21492_v39, %v21491_v62 }
 0x3bb   :  { %6243 = vmatpush1.bf16.msra.mxu0 %v12269_v38  ;;  %6366 = vmatpush1.bf16.msra.mxu1 %v12271_v42  ;;  %v21465_v38 = vld [vmem:[#allocation129_spill] sm:$0xff] }
 0x3bc   :  { %6244 = vmatprep.subr.bf16.mxu0 %v12278_v30  ;;  %6367 = vmatprep.subr.bf16.mxu1 %v12280_v3  ;;  %v21466_v42 = vld [vmem:[#allocation125_spill] sm:$0xff]  ;;  %v12342_v3 = vcombine.high %v21468_v2, %v21467_v34 }
 0x3bd   :  { %v12336_v27 = vcombine.high %v21466_v42, %v21465_v38  ;;  %v12335_v30 = vcombine.low %v21466_v42, %v21465_v38  ;;  %v21495_v38 = vld [vmem:[#allocation192_spill] sm:$0xff] }
 0x3be   :  { %v21496_v42 = vld [vmem:[#allocation188_spill] sm:$0xff] }
 0x3bf   :  { %6245 = vmatpush1.bf16.msra.mxu0 %v12277_v14  ;;  %6368 = vmatpush1.bf16.msra.mxu1 %v12279_v10  ;;  %v21469_v14 = vld [vmem:[#allocation137_spill] sm:$0xff]  ;;  %v12397_v2 = vcombine.low %v21496_v42, %v21495_v38 }
 0x3c0   :  { %6246 = vmatprep.subr.bf16.mxu0 %v12286_v22  ;;  %6369 = vmatprep.subr.bf16.mxu1 %v12288_v0  ;;  %v21470_v10 = vld [vmem:[#allocation133_spill] sm:$0xff]  ;;  %v12350_v0 = vcombine.high %v21472_v7, %v21471_v26 }
 0x3c1   :  { %v12344_v19 = vcombine.high %v21470_v10, %v21469_v14  ;;  %v12343_v22 = vcombine.low %v21470_v10, %v21469_v14  ;;  %v21499_v14 = vld [vmem:[#allocation200_spill] sm:$0xff] }
 0x3c2   :  { %v21500_v10 = vld [vmem:[#allocation196_spill] sm:$0xff] }
 0x3c3   :  { %6247 = vmatpush1.bf16.msra.mxu0 %v12285_v1  ;;  %6370 = vmatpush1.bf16.msra.mxu1 %v12287_v4  ;;  %v21473_v1 = vld [vmem:[#allocation145_spill] sm:$0xff]  ;;  %v12405_v7 = vcombine.low %v21500_v10, %v21499_v14 }
 0x3c4   :  { %6248 = vmatprep.subr.bf16.mxu0 %v12294_v8  ;;  %6371 = vmatprep.subr.bf16.mxu1 %v12296_v16  ;;  %v21474_v4 = vld [vmem:[#allocation141_spill] sm:$0xff]  ;;  %v12358_v16 = vcombine.high %v21476_v12, %v21475_v9 }
 0x3c5   :  { %v12352_v5 = vcombine.high %v21474_v4, %v21473_v1  ;;  %v12351_v8 = vcombine.low %v21474_v4, %v21473_v1  ;;  %v21503_v1 = vld [vmem:[#allocation208_spill] sm:$0xff] }
 0x3c6   :  { %v21504_v4 = vld [vmem:[#allocation204_spill] sm:$0xff] }
 0x3c7   :  { %6249 = vmatpush1.bf16.msra.mxu0 %v12293_v17  ;;  %6372 = vmatpush1.bf16.msra.mxu1 %v12295_v20  ;;  %v21477_v17 = vld [vmem:[#allocation153_spill] sm:$0xff]  ;;  %v12413_v12 = vcombine.low %v21504_v4, %v21503_v1 }
 0x3c8   :  { %6259 = vmatprep.subr.bf16.mxu0 %v12302_v28  ;;  %6382 = vmatprep.subr.bf16.mxu1 %v12304_v37  ;;  %v21478_v20 = vld [vmem:[#allocation149_spill] sm:$0xff]  ;;  %v12366_v37 = vcombine.high %v21480_v32, %v21479_v29 }
 0x3c9   :  { %v12360_v21 = vcombine.high %v21478_v20, %v21477_v17  ;;  %v12359_v28 = vcombine.low %v21478_v20, %v21477_v17  ;;  %v21507_v17 = vld [vmem:[#allocation216_spill] sm:$0xff] }
 0x3ca   :  { %6251 = vmatmul.mubr.bf16.vlgmr.msra.gmra.mrb[4].mxu0 %v19292_v13  ;;  %6374 = vmatmul.mubr.bf16.vlgmr.msra.gmra.mrb[4].mxu1 %v19292_v13  ;;  %v12317_v13 = vcombine.low %v21456_v60, %v21455_v57  ;;  %v12373_v60 = vcombine.low %v21484_v52, %v21483_v49  ;;  %v21508_v20 = vld [vmem:[#allocation212_spill] sm:$0xff] }
 0x3cb   :  { %6260 = vmatpush1.bf16.msra.mxu0 %v12301_v40  ;;  %6383 = vmatpush1.bf16.msra.mxu1 %v12303_v41  ;;  %v21481_v40 = vld [vmem:[#allocation161_spill] sm:$0xff]  ;;  %v12421_v32 = vcombine.low %v21508_v20, %v21507_v17 }
 0x3cc   :  { %6261 = vmatprep.subr.bf16.mxu0 %v12310_v48  ;;  %6384 = vmatprep.subr.bf16.mxu1 %v12312_v33  ;;  %v21482_v41 = vld [vmem:[#allocation157_spill] sm:$0xff]  ;;  %v12374_v33 = vcombine.high %v21484_v52, %v21483_v49 }
 0x3cd   :  { %6291 = vmatprep.mubr.bf16.mxu0 %v19304_v6  ;;  %6414 = vmatprep.mubr.bf16.mxu1 %v19304_v6  ;;  %v12325_v6 = vcombine.low %v21460_v51, %v21459_v47  ;;  %v12368_v44 = vcombine.high %v21482_v41, %v21481_v40  ;;  %v12367_v48 = vcombine.low %v21482_v41, %v21481_v40  ;;  %v21511_v40 = vld [vmem:[#allocation224_spill] sm:$0xff] }
 0x3ce   :  { %v12381_v51 = vcombine.low %v21488_v25, %v21487_v55  ;;  %v21512_v41 = vld [vmem:[#allocation220_spill] sm:$0xff] }
 0x3cf   :  { %6262 = vmatpush1.bf16.msra.mxu0 %v12309_v53  ;;  %6385 = vmatpush1.bf16.msra.mxu1 %v12311_v56  ;;  %v21485_v53 = vld [vmem:[#allocation169_spill] sm:$0xff]  ;;  %v12429_v52 = vcombine.low %v21512_v41, %v21511_v40 }
 0x3d0   :  { %6263 = vmatprep.subr.bf16.mxu0 %v12318_v61  ;;  %6386 = vmatprep.subr.bf16.mxu1 %v12320_v58  ;;  %v21486_v56 = vld [vmem:[#allocation165_spill] sm:$0xff]  ;;  %v12382_v58 = vcombine.high %v21488_v25, %v21487_v55 }
 0x3d1   :  { %v12376_v57 = vcombine.high %v21486_v56, %v21485_v53  ;;  %v12375_v61 = vcombine.low %v21486_v56, %v21485_v53  ;;  %v21515_v53 = vld [vmem:[#allocation232_spill] sm:$0xff] }
 0x3d2   :  { %v21516_v56 = vld [vmem:[#allocation228_spill] sm:$0xff] }
 0x3d3   :  { %6264 = vmatpush1.bf16.msra.mxu0 %v12317_v13  ;;  %6387 = vmatpush1.bf16.msra.mxu1 %v12319_v63  ;;  %v21489_v13 = vld [vmem:[#allocation177_spill] sm:$0xff]  ;;  %v12437_v25 = vcombine.low %v21516_v56, %v21515_v53 }
 0x3d4   :  { %6265 = vmatprep.subr.bf16.mxu0 %v12326_v54  ;;  %6388 = vmatprep.subr.bf16.mxu1 %v12328_v43  ;;  %v21490_v63 = vld [vmem:[#allocation173_spill] sm:$0xff]  ;;  %v12390_v43 = vcombine.high %v21492_v39, %v21491_v62 }
 0x3d5   :  { %v12384_v47 = vcombine.high %v21490_v63, %v21489_v13  ;;  %v12383_v54 = vcombine.low %v21490_v63, %v21489_v13  ;;  %v21519_v13 = vld [vmem:[#allocation240_spill] sm:$0xff] }
 0x3d6   :  { %v21520_v63 = vld [vmem:[#allocation236_spill] sm:$0xff] }
 0x3d7   :  { %6266 = vmatpush1.bf16.msra.mxu0 %v12325_v6  ;;  %6389 = vmatpush1.bf16.msra.mxu1 %v12327_v46  ;;  %v21493_v6 = vld [vmem:[#allocation185_spill] sm:$0xff] }
 0x3d8   :  { %6267 = vmatprep.subr.bf16.mxu0 %v12334_v35  ;;  %6390 = vmatprep.subr.bf16.mxu1 %v12336_v27  ;;  %v21494_v46 = vld [vmem:[#allocation181_spill] sm:$0xff]  ;;  %v12398_v27 = vcombine.high %v21496_v42, %v21495_v38 }
 0x3d9   :  { %v12392_v50 = vcombine.high %v21494_v46, %v21493_v6  ;;  %v12391_v35 = vcombine.low %v21494_v46, %v21493_v6  ;;  %v21524_v6 = vld [vmem:[#allocation244_spill] sm:$0xff] }
 0x3db   :  { %6268 = vmatpush1.bf16.msra.mxu0 %v12333_v23  ;;  %6391 = vmatpush1.bf16.msra.mxu1 %v12335_v30  ;;  %v21497_v23 = vld [vmem:[#allocation193_spill] sm:$0xff] }
 0x3dc   :  { %6269 = vmatprep.subr.bf16.mxu0 %v12342_v3  ;;  %6392 = vmatprep.subr.bf16.mxu1 %v12344_v19  ;;  %v21498_v30 = vld [vmem:[#allocation189_spill] sm:$0xff]  ;;  %v12406_v19 = vcombine.high %v21500_v10, %v21499_v14 }
 0x3dd   :  { %v12400_v34 = vcombine.high %v21498_v30, %v21497_v23  ;;  %v12399_v3 = vcombine.low %v21498_v30, %v21497_v23  ;;  %v21528_v23 = vld [vmem:[#allocation252_spill] sm:$0xff] }
 0x3df   :  { %6270 = vmatpush1.bf16.msra.mxu0 %v12341_v15  ;;  %6393 = vmatpush1.bf16.msra.mxu1 %v12343_v22  ;;  %v21501_v15 = vld [vmem:[#allocation201_spill] sm:$0xff] }
 0x3e0   :  { %6271 = vmatprep.subr.bf16.mxu0 %v12350_v0  ;;  %6394 = vmatprep.subr.bf16.mxu1 %v12352_v5  ;;  %v21502_v22 = vld [vmem:[#allocation197_spill] sm:$0xff]  ;;  %v12414_v5 = vcombine.high %v21504_v4, %v21503_v1 }
 0x3e1   :  { %v12408_v26 = vcombine.high %v21502_v22, %v21501_v15  ;;  %v12407_v0 = vcombine.low %v21502_v22, %v21501_v15  ;;  %v21532_v22 = vld [vmem:[#allocation261_spill] sm:$0xff] }
 0x3e3   :  { %6272 = vmatpush1.bf16.msra.mxu0 %v12349_v18  ;;  %6395 = vmatpush1.bf16.msra.mxu1 %v12351_v8  ;;  %v21505_v18 = vld [vmem:[#allocation209_spill] sm:$0xff] }
 0x3e4   :  { %6273 = vmatprep.subr.bf16.mxu0 %v12358_v16  ;;  %6396 = vmatprep.subr.bf16.mxu1 %v12360_v21  ;;  %v21506_v8 = vld [vmem:[#allocation205_spill] sm:$0xff]  ;;  %v12422_v21 = vcombine.high %v21508_v20, %v21507_v17 }
 0x3e5   :  { %v12416_v9 = vcombine.high %v21506_v8, %v21505_v18  ;;  %v12415_v16 = vcombine.low %v21506_v8, %v21505_v18 }
 0x3e7   :  { %6274 = vmatpush1.bf16.msra.mxu0 %v12357_v24  ;;  %6397 = vmatpush1.bf16.msra.mxu1 %v12359_v28  ;;  %v21509_v24 = vld [vmem:[#allocation217_spill] sm:$0xff] }
 0x3e8   :  { %6275 = vmatprep.subr.bf16.mxu0 %v12366_v37  ;;  %6398 = vmatprep.subr.bf16.mxu1 %v12368_v44  ;;  %v21510_v28 = vld [vmem:[#allocation213_spill] sm:$0xff]  ;;  %v12430_v44 = vcombine.high %v21512_v41, %v21511_v40 }
 0x3e9   :  { %v12424_v29 = vcombine.high %v21510_v28, %v21509_v24  ;;  %v12423_v37 = vcombine.low %v21510_v28, %v21509_v24 }
 0x3eb   :  { %6276 = vmatpush1.bf16.msra.mxu0 %v12365_v45  ;;  %6399 = vmatpush1.bf16.msra.mxu1 %v12367_v48  ;;  %v21513_v45 = vld [vmem:[#allocation225_spill] sm:$0xff] }
 0x3ec   :  { %6277 = vmatprep.subr.bf16.mxu0 %v12374_v33  ;;  %6400 = vmatprep.subr.bf16.mxu1 %v12376_v57  ;;  %v21514_v48 = vld [vmem:[#allocation221_spill] sm:$0xff]  ;;  %v12438_v57 = vcombine.high %v21516_v56, %v21515_v53 }
 0x3ed   :  { %v12432_v49 = vcombine.high %v21514_v48, %v21513_v45  ;;  %v12431_v33 = vcombine.low %v21514_v48, %v21513_v45 }
 0x3ef   :  { %6278 = vmatpush1.bf16.msra.mxu0 %v12373_v60  ;;  %6401 = vmatpush1.bf16.msra.mxu1 %v12375_v61  ;;  %v21517_v60 = vld [vmem:[#allocation233_spill] sm:$0xff] }
 0x3f0   :  { %6279 = vmatprep.subr.bf16.mxu0 %v12382_v58  ;;  %6402 = vmatprep.subr.bf16.mxu1 %v12384_v47  ;;  %v21518_v61 = vld [vmem:[#allocation229_spill] sm:$0xff]  ;;  %v12446_v47 = vcombine.high %v21520_v63, %v21519_v13 }
 0x3f1   :  { %v12440_v55 = vcombine.high %v21518_v61, %v21517_v60  ;;  %v12439_v58 = vcombine.low %v21518_v61, %v21517_v60 }
 0x3f3   :  { %6280 = vmatpush1.bf16.msra.mxu0 %v12381_v51  ;;  %6403 = vmatpush1.bf16.msra.mxu1 %v12383_v54  ;;  %v21521_v51 = vld [vmem:[#allocation241_spill] sm:$0xff] }
 0x3f4   :  { %6281 = vmatprep.subr.bf16.mxu0 %v12390_v43  ;;  %6404 = vmatprep.subr.bf16.mxu1 %v12392_v50  ;;  %v21522_v54 = vld [vmem:[#allocation237_spill] sm:$0xff]  ;;  %v21523_v43 = vld [vmem:[#allocation248_spill] sm:$0xff] }
 0x3f5   :  { %v12448_v62 = vcombine.high %v21522_v54, %v21521_v51  ;;  %v12447_v39 = vcombine.low %v21522_v54, %v21521_v51  ;;  %v12454_v46 = vcombine.high %v21524_v6, %v21523_v43  ;;  %v21525_v50 = vld [vmem:[#allocation249_spill] sm:$0xff]  ;;  %v12453_v38 = vcombine.low %v21524_v6, %v21523_v43 }
 0x3f7   :  { %6282 = vmatpush1.bf16.msra.mxu0 %v12389_v31  ;;  %6405 = vmatpush1.bf16.msra.mxu1 %v12391_v35  ;;  %v21526_v31 = vld [vmem:[#allocation245_spill] sm:$0xff] }
 0x3f8   :  { %6283 = vmatprep.subr.bf16.mxu0 %v12398_v27  ;;  %6406 = vmatprep.subr.bf16.mxu1 %v12400_v34  ;;  %v12456_v35 = vcombine.high %v21526_v31, %v21525_v50  ;;  %v12455_v42 = vcombine.low %v21526_v31, %v21525_v50  ;;  %v21527_v27 = vld [vmem:[#allocation256_spill] sm:$0xff]  ;;  %v21529_v34 = vld [vmem:[#allocation257_spill] sm:$0xff] }
 0x3f9   :  { %v12462_v30 = vcombine.high %v21528_v23, %v21527_v27  ;;  %v12461_v14 = vcombine.low %v21528_v23, %v21527_v27 }
 0x3fb   :  { %6284 = vmatpush1.bf16.msra.mxu0 %v12397_v2  ;;  %6407 = vmatpush1.bf16.msra.mxu1 %v12399_v3  ;;  %v21530_v2 = vld [vmem:[#allocation253_spill] sm:$0xff] }
 0x3fc   :  { %6285 = vmatprep.subr.bf16.mxu0 %v12406_v19  ;;  %6408 = vmatprep.subr.bf16.mxu1 %v12408_v26  ;;  %v12464_v3 = vcombine.high %v21530_v2, %v21529_v34  ;;  %v12463_v10 = vcombine.low %v21530_v2, %v21529_v34  ;;  %v21531_v19 = vld [vmem:[#allocation260_spill] sm:$0xff]  ;;  %v12472_v26 = vcombine.high %v21532_v22, %v21532_v22 }
 0x3fd   :  { %v12470_v15 = vcombine.high %v21531_v19, %v21531_v19 }
 0x3ff   :  { %6286 = vmatpush1.bf16.msra.mxu0 %v12405_v7  ;;  %6409 = vmatpush1.bf16.msra.mxu1 %v12407_v0  ;;  %v12469_v7 = vcombine.low %v21531_v19, %v21531_v19  ;;  %v12471_v0 = vcombine.low %v21532_v22, %v21532_v22 }
 0x400   :  { %6287 = vmatprep.subr.bf16.mxu0 %v12414_v5  ;;  %6410 = vmatprep.subr.bf16.mxu1 %v12416_v9  ;;  %v4386_v5 = vlaneseq }
 0x401   :  { %v5961_v1 = vsel %vm5947_vm0, %v12469_v7, 0  ;;  %v5967_v4 = vsel %vm5947_vm0, %v12471_v0, 0 }
 0x402   :  { %v19816_v18 = vshrl.u32 %v4386_v5, 7 }
 0x403   :  { %6288 = vmatpush1.bf16.msra.mxu0 %v12413_v12  ;;  %6411 = vmatpush1.bf16.msra.mxu1 %v12415_v16  ;;  %v4384_v12 = vld [vmem:[%s20461_s2] sm:$0xff] }
 0x404   :  { %6289 = vmatprep.subr.bf16.mxu0 %v12422_v21  ;;  %6412 = vmatprep.subr.bf16.mxu1 %v12424_v29  ;;  %v19819_v8 = vsub.s32 0, %v19816_v18  ;;  %v19822_v9 = vsub.s32 2, %v19816_v18  ;;  %v19828_v16 = vsub.s32 1, %v19816_v18  ;;  %v19831_v17 = vsub.s32 3, %v19816_v18 }
 0x405   :  { %v19847_v61 = vsub.s32 4, %v19816_v18 }
 0x406   :  { %v4397_v20 = vrot.slane %v4384_v12, %v19822_v9  ;;  %v4393_v21 = vrot.slane %v4384_v12, %v19828_v16  ;;  %v4401_v24 = vrot.slane %v4384_v12, %v19831_v17 }
 0x407   :  { %6290 = vmatpush1.bf16.msra.mxu0 %v12421_v32  ;;  %6413 = vmatpush1.bf16.msra.mxu1 %v12423_v37 }
 0x408   :  { %6300 = vmatprep.subr.bf16.mxu0 %v12430_v44  ;;  %6423 = vmatprep.subr.bf16.mxu1 %v12432_v49 }
 0x40a   :  { %6292 = vmatmul.mubr.bf16.vlgmr.msra.gmra.mrb[4].mxu0 %v19432_v36  ;;  %6415 = vmatmul.mubr.bf16.vlgmr.msra.gmra.mrb[4].mxu1 %v19432_v36  ;;  %v12445_v36 = vcombine.low %v21520_v63, %v21519_v13  ;;  %v4405_v13 = vrot.slane %v4384_v12, %v19847_v61 }
 0x40b   :  { %6301 = vmatpush1.bf16.msra.mxu0 %v12429_v52  ;;  %6424 = vmatpush1.bf16.msra.mxu1 %v12431_v33 }
 0x40c   :  { %6302 = vmatprep.subr.bf16.mxu0 %v12438_v57  ;;  %6425 = vmatprep.subr.bf16.mxu1 %v12440_v55  ;;  %v4412_v55 = vsub.s32 6, %v19816_v18 }
 0x40d   :  { %6332 = vmatprep.mubr.bf16.mxu0 %v14032_v59  ;;  %6455 = vmatprep.mubr.bf16.mxu1 %v14032_v59 }
 0x40e   :  { %v4413_v63 = vrot.slane %v4384_v12, %v4412_v55 }
 0x40f   :  { %6303 = vmatpush1.bf16.msra.mxu0 %v12437_v25  ;;  %6426 = vmatpush1.bf16.msra.mxu1 %v12439_v58  ;;  %v4408_v25 = vsub.s32 5, %v19816_v18  ;;  %v4416_v58 = vsub.s32 7, %v19816_v18 }
 0x410   :  { %6304 = vmatprep.subr.bf16.mxu0 %v12446_v47  ;;  %6427 = vmatprep.subr.bf16.mxu1 %v12448_v62 }
 0x411   :  { %v4409_v47 = vrot.slane %v4384_v12, %v4408_v25  ;;  %v4417_v51 = vrot.slane %v4384_v12, %v4416_v58 }
 0x413   :  { %6305 = vmatpush1.bf16.msra.mxu0 %v12445_v36  ;;  %6428 = vmatpush1.bf16.msra.mxu1 %v12447_v39 }
 0x414   :  { %6306 = vmatprep.subr.bf16.mxu0 %v12454_v46  ;;  %6429 = vmatprep.subr.bf16.mxu1 %v12456_v35 }
 0x417   :  { %6307 = vmatpush1.bf16.msra.mxu0 %v12453_v38  ;;  %6430 = vmatpush1.bf16.msra.mxu1 %v12455_v42 }
 0x418   :  { %6308 = vmatprep.subr.bf16.mxu0 %v12462_v30  ;;  %6431 = vmatprep.subr.bf16.mxu1 %v12464_v3 }
 0x41b   :  { %6309 = vmatpush1.bf16.msra.mxu0 %v12461_v14  ;;  %6432 = vmatpush1.bf16.msra.mxu1 %v12463_v10 }
 0x41c   :  { %12477 = vmatprep.subr.msk.bf16.mxu0 %vm5947_vm0, %v12470_v15  ;;  %12479 = vmatprep.subr.msk.bf16.mxu1 %vm5947_vm0, %v12472_v26 }
 0x41f   :  { %6311 = vmatpush1.bf16.msra.mxu0 %v5961_v1  ;;  %6434 = vmatpush1.bf16.msra.mxu1 %v5967_v4 }
 0x422   :  { %12478 = vmatmul.mubr.msk.bf16.vlgmr.msra.gmra.mrb[4].mxu0 %vm5943_vm1, %v19492_v11  ;;  %12480 = vmatmul.mubr.msk.bf16.vlgmr.msra.gmra.mrb[4].mxu1 %vm5943_vm1, %v19492_v11  ;;  %v4389_v11 = vrot.slane %v4384_v12, %v19819_v8 }
 0x45d   :  { %v6088_v28 = vpop.f32.mrb[0].mxu0  ;;  %v6211_v29 = vpop.f32.mrb[0].mxu1 }
 0x45e   :  { %v19837_v32 = vadd.f32 %v6088_v28, %v4389_v11  ;;  %v19839_v37 = vadd.f32 %v6211_v29, %v4397_v20  ;;  %v6090_v40 = vpop.f32.mrb[1].mxu0  ;;  %v6213_v41 = vpop.f32.mrb[1].mxu1 }
 0x45f   :  { %v13261_v44 = vadd.f32 %v6090_v40, %v4393_v21  ;;  %v19841_v45 = vadd.f32 %v6213_v41, %v4401_v24  ;;  %v6092_v48 = vpop.f32.mrb[2].mxu0  ;;  %v6215_v49 = vpop.f32.mrb[2].mxu1 }
 0x460   :  { %v6464_v52 = vmax.f32 %v19837_v32, 0.0  ;;  %v6466_v33 = vmax.f32 %v19839_v37, 0.0  ;;  %v6093_v53 = vpop.f32.mrb[3].mxu0  ;;  %v6216_v56 = vpop.f32.mrb[3].mxu1 }
 0x461   :  { %v6465_v57 = vmax.f32 %v13261_v44, 0.0  ;;  %v6467_v60 = vmax.f32 %v19841_v45, 0.0 }
 0x4f5   :  { %v6334_v54 = vpop.f32.mrb[4].mxu0  ;;  %v6457_v62 = vpop.f32.mrb[4].mxu1 }
 0x4f6   :  { %v19857_v36 = vadd.f32 %v6334_v54, %v4405_v13  ;;  %v19859_v39 = vadd.f32 %v6457_v62, %v4413_v63  ;;  %v6336_v43 = vpop.f32.mrb[5].mxu0  ;;  %v6459_v6 = vpop.f32.mrb[5].mxu1 }
 0x4f7   :  { %v19861_v46 = vadd.f32 %v6336_v43, %v4409_v47  ;;  %v19863_v50 = vadd.f32 %v6459_v6, %v4417_v51  ;;  %v6338_v31 = vpop.f32.mrb[6].mxu0  ;;  %v6461_v35 = vpop.f32.mrb[6].mxu1 }
 0x4f8   :  { %v6468_v38 = vmax.f32 %v19857_v36, 0.0  ;;  %v6470_v42 = vmax.f32 %v19859_v39, 0.0  ;;  %v6339_v27 = vpop.f32.mrb[7].mxu0  ;;  %v6462_v23 = vpop.f32.mrb[7].mxu1 }
 0x4f9   :  { %v6469_v30 = vmax.f32 %v19861_v46, 0.0  ;;  %v6471_v34 = vmax.f32 %v19863_v50, 0.0 }
 0x4fa   :  { %14024 = dma.done.wait [#allocation7 + $0x1], 56000 }
 0x4fb   :  { %14025 = vsyncadd [#allocation7 + $0x1], 4294911296  ;;  %v19869_v2 = vpack.c.bf16 %v6465_v57, %v6465_v57  ;;  %v13391_v3 = vld [vmem:[#allocation3 + $0x4] ss:$28 sps:$4 sm:$0xff]   ;;  %v13393_v14 = vld [vmem:[#allocation3 + $0xc] ss:$28 sps:$4 sm:$0xff]  }
 0x4fc   :  { %9296 = vmatprep.subr.bf16.mxu0 %v13391_v3  ;;  %v13395_v10 = vld [vmem:[#allocation3] ss:$28 sps:$4 sm:$0xff]   ;;  %v13396_v19 = vld [vmem:[#allocation3 + $0x8] ss:$28 sps:$4 sm:$0xff]   ;;  %9460 = vmatprep.subr.bf16.mxu1 %v13393_v14  ;;  %v13401_v26 = vld [vmem:[#allocation3 + $0x38] ss:$28 sps:$4 sm:$0xff]  }
 0x4fd   :  { %9328 = vmatprep.mubr.bf16.mxu0 %v19869_v2  ;;  %9492 = vmatprep.mubr.bf16.mxu1 %v19869_v2  ;;  %v13397_v15 = vld [vmem:[#allocation3 + $0x3c] ss:$28 sps:$4 sm:$0xff]   ;;  %v13399_v22 = vld [vmem:[#allocation3 + $0x44] ss:$28 sps:$4 sm:$0xff]   ;;  %v13403_v0 = vld [vmem:[#allocation3 + $0x74] ss:$28 sps:$4 sm:$0xff]  }
 0x4fe   :  { %9297 = vmatpush1.bf16.msra.mxu0 %v13395_v10  ;;  %9461 = vmatpush1.bf16.msra.mxu1 %v13396_v19  ;;  %v13402_v7 = vld [vmem:[#allocation3 + $0x40] ss:$28 sps:$4 sm:$0xff]   ;;  %v13407_v4 = vld [vmem:[#allocation3 + $0x70] ss:$28 sps:$4 sm:$0xff]   ;;  %v13408_v5 = vld [vmem:[#allocation3 + $0x78] ss:$28 sps:$4 sm:$0xff]  }
 0x4ff   :  { %9298 = vmatprep.subr.bf16.mxu0 %v13397_v15  ;;  %9462 = vmatprep.subr.bf16.mxu1 %v13399_v22  ;;  %v13405_v1 = vld [vmem:[#allocation3 + $0x7c] ss:$28 sps:$4 sm:$0xff]   ;;  %v13409_v12 = vld [vmem:[#allocation3 + $0xac] ss:$28 sps:$4 sm:$0xff]   ;;  %v13411_v11 = vld [vmem:[#allocation3 + $0xb4] ss:$28 sps:$4 sm:$0xff]  }
 0x500   :  { %v13413_v20 = vld [vmem:[#allocation3 + $0xa8] ss:$28 sps:$4 sm:$0xff]   ;;  %v13414_v21 = vld [vmem:[#allocation3 + $0xb0] ss:$28 sps:$4 sm:$0xff]   ;;  %v13419_v29 = vld [vmem:[#allocation3 + $0xe0] ss:$28 sps:$4 sm:$0xff]  }
 0x501   :  { %v13415_v24 = vld [vmem:[#allocation3 + $0xe4] ss:$28 sps:$4 sm:$0xff]   ;;  %v13417_v28 = vld [vmem:[#allocation3 + $0xec] ss:$28 sps:$4 sm:$0xff]   ;;  %v13421_v41 = vld [vmem:[#allocation3 + $0x11c] ss:$28 sps:$4 sm:$0xff]  }
 0x502   :  { %9299 = vmatpush1.bf16.msra.mxu0 %v13401_v26  ;;  %9463 = vmatpush1.bf16.msra.mxu1 %v13402_v7  ;;  %v13420_v40 = vld [vmem:[#allocation3 + $0xe8] ss:$28 sps:$4 sm:$0xff]   ;;  %v13425_v48 = vld [vmem:[#allocation3 + $0x118] ss:$28 sps:$4 sm:$0xff]   ;;  %v13426_v49 = vld [vmem:[#allocation3 + $0x120] ss:$28 sps:$4 sm:$0xff]  }
 0x503   :  { %9300 = vmatprep.subr.bf16.mxu0 %v13403_v0  ;;  %9464 = vmatprep.subr.bf16.mxu1 %v13405_v1  ;;  %v13423_v44 = vld [vmem:[#allocation3 + $0x124] ss:$28 sps:$4 sm:$0xff]   ;;  %v13427_v53 = vld [vmem:[#allocation3 + $0x154] ss:$28 sps:$4 sm:$0xff]   ;;  %v13429_v56 = vld [vmem:[#allocation3 + $0x15c] ss:$28 sps:$4 sm:$0xff]  }
 0x504   :  { %v13431_v57 = vld [vmem:[#allocation3 + $0x150] ss:$28 sps:$4 sm:$0xff]   ;;  %v13432_v58 = vld [vmem:[#allocation3 + $0x158] ss:$28 sps:$4 sm:$0xff]   ;;  %v13437_v47 = vld [vmem:[#allocation3 + $0x188] ss:$28 sps:$4 sm:$0xff]  }
 0x505   :  { %v13433_v13 = vld [vmem:[#allocation3 + $0x18c] ss:$28 sps:$4 sm:$0xff]   ;;  %v13435_v63 = vld [vmem:[#allocation3 + $0x194] ss:$28 sps:$4 sm:$0xff]   ;;  %v13439_v54 = vld [vmem:[#allocation3 + $0x1c4] ss:$28 sps:$4 sm:$0xff]  }
 0x506   :  { %9301 = vmatpush1.bf16.msra.mxu0 %v13407_v4  ;;  %9465 = vmatpush1.bf16.msra.mxu1 %v13408_v5  ;;  %v13438_v51 = vld [vmem:[#allocation3 + $0x190] ss:$28 sps:$4 sm:$0xff]   ;;  %v13443_v43 = vld [vmem:[#allocation3 + $0x1c0] ss:$28 sps:$4 sm:$0xff]   ;;  %v13444_v6 = vld [vmem:[#allocation3 + $0x1c8] ss:$28 sps:$4 sm:$0xff]  }
 0x507   :  { %9302 = vmatprep.subr.bf16.mxu0 %v13409_v12  ;;  %9466 = vmatprep.subr.bf16.mxu1 %v13411_v11  ;;  %v13441_v62 = vld [vmem:[#allocation3 + $0x1cc] ss:$28 sps:$4 sm:$0xff]   ;;  %v13445_v31 = vld [vmem:[#allocation3 + $0x1fc] ss:$28 sps:$4 sm:$0xff]   ;;  %v13447_v35 = vld [vmem:[#allocation3 + $0x204] ss:$28 sps:$4 sm:$0xff]  }
 0x508   :  { %v13449_v27 = vld [vmem:[#allocation3 + $0x1f8] ss:$28 sps:$4 sm:$0xff]   ;;  %v13450_v23 = vld [vmem:[#allocation3 + $0x200] ss:$28 sps:$4 sm:$0xff]   ;;  %v13455_v10 = vld [vmem:[#allocation3 + $0x230] ss:$28 sps:$4 sm:$0xff]  }
 0x509   :  { %v13451_v3 = vld [vmem:[#allocation3 + $0x234] ss:$28 sps:$4 sm:$0xff]   ;;  %v13453_v14 = vld [vmem:[#allocation3 + $0x23c] ss:$28 sps:$4 sm:$0xff]   ;;  %v13457_v15 = vld [vmem:[#allocation3 + $0x26c] ss:$28 sps:$4 sm:$0xff]  }
 0x50a   :  { %9303 = vmatpush1.bf16.msra.mxu0 %v13413_v20  ;;  %9467 = vmatpush1.bf16.msra.mxu1 %v13414_v21  ;;  %v13456_v19 = vld [vmem:[#allocation3 + $0x238] ss:$28 sps:$4 sm:$0xff]   ;;  %v13461_v26 = vld [vmem:[#allocation3 + $0x268] ss:$28 sps:$4 sm:$0xff]   ;;  %v13462_v7 = vld [vmem:[#allocation3 + $0x270] ss:$28 sps:$4 sm:$0xff]  }
 0x50b   :  { %9304 = vmatprep.subr.bf16.mxu0 %v13415_v24  ;;  %9468 = vmatprep.subr.bf16.mxu1 %v13417_v28  ;;  %v13459_v22 = vld [vmem:[#allocation3 + $0x274] ss:$28 sps:$4 sm:$0xff]   ;;  %v13463_v0 = vld [vmem:[#allocation3 + $0x2a4] ss:$28 sps:$4 sm:$0xff]   ;;  %v13465_v1 = vld [vmem:[#allocation3 + $0x2ac] ss:$28 sps:$4 sm:$0xff]  }
 0x50c   :  { %v13467_v4 = vld [vmem:[#allocation3 + $0x2a0] ss:$28 sps:$4 sm:$0xff]   ;;  %v13468_v5 = vld [vmem:[#allocation3 + $0x2a8] ss:$28 sps:$4 sm:$0xff]   ;;  %v13473_v20 = vld [vmem:[#allocation3 + $0x2d8] ss:$28 sps:$4 sm:$0xff]  }
 0x50d   :  { %v13469_v12 = vld [vmem:[#allocation3 + $0x2dc] ss:$28 sps:$4 sm:$0xff]   ;;  %v13471_v11 = vld [vmem:[#allocation3 + $0x2e4] ss:$28 sps:$4 sm:$0xff]   ;;  %v13475_v24 = vld [vmem:[#allocation3 + $0x314] ss:$28 sps:$4 sm:$0xff]  }
 0x50e   :  { %9305 = vmatpush1.bf16.msra.mxu0 %v13419_v29  ;;  %9469 = vmatpush1.bf16.msra.mxu1 %v13420_v40  ;;  %v13474_v21 = vld [vmem:[#allocation3 + $0x2e0] ss:$28 sps:$4 sm:$0xff]   ;;  %v13479_v29 = vld [vmem:[#allocation3 + $0x310] ss:$28 sps:$4 sm:$0xff]   ;;  %v13480_v40 = vld [vmem:[#allocation3 + $0x318] ss:$28 sps:$4 sm:$0xff]  }
 0x50f   :  { %9306 = vmatprep.subr.bf16.mxu0 %v13421_v41  ;;  %9470 = vmatprep.subr.bf16.mxu1 %v13423_v44  ;;  %v13477_v28 = vld [vmem:[#allocation3 + $0x31c] ss:$28 sps:$4 sm:$0xff]   ;;  %v13481_v41 = vld [vmem:[#allocation3 + $0x34c] ss:$28 sps:$4 sm:$0xff]   ;;  %v13483_v44 = vld [vmem:[#allocation3 + $0x354] ss:$28 sps:$4 sm:$0xff]  }
 0x510   :  { %v13496_v32 = vld [vmem:[#allocation3 + $0x3c0] ss:$28 sps:$4 sm:$0xff]   ;;  %v13499_v45 = vld [vmem:[#allocation3 + $0x3f0] ss:$28 sps:$4 sm:$0xff]   ;;  %vm9271_vm2 = vcmask 850944  }
 0x511   :  { %v13592_v37 = vld [vmem:[#allocation3 + $0x740] ss:$28 sps:$4 sm:$0xff]   ;;  %v13595_v46 = vld [vmem:[#allocation3 + $0x770] ss:$28 sps:$4 sm:$0xff]   ;;  %v13685_v36 = vld [vmem:[#allocation3 + $0xab8] ss:$28 sps:$4 sm:$0xff]  }
 0x512   :  { %9307 = vmatpush1.bf16.msra.mxu0 %v13425_v48  ;;  %9471 = vmatpush1.bf16.msra.mxu1 %v13426_v49  ;;  %v13485_v48 = vld [vmem:[#allocation3 + $0x348] ss:$28 sps:$4 sm:$0xff]   ;;  %v13486_v49 = vld [vmem:[#allocation3 + $0x350] ss:$28 sps:$4 sm:$0xff]  }
 0x513   :  { %9308 = vmatprep.subr.bf16.mxu0 %v13427_v53  ;;  %9472 = vmatprep.subr.bf16.mxu1 %v13429_v56  ;;  %v13489_v53 = vld [vmem:[#allocation3 + $0x384] ss:$28 sps:$4 sm:$0xff]   ;;  %v13492_v56 = vld [vmem:[#allocation3 + $0x38c] ss:$28 sps:$4 sm:$0xff]  }
 0x514   :  { %v13691_v50 = vld [vmem:[#allocation3 + $0xaf0] ss:$28 sps:$4 sm:$0xff]   ;;  %v13780_v39 = vld [vmem:[#allocation3 + $0x248] ss:$28 sps:$4 sm:$0xff]  }
 0x516   :  { %9309 = vmatpush1.bf16.msra.mxu0 %v13431_v57  ;;  %9473 = vmatpush1.bf16.msra.mxu1 %v13432_v58  ;;  %v13487_v57 = vld [vmem:[#allocation3 + $0x380] ss:$28 sps:$4 sm:$0xff]   ;;  %v13490_v58 = vld [vmem:[#allocation3 + $0x388] ss:$28 sps:$4 sm:$0xff]  }
 0x517   :  { %9310 = vmatprep.subr.bf16.mxu0 %v13433_v13  ;;  %9474 = vmatprep.subr.bf16.mxu1 %v13435_v63  ;;  %v19876_v13 = vpack.c.bf16 %v6464_v52, %v6464_v52  ;;  %v13495_v63 = vld [vmem:[#allocation3 + $0x3bc] ss:$28 sps:$4 sm:$0xff]   ;;  %v13501_v52 = vld [vmem:[#allocation3 + $0x3f4] ss:$28 sps:$4 sm:$0xff]  }
 0x51a   :  { %9311 = vmatpush1.bf16.msra.mxu0 %v13437_v47  ;;  %9475 = vmatpush1.bf16.msra.mxu1 %v13438_v51  ;;  %v13498_v47 = vld [vmem:[#allocation3 + $0x3c4] ss:$28 sps:$4 sm:$0xff]   ;;  %v19881_v51 = vpack.c.bf16 %v6467_v60, %v6467_v60  ;;  %v13507_v60 = vld [vmem:[#allocation3 + $0x42c] ss:$28 sps:$4 sm:$0xff]  }
 0x51b   :  { %9312 = vmatprep.subr.bf16.mxu0 %v13439_v54  ;;  %9476 = vmatprep.subr.bf16.mxu1 %v13441_v62  ;;  %v13493_v54 = vld [vmem:[#allocation3 + $0x3b8] ss:$28 sps:$4 sm:$0xff]  }
 0x51c   :  { %v13504_v62 = vld [vmem:[#allocation3 + $0x3fc] ss:$28 sps:$4 sm:$0xff]  }
 0x51e   :  { %9313 = vmatpush1.bf16.msra.mxu0 %v13443_v43  ;;  %9477 = vmatpush1.bf16.msra.mxu1 %v13444_v6  ;;  %v13502_v43 = vld [vmem:[#allocation3 + $0x3f8] ss:$28 sps:$4 sm:$0xff]  }
 0x51f   :  { %9314 = vmatprep.subr.bf16.mxu0 %v13445_v31  ;;  %9478 = vmatprep.subr.bf16.mxu1 %v13447_v35  ;;  %v13510_v6 = vld [vmem:[#allocation3 + $0x434] ss:$28 sps:$4 sm:$0xff]   ;;  %v13505_v31 = vld [vmem:[#allocation3 + $0x428] ss:$28 sps:$4 sm:$0xff]  }
 0x520   :  { %v13508_v35 = vld [vmem:[#allocation3 + $0x430] ss:$28 sps:$4 sm:$0xff]  }
 0x522   :  { %9315 = vmatpush1.bf16.msra.mxu0 %v13449_v27  ;;  %9479 = vmatpush1.bf16.msra.mxu1 %v13450_v23  ;;  %v13513_v27 = vld [vmem:[#allocation3 + $0x464] ss:$28 sps:$4 sm:$0xff]   ;;  %v13516_v23 = vld [vmem:[#allocation3 + $0x46c] ss:$28 sps:$4 sm:$0xff]  }
 0x523   :  { %9316 = vmatprep.subr.bf16.mxu0 %v13451_v3  ;;  %9480 = vmatprep.subr.bf16.mxu1 %v13453_v14  ;;  %v13511_v3 = vld [vmem:[#allocation3 + $0x460] ss:$28 sps:$4 sm:$0xff]   ;;  %v13514_v14 = vld [vmem:[#allocation3 + $0x468] ss:$28 sps:$4 sm:$0xff]  }
 0x526   :  { %9317 = vmatpush1.bf16.msra.mxu0 %v13455_v10  ;;  %9481 = vmatpush1.bf16.msra.mxu1 %v13456_v19  ;;  %v13519_v10 = vld [vmem:[#allocation3 + $0x49c] ss:$28 sps:$4 sm:$0xff]   ;;  %v13522_v19 = vld [vmem:[#allocation3 + $0x4a4] ss:$28 sps:$4 sm:$0xff]  }
 0x527   :  { %9318 = vmatprep.subr.bf16.mxu0 %v13457_v15  ;;  %9482 = vmatprep.subr.bf16.mxu1 %v13459_v22  ;;  %v13517_v15 = vld [vmem:[#allocation3 + $0x498] ss:$28 sps:$4 sm:$0xff]   ;;  %v13520_v22 = vld [vmem:[#allocation3 + $0x4a0] ss:$28 sps:$4 sm:$0xff]  }
 0x52a   :  { %9319 = vmatpush1.bf16.msra.mxu0 %v13461_v26  ;;  %9483 = vmatpush1.bf16.msra.mxu1 %v13462_v7  ;;  %v13525_v26 = vld [vmem:[#allocation3 + $0x4d4] ss:$28 sps:$4 sm:$0xff]   ;;  %v13528_v7 = vld [vmem:[#allocation3 + $0x4dc] ss:$28 sps:$4 sm:$0xff]  }
 0x52b   :  { %9320 = vmatprep.subr.bf16.mxu0 %v13463_v0  ;;  %9484 = vmatprep.subr.bf16.mxu1 %v13465_v1  ;;  %v13523_v0 = vld [vmem:[#allocation3 + $0x4d0] ss:$28 sps:$4 sm:$0xff]   ;;  %v13526_v1 = vld [vmem:[#allocation3 + $0x4d8] ss:$28 sps:$4 sm:$0xff]  }
 0x52e   :  { %9321 = vmatpush1.bf16.msra.mxu0 %v13467_v4  ;;  %9485 = vmatpush1.bf16.msra.mxu1 %v13468_v5  ;;  %v13531_v4 = vld [vmem:[#allocation3 + $0x50c] ss:$28 sps:$4 sm:$0xff]   ;;  %v13534_v5 = vld [vmem:[#allocation3 + $0x514] ss:$28 sps:$4 sm:$0xff]  }
 0x52f   :  { %9322 = vmatprep.subr.bf16.mxu0 %v13469_v12  ;;  %9486 = vmatprep.subr.bf16.mxu1 %v13471_v11  ;;  %v13529_v12 = vld [vmem:[#allocation3 + $0x508] ss:$28 sps:$4 sm:$0xff]   ;;  %v13532_v11 = vld [vmem:[#allocation3 + $0x510] ss:$28 sps:$4 sm:$0xff]  }
 0x532   :  { %9323 = vmatpush1.bf16.msra.mxu0 %v13473_v20  ;;  %9487 = vmatpush1.bf16.msra.mxu1 %v13474_v21  ;;  %v13537_v20 = vld [vmem:[#allocation3 + $0x544] ss:$28 sps:$4 sm:$0xff]   ;;  %v13540_v21 = vld [vmem:[#allocation3 + $0x54c] ss:$28 sps:$4 sm:$0xff]  }
 0x533   :  { %9324 = vmatprep.subr.bf16.mxu0 %v13475_v24  ;;  %9488 = vmatprep.subr.bf16.mxu1 %v13477_v28  ;;  %v13535_v24 = vld [vmem:[#allocation3 + $0x540] ss:$28 sps:$4 sm:$0xff]   ;;  %v13538_v28 = vld [vmem:[#allocation3 + $0x548] ss:$28 sps:$4 sm:$0xff]  }
 0x536   :  { %9325 = vmatpush1.bf16.msra.mxu0 %v13479_v29  ;;  %9489 = vmatpush1.bf16.msra.mxu1 %v13480_v40  ;;  %v13543_v29 = vld [vmem:[#allocation3 + $0x57c] ss:$28 sps:$4 sm:$0xff]   ;;  %v13546_v40 = vld [vmem:[#allocation3 + $0x584] ss:$28 sps:$4 sm:$0xff]  }
 0x537   :  { %9326 = vmatprep.subr.bf16.mxu0 %v13481_v41  ;;  %9490 = vmatprep.subr.bf16.mxu1 %v13483_v44  ;;  %v13541_v41 = vld [vmem:[#allocation3 + $0x578] ss:$28 sps:$4 sm:$0xff]   ;;  %v13544_v44 = vld [vmem:[#allocation3 + $0x580] ss:$28 sps:$4 sm:$0xff]  }
 0x53a   :  { %9327 = vmatpush1.bf16.msra.mxu0 %v13485_v48  ;;  %9491 = vmatpush1.bf16.msra.mxu1 %v13486_v49  ;;  %v13549_v48 = vld [vmem:[#allocation3 + $0x5b4] ss:$28 sps:$4 sm:$0xff]   ;;  %v13552_v49 = vld [vmem:[#allocation3 + $0x5bc] ss:$28 sps:$4 sm:$0xff]  }
 0x53b   :  { %9337 = vmatprep.subr.bf16.mxu0 %v13489_v53  ;;  %9501 = vmatprep.subr.bf16.mxu1 %v13492_v56  ;;  %v13547_v53 = vld [vmem:[#allocation3 + $0x5b0] ss:$28 sps:$4 sm:$0xff]   ;;  %v13550_v56 = vld [vmem:[#allocation3 + $0x5b8] ss:$28 sps:$4 sm:$0xff]  }
 0x53d   :  { %9329 = vmatmul.mubr.bf16.vlgmr.msra.gmra.mrb[8].mxu0 %v19876_v13  ;;  %9493 = vmatmul.mubr.bf16.vlgmr.msra.gmra.mrb[8].mxu1 %v19876_v13 }
 0x53e   :  { %9338 = vmatpush1.bf16.msra.mxu0 %v13487_v57  ;;  %9502 = vmatpush1.bf16.msra.mxu1 %v13490_v58  ;;  %v13555_v57 = vld [vmem:[#allocation3 + $0x5ec] ss:$28 sps:$4 sm:$0xff]   ;;  %v13558_v58 = vld [vmem:[#allocation3 + $0x5f4] ss:$28 sps:$4 sm:$0xff]  }
 0x53f   :  { %9339 = vmatprep.subr.bf16.mxu0 %v13495_v63  ;;  %9503 = vmatprep.subr.bf16.mxu1 %v13498_v47  ;;  %v13553_v63 = vld [vmem:[#allocation3 + $0x5e8] ss:$28 sps:$4 sm:$0xff]   ;;  %v13556_v47 = vld [vmem:[#allocation3 + $0x5f0] ss:$28 sps:$4 sm:$0xff]  }
 0x540   :  { %9369 = vmatprep.mubr.bf16.mxu0 %v19881_v51  ;;  %9533 = vmatprep.mubr.bf16.mxu1 %v19881_v51 }
 0x542   :  { %9340 = vmatpush1.bf16.msra.mxu0 %v13493_v54  ;;  %9504 = vmatpush1.bf16.msra.mxu1 %v13496_v32  ;;  %v13561_v54 = vld [vmem:[#allocation3 + $0x624] ss:$28 sps:$4 sm:$0xff]   ;;  %v13564_v32 = vld [vmem:[#allocation3 + $0x62c] ss:$28 sps:$4 sm:$0xff]  }
 0x543   :  { %9341 = vmatprep.subr.bf16.mxu0 %v13501_v52  ;;  %9505 = vmatprep.subr.bf16.mxu1 %v13504_v62  ;;  %v13559_v52 = vld [vmem:[#allocation3 + $0x620] ss:$28 sps:$4 sm:$0xff]   ;;  %v13562_v62 = vld [vmem:[#allocation3 + $0x628] ss:$28 sps:$4 sm:$0xff]  }
 0x546   :  { %9342 = vmatpush1.bf16.msra.mxu0 %v13499_v45  ;;  %9506 = vmatpush1.bf16.msra.mxu1 %v13502_v43  ;;  %v13567_v45 = vld [vmem:[#allocation3 + $0x65c] ss:$28 sps:$4 sm:$0xff]   ;;  %v13570_v43 = vld [vmem:[#allocation3 + $0x664] ss:$28 sps:$4 sm:$0xff]  }
 0x547   :  { %9343 = vmatprep.subr.bf16.mxu0 %v13507_v60  ;;  %9507 = vmatprep.subr.bf16.mxu1 %v13510_v6  ;;  %v13565_v60 = vld [vmem:[#allocation3 + $0x658] ss:$28 sps:$4 sm:$0xff]   ;;  %v13568_v6 = vld [vmem:[#allocation3 + $0x660] ss:$28 sps:$4 sm:$0xff]  }
 0x54a   :  { %9344 = vmatpush1.bf16.msra.mxu0 %v13505_v31  ;;  %9508 = vmatpush1.bf16.msra.mxu1 %v13508_v35  ;;  %v13573_v31 = vld [vmem:[#allocation3 + $0x694] ss:$28 sps:$4 sm:$0xff]   ;;  %v13576_v35 = vld [vmem:[#allocation3 + $0x69c] ss:$28 sps:$4 sm:$0xff]  }
 0x54b   :  { %9345 = vmatprep.subr.bf16.mxu0 %v13513_v27  ;;  %9509 = vmatprep.subr.bf16.mxu1 %v13516_v23  ;;  %v13571_v27 = vld [vmem:[#allocation3 + $0x690] ss:$28 sps:$4 sm:$0xff]   ;;  %v13574_v23 = vld [vmem:[#allocation3 + $0x698] ss:$28 sps:$4 sm:$0xff]  }
 0x54e   :  { %9346 = vmatpush1.bf16.msra.mxu0 %v13511_v3  ;;  %9510 = vmatpush1.bf16.msra.mxu1 %v13514_v14  ;;  %v13579_v3 = vld [vmem:[#allocation3 + $0x6cc] ss:$28 sps:$4 sm:$0xff]   ;;  %v13582_v14 = vld [vmem:[#allocation3 + $0x6d4] ss:$28 sps:$4 sm:$0xff]  }
 0x54f   :  { %9347 = vmatprep.subr.bf16.mxu0 %v13519_v10  ;;  %9511 = vmatprep.subr.bf16.mxu1 %v13522_v19  ;;  %v13577_v10 = vld [vmem:[#allocation3 + $0x6c8] ss:$28 sps:$4 sm:$0xff]   ;;  %v13580_v19 = vld [vmem:[#allocation3 + $0x6d0] ss:$28 sps:$4 sm:$0xff]  }
 0x552   :  { %9348 = vmatpush1.bf16.msra.mxu0 %v13517_v15  ;;  %9512 = vmatpush1.bf16.msra.mxu1 %v13520_v22  ;;  %v13585_v15 = vld [vmem:[#allocation3 + $0x704] ss:$28 sps:$4 sm:$0xff]   ;;  %v13588_v22 = vld [vmem:[#allocation3 + $0x70c] ss:$28 sps:$4 sm:$0xff]  }
 0x553   :  { %9349 = vmatprep.subr.bf16.mxu0 %v13525_v26  ;;  %9513 = vmatprep.subr.bf16.mxu1 %v13528_v7  ;;  %v13583_v26 = vld [vmem:[#allocation3 + $0x700] ss:$28 sps:$4 sm:$0xff]   ;;  %v13586_v7 = vld [vmem:[#allocation3 + $0x708] ss:$28 sps:$4 sm:$0xff]  }
 0x556   :  { %9350 = vmatpush1.bf16.msra.mxu0 %v13523_v0  ;;  %9514 = vmatpush1.bf16.msra.mxu1 %v13526_v1  ;;  %v19890_v0 = vpack.c.bf16 %v6466_v33, %v6466_v33  ;;  %v13591_v1 = vld [vmem:[#allocation3 + $0x73c] ss:$28 sps:$4 sm:$0xff]   ;;  %v13597_v33 = vld [vmem:[#allocation3 + $0x774] ss:$28 sps:$4 sm:$0xff]  }
 0x557   :  { %9351 = vmatprep.subr.bf16.mxu0 %v13531_v4  ;;  %9515 = vmatprep.subr.bf16.mxu1 %v13534_v5  ;;  %v13594_v4 = vld [vmem:[#allocation3 + $0x744] ss:$28 sps:$4 sm:$0xff]   ;;  %v19895_v5 = vpack.c.bf16 %v6469_v30, %v6469_v30  ;;  %v13603_v30 = vld [vmem:[#allocation3 + $0x7ac] ss:$28 sps:$4 sm:$0xff]  }
 0x55a   :  { %9352 = vmatpush1.bf16.msra.mxu0 %v13529_v12  ;;  %9516 = vmatpush1.bf16.msra.mxu1 %v13532_v11  ;;  %v13589_v12 = vld [vmem:[#allocation3 + $0x738] ss:$28 sps:$4 sm:$0xff]  }
 0x55b   :  { %9353 = vmatprep.subr.bf16.mxu0 %v13537_v20  ;;  %9517 = vmatprep.subr.bf16.mxu1 %v13540_v21  ;;  %v13600_v11 = vld [vmem:[#allocation3 + $0x77c] ss:$28 sps:$4 sm:$0xff]   ;;  %v13606_v21 = vld [vmem:[#allocation3 + $0x7b4] ss:$28 sps:$4 sm:$0xff]  }
 0x55c   :  { %v13598_v20 = vld [vmem:[#allocation3 + $0x778] ss:$28 sps:$4 sm:$0xff]  }
 0x55e   :  { %9354 = vmatpush1.bf16.msra.mxu0 %v13535_v24  ;;  %9518 = vmatpush1.bf16.msra.mxu1 %v13538_v28  ;;  %v13601_v24 = vld [vmem:[#allocation3 + $0x7a8] ss:$28 sps:$4 sm:$0xff]   ;;  %v13604_v28 = vld [vmem:[#allocation3 + $0x7b0] ss:$28 sps:$4 sm:$0xff]  }
 0x55f   :  { %9355 = vmatprep.subr.bf16.mxu0 %v13543_v29  ;;  %9519 = vmatprep.subr.bf16.mxu1 %v13546_v40  ;;  %v13609_v29 = vld [vmem:[#allocation3 + $0x7e4] ss:$28 sps:$4 sm:$0xff]   ;;  %v13612_v40 = vld [vmem:[#allocation3 + $0x7ec] ss:$28 sps:$4 sm:$0xff]  }
 0x562   :  { %9356 = vmatpush1.bf16.msra.mxu0 %v13541_v41  ;;  %9520 = vmatpush1.bf16.msra.mxu1 %v13544_v44  ;;  %v13607_v41 = vld [vmem:[#allocation3 + $0x7e0] ss:$28 sps:$4 sm:$0xff]   ;;  %v13610_v44 = vld [vmem:[#allocation3 + $0x7e8] ss:$28 sps:$4 sm:$0xff]  }
 0x563   :  { %9357 = vmatprep.subr.bf16.mxu0 %v13549_v48  ;;  %9521 = vmatprep.subr.bf16.mxu1 %v13552_v49  ;;  %v13615_v48 = vld [vmem:[#allocation3 + $0x81c] ss:$28 sps:$4 sm:$0xff]   ;;  %v13618_v49 = vld [vmem:[#allocation3 + $0x824] ss:$28 sps:$4 sm:$0xff]  }
 0x566   :  { %9358 = vmatpush1.bf16.msra.mxu0 %v13547_v53  ;;  %9522 = vmatpush1.bf16.msra.mxu1 %v13550_v56  ;;  %v13613_v53 = vld [vmem:[#allocation3 + $0x818] ss:$28 sps:$4 sm:$0xff]   ;;  %v13616_v56 = vld [vmem:[#allocation3 + $0x820] ss:$28 sps:$4 sm:$0xff]  }
 0x567   :  { %9359 = vmatprep.subr.bf16.mxu0 %v13555_v57  ;;  %9523 = vmatprep.subr.bf16.mxu1 %v13558_v58  ;;  %v13621_v57 = vld [vmem:[#allocation3 + $0x854] ss:$28 sps:$4 sm:$0xff]   ;;  %v13624_v58 = vld [vmem:[#allocation3 + $0x85c] ss:$28 sps:$4 sm:$0xff]  }
 0x56a   :  { %9360 = vmatpush1.bf16.msra.mxu0 %v13553_v63  ;;  %9524 = vmatpush1.bf16.msra.mxu1 %v13556_v47  ;;  %v13619_v63 = vld [vmem:[#allocation3 + $0x850] ss:$28 sps:$4 sm:$0xff]   ;;  %v13622_v47 = vld [vmem:[#allocation3 + $0x858] ss:$28 sps:$4 sm:$0xff]  }
 0x56b   :  { %9361 = vmatprep.subr.bf16.mxu0 %v13561_v54  ;;  %9525 = vmatprep.subr.bf16.mxu1 %v13564_v32  ;;  %v13627_v54 = vld [vmem:[#allocation3 + $0x88c] ss:$28 sps:$4 sm:$0xff]   ;;  %v13630_v32 = vld [vmem:[#allocation3 + $0x894] ss:$28 sps:$4 sm:$0xff]  }
 0x56e   :  { %9362 = vmatpush1.bf16.msra.mxu0 %v13559_v52  ;;  %9526 = vmatpush1.bf16.msra.mxu1 %v13562_v62  ;;  %v13625_v52 = vld [vmem:[#allocation3 + $0x888] ss:$28 sps:$4 sm:$0xff]   ;;  %v13628_v62 = vld [vmem:[#allocation3 + $0x890] ss:$28 sps:$4 sm:$0xff]  }
 0x56f   :  { %9363 = vmatprep.subr.bf16.mxu0 %v13567_v45  ;;  %9527 = vmatprep.subr.bf16.mxu1 %v13570_v43  ;;  %v13633_v45 = vld [vmem:[#allocation3 + $0x8c4] ss:$28 sps:$4 sm:$0xff]   ;;  %v13636_v43 = vld [vmem:[#allocation3 + $0x8cc] ss:$28 sps:$4 sm:$0xff]  }
 0x572   :  { %9364 = vmatpush1.bf16.msra.mxu0 %v13565_v60  ;;  %9528 = vmatpush1.bf16.msra.mxu1 %v13568_v6  ;;  %v13631_v60 = vld [vmem:[#allocation3 + $0x8c0] ss:$28 sps:$4 sm:$0xff]   ;;  %v13634_v6 = vld [vmem:[#allocation3 + $0x8c8] ss:$28 sps:$4 sm:$0xff]  }
 0x573   :  { %9365 = vmatprep.subr.bf16.mxu0 %v13573_v31  ;;  %9529 = vmatprep.subr.bf16.mxu1 %v13576_v35  ;;  %v13639_v31 = vld [vmem:[#allocation3 + $0x8fc] ss:$28 sps:$4 sm:$0xff]   ;;  %v13642_v35 = vld [vmem:[#allocation3 + $0x904] ss:$28 sps:$4 sm:$0xff]  }
 0x576   :  { %9366 = vmatpush1.bf16.msra.mxu0 %v13571_v27  ;;  %9530 = vmatpush1.bf16.msra.mxu1 %v13574_v23  ;;  %v13637_v27 = vld [vmem:[#allocation3 + $0x8f8] ss:$28 sps:$4 sm:$0xff]   ;;  %v13640_v23 = vld [vmem:[#allocation3 + $0x900] ss:$28 sps:$4 sm:$0xff]  }
 0x577   :  { %9367 = vmatprep.subr.bf16.mxu0 %v13579_v3  ;;  %9531 = vmatprep.subr.bf16.mxu1 %v13582_v14  ;;  %v13645_v3 = vld [vmem:[#allocation3 + $0x934] ss:$28 sps:$4 sm:$0xff]   ;;  %v13648_v14 = vld [vmem:[#allocation3 + $0x93c] ss:$28 sps:$4 sm:$0xff]  }
 0x57a   :  { %9368 = vmatpush1.bf16.msra.mxu0 %v13577_v10  ;;  %9532 = vmatpush1.bf16.msra.mxu1 %v13580_v19  ;;  %v13643_v10 = vld [vmem:[#allocation3 + $0x930] ss:$28 sps:$4 sm:$0xff]   ;;  %v13646_v19 = vld [vmem:[#allocation3 + $0x938] ss:$28 sps:$4 sm:$0xff]  }
 0x57b   :  { %9378 = vmatprep.subr.bf16.mxu0 %v13585_v15  ;;  %9542 = vmatprep.subr.bf16.mxu1 %v13588_v22  ;;  %v13651_v15 = vld [vmem:[#allocation3 + $0x96c] ss:$28 sps:$4 sm:$0xff]   ;;  %v13654_v22 = vld [vmem:[#allocation3 + $0x974] ss:$28 sps:$4 sm:$0xff]  }
 0x57d   :  { %9370 = vmatmul.mubr.bf16.vlgmr.msra.gmra.mrb[8].mxu0 %v19890_v0  ;;  %9534 = vmatmul.mubr.bf16.vlgmr.msra.gmra.mrb[8].mxu1 %v19890_v0 }
 0x57e   :  { %9379 = vmatpush1.bf16.msra.mxu0 %v13583_v26  ;;  %9543 = vmatpush1.bf16.msra.mxu1 %v13586_v7  ;;  %v13649_v26 = vld [vmem:[#allocation3 + $0x968] ss:$28 sps:$4 sm:$0xff]   ;;  %v13652_v7 = vld [vmem:[#allocation3 + $0x970] ss:$28 sps:$4 sm:$0xff]  }
 0x57f   :  { %9380 = vmatprep.subr.bf16.mxu0 %v13591_v1  ;;  %9544 = vmatprep.subr.bf16.mxu1 %v13594_v4  ;;  %v13657_v1 = vld [vmem:[#allocation3 + $0x9a4] ss:$28 sps:$4 sm:$0xff]   ;;  %v13660_v4 = vld [vmem:[#allocation3 + $0x9ac] ss:$28 sps:$4 sm:$0xff]  }
 0x580   :  { %9410 = vmatprep.mubr.bf16.mxu0 %v19895_v5  ;;  %9574 = vmatprep.mubr.bf16.mxu1 %v19895_v5 }
 0x582   :  { %9381 = vmatpush1.bf16.msra.mxu0 %v13589_v12  ;;  %9545 = vmatpush1.bf16.msra.mxu1 %v13592_v37  ;;  %v13655_v12 = vld [vmem:[#allocation3 + $0x9a0] ss:$28 sps:$4 sm:$0xff]   ;;  %v13658_v37 = vld [vmem:[#allocation3 + $0x9a8] ss:$28 sps:$4 sm:$0xff]  }
 0x583   :  { %9382 = vmatprep.subr.bf16.mxu0 %v13597_v33  ;;  %9546 = vmatprep.subr.bf16.mxu1 %v13600_v11  ;;  %v13663_v33 = vld [vmem:[#allocation3 + $0x9dc] ss:$28 sps:$4 sm:$0xff]   ;;  %v13666_v11 = vld [vmem:[#allocation3 + $0x9e4] ss:$28 sps:$4 sm:$0xff]  }
 0x586   :  { %9383 = vmatpush1.bf16.msra.mxu0 %v13595_v46  ;;  %9547 = vmatpush1.bf16.msra.mxu1 %v13598_v20  ;;  %v13661_v46 = vld [vmem:[#allocation3 + $0x9d8] ss:$28 sps:$4 sm:$0xff]   ;;  %v13664_v20 = vld [vmem:[#allocation3 + $0x9e0] ss:$28 sps:$4 sm:$0xff]  }
 0x587   :  { %9384 = vmatprep.subr.bf16.mxu0 %v13603_v30  ;;  %9548 = vmatprep.subr.bf16.mxu1 %v13606_v21  ;;  %v13669_v30 = vld [vmem:[#allocation3 + $0xa14] ss:$28 sps:$4 sm:$0xff]   ;;  %v13672_v21 = vld [vmem:[#allocation3 + $0xa1c] ss:$28 sps:$4 sm:$0xff]  }
 0x58a   :  { %9385 = vmatpush1.bf16.msra.mxu0 %v13601_v24  ;;  %9549 = vmatpush1.bf16.msra.mxu1 %v13604_v28  ;;  %v13667_v24 = vld [vmem:[#allocation3 + $0xa10] ss:$28 sps:$4 sm:$0xff]   ;;  %v13670_v28 = vld [vmem:[#allocation3 + $0xa18] ss:$28 sps:$4 sm:$0xff]  }
 0x58b   :  { %9386 = vmatprep.subr.bf16.mxu0 %v13609_v29  ;;  %9550 = vmatprep.subr.bf16.mxu1 %v13612_v40  ;;  %v13675_v29 = vld [vmem:[#allocation3 + $0xa4c] ss:$28 sps:$4 sm:$0xff]   ;;  %v13678_v40 = vld [vmem:[#allocation3 + $0xa54] ss:$28 sps:$4 sm:$0xff]  }
 0x58e   :  { %9387 = vmatpush1.bf16.msra.mxu0 %v13607_v41  ;;  %9551 = vmatpush1.bf16.msra.mxu1 %v13610_v44  ;;  %v13673_v41 = vld [vmem:[#allocation3 + $0xa48] ss:$28 sps:$4 sm:$0xff]   ;;  %v13676_v44 = vld [vmem:[#allocation3 + $0xa50] ss:$28 sps:$4 sm:$0xff]  }
 0x58f   :  { %9388 = vmatprep.subr.bf16.mxu0 %v13615_v48  ;;  %9552 = vmatprep.subr.bf16.mxu1 %v13618_v49  ;;  %v13681_v48 = vld [vmem:[#allocation3 + $0xa84] ss:$28 sps:$4 sm:$0xff]   ;;  %v13684_v49 = vld [vmem:[#allocation3 + $0xa8c] ss:$28 sps:$4 sm:$0xff]  }
 0x592   :  { %9389 = vmatpush1.bf16.msra.mxu0 %v13613_v53  ;;  %9553 = vmatpush1.bf16.msra.mxu1 %v13616_v56  ;;  %v13679_v53 = vld [vmem:[#allocation3 + $0xa80] ss:$28 sps:$4 sm:$0xff]   ;;  %v13682_v56 = vld [vmem:[#allocation3 + $0xa88] ss:$28 sps:$4 sm:$0xff]  }
 0x593   :  { %9390 = vmatprep.subr.bf16.mxu0 %v13621_v57  ;;  %9554 = vmatprep.subr.bf16.mxu1 %v13624_v58  ;;  %v19904_v57 = vpack.c.bf16 %v6468_v38, %v6468_v38  ;;  %v13687_v58 = vld [vmem:[#allocation3 + $0xabc] ss:$28 sps:$4 sm:$0xff]  }
 0x594   :  { %v13688_v38 = vld [vmem:[#allocation3 + $0xac0] ss:$28 sps:$4 sm:$0xff]  }
 0x596   :  { %9391 = vmatpush1.bf16.msra.mxu0 %v13619_v63  ;;  %9555 = vmatpush1.bf16.msra.mxu1 %v13622_v47  ;;  %v13690_v63 = vld [vmem:[#allocation3 + $0xac4] ss:$28 sps:$4 sm:$0xff]   ;;  %v19909_v47 = vpack.c.bf16 %v6471_v34, %v6471_v34  ;;  %v13694_v34 = vld [vmem:[#allocation3 + $0xaf8] ss:$28 sps:$4 sm:$0xff]  }
 0x597   :  { %9392 = vmatprep.subr.bf16.mxu0 %v13627_v54  ;;  %9556 = vmatprep.subr.bf16.mxu1 %v13630_v32  ;;  %v13693_v54 = vld [vmem:[#allocation3 + $0xaf4] ss:$28 sps:$4 sm:$0xff]   ;;  %v13696_v32 = vld [vmem:[#allocation3 + $0xafc] ss:$28 sps:$4 sm:$0xff]  }
 0x59a   :  { %9393 = vmatpush1.bf16.msra.mxu0 %v13625_v52  ;;  %9557 = vmatpush1.bf16.msra.mxu1 %v13628_v62  ;;  %v13699_v52 = vld [vmem:[#allocation3 + $0xb2c] ss:$28 sps:$4 sm:$0xff]   ;;  %v13702_v62 = vld [vmem:[#allocation3 + $0xb34] ss:$28 sps:$4 sm:$0xff]  }
 0x59b   :  { %9394 = vmatprep.subr.bf16.mxu0 %v13633_v45  ;;  %9558 = vmatprep.subr.bf16.mxu1 %v13636_v43  ;;  %v13697_v45 = vld [vmem:[#allocation3 + $0xb28] ss:$28 sps:$4 sm:$0xff]   ;;  %v13700_v43 = vld [vmem:[#allocation3 + $0xb30] ss:$28 sps:$4 sm:$0xff]  }
 0x59e   :  { %9395 = vmatpush1.bf16.msra.mxu0 %v13631_v60  ;;  %9559 = vmatpush1.bf16.msra.mxu1 %v13634_v6  ;;  %v13705_v60 = vld [vmem:[#allocation3 + $0xb64] ss:$28 sps:$4 sm:$0xff]   ;;  %v13708_v6 = vld [vmem:[#allocation3 + $0xb6c] ss:$28 sps:$4 sm:$0xff]  }
 0x59f   :  { %9396 = vmatprep.subr.bf16.mxu0 %v13639_v31  ;;  %9560 = vmatprep.subr.bf16.mxu1 %v13642_v35  ;;  %v13703_v31 = vld [vmem:[#allocation3 + $0xb60] ss:$28 sps:$4 sm:$0xff]   ;;  %v13706_v35 = vld [vmem:[#allocation3 + $0xb68] ss:$28 sps:$4 sm:$0xff]  }
 0x5a2   :  { %9397 = vmatpush1.bf16.msra.mxu0 %v13637_v27  ;;  %9561 = vmatpush1.bf16.msra.mxu1 %v13640_v23  ;;  %v13711_v27 = vld [vmem:[#allocation3 + $0xb9c] ss:$28 sps:$4 sm:$0xff]   ;;  %v13714_v23 = vld [vmem:[#allocation3 + $0xba4] ss:$28 sps:$4 sm:$0xff]  }
 0x5a3   :  { %9398 = vmatprep.subr.bf16.mxu0 %v13645_v3  ;;  %9562 = vmatprep.subr.bf16.mxu1 %v13648_v14  ;;  %v13709_v3 = vld [vmem:[#allocation3 + $0xb98] ss:$28 sps:$4 sm:$0xff]   ;;  %v13712_v14 = vld [vmem:[#allocation3 + $0xba0] ss:$28 sps:$4 sm:$0xff]  }
 0x5a6   :  { %9399 = vmatpush1.bf16.msra.mxu0 %v13643_v10  ;;  %9563 = vmatpush1.bf16.msra.mxu1 %v13646_v19  ;;  %v13717_v10 = vld [vmem:[#allocation3 + $0xbd4] ss:$28 sps:$4 sm:$0xff]   ;;  %v13720_v19 = vld [vmem:[#allocation3 + $0xbdc] ss:$28 sps:$4 sm:$0xff]  }
 0x5a7   :  { %9400 = vmatprep.subr.bf16.mxu0 %v13651_v15  ;;  %9564 = vmatprep.subr.bf16.mxu1 %v13654_v22  ;;  %v13715_v15 = vld [vmem:[#allocation3 + $0xbd0] ss:$28 sps:$4 sm:$0xff]   ;;  %v13718_v22 = vld [vmem:[#allocation3 + $0xbd8] ss:$28 sps:$4 sm:$0xff]  }
 0x5aa   :  { %9401 = vmatpush1.bf16.msra.mxu0 %v13649_v26  ;;  %9565 = vmatpush1.bf16.msra.mxu1 %v13652_v7  ;;  %v13723_v26 = vld [vmem:[#allocation3 + $0xc0c] ss:$28 sps:$4 sm:$0xff]   ;;  %v13726_v7 = vld [vmem:[#allocation3 + $0xc14] ss:$28 sps:$4 sm:$0xff]  }
 0x5ab   :  { %9402 = vmatprep.subr.bf16.mxu0 %v13657_v1  ;;  %9566 = vmatprep.subr.bf16.mxu1 %v13660_v4  ;;  %v13721_v1 = vld [vmem:[#allocation3 + $0xc08] ss:$28 sps:$4 sm:$0xff]   ;;  %v13724_v4 = vld [vmem:[#allocation3 + $0xc10] ss:$28 sps:$4 sm:$0xff]  }
 0x5ae   :  { %9403 = vmatpush1.bf16.msra.mxu0 %v13655_v12  ;;  %9567 = vmatpush1.bf16.msra.mxu1 %v13658_v37  ;;  %v13729_v12 = vld [vmem:[#allocation3 + $0xc44] ss:$28 sps:$4 sm:$0xff]   ;;  %v13732_v37 = vld [vmem:[#allocation3 + $0xc4c] ss:$28 sps:$4 sm:$0xff]  }
 0x5af   :  { %9404 = vmatprep.subr.bf16.mxu0 %v13663_v33  ;;  %9568 = vmatprep.subr.bf16.mxu1 %v13666_v11  ;;  %v13727_v33 = vld [vmem:[#allocation3 + $0xc40] ss:$28 sps:$4 sm:$0xff]   ;;  %v13730_v11 = vld [vmem:[#allocation3 + $0xc48] ss:$28 sps:$4 sm:$0xff]  }
 0x5b2   :  { %9405 = vmatpush1.bf16.msra.mxu0 %v13661_v46  ;;  %9569 = vmatpush1.bf16.msra.mxu1 %v13664_v20  ;;  %v13735_v46 = vld [vmem:[#allocation3 + $0xc7c] ss:$28 sps:$4 sm:$0xff]   ;;  %v13738_v20 = vld [vmem:[#allocation3 + $0xc84] ss:$28 sps:$4 sm:$0xff]  }
 0x5b3   :  { %9406 = vmatprep.subr.bf16.mxu0 %v13669_v30  ;;  %9570 = vmatprep.subr.bf16.mxu1 %v13672_v21  ;;  %v13733_v30 = vld [vmem:[#allocation3 + $0xc78] ss:$28 sps:$4 sm:$0xff]   ;;  %v13736_v21 = vld [vmem:[#allocation3 + $0xc80] ss:$28 sps:$4 sm:$0xff]  }
 0x5b6   :  { %9407 = vmatpush1.bf16.msra.mxu0 %v13667_v24  ;;  %9571 = vmatpush1.bf16.msra.mxu1 %v13670_v28  ;;  %v13741_v24 = vld [vmem:[#allocation3 + $0xcb4] ss:$28 sps:$4 sm:$0xff]   ;;  %v13744_v28 = vld [vmem:[#allocation3 + $0xcbc] ss:$28 sps:$4 sm:$0xff]  }
 0x5b7   :  { %9408 = vmatprep.subr.bf16.mxu0 %v13675_v29  ;;  %9572 = vmatprep.subr.bf16.mxu1 %v13678_v40  ;;  %v13739_v29 = vld [vmem:[#allocation3 + $0xcb0] ss:$28 sps:$4 sm:$0xff]   ;;  %v13742_v40 = vld [vmem:[#allocation3 + $0xcb8] ss:$28 sps:$4 sm:$0xff]  }
 0x5ba   :  { %9409 = vmatpush1.bf16.msra.mxu0 %v13673_v41  ;;  %9573 = vmatpush1.bf16.msra.mxu1 %v13676_v44  ;;  %v13747_v41 = vld [vmem:[#allocation3 + $0xcec] ss:$28 sps:$4 sm:$0xff]   ;;  %v13750_v44 = vld [vmem:[#allocation3 + $0xcf4] ss:$28 sps:$4 sm:$0xff]  }
 0x5bb   :  { %9419 = vmatprep.subr.bf16.mxu0 %v13681_v48  ;;  %9583 = vmatprep.subr.bf16.mxu1 %v13684_v49  ;;  %v13745_v48 = vld [vmem:[#allocation3 + $0xce8] ss:$28 sps:$4 sm:$0xff]   ;;  %v13748_v49 = vld [vmem:[#allocation3 + $0xcf0] ss:$28 sps:$4 sm:$0xff]  }
 0x5bd   :  { %9411 = vmatmul.mubr.bf16.vlgmr.msra.gmra.mrb[8].mxu0 %v19904_v57  ;;  %9575 = vmatmul.mubr.bf16.vlgmr.msra.gmra.mrb[8].mxu1 %v19904_v57 }
 0x5be   :  { %9420 = vmatpush1.bf16.msra.mxu0 %v13679_v53  ;;  %9584 = vmatpush1.bf16.msra.mxu1 %v13682_v56  ;;  %v13753_v53 = vld [vmem:[#allocation3 + $0xd24] ss:$28 sps:$4 sm:$0xff]   ;;  %v13756_v56 = vld [vmem:[#allocation3 + $0xd2c] ss:$28 sps:$4 sm:$0xff]  }
 0x5bf   :  { %9421 = vmatprep.subr.bf16.mxu0 %v13687_v58  ;;  %9585 = vmatprep.subr.bf16.mxu1 %v13690_v63  ;;  %v13751_v58 = vld [vmem:[#allocation3 + $0xd20] ss:$28 sps:$4 sm:$0xff]   ;;  %v13754_v63 = vld [vmem:[#allocation3 + $0xd28] ss:$28 sps:$4 sm:$0xff]  }
 0x5c0   :  { %12923 = vmatprep.mubr.msk.bf16.mxu0 %vm9271_vm2, %v19909_v47  ;;  %12925 = vmatprep.mubr.msk.bf16.mxu1 %vm9271_vm2, %v19909_v47 }
 0x5c2   :  { %9422 = vmatpush1.bf16.msra.mxu0 %v13685_v36  ;;  %9586 = vmatpush1.bf16.msra.mxu1 %v13688_v38  ;;  %v13759_v36 = vld [vmem:[#allocation3 + $0xd5c] ss:$28 sps:$4 sm:$0xff]   ;;  %v13762_v38 = vld [vmem:[#allocation3 + $0xd64] ss:$28 sps:$4 sm:$0xff]  }
 0x5c3   :  { %9423 = vmatprep.subr.bf16.mxu0 %v13693_v54  ;;  %9587 = vmatprep.subr.bf16.mxu1 %v13696_v32  ;;  %v6972_v54 = vld [vmem:[#allocation3 + $0xd90] sm:$0xff]  ;;  %v6973_v32 = vld [vmem:[#allocation3 + $0xd98] sm:$0xff] }
 0x5c6   :  { %9424 = vmatpush1.bf16.msra.mxu0 %v13691_v50  ;;  %9588 = vmatpush1.bf16.msra.mxu1 %v13694_v34  ;;  %v13757_v50 = vld [vmem:[#allocation3 + $0xd58] ss:$28 sps:$4 sm:$0xff]   ;;  %v13760_v34 = vld [vmem:[#allocation3 + $0xd60] ss:$28 sps:$4 sm:$0xff]  }
 0x5c7   :  { %9425 = vmatprep.subr.bf16.mxu0 %v13699_v52  ;;  %9589 = vmatprep.subr.bf16.mxu1 %v13702_v62  ;;  %v12916_v52 = vcombine.high %v6972_v54, %v6972_v54  ;;  %v12918_v62 = vcombine.high %v6973_v32, %v6973_v32 }
 0x5ca   :  { %9426 = vmatpush1.bf16.msra.mxu0 %v13697_v45  ;;  %9590 = vmatpush1.bf16.msra.mxu1 %v13700_v43  ;;  %v12915_v45 = vcombine.low %v6972_v54, %v6972_v54  ;;  %v12917_v43 = vcombine.low %v6973_v32, %v6973_v32  ;;  %v13812_v54 = vld [vmem:[#allocation3 + $0x208] ss:$28 sps:$4 sm:$0xff]   ;;  %v13816_v32 = vld [vmem:[#allocation3 + $0x3d0] ss:$28 sps:$4 sm:$0xff]  }
 0x5cb   :  { %9427 = vmatprep.subr.bf16.mxu0 %v13705_v60  ;;  %9591 = vmatprep.subr.bf16.mxu1 %v13708_v6  ;;  %v13769_v60 = vld [vmem:[#allocation3 + $0x14] ss:$28 sps:$4 sm:$0xff]  }
 0x5cc   :  { %v9276_v6 = vsel %vm5947_vm0, %v12915_v45, 0  ;;  %v13824_v45 = vld [vmem:[#allocation3 + $0x27c] ss:$28 sps:$4 sm:$0xff]  }
 0x5ce   :  { %9428 = vmatpush1.bf16.msra.mxu0 %v13703_v31  ;;  %9592 = vmatpush1.bf16.msra.mxu1 %v13706_v35  ;;  %v9282_v31 = vsel %vm5947_vm0, %v12917_v43, 0  ;;  %v13770_v35 = vld [vmem:[#allocation3 + $0x1d8] ss:$28 sps:$4 sm:$0xff]   ;;  %v13825_v43 = vld [vmem:[#allocation3 + $0x600] ss:$28 sps:$4 sm:$0xff]  }
 0x5cf   :  { %9429 = vmatprep.subr.bf16.mxu0 %v13711_v27  ;;  %9593 = vmatprep.subr.bf16.mxu1 %v13714_v23  ;;  %v13767_v27 = vld [vmem:[#allocation3 + $0x10] ss:$28 sps:$4 sm:$0xff]   ;;  %v19924_v23 = vpack.c.bf16 %v6470_v42, %v6470_v42  ;;  %v13777_v42 = vld [vmem:[#allocation3 + $0x80] ss:$28 sps:$4 sm:$0xff]  }
 0x5d2   :  { %9430 = vmatpush1.bf16.msra.mxu0 %v13709_v3  ;;  %9594 = vmatpush1.bf16.msra.mxu1 %v13712_v14  ;;  %v13771_v3 = vld [vmem:[#allocation3 + $0x18] ss:$28 sps:$4 sm:$0xff]   ;;  %v13774_v14 = vld [vmem:[#allocation3 + $0x4c] ss:$28 sps:$4 sm:$0xff]  }
 0x5d3   :  { %9431 = vmatprep.subr.bf16.mxu0 %v13717_v10  ;;  %9595 = vmatprep.subr.bf16.mxu1 %v13720_v19  ;;  %v13775_v10 = vld [vmem:[#allocation3 + $0x210] ss:$28 sps:$4 sm:$0xff]   ;;  %v13772_v19 = vld [vmem:[#allocation3 + $0x48] ss:$28 sps:$4 sm:$0xff]  }
 0x5d6   :  { %9432 = vmatpush1.bf16.msra.mxu0 %v13715_v15  ;;  %9596 = vmatpush1.bf16.msra.mxu1 %v13718_v22  ;;  %v13776_v15 = vld [vmem:[#allocation3 + $0x50] ss:$28 sps:$4 sm:$0xff]   ;;  %v13779_v22 = vld [vmem:[#allocation3 + $0x84] ss:$28 sps:$4 sm:$0xff]  }
 0x5d7   :  { %9433 = vmatprep.subr.bf16.mxu0 %v13723_v26  ;;  %9597 = vmatprep.subr.bf16.mxu1 %v13726_v7  ;;  %v13781_v26 = vld [vmem:[#allocation3 + $0x88] ss:$28 sps:$4 sm:$0xff]   ;;  %v13784_v7 = vld [vmem:[#allocation3 + $0xbc] ss:$28 sps:$4 sm:$0xff]  }
 0x5da   :  { %9434 = vmatpush1.bf16.msra.mxu0 %v13721_v1  ;;  %9598 = vmatpush1.bf16.msra.mxu1 %v13724_v4  ;;  %v13785_v1 = vld [vmem:[#allocation3 + $0x280] ss:$28 sps:$4 sm:$0xff]   ;;  %v13782_v4 = vld [vmem:[#allocation3 + $0xb8] ss:$28 sps:$4 sm:$0xff]  }
 0x5db   :  { %9435 = vmatprep.subr.bf16.mxu0 %v13729_v12  ;;  %9599 = vmatprep.subr.bf16.mxu1 %v13732_v37  ;;  %v13786_v12 = vld [vmem:[#allocation3 + $0xc0] ss:$28 sps:$4 sm:$0xff]   ;;  %v13789_v37 = vld [vmem:[#allocation3 + $0xf4] ss:$28 sps:$4 sm:$0xff]  }
 0x5de   :  { %9436 = vmatpush1.bf16.msra.mxu0 %v13727_v33  ;;  %9600 = vmatpush1.bf16.msra.mxu1 %v13730_v11  ;;  %v13790_v33 = vld [vmem:[#allocation3 + $0x2b8] ss:$28 sps:$4 sm:$0xff]   ;;  %v13787_v11 = vld [vmem:[#allocation3 + $0xf0] ss:$28 sps:$4 sm:$0xff]  }
 0x5df   :  { %9437 = vmatprep.subr.bf16.mxu0 %v13735_v46  ;;  %9601 = vmatprep.subr.bf16.mxu1 %v13738_v20  ;;  %v13794_v46 = vld [vmem:[#allocation3 + $0x12c] ss:$28 sps:$4 sm:$0xff]  }
 0x5e0   :  { %v13795_v20 = vld [vmem:[#allocation3 + $0x2f0] ss:$28 sps:$4 sm:$0xff]  }
 0x5e2   :  { %9438 = vmatpush1.bf16.msra.mxu0 %v13733_v30  ;;  %9602 = vmatpush1.bf16.msra.mxu1 %v13736_v21  ;;  %v13792_v30 = vld [vmem:[#allocation3 + $0x128] ss:$28 sps:$4 sm:$0xff]   ;;  %v13796_v21 = vld [vmem:[#allocation3 + $0x130] ss:$28 sps:$4 sm:$0xff]  }
 0x5e3   :  { %9439 = vmatprep.subr.bf16.mxu0 %v13741_v24  ;;  %9603 = vmatprep.subr.bf16.mxu1 %v13744_v28  ;;  %v13799_v24 = vld [vmem:[#allocation3 + $0x164] ss:$28 sps:$4 sm:$0xff]  }
 0x5e4   :  { %v13800_v28 = vld [vmem:[#allocation3 + $0x328] ss:$28 sps:$4 sm:$0xff]  }
 0x5e6   :  { %9440 = vmatpush1.bf16.msra.mxu0 %v13739_v29  ;;  %9604 = vmatpush1.bf16.msra.mxu1 %v13742_v40  ;;  %v13797_v29 = vld [vmem:[#allocation3 + $0x160] ss:$28 sps:$4 sm:$0xff]   ;;  %v13801_v40 = vld [vmem:[#allocation3 + $0x168] ss:$28 sps:$4 sm:$0xff]  }
 0x5e7   :  { %9441 = vmatprep.subr.bf16.mxu0 %v13747_v41  ;;  %9605 = vmatprep.subr.bf16.mxu1 %v13750_v44  ;;  %v13804_v41 = vld [vmem:[#allocation3 + $0x19c] ss:$28 sps:$4 sm:$0xff]  }
 0x5e8   :  { %v13805_v44 = vld [vmem:[#allocation3 + $0x360] ss:$28 sps:$4 sm:$0xff]  }
 0x5ea   :  { %9442 = vmatpush1.bf16.msra.mxu0 %v13745_v48  ;;  %9606 = vmatpush1.bf16.msra.mxu1 %v13748_v49  ;;  %v13802_v48 = vld [vmem:[#allocation3 + $0x198] ss:$28 sps:$4 sm:$0xff]   ;;  %v13806_v49 = vld [vmem:[#allocation3 + $0x1a0] ss:$28 sps:$4 sm:$0xff]  }
 0x5eb   :  { %9443 = vmatprep.subr.bf16.mxu0 %v13753_v53  ;;  %9607 = vmatprep.subr.bf16.mxu1 %v13756_v56  ;;  %v13809_v53 = vld [vmem:[#allocation3 + $0x1d4] ss:$28 sps:$4 sm:$0xff]  }
 0x5ec   :  { %v13810_v56 = vld [vmem:[#allocation3 + $0x558] ss:$28 sps:$4 sm:$0xff]  }
 0x5ee   :  { %9444 = vmatpush1.bf16.msra.mxu0 %v13751_v58  ;;  %9608 = vmatpush1.bf16.msra.mxu1 %v13754_v63  ;;  %v13807_v58 = vld [vmem:[#allocation3 + $0x1d0] ss:$28 sps:$4 sm:$0xff]   ;;  %v13811_v63 = vld [vmem:[#allocation3 + $0x398] ss:$28 sps:$4 sm:$0xff]  }
 0x5ef   :  { %9445 = vmatprep.subr.bf16.mxu0 %v13759_v36  ;;  %9609 = vmatprep.subr.bf16.mxu1 %v13762_v38  ;;  %v13814_v36 = vld [vmem:[#allocation3 + $0x20c] ss:$28 sps:$4 sm:$0xff]  }
 0x5f0   :  { %v13815_v38 = vld [vmem:[#allocation3 + $0x590] ss:$28 sps:$4 sm:$0xff]  }
 0x5f2   :  { %9446 = vmatpush1.bf16.msra.mxu0 %v13757_v50  ;;  %9610 = vmatpush1.bf16.msra.mxu1 %v13760_v34  ;;  %v13819_v50 = vld [vmem:[#allocation3 + $0x244] ss:$28 sps:$4 sm:$0xff]  }
 0x5f3   :  { %12922 = vmatprep.subr.msk.bf16.mxu0 %vm5947_vm0, %v12916_v52  ;;  %12924 = vmatprep.subr.msk.bf16.mxu1 %vm5947_vm0, %v12918_v62  ;;  %v13820_v34 = vld [vmem:[#allocation3 + $0x5c8] ss:$28 sps:$4 sm:$0xff]   ;;  %v13817_v52 = vld [vmem:[#allocation3 + $0x240] ss:$28 sps:$4 sm:$0xff]  }
 0x5f4   :  { %v13821_v62 = vld [vmem:[#allocation3 + $0x408] ss:$28 sps:$4 sm:$0xff]  }
 0x5f6   :  { %9448 = vmatpush1.bf16.msra.mxu0 %v9276_v6  ;;  %9612 = vmatpush1.bf16.msra.mxu1 %v9282_v31  ;;  %v13826_v6 = vld [vmem:[#allocation3 + $0x440] ss:$28 sps:$4 sm:$0xff]   ;;  %v13829_v31 = vld [vmem:[#allocation3 + $0x2b4] ss:$28 sps:$4 sm:$0xff]  }
 0x5f7   :  { %9624 = vmatprep.subr.bf16.mxu0 %v13769_v60  ;;  %13095 = vmatprep.subr.bf16.mxu1 %v13770_v35  ;;  %v13822_v60 = vld [vmem:[#allocation3 + $0x278] ss:$28 sps:$4 sm:$0xff]  }
 0x5f8   :  { %v13830_v35 = vld [vmem:[#allocation3 + $0x638] ss:$28 sps:$4 sm:$0xff]  }
 0x5f9   :  { %9452 = vmatmul.mubr.bf16.vlgmr.msra.gmra.mrb[8].mxu0 %v19924_v23  ;;  %9616 = vmatmul.mubr.bf16.vlgmr.msra.gmra.mrb[8].mxu1 %v19924_v23 }
 0x5fa   :  { %9625 = vmatpush1.bf16.msra.mxu0 %v13767_v27  ;;  %13096 = vmatpush3.bf16.msra.mxu1 %v13771_v3  ;;  %v13827_v27 = vld [vmem:[#allocation3 + $0x2b0] ss:$28 sps:$4 sm:$0xff]   ;;  %v13831_v3 = vld [vmem:[#allocation3 + $0x478] ss:$28 sps:$4 sm:$0xff]  }
 0x5fb   :  { %9626 = vmatprep.subr.bf16.mxu0 %v13774_v14  ;;  %13097 = vmatprep.subr.bf16.mxu1 %v13775_v10  ;;  %v13834_v14 = vld [vmem:[#allocation3 + $0x2ec] ss:$28 sps:$4 sm:$0xff]  }
 0x5fc   :  { %9820 = vmatprep.mubr.bf16.mxu1 %v19869_v2  ;;  %9656 = vmatprep.mubr.bf16.mxu0 %v19869_v2  ;;  %v13791_v2 = vld [vmem:[#allocation3 + $0xf8] ss:$28 sps:$4 sm:$0xff]   ;;  %v13835_v10 = vld [vmem:[#allocation3 + $0x670] ss:$28 sps:$4 sm:$0xff]  }
 0x5fe   :  { %9627 = vmatpush1.bf16.msra.mxu0 %v13772_v19  ;;  %13098 = vmatpush3.bf16.msra.mxu1 %v13776_v15  ;;  %v13832_v19 = vld [vmem:[#allocation3 + $0x2e8] ss:$28 sps:$4 sm:$0xff]   ;;  %v13836_v15 = vld [vmem:[#allocation3 + $0x4b0] ss:$28 sps:$4 sm:$0xff]  }
 0x5ff   :  { %9628 = vmatprep.subr.bf16.mxu0 %v13779_v22  ;;  %13099 = vmatprep.subr.bf16.mxu1 %v13780_v39  ;;  %v13839_v22 = vld [vmem:[#allocation3 + $0x324] ss:$28 sps:$4 sm:$0xff]  }
 0x600   :  { %v13840_v39 = vld [vmem:[#allocation3 + $0x6a8] ss:$28 sps:$4 sm:$0xff]  }
 0x602   :  { %9629 = vmatpush1.bf16.msra.mxu0 %v13777_v42  ;;  %13100 = vmatpush3.bf16.msra.mxu1 %v13781_v26  ;;  %v13837_v42 = vld [vmem:[#allocation3 + $0x320] ss:$28 sps:$4 sm:$0xff]   ;;  %v13841_v26 = vld [vmem:[#allocation3 + $0x4e8] ss:$28 sps:$4 sm:$0xff]  }
 0x603   :  { %9630 = vmatprep.subr.bf16.mxu0 %v13784_v7  ;;  %13101 = vmatprep.subr.bf16.mxu1 %v13785_v1  ;;  %v13844_v7 = vld [vmem:[#allocation3 + $0x35c] ss:$28 sps:$4 sm:$0xff]  }
 0x604   :  { %v13845_v1 = vld [vmem:[#allocation3 + $0x6e0] ss:$28 sps:$4 sm:$0xff]  }
 0x606   :  { %9631 = vmatpush1.bf16.msra.mxu0 %v13782_v4  ;;  %13102 = vmatpush3.bf16.msra.mxu1 %v13786_v12  ;;  %v13842_v4 = vld [vmem:[#allocation3 + $0x358] ss:$28 sps:$4 sm:$0xff]   ;;  %v13846_v12 = vld [vmem:[#allocation3 + $0x520] ss:$28 sps:$4 sm:$0xff]  }
 0x607   :  { %9632 = vmatprep.subr.bf16.mxu0 %v13789_v37  ;;  %13103 = vmatprep.subr.bf16.mxu1 %v13790_v33  ;;  %v13849_v37 = vld [vmem:[#allocation3 + $0x394] ss:$28 sps:$4 sm:$0xff]  }
 0x608   :  { %v13850_v33 = vld [vmem:[#allocation3 + $0x8d8] ss:$28 sps:$4 sm:$0xff]  }
 0x60a   :  { %9633 = vmatpush1.bf16.msra.mxu0 %v13787_v11  ;;  %13104 = vmatpush3.bf16.msra.mxu1 %v13791_v2  ;;  %v13847_v11 = vld [vmem:[#allocation3 + $0x390] ss:$28 sps:$4 sm:$0xff]   ;;  %v13851_v2 = vld [vmem:[#allocation3 + $0x718] ss:$28 sps:$4 sm:$0xff]  }
 0x60b   :  { %9634 = vmatprep.subr.bf16.mxu0 %v13794_v46  ;;  %13105 = vmatprep.subr.bf16.mxu1 %v13795_v20  ;;  %v13854_v46 = vld [vmem:[#allocation3 + $0x3cc] ss:$28 sps:$4 sm:$0xff]  }
 0x60c   :  { %v13855_v20 = vld [vmem:[#allocation3 + $0x910] ss:$28 sps:$4 sm:$0xff]  }
 0x60e   :  { %9635 = vmatpush1.bf16.msra.mxu0 %v13792_v30  ;;  %13106 = vmatpush3.bf16.msra.mxu1 %v13796_v21  ;;  %v13852_v30 = vld [vmem:[#allocation3 + $0x3c8] ss:$28 sps:$4 sm:$0xff]   ;;  %v13856_v21 = vld [vmem:[#allocation3 + $0x750] ss:$28 sps:$4 sm:$0xff]  }
 0x60f   :  { %9636 = vmatprep.subr.bf16.mxu0 %v13799_v24  ;;  %13107 = vmatprep.subr.bf16.mxu1 %v13800_v28  ;;  %v13859_v24 = vld [vmem:[#allocation3 + $0x404] ss:$28 sps:$4 sm:$0xff]  }
 0x610   :  { %v13860_v28 = vld [vmem:[#allocation3 + $0x948] ss:$28 sps:$4 sm:$0xff]  }
 0x612   :  { %9637 = vmatpush1.bf16.msra.mxu0 %v13797_v29  ;;  %13108 = vmatpush3.bf16.msra.mxu1 %v13801_v40  ;;  %v13857_v29 = vld [vmem:[#allocation3 + $0x400] ss:$28 sps:$4 sm:$0xff]   ;;  %v13861_v40 = vld [vmem:[#allocation3 + $0x788] ss:$28 sps:$4 sm:$0xff]  }
 0x613   :  { %9638 = vmatprep.subr.bf16.mxu0 %v13804_v41  ;;  %13109 = vmatprep.subr.bf16.mxu1 %v13805_v44  ;;  %v13865_v41 = vld [vmem:[#allocation3 + $0x980] ss:$28 sps:$4 sm:$0xff]   ;;  %v13862_v44 = vld [vmem:[#allocation3 + $0x438] ss:$28 sps:$4 sm:$0xff]  }
 0x616   :  { %9639 = vmatpush1.bf16.msra.mxu0 %v13802_v48  ;;  %13110 = vmatpush3.bf16.msra.mxu1 %v13806_v49  ;;  %v13866_v48 = vld [vmem:[#allocation3 + $0x7c0] ss:$28 sps:$4 sm:$0xff]   ;;  %v13869_v49 = vld [vmem:[#allocation3 + $0x474] ss:$28 sps:$4 sm:$0xff]  }
 0x617   :  { %9640 = vmatprep.subr.bf16.mxu0 %v13809_v53  ;;  %13117 = vmatprep.subr.bf16.mxu1 %v13810_v56  ;;  %v13870_v53 = vld [vmem:[#allocation3 + $0x9b8] ss:$28 sps:$4 sm:$0xff]   ;;  %v13867_v56 = vld [vmem:[#allocation3 + $0x470] ss:$28 sps:$4 sm:$0xff]  }
 0x619   :  { %9821 = vmatmul.mubr.bf16.vlgmr.msra.gmra.mrb[12].mxu1 %v19876_v13 }
 0x61a   :  { %9641 = vmatpush1.bf16.msra.mxu0 %v13807_v58  ;;  %13118 = vmatpush3.bf16.msra.mxu1 %v13811_v63  ;;  %v13874_v58 = vld [vmem:[#allocation3 + $0x4ac] ss:$28 sps:$4 sm:$0xff]  }
 0x61b   :  { %9642 = vmatprep.subr.bf16.mxu0 %v13814_v36  ;;  %13119 = vmatprep.subr.bf16.mxu1 %v13815_v38  ;;  %v13875_v63 = vld [vmem:[#allocation3 + $0x9f0] ss:$28 sps:$4 sm:$0xff]   ;;  %v13872_v36 = vld [vmem:[#allocation3 + $0x4a8] ss:$28 sps:$4 sm:$0xff]  }
 0x61c   :  { %9860 = vmatprep.mubr.bf16.mxu1 %v19881_v51  ;;  %v13876_v38 = vld [vmem:[#allocation3 + $0x830] ss:$28 sps:$4 sm:$0xff]  }
 0x61e   :  { %9643 = vmatpush1.bf16.msra.mxu0 %v13812_v54  ;;  %13120 = vmatpush3.bf16.msra.mxu1 %v13816_v32  ;;  %v13879_v54 = vld [vmem:[#allocation3 + $0x4e4] ss:$28 sps:$4 sm:$0xff]  }
 0x61f   :  { %9644 = vmatprep.subr.bf16.mxu0 %v13819_v50  ;;  %13121 = vmatprep.subr.bf16.mxu1 %v13820_v34  ;;  %v13880_v32 = vld [vmem:[#allocation3 + $0xa28] ss:$28 sps:$4 sm:$0xff]   ;;  %v13877_v50 = vld [vmem:[#allocation3 + $0x4e0] ss:$28 sps:$4 sm:$0xff]  }
 0x620   :  { %v13881_v34 = vld [vmem:[#allocation3 + $0x868] ss:$28 sps:$4 sm:$0xff]  }
 0x622   :  { %9645 = vmatpush1.bf16.msra.mxu0 %v13817_v52  ;;  %13122 = vmatpush3.bf16.msra.mxu1 %v13821_v62  ;;  %v13884_v52 = vld [vmem:[#allocation3 + $0x51c] ss:$28 sps:$4 sm:$0xff]  }
 0x623   :  { %9646 = vmatprep.subr.bf16.mxu0 %v13824_v45  ;;  %13123 = vmatprep.subr.bf16.mxu1 %v13825_v43  ;;  %v13885_v62 = vld [vmem:[#allocation3 + $0xa60] ss:$28 sps:$4 sm:$0xff]   ;;  %v13882_v45 = vld [vmem:[#allocation3 + $0x518] ss:$28 sps:$4 sm:$0xff]  }
 0x624   :  { %v13886_v43 = vld [vmem:[#allocation3 + $0x8a0] ss:$28 sps:$4 sm:$0xff]  }
 0x626   :  { %9647 = vmatpush1.bf16.msra.mxu0 %v13822_v60  ;;  %13124 = vmatpush3.bf16.msra.mxu1 %v13826_v6  ;;  %v13889_v60 = vld [vmem:[#allocation3 + $0x554] ss:$28 sps:$4 sm:$0xff]  }
 0x627   :  { %9648 = vmatprep.subr.bf16.mxu0 %v13829_v31  ;;  %13125 = vmatprep.subr.bf16.mxu1 %v13830_v35  ;;  %v13887_v6 = vld [vmem:[#allocation3 + $0x550] ss:$28 sps:$4 sm:$0xff]   ;;  %v13890_v31 = vld [vmem:[#allocation3 + $0xa98] ss:$28 sps:$4 sm:$0xff]  }
 0x628   :  { %v13893_v35 = vld [vmem:[#allocation3 + $0x58c] ss:$28 sps:$4 sm:$0xff]  }
 0x62a   :  { %9649 = vmatpush1.bf16.msra.mxu0 %v13827_v27  ;;  %13126 = vmatpush3.bf16.msra.mxu1 %v13831_v3  ;;  %v13891_v27 = vld [vmem:[#allocation3 + $0x588] ss:$28 sps:$4 sm:$0xff]   ;;  %v13894_v3 = vld [vmem:[#allocation3 + $0xad0] ss:$28 sps:$4 sm:$0xff]  }
 0x62b   :  { %9650 = vmatprep.subr.bf16.mxu0 %v13834_v14  ;;  %13127 = vmatprep.subr.bf16.mxu1 %v13835_v10  ;;  %v13897_v14 = vld [vmem:[#allocation3 + $0x5c4] ss:$28 sps:$4 sm:$0xff]  }
 0x62c   :  { %v13895_v10 = vld [vmem:[#allocation3 + $0x5c0] ss:$28 sps:$4 sm:$0xff]  }
 0x62e   :  { %9651 = vmatpush1.bf16.msra.mxu0 %v13832_v19  ;;  %13128 = vmatpush3.bf16.msra.mxu1 %v13836_v15  ;;  %v13898_v19 = vld [vmem:[#allocation3 + $0xb08] ss:$28 sps:$4 sm:$0xff]   ;;  %v13901_v15 = vld [vmem:[#allocation3 + $0x5fc] ss:$28 sps:$4 sm:$0xff]  }
 0x62f   :  { %9652 = vmatprep.subr.bf16.mxu0 %v13839_v22  ;;  %13129 = vmatprep.subr.bf16.mxu1 %v13840_v39  ;;  %v13899_v22 = vld [vmem:[#allocation3 + $0x5f8] ss:$28 sps:$4 sm:$0xff]   ;;  %v13902_v39 = vld [vmem:[#allocation3 + $0xb40] ss:$28 sps:$4 sm:$0xff]  }
 0x632   :  { %9653 = vmatpush1.bf16.msra.mxu0 %v13837_v42  ;;  %13130 = vmatpush3.bf16.msra.mxu1 %v13841_v26  ;;  %v13905_v42 = vld [vmem:[#allocation3 + $0x634] ss:$28 sps:$4 sm:$0xff]  }
 0x633   :  { %9654 = vmatprep.subr.bf16.mxu0 %v13844_v7  ;;  %13131 = vmatprep.subr.bf16.mxu1 %v13845_v1  ;;  %v13903_v26 = vld [vmem:[#allocation3 + $0x630] ss:$28 sps:$4 sm:$0xff]   ;;  %v13906_v7 = vld [vmem:[#allocation3 + $0xb78] ss:$28 sps:$4 sm:$0xff]  }
 0x634   :  { %v13909_v1 = vld [vmem:[#allocation3 + $0x66c] ss:$28 sps:$4 sm:$0xff]  }
 0x636   :  { %9655 = vmatpush1.bf16.msra.mxu0 %v13842_v4  ;;  %13132 = vmatpush3.bf16.msra.mxu1 %v13846_v12  ;;  %v13907_v4 = vld [vmem:[#allocation3 + $0x668] ss:$28 sps:$4 sm:$0xff]   ;;  %v13910_v12 = vld [vmem:[#allocation3 + $0xbb0] ss:$28 sps:$4 sm:$0xff]  }
 0x637   :  { %9665 = vmatprep.subr.bf16.mxu0 %v13849_v37  ;;  %13139 = vmatprep.subr.bf16.mxu1 %v13850_v33  ;;  %v13913_v37 = vld [vmem:[#allocation3 + $0x6a4] ss:$28 sps:$4 sm:$0xff]  }
 0x638   :  { %v13911_v33 = vld [vmem:[#allocation3 + $0x6a0] ss:$28 sps:$4 sm:$0xff]  }
 0x639   :  { %9657 = vmatmul.mubr.bf16.vlgmr.msra.gmra.mrb[12].mxu0 %v19876_v13  ;;  %9861 = vmatmul.mubr.bf16.vlgmr.msra.gmra.mrb[16].mxu1 %v19890_v0  ;;  %v13864_v13 = vld [vmem:[#allocation3 + $0x43c] ss:$28 sps:$4 sm:$0xff]  }
 0x63a   :  { %9666 = vmatpush1.bf16.msra.mxu0 %v13847_v11  ;;  %13140 = vmatpush3.bf16.msra.mxu1 %v13851_v2  ;;  %v13914_v11 = vld [vmem:[#allocation3 + $0xbe8] ss:$28 sps:$4 sm:$0xff]   ;;  %v13917_v2 = vld [vmem:[#allocation3 + $0x6dc] ss:$28 sps:$4 sm:$0xff]  }
 0x63b   :  { %9667 = vmatprep.subr.bf16.mxu0 %v13854_v46  ;;  %13141 = vmatprep.subr.bf16.mxu1 %v13855_v20  ;;  %v13915_v46 = vld [vmem:[#allocation3 + $0x6d8] ss:$28 sps:$4 sm:$0xff]   ;;  %v13918_v20 = vld [vmem:[#allocation3 + $0xc20] ss:$28 sps:$4 sm:$0xff]  }
 0x63c   :  { %9900 = vmatprep.mubr.bf16.mxu1 %v19895_v5  ;;  %9697 = vmatprep.mubr.bf16.mxu0 %v19881_v51  ;;  %v13871_v51 = vld [vmem:[#allocation3 + $0x7f8] ss:$28 sps:$4 sm:$0xff]  }
 0x63e   :  { %9668 = vmatpush1.bf16.msra.mxu0 %v13852_v30  ;;  %13142 = vmatpush3.bf16.msra.mxu1 %v13856_v21  ;;  %v13921_v30 = vld [vmem:[#allocation3 + $0x714] ss:$28 sps:$4 sm:$0xff]  }
 0x63f   :  { %9669 = vmatprep.subr.bf16.mxu0 %v13859_v24  ;;  %13143 = vmatprep.subr.bf16.mxu1 %v13860_v28  ;;  %v13919_v21 = vld [vmem:[#allocation3 + $0x710] ss:$28 sps:$4 sm:$0xff]   ;;  %v13922_v24 = vld [vmem:[#allocation3 + $0xc58] ss:$28 sps:$4 sm:$0xff]  }
 0x640   :  { %v13925_v28 = vld [vmem:[#allocation3 + $0x74c] ss:$28 sps:$4 sm:$0xff]  }
 0x642   :  { %9670 = vmatpush1.bf16.msra.mxu0 %v13857_v29  ;;  %13144 = vmatpush3.bf16.msra.mxu1 %v13861_v40  ;;  %v13923_v29 = vld [vmem:[#allocation3 + $0x748] ss:$28 sps:$4 sm:$0xff]   ;;  %v13926_v40 = vld [vmem:[#allocation3 + $0xc90] ss:$28 sps:$4 sm:$0xff]  }
 0x643   :  { %9671 = vmatprep.subr.bf16.mxu0 %v13864_v13  ;;  %13145 = vmatprep.subr.bf16.mxu1 %v13865_v41  ;;  %v13929_v13 = vld [vmem:[#allocation3 + $0x784] ss:$28 sps:$4 sm:$0xff]  }
 0x644   :  { %v13927_v41 = vld [vmem:[#allocation3 + $0x780] ss:$28 sps:$4 sm:$0xff]  }
 0x646   :  { %9672 = vmatpush1.bf16.msra.mxu0 %v13862_v44  ;;  %13146 = vmatpush3.bf16.msra.mxu1 %v13866_v48  ;;  %v13930_v44 = vld [vmem:[#allocation3 + $0xcc8] ss:$28 sps:$4 sm:$0xff]   ;;  %v13933_v48 = vld [vmem:[#allocation3 + $0x7bc] ss:$28 sps:$4 sm:$0xff]  }
 0x647   :  { %9673 = vmatprep.subr.bf16.mxu0 %v13869_v49  ;;  %13147 = vmatprep.subr.bf16.mxu1 %v13870_v53  ;;  %v13934_v49 = vld [vmem:[#allocation3 + $0xd00] ss:$28 sps:$4 sm:$0xff]   ;;  %v13937_v53 = vld [vmem:[#allocation3 + $0x7f4] ss:$28 sps:$4 sm:$0xff]  }
 0x64a   :  { %9674 = vmatpush1.bf16.msra.mxu0 %v13867_v56  ;;  %13148 = vmatpush3.bf16.msra.mxu1 %v13871_v51  ;;  %v13935_v56 = vld [vmem:[#allocation3 + $0x7f0] ss:$28 sps:$4 sm:$0xff]  }
 0x64b   :  { %9675 = vmatprep.subr.bf16.mxu0 %v13874_v58  ;;  %13149 = vmatprep.subr.bf16.mxu1 %v13875_v63  ;;  %v13941_v51 = vld [vmem:[#allocation3 + $0x82c] ss:$28 sps:$4 sm:$0xff]  }
 0x64c   :  { %v13939_v58 = vld [vmem:[#allocation3 + $0x828] ss:$28 sps:$4 sm:$0xff]   ;;  %v13942_v63 = vld [vmem:[#allocation3 + $0xd70] ss:$28 sps:$4 sm:$0xff]  }
 0x64e   :  { %9676 = vmatpush1.bf16.msra.mxu0 %v13872_v36  ;;  %13150 = vmatpush3.bf16.msra.mxu1 %v13876_v38  ;;  %v13945_v36 = vld [vmem:[#allocation3 + $0x864] ss:$28 sps:$4 sm:$0xff]   ;;  %v13946_v38 = vld [vmem:[#allocation3 + $0xda8] ss:$0 sps:$4 sm:$0xff]  }
 0x64f   :  { %9677 = vmatprep.subr.bf16.mxu0 %v13879_v54  ;;  %13151 = vmatprep.subr.bf16.mxu1 %v13880_v32  ;;  %v13943_v54 = vld [vmem:[#allocation3 + $0x860] ss:$28 sps:$4 sm:$0xff]   ;;  %v9294_v32 = vsel %vm5947_vm0, %v13946_v38, 0 }
 0x650   :  { %v13997_v38 = vld [vmem:[#allocation3 + $0xc1c] ss:$28 sps:$4 sm:$0xff]  }
 0x652   :  { %9678 = vmatpush1.bf16.msra.mxu0 %v13877_v50  ;;  %13152 = vmatpush3.bf16.msra.mxu1 %v13881_v34  ;;  %v13949_v50 = vld [vmem:[#allocation3 + $0x89c] ss:$28 sps:$4 sm:$0xff]  }
 0x653   :  { %9679 = vmatprep.subr.bf16.mxu0 %v13884_v52  ;;  %13153 = vmatprep.subr.bf16.mxu1 %v13885_v62  ;;  %v13947_v34 = vld [vmem:[#allocation3 + $0x898] ss:$28 sps:$4 sm:$0xff]   ;;  %v13950_v62 = vld [vmem:[#allocation3 + $0x8d0] ss:$28 sps:$4 sm:$0xff]  }
 0x654   :  { %v13952_v52 = vld [vmem:[#allocation3 + $0x8d4] ss:$28 sps:$4 sm:$0xff]  }
 0x656   :  { %9680 = vmatpush1.bf16.msra.mxu0 %v13882_v45  ;;  %13154 = vmatpush3.bf16.msra.mxu1 %v13886_v43  ;;  %v13955_v45 = vld [vmem:[#allocation3 + $0x90c] ss:$28 sps:$4 sm:$0xff]  }
 0x657   :  { %9681 = vmatprep.subr.bf16.mxu0 %v13889_v60  ;;  %9908 = vmatprep.subr.bf16.mxu1 %v14032_v59  ;;  %v13953_v43 = vld [vmem:[#allocation3 + $0x908] ss:$28 sps:$4 sm:$0xff]  }
 0x658   :  { %v13958_v60 = vld [vmem:[#allocation3 + $0x944] ss:$28 sps:$4 sm:$0xff]  }
 0x659   :  { %9901 = vmatmul.mubr.bf16.vlgmr.msra.gmra.mrb[20].mxu1 %v19904_v57 }
 0x65a   :  { %9682 = vmatpush1.bf16.msra.mxu0 %v13887_v6  ;;  %9909 = vmatpush1.bf16.msra.mxu1 %v13890_v31  ;;  %v13956_v6 = vld [vmem:[#allocation3 + $0x940] ss:$28 sps:$4 sm:$0xff]  }
 0x65b   :  { %9683 = vmatprep.subr.bf16.mxu0 %v13893_v35  ;;  %9910 = vmatprep.subr.bf16.mxu1 %v14032_v59  ;;  %v13961_v31 = vld [vmem:[#allocation3 + $0x97c] ss:$28 sps:$4 sm:$0xff]  }
 0x65c   :  { %12928 = vmatprep.mubr.msk.bf16.mxu1 %vm9271_vm2, %v19909_v47  ;;  %v13959_v35 = vld [vmem:[#allocation3 + $0x978] ss:$28 sps:$4 sm:$0xff]  }
 0x65e   :  { %9684 = vmatpush1.bf16.msra.mxu0 %v13891_v27  ;;  %9911 = vmatpush1.bf16.msra.mxu1 %v13894_v3  ;;  %v13964_v27 = vld [vmem:[#allocation3 + $0x9b4] ss:$28 sps:$4 sm:$0xff]  }
 0x65f   :  { %9685 = vmatprep.subr.bf16.mxu0 %v13897_v14  ;;  %9912 = vmatprep.subr.bf16.mxu1 %v14032_v59  ;;  %v13962_v3 = vld [vmem:[#allocation3 + $0x9b0] ss:$28 sps:$4 sm:$0xff]  }
 0x660   :  { %v13967_v14 = vld [vmem:[#allocation3 + $0x9ec] ss:$28 sps:$4 sm:$0xff]  }
 0x662   :  { %9686 = vmatpush1.bf16.msra.mxu0 %v13895_v10  ;;  %9913 = vmatpush1.bf16.msra.mxu1 %v13898_v19  ;;  %v13965_v10 = vld [vmem:[#allocation3 + $0x9e8] ss:$28 sps:$4 sm:$0xff]  }
 0x663   :  { %9687 = vmatprep.subr.bf16.mxu0 %v13901_v15  ;;  %9914 = vmatprep.subr.bf16.mxu1 %v14032_v59  ;;  %v13970_v19 = vld [vmem:[#allocation3 + $0xa24] ss:$28 sps:$4 sm:$0xff]  }
 0x664   :  { %v13968_v15 = vld [vmem:[#allocation3 + $0xa20] ss:$28 sps:$4 sm:$0xff]  }
 0x666   :  { %9688 = vmatpush1.bf16.msra.mxu0 %v13899_v22  ;;  %9915 = vmatpush1.bf16.msra.mxu1 %v13902_v39  ;;  %v13973_v22 = vld [vmem:[#allocation3 + $0xa5c] ss:$28 sps:$4 sm:$0xff]  }
 0x667   :  { %9689 = vmatprep.subr.bf16.mxu0 %v13905_v42  ;;  %9916 = vmatprep.subr.bf16.mxu1 %v14032_v59  ;;  %v13971_v39 = vld [vmem:[#allocation3 + $0xa58] ss:$28 sps:$4 sm:$0xff]  }
 0x668   :  { %v13976_v42 = vld [vmem:[#allocation3 + $0xa94] ss:$28 sps:$4 sm:$0xff]  }
 0x66a   :  { %9690 = vmatpush1.bf16.msra.mxu0 %v13903_v26  ;;  %9917 = vmatpush1.bf16.msra.mxu1 %v13906_v7  ;;  %v13974_v26 = vld [vmem:[#allocation3 + $0xa90] ss:$28 sps:$4 sm:$0xff]  }
 0x66b   :  { %9691 = vmatprep.subr.bf16.mxu0 %v13909_v1  ;;  %9918 = vmatprep.subr.bf16.mxu1 %v14032_v59  ;;  %v13979_v7 = vld [vmem:[#allocation3 + $0xacc] ss:$28 sps:$4 sm:$0xff]  }
 0x66c   :  { %v13977_v1 = vld [vmem:[#allocation3 + $0xac8] ss:$28 sps:$4 sm:$0xff]  }
 0x66e   :  { %9692 = vmatpush1.bf16.msra.mxu0 %v13907_v4  ;;  %9919 = vmatpush1.bf16.msra.mxu1 %v13910_v12  ;;  %v13982_v4 = vld [vmem:[#allocation3 + $0xb04] ss:$28 sps:$4 sm:$0xff]  }
 0x66f   :  { %9693 = vmatprep.subr.bf16.mxu0 %v13913_v37  ;;  %9920 = vmatprep.subr.bf16.mxu1 %v14032_v59  ;;  %v13980_v12 = vld [vmem:[#allocation3 + $0xb00] ss:$28 sps:$4 sm:$0xff]  }
 0x670   :  { %v13985_v37 = vld [vmem:[#allocation3 + $0xb3c] ss:$28 sps:$4 sm:$0xff]  }
 0x672   :  { %9694 = vmatpush1.bf16.msra.mxu0 %v13911_v33  ;;  %9921 = vmatpush1.bf16.msra.mxu1 %v13914_v11  ;;  %v13983_v33 = vld [vmem:[#allocation3 + $0xb38] ss:$28 sps:$4 sm:$0xff]  }
 0x673   :  { %9695 = vmatprep.subr.bf16.mxu0 %v13917_v2  ;;  %9922 = vmatprep.subr.bf16.mxu1 %v14032_v59  ;;  %v13988_v11 = vld [vmem:[#allocation3 + $0xb74] ss:$28 sps:$4 sm:$0xff]  }
 0x674   :  { %v13986_v2 = vld [vmem:[#allocation3 + $0xb70] ss:$28 sps:$4 sm:$0xff]  }
 0x676   :  { %9696 = vmatpush1.bf16.msra.mxu0 %v13915_v46  ;;  %9923 = vmatpush1.bf16.msra.mxu1 %v13918_v20  ;;  %v13991_v46 = vld [vmem:[#allocation3 + $0xbac] ss:$28 sps:$4 sm:$0xff]  }
 0x677   :  { %9706 = vmatprep.subr.bf16.mxu0 %v13921_v30  ;;  %9924 = vmatprep.subr.bf16.mxu1 %v14032_v59 }
 0x679   :  { %9698 = vmatmul.mubr.bf16.vlgmr.msra.gmra.mrb[12].mxu0 %v19890_v0  ;;  %v13931_v0 = vld [vmem:[#allocation3 + $0x7b8] ss:$28 sps:$4 sm:$0xff]  }
 0x67a   :  { %9707 = vmatpush1.bf16.msra.mxu0 %v13919_v21  ;;  %9925 = vmatpush1.bf16.msra.mxu1 %v13922_v24  ;;  %v13989_v24 = vld [vmem:[#allocation3 + $0xba8] ss:$28 sps:$4 sm:$0xff]  }
 0x67b   :  { %9708 = vmatprep.subr.bf16.mxu0 %v13925_v28  ;;  %9926 = vmatprep.subr.bf16.mxu1 %v14032_v59  ;;  %v13994_v28 = vld [vmem:[#allocation3 + $0xbe4] ss:$28 sps:$4 sm:$0xff]  }
 0x67c   :  { %9738 = vmatprep.mubr.bf16.mxu0 %v19895_v5  ;;  %v13938_v5 = vld [vmem:[#allocation3 + $0xd38] ss:$28 sps:$4 sm:$0xff]  }
 0x67e   :  { %9709 = vmatpush1.bf16.msra.mxu0 %v13923_v29  ;;  %9927 = vmatpush1.bf16.msra.mxu1 %v13926_v40 }
 0x67f   :  { %9710 = vmatprep.subr.bf16.mxu0 %v13929_v13  ;;  %9928 = vmatprep.subr.bf16.mxu1 %v14032_v59 }
 0x682   :  { %9711 = vmatpush1.bf16.msra.mxu0 %v13927_v41  ;;  %9929 = vmatpush1.bf16.msra.mxu1 %v13930_v44 }
 0x683   :  { %9712 = vmatprep.subr.bf16.mxu0 %v13933_v48  ;;  %9930 = vmatprep.subr.bf16.mxu1 %v14032_v59 }
 0x686   :  { %9713 = vmatpush1.bf16.msra.mxu0 %v13931_v0  ;;  %9931 = vmatpush1.bf16.msra.mxu1 %v13934_v49 }
 0x687   :  { %9714 = vmatprep.subr.bf16.mxu0 %v13937_v53  ;;  %9932 = vmatprep.subr.bf16.mxu1 %v14032_v59 }
 0x68a   :  { %9715 = vmatpush1.bf16.msra.mxu0 %v13935_v56  ;;  %9933 = vmatpush1.bf16.msra.mxu1 %v13938_v5  ;;  %v13992_v5 = vld [vmem:[#allocation3 + $0xbe0] ss:$28 sps:$4 sm:$0xff]  }
 0x68b   :  { %9716 = vmatprep.subr.bf16.mxu0 %v13941_v51  ;;  %9934 = vmatprep.subr.bf16.mxu1 %v14032_v59 }
 0x68e   :  { %9717 = vmatpush1.bf16.msra.mxu0 %v13939_v58  ;;  %9935 = vmatpush1.bf16.msra.mxu1 %v13942_v63 }
 0x68f   :  { %9718 = vmatprep.subr.bf16.mxu0 %v13945_v36  ;;  %9936 = vmatprep.subr.bf16.mxu1 %v14032_v59 }
 0x692   :  { %9719 = vmatpush1.bf16.msra.mxu0 %v13943_v54  ;;  %9937 = vmatpush1.bf16.msra.mxu1 %v9294_v32 }
 0x693   :  { %9720 = vmatprep.subr.bf16.mxu0 %v13949_v50  ;;  %v13995_v50 = vld [vmem:[#allocation3 + $0xc18] ss:$28 sps:$4 sm:$0xff]  }
 0x695   :  { %9941 = vmatmul.mubr.bf16.vlgmr.msra.gmra.mrb[24].mxu1 %v19924_v23 }
 0x696   :  { %9721 = vmatpush1.bf16.msra.mxu0 %v13947_v34  ;;  %v14000_v34 = vld [vmem:[#allocation3 + $0xc54] ss:$28 sps:$4 sm:$0xff]  }
 0x697   :  { %9722 = vmatprep.subr.bf16.mxu0 %v13952_v52  ;;  %v13998_v52 = vld [vmem:[#allocation3 + $0xc50] ss:$28 sps:$4 sm:$0xff]  }
 0x69a   :  { %9723 = vmatpush1.bf16.msra.mxu0 %v13950_v62  ;;  %v14003_v62 = vld [vmem:[#allocation3 + $0xc8c] ss:$28 sps:$4 sm:$0xff]  }
 0x69b   :  { %9724 = vmatprep.subr.bf16.mxu0 %v13955_v45  ;;  %v14001_v45 = vld [vmem:[#allocation3 + $0xc88] ss:$28 sps:$4 sm:$0xff]  }
 0x69e   :  { %9725 = vmatpush1.bf16.msra.mxu0 %v13953_v43  ;;  %v14006_v43 = vld [vmem:[#allocation3 + $0xcc4] ss:$28 sps:$4 sm:$0xff]  }
 0x69f   :  { %9726 = vmatprep.subr.bf16.mxu0 %v13958_v60  ;;  %v14004_v60 = vld [vmem:[#allocation3 + $0xcc0] ss:$28 sps:$4 sm:$0xff]  }
 0x6a2   :  { %9727 = vmatpush1.bf16.msra.mxu0 %v13956_v6  ;;  %v14009_v6 = vld [vmem:[#allocation3 + $0xcfc] ss:$28 sps:$4 sm:$0xff]  }
 0x6a3   :  { %9728 = vmatprep.subr.bf16.mxu0 %v13961_v31  ;;  %v14007_v31 = vld [vmem:[#allocation3 + $0xcf8] ss:$28 sps:$4 sm:$0xff]  }
 0x6a6   :  { %9729 = vmatpush1.bf16.msra.mxu0 %v13959_v35  ;;  %v14012_v35 = vld [vmem:[#allocation3 + $0xd34] ss:$28 sps:$4 sm:$0xff]  }
 0x6a7   :  { %9730 = vmatprep.subr.bf16.mxu0 %v13964_v27  ;;  %v14010_v27 = vld [vmem:[#allocation3 + $0xd30] ss:$28 sps:$4 sm:$0xff]  }
 0x6aa   :  { %9731 = vmatpush1.bf16.msra.mxu0 %v13962_v3  ;;  %v14015_v3 = vld [vmem:[#allocation3 + $0xd6c] ss:$28 sps:$4 sm:$0xff]  }
 0x6ab   :  { %9732 = vmatprep.subr.bf16.mxu0 %v13967_v14  ;;  %v6974_v14 = vld [vmem:[#allocation3 + $0xda0] sm:$0xff] }
 0x6ae   :  { %9733 = vmatpush1.bf16.msra.mxu0 %v13965_v10  ;;  %v14013_v10 = vld [vmem:[#allocation3 + $0xd68] ss:$28 sps:$4 sm:$0xff]  }
 0x6af   :  { %9734 = vmatprep.subr.bf16.mxu0 %v13970_v19  ;;  %v12920_v19 = vcombine.high %v6974_v14, %v6974_v14 }
 0x6b2   :  { %9735 = vmatpush1.bf16.msra.mxu0 %v13968_v15  ;;  %v12919_v15 = vcombine.low %v6974_v14, %v6974_v14 }
 0x6b3   :  { %9736 = vmatprep.subr.bf16.mxu0 %v13973_v22 }
 0x6b6   :  { %9737 = vmatpush1.bf16.msra.mxu0 %v13971_v39 }
 0x6b7   :  { %9747 = vmatprep.subr.bf16.mxu0 %v13976_v42 }
 0x6b9   :  { %9739 = vmatmul.mubr.bf16.vlgmr.msra.gmra.mrb[12].mxu0 %v19904_v57  ;;  %v19964_v57 = vld [vmem:[%s20463_s4] sm:$0x7f] }
 0x6ba   :  { %9748 = vmatpush1.bf16.msra.mxu0 %v13974_v26  ;;  %12927 = vmatprep.mubr.msk.bf16.mxu0 %vm9271_vm2, %v19909_v47  ;;  %v6989_v47 = vrot.slane %v19964_v57, %v19819_v8  ;;  %v6997_v20 = vrot.slane %v19964_v57, %v19822_v9  ;;  %v6993_v30 = vrot.slane %v19964_v57, %v19828_v16 }
 0x6bb   :  { %9749 = vmatprep.subr.bf16.mxu0 %v13979_v7  ;;  %v7001_v21 = vrot.slane %v19964_v57, %v19831_v17  ;;  %v9288_v7 = vsel %vm5947_vm0, %v12919_v15, 0 }
 0x6be   :  { %9750 = vmatpush1.bf16.msra.mxu0 %v13977_v1 }
 0x6bf   :  { %9751 = vmatprep.subr.bf16.mxu0 %v13982_v4  ;;  %v7013_v4 = vrot.slane %v19964_v57, %v4412_v55 }
 0x6c2   :  { %9752 = vmatpush1.bf16.msra.mxu0 %v13980_v12 }
 0x6c3   :  { %9753 = vmatprep.subr.bf16.mxu0 %v13985_v37 }
 0x6c6   :  { %9754 = vmatpush1.bf16.msra.mxu0 %v13983_v33 }
 0x6c7   :  { %9755 = vmatprep.subr.bf16.mxu0 %v13988_v11 }
 0x6ca   :  { %9756 = vmatpush1.bf16.msra.mxu0 %v13986_v2 }
 0x6cb   :  { %9757 = vmatprep.subr.bf16.mxu0 %v13991_v46 }
 0x6cc   :  { %v9453_v29 = vpop.f32.mrb[8].mxu0  ;;  %v9617_v40 = vpop.f32.mrb[8].mxu1 }
 0x6cd   :  { %v19974_v13 = vadd.f32 %v9453_v29, %v6989_v47  ;;  %v19976_v41 = vadd.f32 %v9617_v40, %v6997_v20  ;;  %v9455_v44 = vpop.f32.mrb[9].mxu0  ;;  %v9619_v48 = vpop.f32.mrb[9].mxu1 }
 0x6ce   :  { %v19978_v0 = vadd.f32 %v9455_v44, %v6993_v30  ;;  %v19980_v49 = vadd.f32 %v9619_v48, %v7001_v21  ;;  %v9457_v53 = vpop.f32.mrb[10].mxu0  ;;  %v9621_v56 = vpop.f32.mrb[10].mxu1  ;;  %9758 = vmatpush1.bf16.msra.mxu0 %v13989_v24 }
 0x6cf   :  { %v9948_v51 = vmax.f32 %v19974_v13, 0.0  ;;  %v9950_v58 = vmax.f32 %v19976_v41, 0.0  ;;  %v9458_v63 = vpop.f32.mrb[11].mxu0  ;;  %v9622_v36 = vpop.f32.mrb[11].mxu1  ;;  %9759 = vmatprep.subr.bf16.mxu0 %v13994_v28  ;;  %v7005_v56 = vrot.slane %v19964_v57, %v19847_v61 }
 0x6d0   :  { %v9949_v54 = vmax.f32 %v19978_v0, 0.0  ;;  %v9951_v32 = vmax.f32 %v19980_v49, 0.0 }
 0x6d2   :  { %9760 = vmatpush1.bf16.msra.mxu0 %v13992_v5  ;;  %v7009_v5 = vrot.slane %v19964_v57, %v4408_v25 }
 0x6d3   :  { %9761 = vmatprep.subr.bf16.mxu0 %v13997_v38 }
 0x6d6   :  { %9762 = vmatpush1.bf16.msra.mxu0 %v13995_v50 }
 0x6d7   :  { %9763 = vmatprep.subr.bf16.mxu0 %v14000_v34 }
 0x6da   :  { %9764 = vmatpush1.bf16.msra.mxu0 %v13998_v52 }
 0x6db   :  { %9765 = vmatprep.subr.bf16.mxu0 %v14003_v62 }
 0x6de   :  { %9766 = vmatpush1.bf16.msra.mxu0 %v14001_v45 }
 0x6df   :  { %9767 = vmatprep.subr.bf16.mxu0 %v14006_v43 }
 0x6e2   :  { %9768 = vmatpush1.bf16.msra.mxu0 %v14004_v60 }
 0x6e3   :  { %9769 = vmatprep.subr.bf16.mxu0 %v14009_v6 }
 0x6e6   :  { %9770 = vmatpush1.bf16.msra.mxu0 %v14007_v31 }
 0x6e7   :  { %9771 = vmatprep.subr.bf16.mxu0 %v14012_v35 }
 0x6ea   :  { %9772 = vmatpush1.bf16.msra.mxu0 %v14010_v27 }
 0x6eb   :  { %9773 = vmatprep.subr.bf16.mxu0 %v14015_v3 }
 0x6ec   :  { %v13111_v22 = vpop.f32.mrb[12].mxu1 }
 0x6ed   :  { %v13112_v39 = vpop.f32.mrb[13].mxu1 }
 0x6ee   :  { %9774 = vmatpush1.bf16.msra.mxu0 %v14013_v10  ;;  %v13113_v42 = vadd.f32 %v13112_v39, %v13111_v22  ;;  %v13114_v26 = vpop.f32.mrb[14].mxu1 }
 0x6ef   :  { %12926 = vmatprep.subr.msk.bf16.mxu0 %vm5947_vm0, %v12920_v19  ;;  %v13115_v1 = vpop.f32.mrb[15].mxu1 }
 0x6f0   :  { %v9823_v12 = vadd.f32 %v13113_v42, %v7013_v4 }
 0x6f2   :  { %9776 = vmatpush1.bf16.msra.mxu0 %v9288_v7 }
 0x6f5   :  { %9780 = vmatmul.mubr.bf16.vlgmr.msra.gmra.mrb[12].mxu0 %v19924_v23 }
 0x70c   :  { %v13133_v37 = vpop.f32.mrb[16].mxu1 }
 0x70d   :  { %v13134_v33 = vpop.f32.mrb[17].mxu1 }
 0x70e   :  { %v13135_v11 = vadd.f32 %v13134_v33, %v13133_v37  ;;  %v13136_v2 = vpop.f32.mrb[18].mxu1 }
 0x70f   :  { %v13137_v46 = vpop.f32.mrb[19].mxu1 }
 0x710   :  { %v9863_v47 = vadd.f32 %v13135_v11, %v9823_v12 }
 0x72c   :  { %v13155_v20 = vpop.f32.mrb[20].mxu1 }
 0x72d   :  { %v13156_v30 = vpop.f32.mrb[21].mxu1 }
 0x72e   :  { %v13157_v21 = vadd.f32 %v13156_v30, %v13155_v20  ;;  %v13158_v24 = vpop.f32.mrb[22].mxu1 }
 0x72f   :  { %v13159_v28 = vpop.f32.mrb[23].mxu1 }
 0x730   :  { %v9903_v29 = vadd.f32 %v13157_v21, %v9863_v47 }
 0x768   :  { %v9942_v40 = vpop.f32.mrb[24].mxu1 }
 0x769   :  { %v19992_v44 = vadd.f32 %v9942_v40, %v9903_v29  ;;  %v9944_v23 = vpop.f32.mrb[25].mxu1 }
 0x76a   :  { %v9945_v48 = vpop.f32.mrb[26].mxu1 }
 0x76b   :  { %v9954_v55 = vmax.f32 %v19992_v44, 0.0  ;;  %v9946_v53 = vpop.f32.mrb[27].mxu1 }
 0x7c8   :  { %v9781_v63 = vpop.f32.mrb[12].mxu0 }
 0x7c9   :  { %v20000_v36 = vadd.f32 %v9781_v63, %v7005_v56  ;;  %v9783_v38 = vpop.f32.mrb[13].mxu0 }
 0x7ca   :  { %v20002_v50 = vadd.f32 %v9783_v38, %v7009_v5  ;;  %v9785_v34 = vpop.f32.mrb[14].mxu0 }
 0x7cb   :  { %v9952_v52 = vmax.f32 %v20000_v36, 0.0  ;;  %v9786_v62 = vpop.f32.mrb[15].mxu0 }
 0x7cc   :  { %v9953_v45 = vmax.f32 %v20002_v50, 0.0 }
 0x7cd   :  { %14026 = dma.done.wait [#allocation7 + $0x2], 32000 }
 0x7ce   :  { %14027 = vsyncadd [#allocation7 + $0x2], 4294935296  ;;  %v20009_v18 = vpack.c.bf16 %v9949_v54, %v9949_v54  ;;  %v9960_v25 = vld [vmem:[#allocation4 + $0x8] sm:$0xff]  ;;  %v9962_v57 = vld [vmem:[#allocation4 + $0x18] sm:$0xff]  ;;  %vm14034_vm3 = vmmov 0   ;;  %vm10243_vm4 = vcmask 261120  }
 0x7cf   :  { %v9959_v43 = vld [vmem:[#allocation4] sm:$0xff]  ;;  %10247 = vmatprep.subr.bf16.mxu1 %v9960_v25  ;;  %10411 = vmatprep.subr.bf16.mxu0 %v9962_v57  ;;  %v9961_v60 = vld [vmem:[#allocation4 + $0x10] sm:$0xff]  ;;  %v9964_v0 = vld [vmem:[#allocation4 + $0x28] sm:$0xff] }
 0x7d0   :  { %10279 = vmatprep.mubr.bf16.mxu1 %v20009_v18  ;;  %10443 = vmatprep.mubr.bf16.mxu0 %v20009_v18  ;;  %v9965_v6 = vld [vmem:[#allocation4 + $0x30] sm:$0xff]  ;;  %v9967_v31 = vld [vmem:[#allocation4 + $0x40] sm:$0xff]  ;;  %v9966_v35 = vld [vmem:[#allocation4 + $0x38] sm:$0xff] }
 0x7d1   :  { %10248 = vmatpush1.bf16.msra.mxu1 %v9959_v43  ;;  %10412 = vmatpush1.bf16.msra.mxu0 %v9961_v60  ;;  %v9970_v54 = vld [vmem:[#allocation4 + $0x58] sm:$0xff]  ;;  %v9972_v27 = vld [vmem:[#allocation4 + $0x68] sm:$0xff]  ;;  %v9969_v3 = vld [vmem:[#allocation4 + $0x50] sm:$0xff] }
 0x7d2   :  { %10249 = vmatprep.subr.bf16.mxu1 %v9965_v6  ;;  %10413 = vmatprep.subr.bf16.mxu0 %v9967_v31  ;;  %v9971_v14 = vld [vmem:[#allocation4 + $0x60] sm:$0xff]  ;;  %v9977_v19 = vld [vmem:[#allocation4 + $0x90] sm:$0xff]  ;;  %v9974_v15 = vld [vmem:[#allocation4 + $0x78] sm:$0xff] }
 0x7d3   :  { %v9975_v10 = vld [vmem:[#allocation4 + $0x80] sm:$0xff]  ;;  %v9976_v22 = vld [vmem:[#allocation4 + $0x88] sm:$0xff]  ;;  %v9982_v42 = vld [vmem:[#allocation4 + $0xb8] sm:$0xff] }
 0x7d4   :  { %v9980_v39 = vld [vmem:[#allocation4 + $0xa8] sm:$0xff]  ;;  %v9979_v26 = vld [vmem:[#allocation4 + $0xa0] sm:$0xff]  ;;  %v9981_v7 = vld [vmem:[#allocation4 + $0xb0] sm:$0xff] }
 0x7d5   :  { %10250 = vmatpush1.bf16.msra.mxu1 %v9964_v0  ;;  %10414 = vmatpush1.bf16.msra.mxu0 %v9966_v35  ;;  %v9985_v1 = vld [vmem:[#allocation4 + $0xd0] sm:$0xff]  ;;  %v9987_v4 = vld [vmem:[#allocation4 + $0xe0] sm:$0xff]  ;;  %v9984_v12 = vld [vmem:[#allocation4 + $0xc8] sm:$0xff] }
 0x7d6   :  { %10251 = vmatprep.subr.bf16.mxu1 %v9970_v54  ;;  %10415 = vmatprep.subr.bf16.mxu0 %v9972_v27  ;;  %v9986_v37 = vld [vmem:[#allocation4 + $0xd8] sm:$0xff]  ;;  %v9992_v11 = vld [vmem:[#allocation4 + $0x108] sm:$0xff]  ;;  %v9989_v2 = vld [vmem:[#allocation4 + $0xf0] sm:$0xff] }
 0x7d7   :  { %v9990_v33 = vld [vmem:[#allocation4 + $0xf8] sm:$0xff]  ;;  %v9991_v46 = vld [vmem:[#allocation4 + $0x100] sm:$0xff]  ;;  %v9997_v20 = vld [vmem:[#allocation4 + $0x130] sm:$0xff] }
 0x7d8   :  { %v9995_v47 = vld [vmem:[#allocation4 + $0x120] sm:$0xff]  ;;  %v9994_v30 = vld [vmem:[#allocation4 + $0x118] sm:$0xff]  ;;  %v9996_v21 = vld [vmem:[#allocation4 + $0x128] sm:$0xff] }
 0x7d9   :  { %10252 = vmatpush1.bf16.msra.mxu1 %v9969_v3  ;;  %10416 = vmatpush1.bf16.msra.mxu0 %v9971_v14  ;;  %v10000_v24 = vld [vmem:[#allocation4 + $0x148] sm:$0xff]  ;;  %v10002_v28 = vld [vmem:[#allocation4 + $0x158] sm:$0xff]  ;;  %v9999_v29 = vld [vmem:[#allocation4 + $0x140] sm:$0xff] }
 0x7da   :  { %10253 = vmatprep.subr.bf16.mxu1 %v9975_v10  ;;  %10417 = vmatprep.subr.bf16.mxu0 %v9977_v19  ;;  %v10001_v40 = vld [vmem:[#allocation4 + $0x150] sm:$0xff]  ;;  %v10007_v48 = vld [vmem:[#allocation4 + $0x180] sm:$0xff]  ;;  %v10004_v53 = vld [vmem:[#allocation4 + $0x168] sm:$0xff] }
 0x7db   :  { %v10005_v23 = vld [vmem:[#allocation4 + $0x170] sm:$0xff]  ;;  %v10006_v56 = vld [vmem:[#allocation4 + $0x178] sm:$0xff]  ;;  %v10012_v63 = vld [vmem:[#allocation4 + $0x1a8] sm:$0xff] }
 0x7dc   :  { %v10010_v5 = vld [vmem:[#allocation4 + $0x198] sm:$0xff]  ;;  %v10009_v38 = vld [vmem:[#allocation4 + $0x190] sm:$0xff]  ;;  %v10011_v34 = vld [vmem:[#allocation4 + $0x1a0] sm:$0xff] }
 0x7dd   :  { %10254 = vmatpush1.bf16.msra.mxu1 %v9974_v15  ;;  %10418 = vmatpush1.bf16.msra.mxu0 %v9976_v22  ;;  %v10015_v62 = vld [vmem:[#allocation4 + $0x1c0] sm:$0xff]  ;;  %v10017_v25 = vld [vmem:[#allocation4 + $0x1d0] sm:$0xff]  ;;  %v10014_v57 = vld [vmem:[#allocation4 + $0x1b8] sm:$0xff] }
 0x7de   :  { %10255 = vmatprep.subr.bf16.mxu1 %v9980_v39  ;;  %10419 = vmatprep.subr.bf16.mxu0 %v9982_v42  ;;  %v10016_v43 = vld [vmem:[#allocation4 + $0x1c8] sm:$0xff]  ;;  %v10022_v6 = vld [vmem:[#allocation4 + $0x1f8] sm:$0xff]  ;;  %v10019_v31 = vld [vmem:[#allocation4 + $0x1e0] sm:$0xff] }
 0x7df   :  { %v10020_v60 = vld [vmem:[#allocation4 + $0x1e8] sm:$0xff]  ;;  %v10021_v0 = vld [vmem:[#allocation4 + $0x1f0] sm:$0xff]  ;;  %v10027_v54 = vld [vmem:[#allocation4 + $0x220] sm:$0xff] }
 0x7e0   :  { %v10025_v35 = vld [vmem:[#allocation4 + $0x210] sm:$0xff]  ;;  %v10024_v27 = vld [vmem:[#allocation4 + $0x208] sm:$0xff]  ;;  %v10026_v3 = vld [vmem:[#allocation4 + $0x218] sm:$0xff] }
 0x7e1   :  { %10256 = vmatpush1.bf16.msra.mxu1 %v9979_v26  ;;  %10420 = vmatpush1.bf16.msra.mxu0 %v9981_v7  ;;  %v10030_v14 = vld [vmem:[#allocation4 + $0x238] sm:$0xff]  ;;  %v10032_v10 = vld [vmem:[#allocation4 + $0x248] sm:$0xff]  ;;  %v10029_v19 = vld [vmem:[#allocation4 + $0x230] sm:$0xff] }
 0x7e2   :  { %10257 = vmatprep.subr.bf16.mxu1 %v9985_v1  ;;  %10421 = vmatprep.subr.bf16.mxu0 %v9987_v4  ;;  %v10031_v15 = vld [vmem:[#allocation4 + $0x240] sm:$0xff]  ;;  %v10037_v39 = vld [vmem:[#allocation4 + $0x270] sm:$0xff]  ;;  %v10034_v42 = vld [vmem:[#allocation4 + $0x258] sm:$0xff]  ;;  %v20016_v4 = vpack.c.bf16 %v9948_v51, %v9948_v51 }
 0x7e3   :  { %v10035_v22 = vld [vmem:[#allocation4 + $0x260] sm:$0xff]  ;;  %v10036_v26 = vld [vmem:[#allocation4 + $0x268] sm:$0xff]  ;;  %v10042_v1 = vld [vmem:[#allocation4 + $0x298] sm:$0xff] }
 0x7e4   :  { %v10040_v7 = vld [vmem:[#allocation4 + $0x288] sm:$0xff]  ;;  %v10046_v51 = vld [vmem:[#allocation4 + $0x2b8] sm:$0xff]  ;;  %v10049_v49 = vld [vmem:[#allocation4 + $0x2d0] sm:$0xff] }
 0x7e5   :  { %10258 = vmatpush1.bf16.msra.mxu1 %v9984_v12  ;;  %10422 = vmatpush1.bf16.msra.mxu0 %v9986_v37  ;;  %v10039_v12 = vld [vmem:[#allocation4 + $0x280] sm:$0xff]  ;;  %v10041_v37 = vld [vmem:[#allocation4 + $0x290] sm:$0xff]  ;;  %v10044_v13 = vld [vmem:[#allocation4 + $0x2a8] sm:$0xff] }
 0x7e6   :  { %10259 = vmatprep.subr.bf16.mxu1 %v9990_v33  ;;  %10423 = vmatprep.subr.bf16.mxu0 %v9992_v11  ;;  %v10045_v33 = vld [vmem:[#allocation4 + $0x2b0] sm:$0xff]  ;;  %v10047_v11 = vld [vmem:[#allocation4 + $0x2c0] sm:$0xff]  ;;  %v10124_v41 = vld [vmem:[#allocation4 + $0x528] sm:$0xff] }
 0x7e7   :  { %v10129_v50 = vld [vmem:[#allocation4 + $0x550] sm:$0xff]  ;;  %v10204_v36 = vld [vmem:[#allocation4 + $0x7a8] sm:$0xff] }
 0x7e8   :  { %v9968_v44 = vld [vmem:[#allocation4 + $0x48] sm:$0xff] }
 0x7e9   :  { %10260 = vmatpush1.bf16.msra.mxu1 %v9989_v2  ;;  %10424 = vmatpush1.bf16.msra.mxu0 %v9991_v46  ;;  %v20021_v2 = vpack.c.bf16 %v9951_v32, %v9951_v32  ;;  %v10050_v46 = vld [vmem:[#allocation4 + $0x2d8] sm:$0xff]  ;;  %v10051_v32 = vld [vmem:[#allocation4 + $0x2e0] sm:$0xff] }
 0x7ea   :  { %10261 = vmatprep.subr.bf16.mxu1 %v9995_v47  ;;  %10425 = vmatprep.subr.bf16.mxu0 %v9997_v20  ;;  %v10052_v47 = vld [vmem:[#allocation4 + $0x2e8] sm:$0xff]  ;;  %v10055_v20 = vld [vmem:[#allocation4 + $0x300] sm:$0xff] }
 0x7ed   :  { %10262 = vmatpush1.bf16.msra.mxu1 %v9994_v30  ;;  %10426 = vmatpush1.bf16.msra.mxu0 %v9996_v21  ;;  %v10057_v30 = vld [vmem:[#allocation4 + $0x310] sm:$0xff]  ;;  %v10054_v21 = vld [vmem:[#allocation4 + $0x2f8] sm:$0xff] }
 0x7ee   :  { %10263 = vmatprep.subr.bf16.mxu1 %v10000_v24  ;;  %10427 = vmatprep.subr.bf16.mxu0 %v10002_v28  ;;  %v10056_v24 = vld [vmem:[#allocation4 + $0x308] sm:$0xff] }
 0x7ef   :  { %v10060_v28 = vld [vmem:[#allocation4 + $0x328] sm:$0xff] }
 0x7f1   :  { %10264 = vmatpush1.bf16.msra.mxu1 %v9999_v29  ;;  %10428 = vmatpush1.bf16.msra.mxu0 %v10001_v40  ;;  %v10062_v29 = vld [vmem:[#allocation4 + $0x338] sm:$0xff]  ;;  %v10059_v40 = vld [vmem:[#allocation4 + $0x320] sm:$0xff] }
 0x7f2   :  { %10265 = vmatprep.subr.bf16.mxu1 %v10005_v23  ;;  %10429 = vmatprep.subr.bf16.mxu0 %v10007_v48  ;;  %v10061_v23 = vld [vmem:[#allocation4 + $0x330] sm:$0xff] }
 0x7f3   :  { %v10065_v48 = vld [vmem:[#allocation4 + $0x350] sm:$0xff] }
 0x7f5   :  { %10266 = vmatpush1.bf16.msra.mxu1 %v10004_v53  ;;  %10430 = vmatpush1.bf16.msra.mxu0 %v10006_v56  ;;  %v10067_v53 = vld [vmem:[#allocation4 + $0x360] sm:$0xff]  ;;  %v10064_v56 = vld [vmem:[#allocation4 + $0x348] sm:$0xff] }
 0x7f6   :  { %10267 = vmatprep.subr.bf16.mxu1 %v10010_v5  ;;  %10431 = vmatprep.subr.bf16.mxu0 %v10012_v63  ;;  %v10066_v5 = vld [vmem:[#allocation4 + $0x358] sm:$0xff] }
 0x7f7   :  { %v10070_v63 = vld [vmem:[#allocation4 + $0x378] sm:$0xff] }
 0x7f9   :  { %10268 = vmatpush1.bf16.msra.mxu1 %v10009_v38  ;;  %10432 = vmatpush1.bf16.msra.mxu0 %v10011_v34  ;;  %v10072_v38 = vld [vmem:[#allocation4 + $0x388] sm:$0xff]  ;;  %v10069_v34 = vld [vmem:[#allocation4 + $0x370] sm:$0xff] }
 0x7fa   :  { %10269 = vmatprep.subr.bf16.mxu1 %v10015_v62  ;;  %10433 = vmatprep.subr.bf16.mxu0 %v10017_v25  ;;  %v10071_v62 = vld [vmem:[#allocation4 + $0x380] sm:$0xff] }
 0x7fb   :  { %v10075_v25 = vld [vmem:[#allocation4 + $0x3a0] sm:$0xff] }
 0x7fd   :  { %10270 = vmatpush1.bf16.msra.mxu1 %v10014_v57  ;;  %10434 = vmatpush1.bf16.msra.mxu0 %v10016_v43  ;;  %v10077_v57 = vld [vmem:[#allocation4 + $0x3b0] sm:$0xff]  ;;  %v10074_v43 = vld [vmem:[#allocation4 + $0x398] sm:$0xff] }
 0x7fe   :  { %10271 = vmatprep.subr.bf16.mxu1 %v10020_v60  ;;  %10435 = vmatprep.subr.bf16.mxu0 %v10022_v6  ;;  %v10076_v60 = vld [vmem:[#allocation4 + $0x3a8] sm:$0xff] }
 0x7ff   :  { %v10080_v6 = vld [vmem:[#allocation4 + $0x3c8] sm:$0xff] }
 0x801   :  { %10272 = vmatpush1.bf16.msra.mxu1 %v10019_v31  ;;  %10436 = vmatpush1.bf16.msra.mxu0 %v10021_v0  ;;  %v10082_v31 = vld [vmem:[#allocation4 + $0x3d8] sm:$0xff]  ;;  %v10079_v0 = vld [vmem:[#allocation4 + $0x3c0] sm:$0xff] }
 0x802   :  { %10273 = vmatprep.subr.bf16.mxu1 %v10025_v35  ;;  %10437 = vmatprep.subr.bf16.mxu0 %v10027_v54  ;;  %v10081_v35 = vld [vmem:[#allocation4 + $0x3d0] sm:$0xff] }
 0x803   :  { %v10085_v54 = vld [vmem:[#allocation4 + $0x3f0] sm:$0xff] }
 0x805   :  { %10274 = vmatpush1.bf16.msra.mxu1 %v10024_v27  ;;  %10438 = vmatpush1.bf16.msra.mxu0 %v10026_v3  ;;  %v10087_v27 = vld [vmem:[#allocation4 + $0x400] sm:$0xff]  ;;  %v10084_v3 = vld [vmem:[#allocation4 + $0x3e8] sm:$0xff] }
 0x806   :  { %10275 = vmatprep.subr.bf16.mxu1 %v10030_v14  ;;  %10439 = vmatprep.subr.bf16.mxu0 %v10032_v10  ;;  %v10086_v14 = vld [vmem:[#allocation4 + $0x3f8] sm:$0xff] }
 0x807   :  { %v10090_v10 = vld [vmem:[#allocation4 + $0x418] sm:$0xff] }
 0x809   :  { %10276 = vmatpush1.bf16.msra.mxu1 %v10029_v19  ;;  %10440 = vmatpush1.bf16.msra.mxu0 %v10031_v15  ;;  %v10092_v19 = vld [vmem:[#allocation4 + $0x428] sm:$0xff]  ;;  %v10089_v15 = vld [vmem:[#allocation4 + $0x410] sm:$0xff] }
 0x80a   :  { %10277 = vmatprep.subr.bf16.mxu1 %v10035_v22  ;;  %10441 = vmatprep.subr.bf16.mxu0 %v10037_v39  ;;  %v10091_v22 = vld [vmem:[#allocation4 + $0x420] sm:$0xff] }
 0x80b   :  { %v10095_v39 = vld [vmem:[#allocation4 + $0x440] sm:$0xff] }
 0x80d   :  { %10278 = vmatpush1.bf16.msra.mxu1 %v10034_v42  ;;  %10442 = vmatpush1.bf16.msra.mxu0 %v10036_v26  ;;  %v10097_v42 = vld [vmem:[#allocation4 + $0x450] sm:$0xff]  ;;  %v10094_v26 = vld [vmem:[#allocation4 + $0x438] sm:$0xff] }
 0x80e   :  { %10288 = vmatprep.subr.bf16.mxu1 %v10040_v7  ;;  %10452 = vmatprep.subr.bf16.mxu0 %v10042_v1  ;;  %v10096_v7 = vld [vmem:[#allocation4 + $0x448] sm:$0xff] }
 0x80f   :  { %v10100_v1 = vld [vmem:[#allocation4 + $0x468] sm:$0xff] }
 0x810   :  { %10280 = vmatmul.mubr.bf16.vlgmr.msra.gmra.mrb[28].mxu1 %v20016_v4  ;;  %10444 = vmatmul.mubr.bf16.vlgmr.msra.gmra.mrb[16].mxu0 %v20016_v4 }
 0x811   :  { %10289 = vmatpush1.bf16.msra.mxu1 %v10039_v12  ;;  %10453 = vmatpush1.bf16.msra.mxu0 %v10041_v37  ;;  %v10102_v12 = vld [vmem:[#allocation4 + $0x478] sm:$0xff]  ;;  %v10099_v37 = vld [vmem:[#allocation4 + $0x460] sm:$0xff] }
 0x812   :  { %10290 = vmatprep.subr.bf16.mxu1 %v10045_v33  ;;  %10454 = vmatprep.subr.bf16.mxu0 %v10047_v11  ;;  %v10101_v33 = vld [vmem:[#allocation4 + $0x470] sm:$0xff] }
 0x813   :  { %10320 = vmatprep.mubr.bf16.mxu1 %v20021_v2  ;;  %10484 = vmatprep.mubr.bf16.mxu0 %v20021_v2  ;;  %v10105_v11 = vld [vmem:[#allocation4 + $0x490] sm:$0xff] }
 0x815   :  { %10291 = vmatpush1.bf16.msra.mxu1 %v10044_v13  ;;  %10455 = vmatpush1.bf16.msra.mxu0 %v10046_v51  ;;  %v10107_v13 = vld [vmem:[#allocation4 + $0x4a0] sm:$0xff]  ;;  %v10104_v51 = vld [vmem:[#allocation4 + $0x488] sm:$0xff] }
 0x816   :  { %10292 = vmatprep.subr.bf16.mxu1 %v10050_v46  ;;  %10456 = vmatprep.subr.bf16.mxu0 %v10052_v47  ;;  %v10106_v46 = vld [vmem:[#allocation4 + $0x498] sm:$0xff] }
 0x817   :  { %v10110_v47 = vld [vmem:[#allocation4 + $0x4b8] sm:$0xff] }
 0x819   :  { %10293 = vmatpush1.bf16.msra.mxu1 %v10049_v49  ;;  %10457 = vmatpush1.bf16.msra.mxu0 %v10051_v32  ;;  %v10112_v49 = vld [vmem:[#allocation4 + $0x4c8] sm:$0xff]  ;;  %v10109_v32 = vld [vmem:[#allocation4 + $0x4b0] sm:$0xff] }
 0x81a   :  { %10294 = vmatprep.subr.bf16.mxu1 %v10055_v20  ;;  %10458 = vmatprep.subr.bf16.mxu0 %v10057_v30  ;;  %v10111_v20 = vld [vmem:[#allocation4 + $0x4c0] sm:$0xff] }
 0x81b   :  { %v10115_v30 = vld [vmem:[#allocation4 + $0x4e0] sm:$0xff] }
 0x81d   :  { %10295 = vmatpush1.bf16.msra.mxu1 %v10054_v21  ;;  %10459 = vmatpush1.bf16.msra.mxu0 %v10056_v24  ;;  %v10117_v21 = vld [vmem:[#allocation4 + $0x4f0] sm:$0xff]  ;;  %v10114_v24 = vld [vmem:[#allocation4 + $0x4d8] sm:$0xff] }
 0x81e   :  { %10296 = vmatprep.subr.bf16.mxu1 %v10060_v28  ;;  %10460 = vmatprep.subr.bf16.mxu0 %v10062_v29  ;;  %v10116_v28 = vld [vmem:[#allocation4 + $0x4e8] sm:$0xff] }
 0x81f   :  { %v10120_v29 = vld [vmem:[#allocation4 + $0x508] sm:$0xff] }
 0x821   :  { %10297 = vmatpush1.bf16.msra.mxu1 %v10059_v40  ;;  %10461 = vmatpush1.bf16.msra.mxu0 %v10061_v23  ;;  %v10122_v40 = vld [vmem:[#allocation4 + $0x518] sm:$0xff]  ;;  %v20030_v23 = vpack.c.bf16 %v9950_v58, %v9950_v58 }
 0x822   :  { %10298 = vmatprep.subr.bf16.mxu1 %v10065_v48  ;;  %10462 = vmatprep.subr.bf16.mxu0 %v10067_v53  ;;  %v10119_v48 = vld [vmem:[#allocation4 + $0x500] sm:$0xff]  ;;  %v10121_v53 = vld [vmem:[#allocation4 + $0x510] sm:$0xff]  ;;  %v10126_v58 = vld [vmem:[#allocation4 + $0x538] sm:$0xff] }
 0x825   :  { %10299 = vmatpush1.bf16.msra.mxu1 %v10064_v56  ;;  %10463 = vmatpush1.bf16.msra.mxu0 %v10066_v5  ;;  %v10125_v56 = vld [vmem:[#allocation4 + $0x530] sm:$0xff]  ;;  %v10127_v5 = vld [vmem:[#allocation4 + $0x540] sm:$0xff] }
 0x826   :  { %10300 = vmatprep.subr.bf16.mxu1 %v10070_v63  ;;  %10464 = vmatprep.subr.bf16.mxu0 %v10072_v38  ;;  %v20035_v63 = vpack.c.bf16 %v9953_v45, %v9953_v45  ;;  %v10130_v38 = vld [vmem:[#allocation4 + $0x558] sm:$0xff]  ;;  %v10131_v45 = vld [vmem:[#allocation4 + $0x560] sm:$0xff] }
 0x829   :  { %10301 = vmatpush1.bf16.msra.mxu1 %v10069_v34  ;;  %10465 = vmatpush1.bf16.msra.mxu0 %v10071_v62  ;;  %v10132_v34 = vld [vmem:[#allocation4 + $0x568] sm:$0xff]  ;;  %v10135_v62 = vld [vmem:[#allocation4 + $0x580] sm:$0xff] }
 0x82a   :  { %10302 = vmatprep.subr.bf16.mxu1 %v10075_v25  ;;  %10466 = vmatprep.subr.bf16.mxu0 %v10077_v57  ;;  %v10137_v25 = vld [vmem:[#allocation4 + $0x590] sm:$0xff]  ;;  %v10134_v57 = vld [vmem:[#allocation4 + $0x578] sm:$0xff] }
 0x82d   :  { %10303 = vmatpush1.bf16.msra.mxu1 %v10074_v43  ;;  %10467 = vmatpush1.bf16.msra.mxu0 %v10076_v60  ;;  %v10136_v43 = vld [vmem:[#allocation4 + $0x588] sm:$0xff] }
 0x82e   :  { %10304 = vmatprep.subr.bf16.mxu1 %v10080_v6  ;;  %10468 = vmatprep.subr.bf16.mxu0 %v10082_v31  ;;  %v10140_v60 = vld [vmem:[#allocation4 + $0x5a8] sm:$0xff]  ;;  %v10142_v6 = vld [vmem:[#allocation4 + $0x5b8] sm:$0xff]  ;;  %v10139_v31 = vld [vmem:[#allocation4 + $0x5a0] sm:$0xff] }
 0x831   :  { %10305 = vmatpush1.bf16.msra.mxu1 %v10079_v0  ;;  %10469 = vmatpush1.bf16.msra.mxu0 %v10081_v35  ;;  %v10141_v0 = vld [vmem:[#allocation4 + $0x5b0] sm:$0xff] }
 0x832   :  { %10306 = vmatprep.subr.bf16.mxu1 %v10085_v54  ;;  %10470 = vmatprep.subr.bf16.mxu0 %v10087_v27  ;;  %v10145_v35 = vld [vmem:[#allocation4 + $0x5d0] sm:$0xff]  ;;  %v10147_v54 = vld [vmem:[#allocation4 + $0x5e0] sm:$0xff]  ;;  %v10144_v27 = vld [vmem:[#allocation4 + $0x5c8] sm:$0xff] }
 0x835   :  { %10307 = vmatpush1.bf16.msra.mxu1 %v10084_v3  ;;  %10471 = vmatpush1.bf16.msra.mxu0 %v10086_v14  ;;  %v10146_v3 = vld [vmem:[#allocation4 + $0x5d8] sm:$0xff] }
 0x836   :  { %10308 = vmatprep.subr.bf16.mxu1 %v10090_v10  ;;  %10472 = vmatprep.subr.bf16.mxu0 %v10092_v19  ;;  %v10150_v14 = vld [vmem:[#allocation4 + $0x5f8] sm:$0xff]  ;;  %v10152_v10 = vld [vmem:[#allocation4 + $0x608] sm:$0xff]  ;;  %v10149_v19 = vld [vmem:[#allocation4 + $0x5f0] sm:$0xff] }
 0x839   :  { %10309 = vmatpush1.bf16.msra.mxu1 %v10089_v15  ;;  %10473 = vmatpush1.bf16.msra.mxu0 %v10091_v22  ;;  %v10151_v15 = vld [vmem:[#allocation4 + $0x600] sm:$0xff] }
 0x83a   :  { %10310 = vmatprep.subr.bf16.mxu1 %v10095_v39  ;;  %10474 = vmatprep.subr.bf16.mxu0 %v10097_v42  ;;  %v10155_v22 = vld [vmem:[#allocation4 + $0x620] sm:$0xff]  ;;  %v10157_v39 = vld [vmem:[#allocation4 + $0x630] sm:$0xff]  ;;  %v10154_v42 = vld [vmem:[#allocation4 + $0x618] sm:$0xff] }
 0x83d   :  { %10311 = vmatpush1.bf16.msra.mxu1 %v10094_v26  ;;  %10475 = vmatpush1.bf16.msra.mxu0 %v10096_v7  ;;  %v10156_v26 = vld [vmem:[#allocation4 + $0x628] sm:$0xff] }
 0x83e   :  { %10312 = vmatprep.subr.bf16.mxu1 %v10100_v1  ;;  %10476 = vmatprep.subr.bf16.mxu0 %v10102_v12  ;;  %v10160_v7 = vld [vmem:[#allocation4 + $0x648] sm:$0xff]  ;;  %v10162_v1 = vld [vmem:[#allocation4 + $0x658] sm:$0xff]  ;;  %v10159_v12 = vld [vmem:[#allocation4 + $0x640] sm:$0xff] }
 0x841   :  { %10313 = vmatpush1.bf16.msra.mxu1 %v10099_v37  ;;  %10477 = vmatpush1.bf16.msra.mxu0 %v10101_v33  ;;  %v10161_v37 = vld [vmem:[#allocation4 + $0x650] sm:$0xff] }
 0x842   :  { %10314 = vmatprep.subr.bf16.mxu1 %v10105_v11  ;;  %10478 = vmatprep.subr.bf16.mxu0 %v10107_v13  ;;  %v10165_v33 = vld [vmem:[#allocation4 + $0x670] sm:$0xff]  ;;  %v10167_v11 = vld [vmem:[#allocation4 + $0x680] sm:$0xff]  ;;  %v10164_v13 = vld [vmem:[#allocation4 + $0x668] sm:$0xff] }
 0x845   :  { %10315 = vmatpush1.bf16.msra.mxu1 %v10104_v51  ;;  %10479 = vmatpush1.bf16.msra.mxu0 %v10106_v46  ;;  %v10166_v51 = vld [vmem:[#allocation4 + $0x678] sm:$0xff] }
 0x846   :  { %10316 = vmatprep.subr.bf16.mxu1 %v10110_v47  ;;  %10480 = vmatprep.subr.bf16.mxu0 %v10112_v49  ;;  %v10170_v46 = vld [vmem:[#allocation4 + $0x698] sm:$0xff]  ;;  %v10172_v47 = vld [vmem:[#allocation4 + $0x6a8] sm:$0xff]  ;;  %v10169_v49 = vld [vmem:[#allocation4 + $0x690] sm:$0xff] }
 0x849   :  { %10317 = vmatpush1.bf16.msra.mxu1 %v10109_v32  ;;  %10481 = vmatpush1.bf16.msra.mxu0 %v10111_v20  ;;  %v10171_v32 = vld [vmem:[#allocation4 + $0x6a0] sm:$0xff] }
 0x84a   :  { %10318 = vmatprep.subr.bf16.mxu1 %v10115_v30  ;;  %10482 = vmatprep.subr.bf16.mxu0 %v10117_v21  ;;  %v10175_v20 = vld [vmem:[#allocation4 + $0x6c0] sm:$0xff]  ;;  %v10177_v30 = vld [vmem:[#allocation4 + $0x6d0] sm:$0xff]  ;;  %v10174_v21 = vld [vmem:[#allocation4 + $0x6b8] sm:$0xff] }
 0x84d   :  { %10319 = vmatpush1.bf16.msra.mxu1 %v10114_v24  ;;  %10483 = vmatpush1.bf16.msra.mxu0 %v10116_v28  ;;  %v10176_v24 = vld [vmem:[#allocation4 + $0x6c8] sm:$0xff] }
 0x84e   :  { %10329 = vmatprep.subr.bf16.mxu1 %v10120_v29  ;;  %10493 = vmatprep.subr.bf16.mxu0 %v10122_v40  ;;  %v10180_v28 = vld [vmem:[#allocation4 + $0x6e8] sm:$0xff]  ;;  %v10182_v29 = vld [vmem:[#allocation4 + $0x6f8] sm:$0xff]  ;;  %v10179_v40 = vld [vmem:[#allocation4 + $0x6e0] sm:$0xff] }
 0x850   :  { %10321 = vmatmul.mubr.bf16.vlgmr.msra.gmra.mrb[28].mxu1 %v20030_v23  ;;  %10485 = vmatmul.mubr.bf16.vlgmr.msra.gmra.mrb[16].mxu0 %v20030_v23 }
 0x851   :  { %10330 = vmatpush1.bf16.msra.mxu1 %v10119_v48  ;;  %10494 = vmatpush1.bf16.msra.mxu0 %v10121_v53  ;;  %v10181_v48 = vld [vmem:[#allocation4 + $0x6f0] sm:$0xff] }
 0x852   :  { %10331 = vmatprep.subr.bf16.mxu1 %v10125_v56  ;;  %10495 = vmatprep.subr.bf16.mxu0 %v10127_v5  ;;  %v10185_v53 = vld [vmem:[#allocation4 + $0x710] sm:$0xff]  ;;  %v10187_v56 = vld [vmem:[#allocation4 + $0x720] sm:$0xff]  ;;  %v10184_v5 = vld [vmem:[#allocation4 + $0x708] sm:$0xff] }
 0x853   :  { %10361 = vmatprep.mubr.bf16.mxu1 %v20035_v63  ;;  %10525 = vmatprep.mubr.bf16.mxu0 %v20035_v63 }
 0x855   :  { %10332 = vmatpush1.bf16.msra.mxu1 %v10124_v41  ;;  %10496 = vmatpush1.bf16.msra.mxu0 %v10126_v58  ;;  %v10186_v41 = vld [vmem:[#allocation4 + $0x718] sm:$0xff] }
 0x856   :  { %10333 = vmatprep.subr.bf16.mxu1 %v10130_v38  ;;  %10497 = vmatprep.subr.bf16.mxu0 %v10132_v34  ;;  %v10190_v58 = vld [vmem:[#allocation4 + $0x738] sm:$0xff]  ;;  %v10192_v38 = vld [vmem:[#allocation4 + $0x748] sm:$0xff]  ;;  %v10189_v34 = vld [vmem:[#allocation4 + $0x730] sm:$0xff] }
 0x859   :  { %10334 = vmatpush1.bf16.msra.mxu1 %v10129_v50  ;;  %10498 = vmatpush1.bf16.msra.mxu0 %v10131_v45  ;;  %v10191_v50 = vld [vmem:[#allocation4 + $0x740] sm:$0xff] }
 0x85a   :  { %10335 = vmatprep.subr.bf16.mxu1 %v10135_v62  ;;  %10499 = vmatprep.subr.bf16.mxu0 %v10137_v25  ;;  %v10195_v45 = vld [vmem:[#allocation4 + $0x760] sm:$0xff]  ;;  %v10197_v62 = vld [vmem:[#allocation4 + $0x770] sm:$0xff]  ;;  %v10194_v25 = vld [vmem:[#allocation4 + $0x758] sm:$0xff] }
 0x85d   :  { %10336 = vmatpush1.bf16.msra.mxu1 %v10134_v57  ;;  %10500 = vmatpush1.bf16.msra.mxu0 %v10136_v43  ;;  %v10196_v57 = vld [vmem:[#allocation4 + $0x768] sm:$0xff] }
 0x85e   :  { %10337 = vmatprep.subr.bf16.mxu1 %v10140_v60  ;;  %10501 = vmatprep.subr.bf16.mxu0 %v10142_v6  ;;  %v10200_v43 = vld [vmem:[#allocation4 + $0x788] sm:$0xff]  ;;  %v20044_v60 = vpack.c.bf16 %v9952_v52, %v9952_v52  ;;  %v10199_v6 = vld [vmem:[#allocation4 + $0x780] sm:$0xff]  ;;  %v10202_v52 = vld [vmem:[#allocation4 + $0x798] sm:$0xff] }
 0x861   :  { %10338 = vmatpush1.bf16.msra.mxu1 %v10139_v31  ;;  %10502 = vmatpush1.bf16.msra.mxu0 %v10141_v0  ;;  %v14033_v31 = vmov 0.0   ;;  %v10205_v0 = vld [vmem:[#allocation4 + $0x7b0] sm:$0xff] }
 0x862   :  { %10339 = vmatprep.subr.bf16.mxu1 %v10145_v35  ;;  %10503 = vmatprep.subr.bf16.mxu0 %v10147_v54  ;;  %v10203_v35 = vld [vmem:[#allocation4 + $0x7a0] sm:$0xff]  ;;  %v10208_v54 = vld [vmem:[#allocation4 + $0x7c8] sm:$0xff] }
 0x865   :  { %10340 = vmatpush1.bf16.msra.mxu1 %v10144_v27  ;;  %10504 = vmatpush1.bf16.msra.mxu0 %v10146_v3  ;;  %v10216_v27 = vpack.c.bf16 %v9954_v55, %v9954_v55  ;;  %v10201_v3 = vld [vmem:[#allocation4 + $0x790] sm:$0xff] }
 0x866   :  { %10341 = vmatprep.subr.bf16.mxu1 %v10150_v14  ;;  %10505 = vmatprep.subr.bf16.mxu0 %v10152_v10  ;;  %v10207_v14 = vld [vmem:[#allocation4 + $0x7c0] sm:$0xff]  ;;  %v10206_v10 = vld [vmem:[#allocation4 + $0x7b8] sm:$0xff]  ;;  %v10013_v55 = vld [vmem:[#allocation4 + $0x1b0] sm:$0xff] }
 0x869   :  { %10342 = vmatpush1.bf16.msra.mxu1 %v10149_v19  ;;  %10506 = vmatpush1.bf16.msra.mxu0 %v10151_v15  ;;  %v10003_v19 = vld [vmem:[#allocation4 + $0x160] sm:$0xff] }
 0x86a   :  { %10343 = vmatprep.subr.bf16.mxu1 %v10155_v22  ;;  %10507 = vmatprep.subr.bf16.mxu0 %v10157_v39  ;;  %v9963_v15 = vld [vmem:[#allocation4 + $0x20] sm:$0xff]  ;;  %v10008_v22 = vld [vmem:[#allocation4 + $0x188] sm:$0xff]  ;;  %v9973_v39 = vld [vmem:[#allocation4 + $0x70] sm:$0xff] }
 0x86d   :  { %10344 = vmatpush1.bf16.msra.mxu1 %v10154_v42  ;;  %10508 = vmatpush1.bf16.msra.mxu0 %v10156_v26  ;;  %v10018_v42 = vld [vmem:[#allocation4 + $0x1d8] sm:$0xff] }
 0x86e   :  { %10345 = vmatprep.subr.bf16.mxu1 %v10160_v7  ;;  %10509 = vmatprep.subr.bf16.mxu0 %v10162_v1  ;;  %v9978_v26 = vld [vmem:[#allocation4 + $0x98] sm:$0xff]  ;;  %v10023_v7 = vld [vmem:[#allocation4 + $0x200] sm:$0xff] }
 0x86f   :  { %v9983_v1 = vld [vmem:[#allocation4 + $0xc0] sm:$0xff] }
 0x871   :  { %10346 = vmatpush1.bf16.msra.mxu1 %v10159_v12  ;;  %10510 = vmatpush1.bf16.msra.mxu0 %v10161_v37  ;;  %v10028_v12 = vld [vmem:[#allocation4 + $0x228] sm:$0xff] }
 0x872   :  { %10347 = vmatprep.subr.bf16.mxu1 %v10165_v33  ;;  %10511 = vmatprep.subr.bf16.mxu0 %v10167_v11  ;;  %v9988_v37 = vld [vmem:[#allocation4 + $0xe8] sm:$0xff]  ;;  %v10033_v33 = vld [vmem:[#allocation4 + $0x250] sm:$0xff]  ;;  %v10038_v11 = vld [vmem:[#allocation4 + $0x278] sm:$0xff] }
 0x875   :  { %10348 = vmatpush1.bf16.msra.mxu1 %v10164_v13  ;;  %10512 = vmatpush1.bf16.msra.mxu0 %v10166_v51  ;;  %v9998_v13 = vld [vmem:[#allocation4 + $0x138] sm:$0xff]  ;;  %v10083_v51 = vld [vmem:[#allocation4 + $0x3e0] sm:$0xff] }
 0x876   :  { %10349 = vmatprep.subr.bf16.mxu1 %v10170_v46  ;;  %10513 = vmatprep.subr.bf16.mxu0 %v10172_v47  ;;  %v10043_v46 = vld [vmem:[#allocation4 + $0x2a0] sm:$0xff]  ;;  %v10088_v47 = vld [vmem:[#allocation4 + $0x408] sm:$0xff] }
 0x879   :  { %10350 = vmatpush1.bf16.msra.mxu1 %v10169_v49  ;;  %10514 = vmatpush1.bf16.msra.mxu0 %v10171_v32  ;;  %v10048_v49 = vld [vmem:[#allocation4 + $0x2c8] sm:$0xff]  ;;  %v10093_v32 = vld [vmem:[#allocation4 + $0x430] sm:$0xff] }
 0x87a   :  { %10351 = vmatprep.subr.bf16.mxu1 %v10175_v20  ;;  %10515 = vmatprep.subr.bf16.mxu0 %v10177_v30  ;;  %v10053_v20 = vld [vmem:[#allocation4 + $0x2f0] sm:$0xff]  ;;  %v10098_v30 = vld [vmem:[#allocation4 + $0x458] sm:$0xff] }
 0x87d   :  { %10352 = vmatpush1.bf16.msra.mxu1 %v10174_v21  ;;  %10516 = vmatpush1.bf16.msra.mxu0 %v10176_v24  ;;  %v10058_v21 = vld [vmem:[#allocation4 + $0x318] sm:$0xff]  ;;  %v10103_v24 = vld [vmem:[#allocation4 + $0x480] sm:$0xff] }
 0x87e   :  { %10353 = vmatprep.subr.bf16.mxu1 %v10180_v28  ;;  %10517 = vmatprep.subr.bf16.mxu0 %v10182_v29  ;;  %v10063_v28 = vld [vmem:[#allocation4 + $0x340] sm:$0xff]  ;;  %v10108_v29 = vld [vmem:[#allocation4 + $0x4a8] sm:$0xff] }
 0x881   :  { %10354 = vmatpush1.bf16.msra.mxu1 %v10179_v40  ;;  %10518 = vmatpush1.bf16.msra.mxu0 %v10181_v48  ;;  %v10113_v40 = vld [vmem:[#allocation4 + $0x4d0] sm:$0xff]  ;;  %v10118_v48 = vld [vmem:[#allocation4 + $0x4f8] sm:$0xff] }
 0x882   :  { %10355 = vmatprep.subr.bf16.mxu1 %v10185_v53  ;;  %10519 = vmatprep.subr.bf16.mxu0 %v10187_v56  ;;  %v10078_v53 = vld [vmem:[#allocation4 + $0x3b8] sm:$0xff]  ;;  %v10163_v56 = vld [vmem:[#allocation4 + $0x660] sm:$0xff] }
 0x885   :  { %10356 = vmatpush1.bf16.msra.mxu1 %v10184_v5  ;;  %10520 = vmatpush1.bf16.msra.mxu0 %v10186_v41  ;;  %v10123_v5 = vld [vmem:[#allocation4 + $0x520] sm:$0xff]  ;;  %v10168_v41 = vld [vmem:[#allocation4 + $0x688] sm:$0xff] }
 0x886   :  { %10357 = vmatprep.subr.bf16.mxu1 %v10190_v58  ;;  %10521 = vmatprep.subr.bf16.mxu0 %v10192_v38  ;;  %v10128_v58 = vld [vmem:[#allocation4 + $0x548] sm:$0xff]  ;;  %v10173_v38 = vld [vmem:[#allocation4 + $0x6b0] sm:$0xff] }
 0x889   :  { %10358 = vmatpush1.bf16.msra.mxu1 %v10189_v34  ;;  %10522 = vmatpush1.bf16.msra.mxu0 %v10191_v50  ;;  %v10133_v34 = vld [vmem:[#allocation4 + $0x570] sm:$0xff]  ;;  %v10178_v50 = vld [vmem:[#allocation4 + $0x6d8] sm:$0xff] }
 0x88a   :  { %10359 = vmatprep.subr.bf16.mxu1 %v10195_v45  ;;  %10523 = vmatprep.subr.bf16.mxu0 %v10197_v62  ;;  %v10138_v45 = vld [vmem:[#allocation4 + $0x598] sm:$0xff]  ;;  %v10183_v62 = vld [vmem:[#allocation4 + $0x700] sm:$0xff] }
 0x88d   :  { %10360 = vmatpush1.bf16.msra.mxu1 %v10194_v25  ;;  %10524 = vmatpush1.bf16.msra.mxu0 %v10196_v57  ;;  %v10143_v25 = vld [vmem:[#allocation4 + $0x5c0] sm:$0xff]  ;;  %v10188_v57 = vld [vmem:[#allocation4 + $0x728] sm:$0xff] }
 0x88e   :  { %10370 = vmatprep.subr.bf16.mxu1 %v10200_v43  ;;  %13252 = vmatprep.subr.bf16.mxu0 %v14033_v31  ;;  %v10193_v43 = vld [vmem:[#allocation4 + $0x750] sm:$0xff] }
 0x890   :  { %10362 = vmatmul.mubr.bf16.vlgmr.msra.gmra.mrb[28].mxu1 %v20044_v60  ;;  %10526 = vmatmul.mubr.bf16.vlgmr.msra.gmra.mrb[16].mxu0 %v20044_v60 }
 0x891   :  { %10371 = vmatpush1.bf16.msra.mxu1 %v10199_v6  ;;  %10402 = vmatprep.mubr.bf16.mxu1 %v14032_v59  ;;  %v10198_v6 = vld [vmem:[#allocation4 + $0x778] sm:$0xff] }
 0x892   :  { %10372 = vmatprep.subr.bf16.mxu1 %v10205_v0  ;;  %13253 = vmatpush3.bf16.msra.mxu0 %v10203_v35 }
 0x893   :  { %13254 = vmatprep.subr.bf16.mxu0 %v14033_v31  ;;  %13256 = vmatprep.mubr.msk.bf16.mxu0 %vm14034_vm3, %v14033_v31  ;;  %v10158_v31 = vld [vmem:[#allocation4 + $0x638] sm:$0xff] }
 0x895   :  { %10373 = vmatpush1.bf16.msra.mxu1 %v10204_v36 }
 0x896   :  { %10534 = vmatprep.subr.bf16.mxu1 %v10202_v52  ;;  %13255 = vmatpush3.bf16.msra.mxu0 %v10208_v54  ;;  %v10209_v54 = vld [vmem:[%s20465_s6] sm:$0x1f] }
 0x899   :  { %13257 = vmatmul.mubr.msk.bf16.vlgmr.msra.gmra.mrb[20].mxu0 %vm10243_vm4, %v10216_v27 }
 0x89c   :  { %12929 = vmatmul.mubr.msk.bf16.vlgmr.msra.gmra.mrb[28].mxu1 %vm10243_vm4, %v10216_v27 }
 0x89d   :  { %10535 = vmatpush1.bf16.msra.mxu1 %v10201_v3  ;;  %10566 = vmatprep.mubr.bf16.mxu1 %v14032_v59 }
 0x89e   :  { %10536 = vmatprep.subr.bf16.mxu1 %v10207_v14  ;;  %v10225_v14 = vrot.slane %v10209_v54, %v19828_v16 }
 0x8a1   :  { %10537 = vmatpush1.bf16.msra.mxu1 %v10206_v10 }
 0x8a2   :  { %13161 = vmatprep.subr.bf16.mxu1 %v10003_v19 }
 0x8a4   :  { %12930 = vmatmul.mubr.msk.bf16.vlgmr.msra.gmra.mrb[32].mxu1 %vm10243_vm4, %v10216_v27  ;;  %v10221_v27 = vrot.slane %v10209_v54, %v19819_v8 }
 0x8a5   :  { %13162 = vmatpush3.bf16.msra.mxu1 %v9963_v15  ;;  %10607 = vmatprep.mubr.bf16.mxu1 %v20009_v18  ;;  %v9993_v18 = vld [vmem:[#allocation4 + $0x110] sm:$0xff] }
 0x8a6   :  { %13163 = vmatprep.subr.bf16.mxu1 %v10008_v22 }
 0x8a9   :  { %13164 = vmatpush3.bf16.msra.mxu1 %v9968_v44 }
 0x8aa   :  { %13165 = vmatprep.subr.bf16.mxu1 %v10013_v55 }
 0x8ad   :  { %13166 = vmatpush3.bf16.msra.mxu1 %v9973_v39 }
 0x8ae   :  { %13167 = vmatprep.subr.bf16.mxu1 %v10018_v42  ;;  %v10229_v42 = vrot.slane %v10209_v54, %v19822_v9 }
 0x8b1   :  { %13168 = vmatpush3.bf16.msra.mxu1 %v9978_v26 }
 0x8b2   :  { %13169 = vmatprep.subr.bf16.mxu1 %v10023_v7 }
 0x8b5   :  { %13170 = vmatpush3.bf16.msra.mxu1 %v9983_v1  ;;  %v10233_v1 = vrot.slane %v10209_v54, %v19831_v17 }
 0x8b6   :  { %13171 = vmatprep.subr.bf16.mxu1 %v10028_v12 }
 0x8b9   :  { %13172 = vmatpush3.bf16.msra.mxu1 %v9988_v37 }
 0x8ba   :  { %13173 = vmatprep.subr.bf16.mxu1 %v10033_v33 }
 0x8bd   :  { %13174 = vmatpush3.bf16.msra.mxu1 %v9993_v18 }
 0x8be   :  { %13175 = vmatprep.subr.bf16.mxu1 %v10038_v11 }
 0x8c1   :  { %13176 = vmatpush3.bf16.msra.mxu1 %v9998_v13 }
 0x8c2   :  { %13183 = vmatprep.subr.bf16.mxu1 %v10083_v51 }
 0x8c4   :  { %10608 = vmatmul.mubr.bf16.vlgmr.msra.gmra.mrb[36].mxu1 %v20016_v4  ;;  %v10068_v4 = vld [vmem:[#allocation4 + $0x368] sm:$0xff] }
 0x8c5   :  { %13184 = vmatpush3.bf16.msra.mxu1 %v10043_v46  ;;  %10647 = vmatprep.mubr.bf16.mxu1 %v20021_v2  ;;  %v10073_v2 = vld [vmem:[#allocation4 + $0x390] sm:$0xff] }
 0x8c6   :  { %13185 = vmatprep.subr.bf16.mxu1 %v10088_v47 }
 0x8c9   :  { %13186 = vmatpush3.bf16.msra.mxu1 %v10048_v49 }
 0x8ca   :  { %13187 = vmatprep.subr.bf16.mxu1 %v10093_v32 }
 0x8cd   :  { %13188 = vmatpush3.bf16.msra.mxu1 %v10053_v20 }
 0x8ce   :  { %13189 = vmatprep.subr.bf16.mxu1 %v10098_v30 }
 0x8d1   :  { %13190 = vmatpush3.bf16.msra.mxu1 %v10058_v21 }
 0x8d2   :  { %13191 = vmatprep.subr.bf16.mxu1 %v10103_v24 }
 0x8d5   :  { %13192 = vmatpush3.bf16.msra.mxu1 %v10063_v28 }
 0x8d6   :  { %13193 = vmatprep.subr.bf16.mxu1 %v10108_v29  ;;  %v10237_v29 = vrot.slane %v10209_v54, %v19847_v61 }
 0x8d9   :  { %13194 = vmatpush3.bf16.msra.mxu1 %v10068_v4 }
 0x8da   :  { %13195 = vmatprep.subr.bf16.mxu1 %v10113_v40 }
 0x8dd   :  { %13196 = vmatpush3.bf16.msra.mxu1 %v10073_v2 }
 0x8de   :  { %13197 = vmatprep.subr.bf16.mxu1 %v10118_v48 }
 0x8e1   :  { %13198 = vmatpush3.bf16.msra.mxu1 %v10078_v53 }
 0x8e2   :  { %13205 = vmatprep.subr.bf16.mxu1 %v10163_v56 }
 0x8e4   :  { %10648 = vmatmul.mubr.bf16.vlgmr.msra.gmra.mrb[40].mxu1 %v20030_v23  ;;  %v10148_v23 = vld [vmem:[#allocation4 + $0x5e8] sm:$0xff] }
 0x8e5   :  { %13206 = vmatpush3.bf16.msra.mxu1 %v10123_v5  ;;  %10687 = vmatprep.mubr.bf16.mxu1 %v20035_v63  ;;  %v10153_v63 = vld [vmem:[#allocation4 + $0x610] sm:$0xff] }
 0x8e6   :  { %13207 = vmatprep.subr.bf16.mxu1 %v10168_v41 }
 0x8e9   :  { %13208 = vmatpush3.bf16.msra.mxu1 %v10128_v58 }
 0x8ea   :  { %13209 = vmatprep.subr.bf16.mxu1 %v10173_v38 }
 0x8ed   :  { %13210 = vmatpush3.bf16.msra.mxu1 %v10133_v34 }
 0x8ee   :  { %13211 = vmatprep.subr.bf16.mxu1 %v10178_v50 }
 0x8f1   :  { %13212 = vmatpush3.bf16.msra.mxu1 %v10138_v45 }
 0x8f2   :  { %13213 = vmatprep.subr.bf16.mxu1 %v10183_v62 }
 0x8f5   :  { %13214 = vmatpush3.bf16.msra.mxu1 %v10143_v25 }
 0x8f6   :  { %13215 = vmatprep.subr.bf16.mxu1 %v10188_v57  ;;  %v21533_v57 = vld [vmem:[#allocation264_spill] sm:$0xff] }
 0x8f9   :  { %13216 = vmatpush3.bf16.msra.mxu1 %v10148_v23  ;;  %v21534_v23 = vld [vmem:[#allocation262_spill] sm:$0xff] }
 0x8fa   :  { %13217 = vmatprep.subr.bf16.mxu1 %v10193_v43  ;;  %v12933_v61 = vcombine.high %v21534_v23, %v21533_v57  ;;  %v21535_v43 = vld [vmem:[#allocation265_spill] sm:$0xff] }
 0x8fd   :  { %13218 = vmatpush3.bf16.msra.mxu1 %v10153_v63  ;;  %v21536_v63 = vld [vmem:[#allocation263_spill] sm:$0xff] }
 0x8fe   :  { %13219 = vmatprep.subr.bf16.mxu1 %v10198_v6  ;;  %v12935_v6 = vcombine.high %v21536_v63, %v21535_v43 }
 0x901   :  { %13220 = vmatpush3.bf16.msra.mxu1 %v10158_v31  ;;  %v12932_v31 = vcombine.low %v21534_v23, %v21533_v57 }
 0x904   :  { %10688 = vmatmul.mubr.bf16.vlgmr.msra.gmra.mrb[44].mxu1 %v20044_v60 }
 0x963   :  { %v10527_v0 = vpop.f32.mrb[16].mxu0 }
 0x964   :  { %v10529_v35 = vpop.f32.mrb[17].mxu0  ;;  %v13276_v37 = vadd.f32 %v10527_v0, %v10229_v42  ;;  %v12934_v0 = vcombine.low %v21536_v63, %v21535_v43 }
 0x965   :  { %v10531_v36 = vpop.f32.mrb[18].mxu0  ;;  %v13278_v33 = vadd.f32 %v10529_v35, %v10233_v1 }
 0x966   :  { %v10532_v52 = vpop.f32.mrb[19].mxu0 }
 0x96c   :  { %v10729_v3 = vpop.f32.mrb[20].mxu0 }
 0x96d   :  { %v13258_v10 = vpop.f32.mrb[21].mxu0 }
 0x96e   :  { %v10732_v19 = vpop.f32.mrb[22].mxu0 }
 0x96f   :  { %v10404_v15 = vpop.f32.mrb[28].mxu1  ;;  %v13259_v22 = vpop.f32.mrb[23].mxu0 }
 0x970   :  { %v20064_v44 = vadd.f32 %v10404_v15, %v10221_v27  ;;  %v10406_v60 = vpop.f32.mrb[29].mxu1 }
 0x971   :  { %v20066_v55 = vadd.f32 %v10406_v60, %v10225_v14  ;;  %v10408_v39 = vpop.f32.mrb[30].mxu1 }
 0x972   :  { %v10735_v26 = vmax.f32 %v20064_v44, 0.0  ;;  %v10409_v7 = vpop.f32.mrb[31].mxu1 }
 0x973   :  { %v10736_v12 = vmax.f32 %v20066_v55, 0.0 }
 0x977   :  { %v10568_v18 = vpop.f32.mrb[32].mxu1 }
 0x978   :  { %v20072_v11 = vadd.f32 %v13276_v37, %v10568_v18  ;;  %v10570_v13 = vpop.f32.mrb[33].mxu1 }
 0x979   :  { %v20074_v51 = vadd.f32 %v13278_v33, %v10570_v13  ;;  %v10572_v46 = vpop.f32.mrb[34].mxu1 }
 0x97a   :  { %v10737_v47 = vmax.f32 %v20072_v11, 0.0  ;;  %v10573_v49 = vpop.f32.mrb[35].mxu1 }
 0x97b   :  { %v10738_v32 = vmax.f32 %v20074_v51, 0.0 }
 0x997   :  { %v13177_v20 = vpop.f32.mrb[36].mxu1 }
 0x998   :  { %v13178_v30 = vpop.f32.mrb[37].mxu1 }
 0x999   :  { %v13179_v21 = vadd.f32 %v13178_v30, %v13177_v20  ;;  %v13180_v24 = vpop.f32.mrb[38].mxu1 }
 0x99a   :  { %v13181_v28 = vpop.f32.mrb[39].mxu1 }
 0x99b   :  { %v10610_v2 = vadd.f32 %v13179_v21, %v10237_v29 }
 0x9b7   :  { %v13199_v4 = vpop.f32.mrb[40].mxu1 }
 0x9b8   :  { %v13200_v40 = vpop.f32.mrb[41].mxu1 }
 0x9b9   :  { %v13201_v48 = vadd.f32 %v13200_v40, %v13199_v4  ;;  %v13202_v53 = vpop.f32.mrb[42].mxu1 }
 0x9ba   :  { %v13203_v56 = vpop.f32.mrb[43].mxu1 }
 0x9bb   :  { %v10650_v5 = vadd.f32 %v13201_v48, %v10610_v2 }
 0x9d7   :  { %v13221_v41 = vpop.f32.mrb[44].mxu1 }
 0x9d8   :  { %v13222_v58 = vpop.f32.mrb[45].mxu1 }
 0x9d9   :  { %v13223_v38 = vadd.f32 %v13222_v58, %v13221_v41  ;;  %v13224_v34 = vpop.f32.mrb[46].mxu1 }
 0x9da   :  { %v13225_v50 = vpop.f32.mrb[47].mxu1 }
 0x9db   :  { %v10690_v45 = vadd.f32 %v13223_v38, %v10650_v5 }
 0x9dd   :  { %v20079_v62 = vadd.f32 %v10729_v3, %v10690_v45 }
 0x9df   :  { %v10739_v25 = vmax.f32 %v20079_v62, 0.0 }
 0x9e0   :  { %14028 = dma.done.wait [#allocation7 + $0x3], 19200 }
 0x9e1   :  { %14029 = vsyncadd [#allocation7 + $0x3], 4294948096  ;;  %v21537_v35 = vld [vmem:[#allocation268_spill] sm:$0xff]  ;;  %v21538_v36 = vld [vmem:[#allocation266_spill] sm:$0xff]  ;;  %11685 = vmatprep.subr.bf16.mxu1 %v12933_v61  ;;  %11808 = vmatprep.subr.bf16.mxu0 %v12935_v6  ;;  %v10895_v34 = vpack.c.bf16 %v10736_v12, %v10736_v12  ;;  %v10897_v44 = vpack.c.bf16 %v10738_v32, %v10738_v32  ;;  %vm11975_vm5 = vcmask 130048  }
 0x9e2   :  { %v12937_v52 = vcombine.high %v21538_v36, %v21537_v35  ;;  %v21539_v54 = vld [vmem:[#allocation269_spill] sm:$0xff]  ;;  %v21540_v27 = vld [vmem:[#allocation267_spill] sm:$0xff]  ;;  %11686 = vmatpush1.bf16.msra.mxu1 %v12932_v31  ;;  %11809 = vmatpush1.bf16.msra.mxu0 %v12934_v0  ;;  %v12936_v14 = vcombine.low %v21538_v36, %v21537_v35  ;;  %v21541_v19 = vld [vmem:[#allocation272_spill] sm:$0xff] }
 0x9e3   :  { %v12939_v3 = vcombine.high %v21540_v27, %v21539_v54  ;;  %v12938_v10 = vcombine.low %v21540_v27, %v21539_v54  ;;  %v21542_v15 = vld [vmem:[#allocation270_spill] sm:$0xff]  ;;  %v21543_v60 = vld [vmem:[#allocation273_spill] sm:$0xff]  ;;  %v21544_v39 = vld [vmem:[#allocation271_spill] sm:$0xff]  ;;  %11717 = vmatprep.mubr.bf16.mxu1 %v10895_v34  ;;  %11840 = vmatprep.mubr.bf16.mxu0 %v10895_v34 }
 0x9e4   :  { %11687 = vmatprep.subr.bf16.mxu1 %v12937_v52  ;;  %v12941_v22 = vcombine.high %v21542_v15, %v21541_v19  ;;  %v12943_v42 = vcombine.high %v21544_v39, %v21543_v60  ;;  %v12940_v7 = vcombine.low %v21542_v15, %v21541_v19  ;;  %v12942_v1 = vcombine.low %v21544_v39, %v21543_v60  ;;  %v21545_v37 = vld [vmem:[#allocation276_spill] sm:$0xff]  ;;  %v21546_v33 = vld [vmem:[#allocation274_spill] sm:$0xff]  ;;  %v21547_v13 = vld [vmem:[#allocation277_spill] sm:$0xff] }
 0x9e5   :  { %11810 = vmatprep.subr.bf16.mxu0 %v12939_v3  ;;  %v12945_v18 = vcombine.high %v21546_v33, %v21545_v37  ;;  %v21548_v46 = vld [vmem:[#allocation275_spill] sm:$0xff]  ;;  %v12944_v20 = vcombine.low %v21546_v33, %v21545_v37  ;;  %v21549_v21 = vld [vmem:[#allocation280_spill] sm:$0xff]  ;;  %v21550_v24 = vld [vmem:[#allocation278_spill] sm:$0xff] }
 0x9e6   :  { %11688 = vmatpush1.bf16.msra.mxu1 %v12936_v14  ;;  %11811 = vmatpush1.bf16.msra.mxu0 %v12938_v10  ;;  %v12947_v49 = vcombine.high %v21548_v46, %v21547_v13  ;;  %v12946_v30 = vcombine.low %v21548_v46, %v21547_v13  ;;  %v12949_v28 = vcombine.high %v21550_v24, %v21549_v21  ;;  %v21551_v29 = vld [vmem:[#allocation281_spill] sm:$0xff]  ;;  %v21552_v4 = vld [vmem:[#allocation279_spill] sm:$0xff]  ;;  %v21553_v53 = vld [vmem:[#allocation284_spill] sm:$0xff] }
 0x9e7   :  { %11689 = vmatprep.subr.bf16.mxu1 %v12941_v22  ;;  %11812 = vmatprep.subr.bf16.mxu0 %v12943_v42  ;;  %v12951_v40 = vcombine.high %v21552_v4, %v21551_v29  ;;  %v12948_v2 = vcombine.low %v21550_v24, %v21549_v21  ;;  %v12950_v48 = vcombine.low %v21552_v4, %v21551_v29  ;;  %v21554_v56 = vld [vmem:[#allocation282_spill] sm:$0xff]  ;;  %v21555_v41 = vld [vmem:[#allocation285_spill] sm:$0xff]  ;;  %v21556_v58 = vld [vmem:[#allocation283_spill] sm:$0xff] }
 0x9e8   :  { %v12953_v5 = vcombine.high %v21554_v56, %v21553_v53  ;;  %v12955_v38 = vcombine.high %v21556_v58, %v21555_v41  ;;  %v12952_v50 = vcombine.low %v21554_v56, %v21553_v53  ;;  %v12954_v45 = vcombine.low %v21556_v58, %v21555_v41  ;;  %v21557_v57 = vld [vmem:[#allocation288_spill] sm:$0xff]  ;;  %v21558_v23 = vld [vmem:[#allocation286_spill] sm:$0xff]  ;;  %v21559_v43 = vld [vmem:[#allocation289_spill] sm:$0xff] }
 0x9e9   :  { %v12957_v61 = vcombine.high %v21558_v23, %v21557_v57  ;;  %v21560_v63 = vld [vmem:[#allocation287_spill] sm:$0xff]  ;;  %v12956_v55 = vcombine.low %v21558_v23, %v21557_v57  ;;  %v21561_v31 = vld [vmem:[#allocation292_spill] sm:$0xff]  ;;  %v21562_v0 = vld [vmem:[#allocation290_spill] sm:$0xff] }
 0x9ea   :  { %11690 = vmatpush1.bf16.msra.mxu1 %v12940_v7  ;;  %11813 = vmatpush1.bf16.msra.mxu0 %v12942_v1  ;;  %v12959_v6 = vcombine.high %v21560_v63, %v21559_v43  ;;  %v12958_v12 = vcombine.low %v21560_v63, %v21559_v43  ;;  %v12961_v35 = vcombine.high %v21562_v0, %v21561_v31  ;;  %v21563_v36 = vld [vmem:[#allocation293_spill] sm:$0xff]  ;;  %v21564_v52 = vld [vmem:[#allocation291_spill] sm:$0xff]  ;;  %v21565_v14 = vld [vmem:[#allocation296_spill] sm:$0xff] }
 0x9eb   :  { %11691 = vmatprep.subr.bf16.mxu1 %v12945_v18  ;;  %11814 = vmatprep.subr.bf16.mxu0 %v12947_v49  ;;  %v12963_v54 = vcombine.high %v21564_v52, %v21563_v36  ;;  %v12960_v27 = vcombine.low %v21562_v0, %v21561_v31  ;;  %v12962_v3 = vcombine.low %v21564_v52, %v21563_v36  ;;  %v21566_v10 = vld [vmem:[#allocation294_spill] sm:$0xff]  ;;  %v21567_v15 = vld [vmem:[#allocation297_spill] sm:$0xff]  ;;  %v21568_v22 = vld [vmem:[#allocation295_spill] sm:$0xff] }
 0x9ec   :  { %v12965_v19 = vcombine.high %v21566_v10, %v21565_v14  ;;  %v12967_v60 = vcombine.high %v21568_v22, %v21567_v15  ;;  %v12964_v39 = vcombine.low %v21566_v10, %v21565_v14  ;;  %v12966_v42 = vcombine.low %v21568_v22, %v21567_v15  ;;  %v21569_v7 = vld [vmem:[#allocation300_spill] sm:$0xff]  ;;  %v21570_v1 = vld [vmem:[#allocation298_spill] sm:$0xff]  ;;  %v21571_v33 = vld [vmem:[#allocation301_spill] sm:$0xff] }
 0x9ed   :  { %v12969_v37 = vcombine.high %v21570_v1, %v21569_v7  ;;  %v21572_v18 = vld [vmem:[#allocation299_spill] sm:$0xff]  ;;  %v12968_v46 = vcombine.low %v21570_v1, %v21569_v7  ;;  %v21575_v24 = vld [vmem:[#allocation305_spill] sm:$0xff]  ;;  %v21581_v34 = vld [vmem:[#allocation312_spill] sm:$0xff] }
 0x9ee   :  { %11692 = vmatpush1.bf16.msra.mxu1 %v12944_v20  ;;  %11815 = vmatpush1.bf16.msra.mxu0 %v12946_v30  ;;  %v12971_v13 = vcombine.high %v21572_v18, %v21571_v33  ;;  %v12970_v49 = vcombine.low %v21572_v18, %v21571_v33  ;;  %v21573_v20 = vld [vmem:[#allocation304_spill] sm:$0xff]  ;;  %v21574_v30 = vld [vmem:[#allocation302_spill] sm:$0xff]  ;;  %v21579_v56 = vld [vmem:[#allocation309_spill] sm:$0xff] }
 0x9ef   :  { %11693 = vmatprep.subr.bf16.mxu1 %v12949_v28  ;;  %11816 = vmatprep.subr.bf16.mxu0 %v12951_v40  ;;  %v12973_v21 = vcombine.high %v21574_v30, %v21573_v20  ;;  %v21576_v28 = vld [vmem:[#allocation303_spill] sm:$0xff]  ;;  %v12972_v4 = vcombine.low %v21574_v30, %v21573_v20  ;;  %v21583_v57 = vld [vmem:[#allocation313_spill] sm:$0xff] }
 0x9f0   :  { %v12975_v29 = vcombine.high %v21576_v28, %v21575_v24  ;;  %v12974_v40 = vcombine.low %v21576_v28, %v21575_v24  ;;  %v21584_v23 = vld [vmem:[#allocation311_spill] sm:$0xff]  ;;  %v21587_v31 = vld [vmem:[#allocation317_spill] sm:$0xff]  ;;  %v10894_v24 = vpack.c.bf16 %v10735_v26, %v10735_v26 }
 0x9f1   :  { %v12982_v63 = vcombine.low %v21584_v23, %v21583_v57  ;;  %v21588_v0 = vld [vmem:[#allocation315_spill] sm:$0xff]  ;;  %v21591_v14 = vld [vmem:[#allocation321_spill] sm:$0xff] }
 0x9f2   :  { %11694 = vmatpush1.bf16.msra.mxu1 %v12948_v2  ;;  %11817 = vmatpush1.bf16.msra.mxu0 %v12950_v48  ;;  %v21577_v2 = vld [vmem:[#allocation308_spill] sm:$0xff]  ;;  %v21578_v48 = vld [vmem:[#allocation306_spill] sm:$0xff]  ;;  %v12986_v52 = vcombine.low %v21588_v0, %v21587_v31  ;;  %v21592_v10 = vld [vmem:[#allocation319_spill] sm:$0xff] }
 0x9f3   :  { %11695 = vmatprep.subr.bf16.mxu1 %v12953_v5  ;;  %11818 = vmatprep.subr.bf16.mxu0 %v12955_v38  ;;  %v12977_v53 = vcombine.high %v21578_v48, %v21577_v2  ;;  %v21580_v5 = vld [vmem:[#allocation307_spill] sm:$0xff]  ;;  %v12976_v58 = vcombine.low %v21578_v48, %v21577_v2  ;;  %v12990_v22 = vcombine.low %v21592_v10, %v21591_v14  ;;  %v21595_v7 = vld [vmem:[#allocation325_spill] sm:$0xff] }
 0x9f4   :  { %v12979_v41 = vcombine.high %v21580_v5, %v21579_v56  ;;  %v12978_v38 = vcombine.low %v21580_v5, %v21579_v56  ;;  %v21596_v1 = vld [vmem:[#allocation323_spill] sm:$0xff]  ;;  %v21599_v20 = vld [vmem:[#allocation329_spill] sm:$0xff] }
 0x9f5   :  { %v12994_v18 = vcombine.low %v21596_v1, %v21595_v7  ;;  %v21600_v30 = vld [vmem:[#allocation327_spill] sm:$0xff]  ;;  %v21603_v48 = vld [vmem:[#allocation333_spill] sm:$0xff] }
 0x9f6   :  { %11696 = vmatpush1.bf16.msra.mxu1 %v12952_v50  ;;  %11819 = vmatpush1.bf16.msra.mxu0 %v12954_v45  ;;  %v21582_v50 = vld [vmem:[#allocation310_spill] sm:$0xff] }
 0x9f7   :  { %11697 = vmatprep.subr.bf16.mxu1 %v12957_v61  ;;  %11820 = vmatprep.subr.bf16.mxu0 %v12959_v6  ;;  %v12981_v45 = vcombine.high %v21582_v50, %v21581_v34  ;;  %v12983_v61 = vcombine.high %v21584_v23, %v21583_v57  ;;  %v12980_v43 = vcombine.low %v21582_v50, %v21581_v34  ;;  %v21585_v6 = vld [vmem:[#allocation316_spill] sm:$0xff]  ;;  %v21607_v34 = vld [vmem:[#allocation337_spill] sm:$0xff]  ;;  %v21608_v50 = vld [vmem:[#allocation335_spill] sm:$0xff] }
 0x9f8   :  { %v13007_v51 = vcombine.high %v21608_v50, %v21607_v34  ;;  %v21609_v57 = vld [vmem:[#allocation340_spill] sm:$0xff]  ;;  %v21610_v23 = vld [vmem:[#allocation338_spill] sm:$0xff] }
 0x9fa   :  { %11698 = vmatpush1.bf16.msra.mxu1 %v12956_v55  ;;  %11821 = vmatpush1.bf16.msra.mxu0 %v12958_v12  ;;  %v21586_v55 = vld [vmem:[#allocation314_spill] sm:$0xff] }
 0x9fb   :  { %11699 = vmatprep.subr.bf16.mxu1 %v12961_v35  ;;  %11822 = vmatprep.subr.bf16.mxu0 %v12963_v54  ;;  %v12985_v12 = vcombine.high %v21586_v55, %v21585_v6  ;;  %v12987_v35 = vcombine.high %v21588_v0, %v21587_v31  ;;  %v12984_v36 = vcombine.low %v21586_v55, %v21585_v6  ;;  %v21589_v54 = vld [vmem:[#allocation320_spill] sm:$0xff]  ;;  %v21614_v0 = vld [vmem:[#allocation342_spill] sm:$0xff] }
 0x9fc   :  { %v13008_v55 = vcombine.low %v21610_v23, %v21609_v57  ;;  %v21613_v31 = vld [vmem:[#allocation344_spill] sm:$0xff] }
 0x9fe   :  { %11700 = vmatpush1.bf16.msra.mxu1 %v12960_v27  ;;  %11823 = vmatpush1.bf16.msra.mxu0 %v12962_v3  ;;  %v21590_v27 = vld [vmem:[#allocation318_spill] sm:$0xff] }
 0x9ff   :  { %11701 = vmatprep.subr.bf16.mxu1 %v12965_v19  ;;  %11824 = vmatprep.subr.bf16.mxu0 %v12967_v60  ;;  %v12989_v3 = vcombine.high %v21590_v27, %v21589_v54  ;;  %v12991_v19 = vcombine.high %v21592_v10, %v21591_v14  ;;  %v12988_v15 = vcombine.low %v21590_v27, %v21589_v54  ;;  %v21593_v60 = vld [vmem:[#allocation324_spill] sm:$0xff]  ;;  %v21618_v10 = vld [vmem:[#allocation346_spill] sm:$0xff] }
 0xa00   :  { %v13012_v27 = vcombine.low %v21614_v0, %v21613_v31  ;;  %v21617_v14 = vld [vmem:[#allocation348_spill] sm:$0xff] }
 0xa02   :  { %11702 = vmatpush1.bf16.msra.mxu1 %v12964_v39  ;;  %11825 = vmatpush1.bf16.msra.mxu0 %v12966_v42  ;;  %v21594_v39 = vld [vmem:[#allocation322_spill] sm:$0xff] }
 0xa03   :  { %11703 = vmatprep.subr.bf16.mxu1 %v12969_v37  ;;  %11826 = vmatprep.subr.bf16.mxu0 %v12971_v13  ;;  %v12993_v42 = vcombine.high %v21594_v39, %v21593_v60  ;;  %v12995_v37 = vcombine.high %v21596_v1, %v21595_v7  ;;  %v12992_v33 = vcombine.low %v21594_v39, %v21593_v60  ;;  %v21597_v13 = vld [vmem:[#allocation328_spill] sm:$0xff]  ;;  %v21622_v1 = vld [vmem:[#allocation350_spill] sm:$0xff] }
 0xa04   :  { %v13016_v39 = vcombine.low %v21618_v10, %v21617_v14  ;;  %v21621_v7 = vld [vmem:[#allocation352_spill] sm:$0xff] }
 0xa06   :  { %11704 = vmatpush1.bf16.msra.mxu1 %v12968_v46  ;;  %11827 = vmatpush1.bf16.msra.mxu0 %v12970_v49  ;;  %v21598_v46 = vld [vmem:[#allocation326_spill] sm:$0xff] }
 0xa07   :  { %11705 = vmatprep.subr.bf16.mxu1 %v12973_v21  ;;  %11828 = vmatprep.subr.bf16.mxu0 %v12975_v29  ;;  %v12997_v49 = vcombine.high %v21598_v46, %v21597_v13  ;;  %v12999_v21 = vcombine.high %v21600_v30, %v21599_v20  ;;  %v12996_v28 = vcombine.low %v21598_v46, %v21597_v13 }
 0xa08   :  { %v12998_v29 = vcombine.low %v21600_v30, %v21599_v20  ;;  %v13020_v46 = vcombine.low %v21622_v1, %v21621_v7  ;;  %v21625_v20 = vld [vmem:[#allocation356_spill] sm:$0xff]  ;;  %v21626_v30 = vld [vmem:[#allocation354_spill] sm:$0xff] }
 0xa0a   :  { %11706 = vmatpush1.bf16.msra.mxu1 %v12972_v4  ;;  %11829 = vmatpush1.bf16.msra.mxu0 %v12974_v40  ;;  %v21601_v4 = vld [vmem:[#allocation332_spill] sm:$0xff]  ;;  %v21602_v40 = vld [vmem:[#allocation330_spill] sm:$0xff] }
 0xa0b   :  { %11707 = vmatprep.subr.bf16.mxu1 %v12977_v53  ;;  %11830 = vmatprep.subr.bf16.mxu0 %v12979_v41  ;;  %v13001_v2 = vcombine.high %v21602_v40, %v21601_v4  ;;  %v21604_v53 = vld [vmem:[#allocation331_spill] sm:$0xff]  ;;  %v13000_v26 = vcombine.low %v21602_v40, %v21601_v4  ;;  %v21605_v41 = vld [vmem:[#allocation336_spill] sm:$0xff]  ;;  %v13024_v4 = vcombine.low %v21626_v30, %v21625_v20 }
 0xa0c   :  { %v13003_v56 = vcombine.high %v21604_v53, %v21603_v48  ;;  %v13002_v5 = vcombine.low %v21604_v53, %v21603_v48  ;;  %v21630_v48 = vld [vmem:[#allocation358_spill] sm:$0xff] }
 0xa0e   :  { %11708 = vmatpush1.bf16.msra.mxu1 %v12976_v58  ;;  %11831 = vmatpush1.bf16.msra.mxu0 %v12978_v38  ;;  %v21606_v58 = vld [vmem:[#allocation334_spill] sm:$0xff] }
 0xa0f   :  { %11709 = vmatprep.subr.bf16.mxu1 %v12981_v45  ;;  %11832 = vmatprep.subr.bf16.mxu0 %v12983_v61  ;;  %v13005_v38 = vcombine.high %v21606_v58, %v21605_v41  ;;  %v13004_v32 = vcombine.low %v21606_v58, %v21605_v41  ;;  %v13006_v45 = vcombine.low %v21608_v50, %v21607_v34  ;;  %v21633_v58 = vld [vmem:[#allocation364_spill] sm:$0xff]  ;;  %v21635_v50 = vld [vmem:[#allocation365_spill] sm:$0xff] }
 0xa10   :  { %v13009_v61 = vcombine.high %v21610_v23, %v21609_v57  ;;  %v21637_v23 = vld [vmem:[#allocation368_spill] sm:$0xff] }
 0xa12   :  { %11710 = vmatpush1.bf16.msra.mxu1 %v12980_v43  ;;  %11833 = vmatpush1.bf16.msra.mxu0 %v12982_v63  ;;  %v21611_v43 = vld [vmem:[#allocation341_spill] sm:$0xff]  ;;  %v21612_v63 = vld [vmem:[#allocation339_spill] sm:$0xff] }
 0xa13   :  { %11711 = vmatprep.subr.bf16.mxu1 %v12985_v12  ;;  %11834 = vmatprep.subr.bf16.mxu0 %v12987_v35  ;;  %v13011_v6 = vcombine.high %v21612_v63, %v21611_v43  ;;  %v13010_v12 = vcombine.low %v21612_v63, %v21611_v43  ;;  %v13013_v35 = vcombine.high %v21614_v0, %v21613_v31  ;;  %v21639_v63 = vld [vmem:[#allocation369_spill] sm:$0xff]  ;;  %v21641_v0 = vld [vmem:[#allocation372_spill] sm:$0xff] }
 0xa16   :  { %11712 = vmatpush1.bf16.msra.mxu1 %v12984_v36  ;;  %11835 = vmatpush1.bf16.msra.mxu0 %v12986_v52  ;;  %v21615_v36 = vld [vmem:[#allocation345_spill] sm:$0xff]  ;;  %v21616_v52 = vld [vmem:[#allocation343_spill] sm:$0xff] }
 0xa17   :  { %11713 = vmatprep.subr.bf16.mxu1 %v12989_v3  ;;  %11836 = vmatprep.subr.bf16.mxu0 %v12991_v19  ;;  %v13015_v54 = vcombine.high %v21616_v52, %v21615_v36  ;;  %v13014_v3 = vcombine.low %v21616_v52, %v21615_v36  ;;  %v13017_v19 = vcombine.high %v21618_v10, %v21617_v14  ;;  %v21643_v52 = vld [vmem:[#allocation373_spill] sm:$0xff]  ;;  %v21645_v10 = vld [vmem:[#allocation376_spill] sm:$0xff] }
 0xa1a   :  { %11714 = vmatpush1.bf16.msra.mxu1 %v12988_v15  ;;  %11837 = vmatpush1.bf16.msra.mxu0 %v12990_v22  ;;  %v21619_v15 = vld [vmem:[#allocation349_spill] sm:$0xff]  ;;  %v21620_v22 = vld [vmem:[#allocation347_spill] sm:$0xff] }
 0xa1b   :  { %11715 = vmatprep.subr.bf16.mxu1 %v12993_v42  ;;  %11838 = vmatprep.subr.bf16.mxu0 %v12995_v37  ;;  %v13019_v60 = vcombine.high %v21620_v22, %v21619_v15  ;;  %v13018_v42 = vcombine.low %v21620_v22, %v21619_v15  ;;  %v13021_v37 = vcombine.high %v21622_v1, %v21621_v7  ;;  %v21647_v22 = vld [vmem:[#allocation377_spill] sm:$0xff]  ;;  %v21649_v1 = vld [vmem:[#allocation380_spill] sm:$0xff] }
 0xa1e   :  { %11716 = vmatpush1.bf16.msra.mxu1 %v12992_v33  ;;  %11839 = vmatpush1.bf16.msra.mxu0 %v12994_v18  ;;  %v21623_v33 = vld [vmem:[#allocation353_spill] sm:$0xff]  ;;  %v21624_v18 = vld [vmem:[#allocation351_spill] sm:$0xff] }
 0xa1f   :  { %11726 = vmatprep.subr.bf16.mxu1 %v12997_v49  ;;  %11849 = vmatprep.subr.bf16.mxu0 %v12999_v21  ;;  %v13023_v13 = vcombine.high %v21624_v18, %v21623_v33  ;;  %v13022_v49 = vcombine.low %v21624_v18, %v21623_v33  ;;  %v13025_v21 = vcombine.high %v21626_v30, %v21625_v20  ;;  %v21651_v18 = vld [vmem:[#allocation381_spill] sm:$0xff]  ;;  %v21653_v30 = vld [vmem:[#allocation384_spill] sm:$0xff] }
 0xa21   :  { %11718 = vmatmul.mubr.bf16.vlgmr.msra.gmra.mrb[48].mxu1 %v10894_v24  ;;  %11841 = vmatmul.mubr.bf16.vlgmr.msra.gmra.mrb[24].mxu0 %v10894_v24  ;;  %v21627_v24 = vld [vmem:[#allocation357_spill] sm:$0xff] }
 0xa22   :  { %11727 = vmatpush1.bf16.msra.mxu1 %v12996_v28  ;;  %11850 = vmatpush1.bf16.msra.mxu0 %v12998_v29  ;;  %v21628_v28 = vld [vmem:[#allocation355_spill] sm:$0xff] }
 0xa23   :  { %11728 = vmatprep.subr.bf16.mxu1 %v13001_v2  ;;  %11851 = vmatprep.subr.bf16.mxu0 %v13003_v56  ;;  %v13027_v29 = vcombine.high %v21628_v28, %v21627_v24  ;;  %v13026_v40 = vcombine.low %v21628_v28, %v21627_v24  ;;  %v21629_v2 = vld [vmem:[#allocation360_spill] sm:$0xff]  ;;  %v21631_v56 = vld [vmem:[#allocation361_spill] sm:$0xff] }
 0xa24   :  { %11758 = vmatprep.mubr.bf16.mxu1 %v10897_v44  ;;  %11881 = vmatprep.mubr.bf16.mxu0 %v10897_v44  ;;  %v13029_v53 = vcombine.high %v21630_v48, %v21629_v2  ;;  %v21632_v44 = vld [vmem:[#allocation359_spill] sm:$0xff]  ;;  %v21655_v28 = vld [vmem:[#allocation385_spill] sm:$0xff] }
 0xa25   :  { %v13030_v41 = vcombine.low %v21632_v44, %v21631_v56 }
 0xa26   :  { %11729 = vmatpush1.bf16.msra.mxu1 %v13000_v26  ;;  %11852 = vmatpush1.bf16.msra.mxu0 %v13002_v5  ;;  %v13031_v26 = vcombine.high %v21632_v44, %v21631_v56  ;;  %v13028_v5 = vcombine.low %v21630_v48, %v21629_v2  ;;  %v21657_v48 = vld [vmem:[#allocation388_spill] sm:$0xff]  ;;  %v21659_v44 = vld [vmem:[#allocation389_spill] sm:$0xff] }
 0xa27   :  { %11730 = vmatprep.subr.bf16.mxu1 %v13005_v38  ;;  %11853 = vmatprep.subr.bf16.mxu0 %v13007_v51  ;;  %v21634_v38 = vld [vmem:[#allocation362_spill] sm:$0xff]  ;;  %v21636_v51 = vld [vmem:[#allocation363_spill] sm:$0xff] }
 0xa28   :  { %v13033_v34 = vcombine.high %v21634_v38, %v21633_v58  ;;  %v13034_v57 = vcombine.low %v21636_v51, %v21635_v50 }
 0xa2a   :  { %11731 = vmatpush1.bf16.msra.mxu1 %v13004_v32  ;;  %11854 = vmatpush1.bf16.msra.mxu0 %v13006_v45  ;;  %v13035_v32 = vcombine.high %v21636_v51, %v21635_v50  ;;  %v13032_v45 = vcombine.low %v21634_v38, %v21633_v58  ;;  %v21661_v38 = vld [vmem:[#allocation392_spill] sm:$0xff]  ;;  %v21663_v51 = vld [vmem:[#allocation393_spill] sm:$0xff] }
 0xa2b   :  { %11732 = vmatprep.subr.bf16.mxu1 %v13009_v61  ;;  %11855 = vmatprep.subr.bf16.mxu0 %v13011_v6  ;;  %v21638_v61 = vld [vmem:[#allocation366_spill] sm:$0xff]  ;;  %v21640_v6 = vld [vmem:[#allocation367_spill] sm:$0xff] }
 0xa2c   :  { %v13037_v43 = vcombine.high %v21638_v61, %v21637_v23  ;;  %v13038_v31 = vcombine.low %v21640_v6, %v21639_v63 }
 0xa2e   :  { %11733 = vmatpush1.bf16.msra.mxu1 %v13008_v55  ;;  %11856 = vmatpush1.bf16.msra.mxu0 %v13010_v12  ;;  %v13039_v55 = vcombine.high %v21640_v6, %v21639_v63  ;;  %v13036_v12 = vcombine.low %v21638_v61, %v21637_v23  ;;  %v21666_v63 = vld [vmem:[#allocation394_spill] sm:$0xff] }
 0xa2f   :  { %11734 = vmatprep.subr.bf16.mxu1 %v13013_v35  ;;  %11857 = vmatprep.subr.bf16.mxu0 %v13015_v54  ;;  %v21642_v35 = vld [vmem:[#allocation370_spill] sm:$0xff]  ;;  %v21644_v54 = vld [vmem:[#allocation371_spill] sm:$0xff] }
 0xa30   :  { %v13041_v36 = vcombine.high %v21642_v35, %v21641_v0  ;;  %v13042_v14 = vcombine.low %v21644_v54, %v21643_v52 }
 0xa32   :  { %11735 = vmatpush1.bf16.msra.mxu1 %v13012_v27  ;;  %11858 = vmatpush1.bf16.msra.mxu0 %v13014_v3  ;;  %v13043_v27 = vcombine.high %v21644_v54, %v21643_v52  ;;  %v13040_v3 = vcombine.low %v21642_v35, %v21641_v0  ;;  %v21669_v0 = vld [vmem:[#allocation400_spill] sm:$0xff]  ;;  %v21670_v35 = vld [vmem:[#allocation398_spill] sm:$0xff]  ;;  %v21671_v52 = vld [vmem:[#allocation401_spill] sm:$0xff] }
 0xa33   :  { %11736 = vmatprep.subr.bf16.mxu1 %v13017_v19  ;;  %11859 = vmatprep.subr.bf16.mxu0 %v13019_v60  ;;  %v21646_v19 = vld [vmem:[#allocation374_spill] sm:$0xff]  ;;  %v21648_v60 = vld [vmem:[#allocation375_spill] sm:$0xff] }
 0xa34   :  { %v13045_v15 = vcombine.high %v21646_v19, %v21645_v10  ;;  %v13046_v7 = vcombine.low %v21648_v60, %v21647_v22  ;;  %v21672_v54 = vld [vmem:[#allocation399_spill] sm:$0xff] }
 0xa36   :  { %11737 = vmatpush1.bf16.msra.mxu1 %v13016_v39  ;;  %11860 = vmatpush1.bf16.msra.mxu0 %v13018_v42  ;;  %v13047_v39 = vcombine.high %v21648_v60, %v21647_v22  ;;  %v13044_v42 = vcombine.low %v21646_v19, %v21645_v10  ;;  %v21673_v10 = vld [vmem:[#allocation404_spill] sm:$0xff]  ;;  %v21674_v19 = vld [vmem:[#allocation402_spill] sm:$0xff]  ;;  %v21675_v22 = vld [vmem:[#allocation405_spill] sm:$0xff] }
 0xa37   :  { %11738 = vmatprep.subr.bf16.mxu1 %v13021_v37  ;;  %11861 = vmatprep.subr.bf16.mxu0 %v13023_v13  ;;  %v21650_v37 = vld [vmem:[#allocation378_spill] sm:$0xff]  ;;  %v21652_v13 = vld [vmem:[#allocation379_spill] sm:$0xff] }
 0xa38   :  { %v13049_v33 = vcombine.high %v21650_v37, %v21649_v1  ;;  %v13050_v20 = vcombine.low %v21652_v13, %v21651_v18  ;;  %v21676_v60 = vld [vmem:[#allocation403_spill] sm:$0xff] }
 0xa3a   :  { %11739 = vmatpush1.bf16.msra.mxu1 %v13020_v46  ;;  %11862 = vmatpush1.bf16.msra.mxu0 %v13022_v49  ;;  %v13051_v46 = vcombine.high %v21652_v13, %v21651_v18  ;;  %v13048_v49 = vcombine.low %v21650_v37, %v21649_v1  ;;  %v21677_v1 = vld [vmem:[#allocation408_spill] sm:$0xff]  ;;  %v21678_v37 = vld [vmem:[#allocation406_spill] sm:$0xff]  ;;  %v21679_v18 = vld [vmem:[#allocation409_spill] sm:$0xff] }
 0xa3b   :  { %11740 = vmatprep.subr.bf16.mxu1 %v13025_v21  ;;  %11863 = vmatprep.subr.bf16.mxu0 %v13027_v29  ;;  %v21654_v21 = vld [vmem:[#allocation382_spill] sm:$0xff]  ;;  %v21656_v29 = vld [vmem:[#allocation383_spill] sm:$0xff] }
 0xa3c   :  { %v13053_v24 = vcombine.high %v21654_v21, %v21653_v30  ;;  %v13054_v2 = vcombine.low %v21656_v29, %v21655_v28  ;;  %v21680_v13 = vld [vmem:[#allocation407_spill] sm:$0xff] }
 0xa3e   :  { %11741 = vmatpush1.bf16.msra.mxu1 %v13024_v4  ;;  %11864 = vmatpush1.bf16.msra.mxu0 %v13026_v40  ;;  %v13055_v4 = vcombine.high %v21656_v29, %v21655_v28  ;;  %v13052_v40 = vcombine.low %v21654_v21, %v21653_v30  ;;  %v21681_v30 = vld [vmem:[#allocation410_spill] sm:$0xff] }
 0xa3f   :  { %11742 = vmatprep.subr.bf16.mxu1 %v13029_v53  ;;  %11865 = vmatprep.subr.bf16.mxu0 %v13031_v26  ;;  %v21658_v53 = vld [vmem:[#allocation386_spill] sm:$0xff]  ;;  %v21660_v26 = vld [vmem:[#allocation387_spill] sm:$0xff]  ;;  %v13081_v21 = vcombine.high %v21681_v30, %v21681_v30  ;;  %v13080_v29 = vcombine.low %v21681_v30, %v21681_v30 }
 0xa40   :  { %v13057_v56 = vcombine.high %v21658_v53, %v21657_v48  ;;  %v13058_v58 = vcombine.low %v21660_v26, %v21659_v44 }
 0xa42   :  { %11743 = vmatpush1.bf16.msra.mxu1 %v13028_v5  ;;  %11866 = vmatpush1.bf16.msra.mxu0 %v13030_v41  ;;  %v13059_v5 = vcombine.high %v21660_v26, %v21659_v44  ;;  %v13056_v41 = vcombine.low %v21658_v53, %v21657_v48  ;;  %v10898_v48 = vpack.c.bf16 %v10739_v25, %v10739_v25  ;;  %v10893_v53 = vld [vmem:[%s20467_s8] sm:$0xf] }
 0xa43   :  { %11744 = vmatprep.subr.bf16.mxu1 %v13033_v34  ;;  %11867 = vmatprep.subr.bf16.mxu0 %v13035_v32  ;;  %v21662_v34 = vld [vmem:[#allocation390_spill] sm:$0xff]  ;;  %v21664_v32 = vld [vmem:[#allocation391_spill] sm:$0xff]  ;;  %v10911_v44 = vrot.slane %v10893_v53, %v19822_v9  ;;  %v10907_v26 = vrot.slane %v10893_v53, %v19828_v16  ;;  %v10915_v62 = vrot.slane %v10893_v53, %v19831_v17 }
 0xa44   :  { %v13061_v50 = vcombine.high %v21662_v34, %v21661_v38  ;;  %v13060_v23 = vcombine.low %v21662_v34, %v21661_v38  ;;  %v13062_v61 = vcombine.low %v21664_v32, %v21663_v51 }
 0xa46   :  { %11745 = vmatpush1.bf16.msra.mxu1 %v13032_v45  ;;  %11868 = vmatpush1.bf16.msra.mxu0 %v13034_v57  ;;  %v13063_v45 = vcombine.high %v21664_v32, %v21663_v51  ;;  %v10896_v57 = vpack.c.bf16 %v10737_v47, %v10737_v47 }
 0xa47   :  { %11746 = vmatprep.subr.bf16.mxu1 %v13037_v43  ;;  %11869 = vmatprep.subr.bf16.mxu0 %v13039_v55  ;;  %v21665_v43 = vld [vmem:[#allocation396_spill] sm:$0xff]  ;;  %v21667_v55 = vld [vmem:[#allocation397_spill] sm:$0xff] }
 0xa48   :  { %v13065_v6 = vcombine.high %v21666_v63, %v21665_v43  ;;  %v13064_v11 = vcombine.low %v21666_v63, %v21665_v43  ;;  %v21683_v63 = vld [vmem:[#allocation420_spill] sm:$0xff] }
 0xa4a   :  { %11747 = vmatpush1.bf16.msra.mxu1 %v13036_v12  ;;  %11870 = vmatpush1.bf16.msra.mxu0 %v13038_v31  ;;  %v21668_v12 = vld [vmem:[#allocation395_spill] sm:$0xff] }
 0xa4b   :  { %11748 = vmatprep.subr.bf16.mxu1 %v13041_v36  ;;  %11871 = vmatprep.subr.bf16.mxu0 %v13043_v27  ;;  %v13067_v31 = vcombine.high %v21668_v12, %v21667_v55  ;;  %v13066_v47 = vcombine.low %v21668_v12, %v21667_v55  ;;  %v13069_v36 = vcombine.high %v21670_v35, %v21669_v0 }
 0xa4c   :  { %v13071_v27 = vcombine.high %v21672_v54, %v21671_v52 }
 0xa4e   :  { %11749 = vmatpush1.bf16.msra.mxu1 %v13040_v3  ;;  %11872 = vmatpush1.bf16.msra.mxu0 %v13042_v14  ;;  %v13068_v3 = vcombine.low %v21670_v35, %v21669_v0  ;;  %v13070_v14 = vcombine.low %v21672_v54, %v21671_v52 }
 0xa4f   :  { %11750 = vmatprep.subr.bf16.mxu1 %v13045_v15  ;;  %11873 = vmatprep.subr.bf16.mxu0 %v13047_v39  ;;  %v13073_v15 = vcombine.high %v21674_v19, %v21673_v10  ;;  %v13075_v39 = vcombine.high %v21676_v60, %v21675_v22 }
 0xa52   :  { %11751 = vmatpush1.bf16.msra.mxu1 %v13044_v42  ;;  %11874 = vmatpush1.bf16.msra.mxu0 %v13046_v7  ;;  %v13072_v42 = vcombine.low %v21674_v19, %v21673_v10  ;;  %v13074_v7 = vcombine.low %v21676_v60, %v21675_v22 }
 0xa53   :  { %11752 = vmatprep.subr.bf16.mxu1 %v13049_v33  ;;  %11875 = vmatprep.subr.bf16.mxu0 %v13051_v46  ;;  %v13077_v33 = vcombine.high %v21678_v37, %v21677_v1  ;;  %v13079_v46 = vcombine.high %v21680_v13, %v21679_v18 }
 0xa56   :  { %11753 = vmatpush1.bf16.msra.mxu1 %v13048_v49  ;;  %11876 = vmatpush1.bf16.msra.mxu0 %v13050_v20  ;;  %v13076_v49 = vcombine.low %v21678_v37, %v21677_v1  ;;  %v13078_v20 = vcombine.low %v21680_v13, %v21679_v18 }
 0xa57   :  { %11754 = vmatprep.subr.bf16.mxu1 %v13053_v24  ;;  %11877 = vmatprep.subr.bf16.mxu0 %v13055_v4  ;;  %v21682_v24 = vld [vmem:[#allocation411_spill] sm:$0xff] }
 0xa58   :  { %v13083_v28 = vcombine.high %v21682_v24, %v21682_v24  ;;  %v13082_v4 = vcombine.low %v21682_v24, %v21682_v24 }
 0xa5a   :  { %11755 = vmatpush1.bf16.msra.mxu1 %v13052_v40  ;;  %11878 = vmatpush1.bf16.msra.mxu0 %v13054_v2  ;;  %v11674_v40 = vsel %vm5947_vm0, %v13080_v29, 0  ;;  %v11680_v2 = vsel %vm5947_vm0, %v13082_v4, 0 }
 0xa5b   :  { %11756 = vmatprep.subr.bf16.mxu1 %v13057_v56  ;;  %11879 = vmatprep.subr.bf16.mxu0 %v13059_v5  ;;  %v10903_v56 = vrot.slane %v10893_v53, %v19819_v8 }
 0xa5e   :  { %11757 = vmatpush1.bf16.msra.mxu1 %v13056_v41  ;;  %11880 = vmatpush1.bf16.msra.mxu0 %v13058_v58 }
 0xa5f   :  { %11767 = vmatprep.subr.bf16.mxu1 %v13061_v50  ;;  %11890 = vmatprep.subr.bf16.mxu0 %v13063_v45 }
 0xa61   :  { %11759 = vmatmul.mubr.bf16.vlgmr.msra.gmra.mrb[48].mxu1 %v10896_v57  ;;  %11882 = vmatmul.mubr.bf16.vlgmr.msra.gmra.mrb[24].mxu0 %v10896_v57 }
 0xa62   :  { %11768 = vmatpush1.bf16.msra.mxu1 %v13060_v23  ;;  %11891 = vmatpush1.bf16.msra.mxu0 %v13062_v61 }
 0xa63   :  { %11769 = vmatprep.subr.bf16.mxu1 %v13065_v6  ;;  %11892 = vmatprep.subr.bf16.mxu0 %v13067_v31 }
 0xa64   :  { %11799 = vmatprep.mubr.bf16.mxu1 %v14032_v59  ;;  %11922 = vmatprep.mubr.bf16.mxu0 %v14032_v59 }
 0xa66   :  { %11770 = vmatpush1.bf16.msra.mxu1 %v13064_v11  ;;  %11893 = vmatpush1.bf16.msra.mxu0 %v13066_v47 }
 0xa67   :  { %11771 = vmatprep.subr.bf16.mxu1 %v13069_v36  ;;  %11894 = vmatprep.subr.bf16.mxu0 %v13071_v27 }
 0xa6a   :  { %11772 = vmatpush1.bf16.msra.mxu1 %v13068_v3  ;;  %11895 = vmatpush1.bf16.msra.mxu0 %v13070_v14 }
 0xa6b   :  { %11773 = vmatprep.subr.bf16.mxu1 %v13073_v15  ;;  %11896 = vmatprep.subr.bf16.mxu0 %v13075_v39 }
 0xa6e   :  { %11774 = vmatpush1.bf16.msra.mxu1 %v13072_v42  ;;  %11897 = vmatpush1.bf16.msra.mxu0 %v13074_v7 }
 0xa6f   :  { %11775 = vmatprep.subr.bf16.mxu1 %v13077_v33  ;;  %11898 = vmatprep.subr.bf16.mxu0 %v13079_v46 }
 0xa72   :  { %11776 = vmatpush1.bf16.msra.mxu1 %v13076_v49  ;;  %11899 = vmatpush1.bf16.msra.mxu0 %v13078_v20 }
 0xa73   :  { %13084 = vmatprep.subr.msk.bf16.mxu1 %vm5947_vm0, %v13081_v21  ;;  %13086 = vmatprep.subr.msk.bf16.mxu0 %vm5947_vm0, %v13083_v28 }
 0xa76   :  { %11778 = vmatpush1.bf16.msra.mxu1 %v11674_v40  ;;  %11901 = vmatpush1.bf16.msra.mxu0 %v11680_v2 }
 0xa77   :  { %13230 = vmatprep.subr.bf16.mxu1 %v21683_v63  ;;  %12019 = vmatprep.subr.bf16.mxu0 %v14032_v59 }
 0xa79   :  { %13085 = vmatmul.mubr.msk.bf16.vlgmr.msra.gmra.mrb[48].mxu1 %vm5943_vm1, %v10898_v48  ;;  %13087 = vmatmul.mubr.msk.bf16.vlgmr.msra.gmra.mrb[24].mxu0 %vm5943_vm1, %v10898_v48 }
 0xb4c   :  { %v11801_v5 = vpop.f32.mrb[48].mxu1  ;;  %v11924_v25 = vpop.f32.mrb[24].mxu0 }
 0xb4d   :  { %v13280_v41 = vadd.f32 %v11801_v5, %v10903_v56  ;;  %v13282_v58 = vadd.f32 %v11924_v25, %v10911_v44  ;;  %v11803_v38 = vpop.f32.mrb[49].mxu1  ;;  %v11926_v34 = vpop.f32.mrb[25].mxu0 }
 0xb4e   :  { %v13281_v50 = vadd.f32 %v11803_v38, %v10907_v26  ;;  %v13283_v51 = vadd.f32 %v11926_v34, %v10915_v62  ;;  %v11805_v32 = vpop.f32.mrb[50].mxu1  ;;  %v11928_v45 = vpop.f32.mrb[26].mxu0 }
 0xb4f   :  { %v11931_v57 = vmax.f32 %v13280_v41, 0.0  ;;  %v11933_v23 = vmax.f32 %v13282_v58, 0.0  ;;  %v11806_v61 = vpop.f32.mrb[51].mxu1  ;;  %v11929_v8 = vpop.f32.mrb[27].mxu0 }
 0xb50   :  { %v11932_v43 = vmax.f32 %v13281_v50, 0.0  ;;  %v11934_v9 = vmax.f32 %v13283_v51, 0.0 }
 0xb52   :  { %v11966_v16 = vpack.c.bf16 %v11932_v43, %v11932_v43  ;;  %v11968_v17 = vpack.c.bf16 %v11934_v9, %v11934_v9 }
 0xb53   :  { %14030 = dma.done.wait [#allocation7 + $0x4], 3200 }
 0xb54   :  { %14031 = vsyncadd [#allocation7 + $0x4], 4294964096  ;;  %v21684_v6 = vld [vmem:[#allocation412_spill] sm:$0xff]  ;;  %v21686_v12 = vld [vmem:[#allocation421_spill] sm:$0xff]  ;;  %12011 = vmatprep.mubr.bf16.mxu1 %v11966_v16  ;;  %13089 = vmatprep.mubr.msk.bf16.mxu0 %vm11975_vm5, %v11968_v17  ;;  %v11965_v7 = vpack.c.bf16 %v11931_v57, %v11931_v57  ;;  %v11967_v33 = vpack.c.bf16 %v11933_v23, %v11933_v23  ;;  %vm12059_vm6 = vcmask 23552  }
 0xb55   :  { %13231 = vmatpush3.bf16.msra.mxu1 %v21684_v6  ;;  %v21685_v55 = vld [vmem:[#allocation428_spill] sm:$0xff]  ;;  %v21687_v31 = vld [vmem:[#allocation413_spill] sm:$0xff]  ;;  %v21689_v47 = vld [vmem:[#allocation422_spill] sm:$0xff] }
 0xb56   :  { %12020 = vmatpush1.bf16.msra.mxu0 %v21685_v55  ;;  %13232 = vmatprep.subr.bf16.mxu1 %v21686_v12  ;;  %v21688_v11 = vld [vmem:[#allocation429_spill] sm:$0xff]  ;;  %v21690_v0 = vld [vmem:[#allocation414_spill] sm:$0xff]  ;;  %v21692_v36 = vld [vmem:[#allocation423_spill] sm:$0xff] }
 0xb57   :  { %12021 = vmatprep.subr.bf16.mxu0 %v14032_v59  ;;  %v21691_v35 = vld [vmem:[#allocation430_spill] sm:$0xff]  ;;  %v21693_v52 = vld [vmem:[#allocation415_spill] sm:$0xff]  ;;  %v21695_v27 = vld [vmem:[#allocation424_spill] sm:$0xff] }
 0xb58   :  { %v21694_v54 = vld [vmem:[#allocation431_spill] sm:$0xff]  ;;  %v21696_v3 = vld [vmem:[#allocation416_spill] sm:$0xff]  ;;  %v21698_v10 = vld [vmem:[#allocation425_spill] sm:$0xff] }
 0xb59   :  { %13233 = vmatpush3.bf16.msra.mxu1 %v21687_v31  ;;  %v21697_v14 = vld [vmem:[#allocation432_spill] sm:$0xff]  ;;  %v21699_v19 = vld [vmem:[#allocation417_spill] sm:$0xff]  ;;  %v21701_v22 = vld [vmem:[#allocation426_spill] sm:$0xff] }
 0xb5a   :  { %12022 = vmatpush1.bf16.msra.mxu0 %v21688_v11  ;;  %13234 = vmatprep.subr.bf16.mxu1 %v21689_v47  ;;  %v21700_v15 = vld [vmem:[#allocation433_spill] sm:$0xff]  ;;  %v21702_v60 = vld [vmem:[#allocation418_spill] sm:$0xff]  ;;  %v21704_v42 = vld [vmem:[#allocation427_spill] sm:$0xff] }
 0xb5b   :  { %12023 = vmatprep.subr.bf16.mxu0 %v14032_v59  ;;  %v21703_v39 = vld [vmem:[#allocation434_spill] sm:$0xff]  ;;  %v21705_v1 = vld [vmem:[#allocation419_spill] sm:$0xff]  ;;  %v21707_v18 = vld [vmem:[#allocation436_spill] sm:$0xff] }
 0xb5c   :  { %v21706_v37 = vld [vmem:[#allocation435_spill] sm:$0xff] }
 0xb5d   :  { %13235 = vmatpush3.bf16.msra.mxu1 %v21690_v0  ;;  %v13088_v49 = vld [vmem:[%s20469_s10] ss:$0 sm:$0xff] }
 0xb5e   :  { %12024 = vmatpush1.bf16.msra.mxu0 %v21691_v35  ;;  %13236 = vmatprep.subr.bf16.mxu1 %v21692_v36 }
 0xb5f   :  { %12025 = vmatprep.subr.bf16.mxu0 %v14032_v59 }
 0xb61   :  { %13237 = vmatpush3.bf16.msra.mxu1 %v21693_v52 }
 0xb62   :  { %12026 = vmatpush1.bf16.msra.mxu0 %v21694_v54  ;;  %13238 = vmatprep.subr.bf16.mxu1 %v21695_v27 }
 0xb63   :  { %12027 = vmatprep.subr.bf16.mxu0 %v14032_v59 }
 0xb65   :  { %13239 = vmatpush3.bf16.msra.mxu1 %v21696_v3 }
 0xb66   :  { %12028 = vmatpush1.bf16.msra.mxu0 %v21697_v14  ;;  %13240 = vmatprep.subr.bf16.mxu1 %v21698_v10 }
 0xb67   :  { %12029 = vmatprep.subr.bf16.mxu0 %v14032_v59 }
 0xb69   :  { %13241 = vmatpush3.bf16.msra.mxu1 %v21699_v19 }
 0xb6a   :  { %12030 = vmatpush1.bf16.msra.mxu0 %v21700_v15  ;;  %13242 = vmatprep.subr.bf16.mxu1 %v21701_v22 }
 0xb6b   :  { %12031 = vmatprep.subr.bf16.mxu0 %v14032_v59 }
 0xb6d   :  { %13243 = vmatpush3.bf16.msra.mxu1 %v21702_v60 }
 0xb6e   :  { %12032 = vmatpush1.bf16.msra.mxu0 %v21703_v39  ;;  %13244 = vmatprep.subr.bf16.mxu1 %v21704_v42 }
 0xb6f   :  { %12033 = vmatprep.subr.bf16.mxu0 %v14032_v59 }
 0xb71   :  { %13245 = vmatpush3.bf16.msra.mxu1 %v21705_v1 }
 0xb72   :  { %12034 = vmatpush1.bf16.msra.mxu0 %v21706_v37 }
 0xb73   :  { %12035 = vmatprep.subr.bf16.mxu0 %v14032_v59 }
 0xb74   :  { %12012 = vmatmul.mubr.bf16.vlgmr.msra.gmra.mrb[52].mxu1 %v11965_v7 }
 0xb76   :  { %12036 = vmatpush1.bf16.msra.mxu0 %v21707_v18 }
 0xb79   :  { %12052 = vmatmul.mubr.bf16.vlgmr.msra.gmra.mrb[28].mxu0 %v11967_v33 }
 0xc47   :  { %v13246_v13 = vpop.f32.mrb[52].mxu1 }
 0xc48   :  { %v13247_v46 = vpop.f32.mrb[53].mxu1 }
 0xc49   :  { %v13248_v20 = vadd.f32 %v13247_v46, %v13246_v13  ;;  %v13249_v30 = vpop.f32.mrb[54].mxu1 }
 0xc4a   :  { %v13250_v21 = vpop.f32.mrb[55].mxu1 }
 0xc4b   :  { %v12014_v24 = vadd.f32 %v13248_v20, %v13088_v49 }
 0xc4c   :  { %v12053_v28 = vpop.f32.mrb[28].mxu0 }
 0xc4d   :  { %v12055_v29 = vpop.f32.mrb[29].mxu0  ;;  %v12054_v4 = vadd.f32 %v12053_v28, %v12014_v24 }
 0xc4e   :  { %v12056_v59 = vpop.f32.mrb[30].mxu0 }
 0xc4f   :  { %v12057_v40 = vpop.f32.mrb[31].mxu0  ;;  %v12060_v2 = vsel %vm12059_vm6, %v12054_v4, -inf }
 0xc50   :  { %12061 = vmax.xlane.f32.xlu0 %v12060_v2 }
 0xcdd   :  { %v12062_v48 = vpop.xlane.xlu0 %12061 }
 0xcde   :  { %v12063_v53 = vsub.f32 %v12054_v4, %v12062_v48 }
 0xce0   :  { %v12064_v56 = vmul.f32 1.442695, %v12063_v53 }
 0xce2   :  { %14018 = vpow2.f32 %v12064_v56 }
 0xcec   :  { %v14019_v44 = vpop.eup %14018 }
 0xced   :  { %v12066_v26 = vsel %vm12059_vm6, %v14019_v44, 0.0 }
 0xcee   :  { %12067 = vadd.xlane.f32.xlu0 %v12066_v26 }
 0xd7b   :  { %v12068_v62 = vpop.xlane.xlu0 %12067 }
 0xd7c   :  { %14020 = vlog2.f32 %v12068_v62 }
 0xd86   :  { %v14021_v5 = vpop.eup %14020 }
 0xd87   :  { %v12070_v25 = vmul.f32 0.6931472, %v14021_v5 }
 0xd89   :  { %v12071_v41 = vsub.f32 %v12063_v53, %v12070_v25 }
 0xd8b   :  { %12072 = vst.msk [vmem:[%s20470_s11] sm:$0xff] %vm12059_vm6, %v12071_v41 }
 0xd8c   :  { %12077 = vsyncmov [#allocation7] }
 0xd8f   :  { %s12078_s29 = vpop.sfrf %12077 }
 0xd90   :  { %p13090_p0 = scmp.ne.s32.totalorder %s12078_s29, 0 }
 0xd92   :  { %12082 = shalt.err (%p13090_p0)  }
 0xd93   :  { %12084 = vsyncmov [#allocation7 + $0x1] }
 0xd96   :  { %s12085_s5 = vpop.sfrf %12084 }
 0xd97   :  { %p13091_p1 = scmp.ne.s32.totalorder %s12085_s5, 0 }
 0xd99   :  { %12089 = shalt.err (%p13091_p1)  }
 0xd9a   :  { %12091 = vsyncmov [#allocation7 + $0x2] }
 0xd9d   :  { %s12092_s30 = vpop.sfrf %12091 }
 0xd9e   :  { %p13092_p2 = scmp.ne.s32.totalorder %s12092_s30, 0 }
 0xda0   :  { %12096 = shalt.err (%p13092_p2)  }
 0xda1   :  { %12098 = vsyncmov [#allocation7 + $0x3] }
 0xda4   :  { %s12099_s12 = vpop.sfrf %12098 }
 0xda5   :  { %p13093_p3 = scmp.ne.s32.totalorder %s12099_s12, 0 }
 0xda7   :  { %12103 = shalt.err (%p13093_p3)  }
 0xda8   :  { %12105 = vsyncmov [#allocation7 + $0x4] }
 0xdab   :  { %s12106_s3 = vpop.sfrf %12105 }
 0xdac   :  { %p13094_p4 = scmp.ne.s32.totalorder %s12106_s3, 0 }
 0xdae   :  { %12110 = shalt.err (%p13094_p4)  }

</bundles_post_ra>
